<compile_context>
chip_gen: v7x
topology: tpu7x:2x2x1
jax: 0.10.0
libtpu: 0.0.40
codegen_flags: <defaults>
</compile_context>

<pallas_src>
import jax
import jax.numpy as jnp
from jax.experimental import pallas as pl
from jax.experimental.pallas import tpu as pltpu


# ----------------------------- Pallas kernels -------------------------------

def _conv_relu_pool_kernel(p_ref, w_ref, b_ref, o_ref):
    """One grid step per 2x2-pooling phase (4 phases total).

    p_ref : (1, M, K) bf16  im2col patches of this phase (M=B*Ho*Wo, K=25*Cin)
    w_ref : (K, Cout) bf16  flattened conv weight
    b_ref : (1, Cout) f32   conv bias
    o_ref : (M, Cout) bf16  pooled output; same output block for every phase
                            -> stays VMEM-resident, max-accumulated in place.
    """
    ph = pl.program_id(0)
    y = jnp.dot(p_ref[0], w_ref[...], preferred_element_type=jnp.float32)
    y = jnp.maximum(y + b_ref[...], 0.0).astype(o_ref.dtype)   # bias + ReLU

    @pl.when(ph == 0)
    def _():
        o_ref[...] = y

    @pl.when(ph != 0)
    def _():
        o_ref[...] = jnp.maximum(o_ref[...], y)   # 2x2 max-pool reduction


def _fc_stack_kernel(x_ref, w1_ref, b1_ref, w2_ref, b2_ref, w3_ref, b3_ref,
                     o_ref, h1_ref):
    """fc3(fc2(fc1(x))) fused into one launch.

    fc1 is K-tiled over the grid with a f32 VMEM accumulator; fc2/fc3 run on
    the last K step (their weights map to the same block every step, so they
    are loaded once and stay VMEM-resident).  No ReLU between FC layers,
    matching the reference module.
    """
    k = pl.program_id(0)

    @pl.when(k == 0)
    def _():
        h1_ref[...] = jnp.zeros_like(h1_ref)

    h1_ref[...] += jnp.dot(x_ref[...], w1_ref[...],
                           preferred_element_type=jnp.float32)

    @pl.when(k == pl.num_programs(0) - 1)
    def _():
        h1 = (h1_ref[...] + b1_ref[...]).astype(jnp.bfloat16)
        h2 = (jnp.dot(h1, w2_ref[...], preferred_element_type=jnp.float32)
              + b2_ref[...]).astype(jnp.bfloat16)
        o_ref[...] = (jnp.dot(h2, w3_ref[...], preferred_element_type=jnp.float32)
                      + b3_ref[...])


# ------------------------------ layer wrappers -------------------------------

def conv_relu_pool(x, wf, bf):
    """Conv2d(k=5, s=1, p=2) + ReLU + MaxPool2d(2, 2).

    x : (B, H, W, Cin) bf16 NHWC;  wf : (25*Cin, Cout) bf16;  bf : (1, Cout) f32.
    Returns (B, H//2, W//2, Cout) bf16.
    """
    B, H, W, Cin = x.shape
    K, Cout = wf.shape
    Ho, Wo = H // 2, W // 2
    M = B * Ho * Wo

    # glue: im2col + split into the 4 2x2-pooling phases (pure data movement, bf16)
    xp = jnp.pad(x, ((0, 0), (2, 2), (2, 2), (0, 0)))
    taps = [xp[:, ky:ky + H, kx:kx + W, :] for ky in range(5) for kx in range(5)]
    patches = jnp.stack(taps, axis=3).reshape(B, H, W, K)        # (B,H,W,25*Cin)
    phases = jnp.stack(
        [patches[:, p::2, q::2, :].reshape(M, K)
         for p in range(2) for q in range(2)], axis=0)           # (4, M, K)

    out = pl.pallas_call(
        _conv_relu_pool_kernel,
        out_shape=jax.ShapeDtypeStruct((M, Cout), jnp.bfloat16),
        grid_spec=pltpu.PrefetchScalarGridSpec(
            num_scalar_prefetch=0,
            grid=(4,),
            in_specs=[
                pl.BlockSpec((1, M, K), lambda ph: (ph, 0, 0)),
                pl.BlockSpec((K, Cout), lambda ph: (0, 0)),
                pl.BlockSpec((1, Cout), lambda ph: (0, 0)),
            ],
            out_specs=pl.BlockSpec((M, Cout), lambda ph: (0, 0)),
        ),
        compiler_params=pltpu.CompilerParams(
            dimension_semantics=("arbitrary",)),
    )(phases, wf, bf)
    return out.reshape(B, Ho, Wo, Cout)


def fc_stack(x, fc1, fc2, fc3, *, tk=1152):
    """Fused fc3(fc2(fc1(x))).  x: (B, K) bf16; fc*: ((K, N) bf16, (1, N) f32)."""
    B, K = x.shape
    w1, b1 = fc1
    w2, b2 = fc2
    w3, b3 = fc3
    N1, N2, N3 = w1.shape[1], w2.shape[1], w3.shape[1]
    if K % tk != 0:
        tk = K

    return pl.pallas_call(
        _fc_stack_kernel,
        out_shape=jax.ShapeDtypeStruct((B, N3), jnp.float32),
        grid_spec=pltpu.PrefetchScalarGridSpec(
            num_scalar_prefetch=0,
            grid=(K // tk,),
            in_specs=[
                pl.BlockSpec((B, tk), lambda k: (0, k)),
                pl.BlockSpec((tk, N1), lambda k: (k, 0)),
                pl.BlockSpec((1, N1), lambda k: (0, 0)),
                pl.BlockSpec((N1, N2), lambda k: (0, 0)),
                pl.BlockSpec((1, N2), lambda k: (0, 0)),
                pl.BlockSpec((N2, N3), lambda k: (0, 0)),
                pl.BlockSpec((1, N3), lambda k: (0, 0)),
            ],
            out_specs=pl.BlockSpec((B, N3), lambda k: (0, 0)),
            scratch_shapes=[pltpu.VMEM((B, N1), jnp.float32)],
        ),
        compiler_params=pltpu.CompilerParams(
            dimension_semantics=("arbitrary",)),
    )(x, w1, b1, w2, b2, w3, b3)


# ------------------------------ parameters -----------------------------------

def init_params(key, num_classes=10):
    """Parameters packed ONCE into kernel-ready layouts (no per-forward
    transposes / flattens)."""

    def conv_raw(k, cin, cout):
        k1, k2 = jax.random.split(k)
        fan_in = cin * 25
        w = jax.random.normal(k1, (cout, cin, 5, 5), jnp.float32) / jnp.sqrt(fan_in)
        b = jax.random.normal(k2, (cout,), jnp.float32) * 0.01
        return w, b

    def fc_raw(k, cin, cout):
        k1, k2 = jax.random.split(k)
        w = jax.random.normal(k1, (cout, cin), jnp.float32) / jnp.sqrt(cin)
        b = jax.random.normal(k2, (cout,), jnp.float32) * 0.01
        return w, b

    def conv_pack(w, b):
        cout, cin = w.shape[0], w.shape[1]
        wf = jnp.transpose(w, (2, 3, 1, 0)).reshape(25 * cin, cout)  # (ky,kx,cin,cout)
        return wf.astype(jnp.bfloat16), b.reshape(1, cout).astype(jnp.float32)

    def fc_pack(w, b, k_pad, n_pad):
        n, kk = w.shape
        wt = jnp.zeros((k_pad, n_pad), jnp.float32).at[:kk, :n].set(jnp.transpose(w))
        bp = jnp.zeros((1, n_pad), jnp.float32).at[:, :n].set(b)
        return wt.astype(jnp.bfloat16), bp

    keys = jax.random.split(key, 6)
    w1, b1 = conv_raw(keys[0], 1, 32)
    w2, b2 = conv_raw(keys[1], 32, 64)
    w3, b3 = conv_raw(keys[2], 128, 512)
    f1w, f1b = fc_raw(keys[3], 3 * 3 * 512, 1000)
    f2w, f2b = fc_raw(keys[4], 1000, 500)
    f3w, f3b = fc_raw(keys[5], 500, num_classes)

    # Fold the duplicated-branch concat into layer3's weight:
    #   out2 == out1  =>  conv(cat(out1, out1), W3) == conv(out1, W3[:, :64] + W3[:, 64:])
    w3_folded = w3[:, :64] + w3[:, 64:]

    return {
        "layer1": conv_pack(w1, b1),
        "layer2": conv_pack(w2, b2),
        "layer3": conv_pack(w3_folded, b3),
        # fc1: 4608 -> 1000 (N padded to 1024); fc2: 1000 -> 500 (K padded to
        # 1024, N to 512); fc3: 500 -> num_classes (K padded to 512).
        # Zero padding keeps the logits exactly equal to the unpadded network.
        "fc1": fc_pack(f1w, f1b, 3 * 3 * 512, 1024),
        "fc2": fc_pack(f2w, f2b, 1024, 512),
        "fc3": fc_pack(f3w, f3b, 512, num_classes),
    }


# ------------------------------ forward pass ----------------------------------

def net_forward(params, x_nchw):
    B = x_nchw.shape[0]
    x = jnp.transpose(x_nchw, (0, 2, 3, 1)).astype(jnp.bfloat16)   # NCHW -> NHWC

    out = conv_relu_pool(x, *params["layer1"])       # (B, 12, 12, 32)
    out1 = conv_relu_pool(out, *params["layer2"])    # (B, 6, 6, 64)
    # layer2 is applied twice to the same input -> out2 == out1; the channel
    # concat + 128-in-channel layer3 conv was folded into layer3's weight.
    out = conv_relu_pool(out1, *params["layer3"])    # (B, 3, 3, 512)

    flat = jnp.transpose(out, (0, 3, 1, 2)).reshape(B, -1)   # PyTorch NCHW flatten order
    # TODO(synk): nn.Dropout() treated as eval-mode identity (no stochastic masking).
    return fc_stack(flat, params["fc1"], params["fc2"], params["fc3"])  # (B, num_classes)


# ----------------------------------- main --------------------------------------

if __name__ == "__main__":
    key = jax.random.PRNGKey(0)
    pkey, xkey = jax.random.split(key)
    params = init_params(pkey, num_classes=10)
    # Input spatial size 24x24 so that flatten gives 3*3*512 = fc1 in_features.
    x = jax.random.normal(xkey, (2, 1, 24, 24), jnp.float32)

    fwd = jax.jit(net_forward)
    out = jax.block_until_ready(fwd(params, x))
    assert out.shape == (2, 10), out.shape
    print("KERNEL_OK")
</pallas_src>

<mosaic_0001>
module attributes {stable_mosaic.version = 11 : i64} {
  func.func @_conv_relu_pool_kernel(%arg0: i32, %arg1: memref<1x288x25xbf16, #tpu.memory_space<vmem>>, %arg2: memref<25x32xbf16, #tpu.memory_space<vmem>>, %arg3: memref<1x32xf32, #tpu.memory_space<vmem>>, %arg4: memref<288x32xbf16, #tpu.memory_space<vmem>>) attributes {dimension_semantics = [#tpu.dimension_semantics<arbitrary>], iteration_bounds = array<i64: 4>, scalar_prefetch = 0 : i64, scratch_operands = 0 : i64, tpu.core_type = #tpu.core_type<tc>, window_params = [{transform_indices = @transform_0, window_bounds = array<i64: 1, 288, 25>}, {pipeline_mode = #tpu.pipeline_mode<synchronous>, transform_indices = @transform_1, window_bounds = array<i64: 25, 32>}, {pipeline_mode = #tpu.pipeline_mode<synchronous>, transform_indices = @transform_2, window_bounds = array<i64: 1, 32>}, {pipeline_mode = #tpu.pipeline_mode<synchronous>, transform_indices = @transform_3, window_bounds = array<i64: 288, 32>}]} {
    %c0 = arith.constant 0 : index
    %c0_0 = arith.constant 0 : index
    %c0_1 = arith.constant 0 : index
    %0 = vector.load %arg1[%c0, %c0_0, %c0_1] : memref<1x288x25xbf16, #tpu.memory_space<vmem>>, vector<1x288x25xbf16>
    %1 = vector.shape_cast %0 : vector<1x288x25xbf16> to vector<288x25xbf16>
    %c0_2 = arith.constant 0 : index
    %c0_3 = arith.constant 0 : index
    %2 = vector.load %arg2[%c0_2, %c0_3] : memref<25x32xbf16, #tpu.memory_space<vmem>>, vector<25x32xbf16>
    %cst = arith.constant dense<0.000000e+00> : vector<288x32xf32>
    %3 = tpu.matmul %1, %2, %cst {dimension_numbers = #tpu.dot_dimension_numbers<[1], [0], [0], [1], [0, 0, 1, 1], [], []>} : vector<288x25xbf16>, vector<25x32xbf16>, vector<288x32xf32> -> vector<288x32xf32>
    %c0_4 = arith.constant 0 : index
    %c0_5 = arith.constant 0 : index
    %4 = vector.load %arg3[%c0_4, %c0_5] : memref<1x32xf32, #tpu.memory_space<vmem>>, vector<1x32xf32>
    %5 = vector.broadcast %4 : vector<1x32xf32> to vector<288x32xf32>
    %6 = arith.addf %3, %5 : vector<288x32xf32>
    %cst_6 = arith.constant 0.000000e+00 : f32
    %7 = vector.broadcast %cst_6 : f32 to vector<288x32xf32>
    %8 = arith.maximumf %6, %7 : vector<288x32xf32>
    %9 = arith.truncf %8 : vector<288x32xf32> to vector<288x32xbf16>
    %c0_i32 = arith.constant 0 : i32
    %10 = arith.cmpi eq, %arg0, %c0_i32 : i32
    %11 = arith.extui %10 : i1 to i32
    %c0_i32_7 = arith.constant 0 : i32
    %12 = arith.cmpi ne, %11, %c0_i32_7 : i32
    scf.if %12 {
      %c0_10 = arith.constant 0 : index
      %c0_11 = arith.constant 0 : index
      %16 = vector.load %arg4[%c0_10, %c0_11] : memref<288x32xbf16, #tpu.memory_space<vmem>>, vector<288x32xbf16>
      tpu.vector_store %arg4[%c0_10, %c0_11], %9 {strides = array<i32>} : memref<288x32xbf16, #tpu.memory_space<vmem>>, vector<288x32xbf16>,
    } else {
    }
    %c0_i32_8 = arith.constant 0 : i32
    %13 = arith.cmpi ne, %arg0, %c0_i32_8 : i32
    %14 = arith.extui %13 : i1 to i32
    %c0_i32_9 = arith.constant 0 : i32
    %15 = arith.cmpi ne, %14, %c0_i32_9 : i32
    scf.if %15 {
      %c0_10 = arith.constant 0 : index
      %c0_11 = arith.constant 0 : index
      %16 = vector.load %arg4[%c0_10, %c0_11] : memref<288x32xbf16, #tpu.memory_space<vmem>>, vector<288x32xbf16>
      %17 = arith.maximumf %16, %9 : vector<288x32xbf16>
      %c0_12 = arith.constant 0 : index
      %c0_13 = arith.constant 0 : index
      %18 = vector.load %arg4[%c0_12, %c0_13] : memref<288x32xbf16, #tpu.memory_space<vmem>>, vector<288x32xbf16>
      tpu.vector_store %arg4[%c0_12, %c0_13], %17 {strides = array<i32>} : memref<288x32xbf16, #tpu.memory_space<vmem>>, vector<288x32xbf16>,
    } else {
    }
    return
  }
  func.func @transform_0(%arg0: i32) -> (i32, i32, i32) {
    %c0_i32 = arith.constant 0 : i32
    %c0_i32_0 = arith.constant 0 : i32
    %c0_i32_1 = arith.constant 0 : i32
    return %arg0, %c0_i32, %c0_i32_0 : i32, i32, i32
  }
  func.func @transform_1(%arg0: i32) -> (i32, i32) {
    %c0_i32 = arith.constant 0 : i32
    %c0_i32_0 = arith.constant 0 : i32
    %c0_i32_1 = arith.constant 0 : i32
    return %c0_i32, %c0_i32_0 : i32, i32
  }
  func.func @transform_2(%arg0: i32) -> (i32, i32) {
    %c0_i32 = arith.constant 0 : i32
    %c0_i32_0 = arith.constant 0 : i32
    %c0_i32_1 = arith.constant 0 : i32
    return %c0_i32, %c0_i32_0 : i32, i32
  }
  func.func @transform_3(%arg0: i32) -> (i32, i32) {
    %c0_i32 = arith.constant 0 : i32
    %c0_i32_0 = arith.constant 0 : i32
    %c0_i32_1 = arith.constant 0 : i32
    return %c0_i32, %c0_i32_0 : i32, i32
  }
}

module attributes {stable_mosaic.version = 11 : i64} {
  func.func @_conv_relu_pool_kernel(%arg0: i32, %arg1: memref<1x72x800xbf16, #tpu.memory_space<vmem>>, %arg2: memref<800x64xbf16, #tpu.memory_space<vmem>>, %arg3: memref<1x64xf32, #tpu.memory_space<vmem>>, %arg4: memref<72x64xbf16, #tpu.memory_space<vmem>>) attributes {dimension_semantics = [#tpu.dimension_semantics<arbitrary>], iteration_bounds = array<i64: 4>, scalar_prefetch = 0 : i64, scratch_operands = 0 : i64, tpu.core_type = #tpu.core_type<tc>, window_params = [{transform_indices = @transform_0, window_bounds = array<i64: 1, 72, 800>}, {pipeline_mode = #tpu.pipeline_mode<synchronous>, transform_indices = @transform_1, window_bounds = array<i64: 800, 64>}, {pipeline_mode = #tpu.pipeline_mode<synchronous>, transform_indices = @transform_2, window_bounds = array<i64: 1, 64>}, {pipeline_mode = #tpu.pipeline_mode<synchronous>, transform_indices = @transform_3, window_bounds = array<i64: 72, 64>}]} {
    %c0 = arith.constant 0 : index
    %c0_0 = arith.constant 0 : index
    %c0_1 = arith.constant 0 : index
    %0 = vector.load %arg1[%c0, %c0_0, %c0_1] : memref<1x72x800xbf16, #tpu.memory_space<vmem>>, vector<1x72x800xbf16>
    %1 = vector.shape_cast %0 : vector<1x72x800xbf16> to vector<72x800xbf16>
    %c0_2 = arith.constant 0 : index
    %c0_3 = arith.constant 0 : index
    %2 = vector.load %arg2[%c0_2, %c0_3] : memref<800x64xbf16, #tpu.memory_space<vmem>>, vector<800x64xbf16>
    %cst = arith.constant dense<0.000000e+00> : vector<72x64xf32>
    %3 = tpu.matmul %1, %2, %cst {dimension_numbers = #tpu.dot_dimension_numbers<[1], [0], [0], [1], [0, 0, 1, 1], [], []>} : vector<72x800xbf16>, vector<800x64xbf16>, vector<72x64xf32> -> vector<72x64xf32>
    %c0_4 = arith.constant 0 : index
    %c0_5 = arith.constant 0 : index
    %4 = vector.load %arg3[%c0_4, %c0_5] : memref<1x64xf32, #tpu.memory_space<vmem>>, vector<1x64xf32>
    %5 = vector.broadcast %4 : vector<1x64xf32> to vector<72x64xf32>
    %6 = arith.addf %3, %5 : vector<72x64xf32>
    %cst_6 = arith.constant 0.000000e+00 : f32
    %7 = vector.broadcast %cst_6 : f32 to vector<72x64xf32>
    %8 = arith.maximumf %6, %7 : vector<72x64xf32>
    %9 = arith.truncf %8 : vector<72x64xf32> to vector<72x64xbf16>
    %c0_i32 = arith.constant 0 : i32
    %10 = arith.cmpi eq, %arg0, %c0_i32 : i32
    %11 = arith.extui %10 : i1 to i32
    %c0_i32_7 = arith.constant 0 : i32
    %12 = arith.cmpi ne, %11, %c0_i32_7 : i32
    scf.if %12 {
      %c0_10 = arith.constant 0 : index
      %c0_11 = arith.constant 0 : index
      %16 = vector.load %arg4[%c0_10, %c0_11] : memref<72x64xbf16, #tpu.memory_space<vmem>>, vector<72x64xbf16>
      tpu.vector_store %arg4[%c0_10, %c0_11], %9 {strides = array<i32>} : memref<72x64xbf16, #tpu.memory_space<vmem>>, vector<72x64xbf16>,
    } else {
    }
    %c0_i32_8 = arith.constant 0 : i32
    %13 = arith.cmpi ne, %arg0, %c0_i32_8 : i32
    %14 = arith.extui %13 : i1 to i32
    %c0_i32_9 = arith.constant 0 : i32
    %15 = arith.cmpi ne, %14, %c0_i32_9 : i32
    scf.if %15 {
      %c0_10 = arith.constant 0 : index
      %c0_11 = arith.constant 0 : index
      %16 = vector.load %arg4[%c0_10, %c0_11] : memref<72x64xbf16, #tpu.memory_space<vmem>>, vector<72x64xbf16>
      %17 = arith.maximumf %16, %9 : vector<72x64xbf16>
      %c0_12 = arith.constant 0 : index
      %c0_13 = arith.constant 0 : index
      %18 = vector.load %arg4[%c0_12, %c0_13] : memref<72x64xbf16, #tpu.memory_space<vmem>>, vector<72x64xbf16>
      tpu.vector_store %arg4[%c0_12, %c0_13], %17 {strides = array<i32>} : memref<72x64xbf16, #tpu.memory_space<vmem>>, vector<72x64xbf16>,
    } else {
    }
    return
  }
  func.func @transform_0(%arg0: i32) -> (i32, i32, i32) {
    %c0_i32 = arith.constant 0 : i32
    %c0_i32_0 = arith.constant 0 : i32
    %c0_i32_1 = arith.constant 0 : i32
    return %arg0, %c0_i32, %c0_i32_0 : i32, i32, i32
  }
  func.func @transform_1(%arg0: i32) -> (i32, i32) {
    %c0_i32 = arith.constant 0 : i32
    %c0_i32_0 = arith.constant 0 : i32
    %c0_i32_1 = arith.constant 0 : i32
    return %c0_i32, %c0_i32_0 : i32, i32
  }
  func.func @transform_2(%arg0: i32) -> (i32, i32) {
    %c0_i32 = arith.constant 0 : i32
    %c0_i32_0 = arith.constant 0 : i32
    %c0_i32_1 = arith.constant 0 : i32
    return %c0_i32, %c0_i32_0 : i32, i32
  }
  func.func @transform_3(%arg0: i32) -> (i32, i32) {
    %c0_i32 = arith.constant 0 : i32
    %c0_i32_0 = arith.constant 0 : i32
    %c0_i32_1 = arith.constant 0 : i32
    return %c0_i32, %c0_i32_0 : i32, i32
  }
}

module attributes {stable_mosaic.version = 11 : i64} {
  func.func @_conv_relu_pool_kernel(%arg0: i32, %arg1: memref<1x18x1600xbf16, #tpu.memory_space<vmem>>, %arg2: memref<1600x512xbf16, #tpu.memory_space<vmem>>, %arg3: memref<1x512xf32, #tpu.memory_space<vmem>>, %arg4: memref<18x512xbf16, #tpu.memory_space<vmem>>) attributes {dimension_semantics = [#tpu.dimension_semantics<arbitrary>], iteration_bounds = array<i64: 4>, scalar_prefetch = 0 : i64, scratch_operands = 0 : i64, tpu.core_type = #tpu.core_type<tc>, window_params = [{transform_indices = @transform_0, window_bounds = array<i64: 1, 18, 1600>}, {pipeline_mode = #tpu.pipeline_mode<synchronous>, transform_indices = @transform_1, window_bounds = array<i64: 1600, 512>}, {pipeline_mode = #tpu.pipeline_mode<synchronous>, transform_indices = @transform_2, window_bounds = array<i64: 1, 512>}, {pipeline_mode = #tpu.pipeline_mode<synchronous>, transform_indices = @transform_3, window_bounds = array<i64: 18, 512>}]} {
    %c0 = arith.constant 0 : index
    %c0_0 = arith.constant 0 : index
    %c0_1 = arith.constant 0 : index
    %0 = vector.load %arg1[%c0, %c0_0, %c0_1] : memref<1x18x1600xbf16, #tpu.memory_space<vmem>>, vector<1x18x1600xbf16>
    %1 = vector.shape_cast %0 : vector<1x18x1600xbf16> to vector<18x1600xbf16>
    %c0_2 = arith.constant 0 : index
    %c0_3 = arith.constant 0 : index
    %2 = vector.load %arg2[%c0_2, %c0_3] : memref<1600x512xbf16, #tpu.memory_space<vmem>>, vector<1600x512xbf16>
    %cst = arith.constant dense<0.000000e+00> : vector<18x512xf32>
    %3 = tpu.matmul %1, %2, %cst {dimension_numbers = #tpu.dot_dimension_numbers<[1], [0], [0], [1], [0, 0, 1, 1], [], []>} : vector<18x1600xbf16>, vector<1600x512xbf16>, vector<18x512xf32> -> vector<18x512xf32>
    %c0_4 = arith.constant 0 : index
    %c0_5 = arith.constant 0 : index
    %4 = vector.load %arg3[%c0_4, %c0_5] : memref<1x512xf32, #tpu.memory_space<vmem>>, vector<1x512xf32>
    %5 = vector.broadcast %4 : vector<1x512xf32> to vector<18x512xf32>
    %6 = arith.addf %3, %5 : vector<18x512xf32>
    %cst_6 = arith.constant 0.000000e+00 : f32
    %7 = vector.broadcast %cst_6 : f32 to vector<18x512xf32>
    %8 = arith.maximumf %6, %7 : vector<18x512xf32>
    %9 = arith.truncf %8 : vector<18x512xf32> to vector<18x512xbf16>
    %c0_i32 = arith.constant 0 : i32
    %10 = arith.cmpi eq, %arg0, %c0_i32 : i32
    %11 = arith.extui %10 : i1 to i32
    %c0_i32_7 = arith.constant 0 : i32
    %12 = arith.cmpi ne, %11, %c0_i32_7 : i32
    scf.if %12 {
      %c0_10 = arith.constant 0 : index
      %c0_11 = arith.constant 0 : index
      %16 = vector.load %arg4[%c0_10, %c0_11] : memref<18x512xbf16, #tpu.memory_space<vmem>>, vector<18x512xbf16>
      tpu.vector_store %arg4[%c0_10, %c0_11], %9 {strides = array<i32>} : memref<18x512xbf16, #tpu.memory_space<vmem>>, vector<18x512xbf16>,
    } else {
    }
    %c0_i32_8 = arith.constant 0 : i32
    %13 = arith.cmpi ne, %arg0, %c0_i32_8 : i32
    %14 = arith.extui %13 : i1 to i32
    %c0_i32_9 = arith.constant 0 : i32
    %15 = arith.cmpi ne, %14, %c0_i32_9 : i32
    scf.if %15 {
      %c0_10 = arith.constant 0 : index
      %c0_11 = arith.constant 0 : index
      %16 = vector.load %arg4[%c0_10, %c0_11] : memref<18x512xbf16, #tpu.memory_space<vmem>>, vector<18x512xbf16>
      %17 = arith.maximumf %16, %9 : vector<18x512xbf16>
      %c0_12 = arith.constant 0 : index
      %c0_13 = arith.constant 0 : index
      %18 = vector.load %arg4[%c0_12, %c0_13] : memref<18x512xbf16, #tpu.memory_space<vmem>>, vector<18x512xbf16>
      tpu.vector_store %arg4[%c0_12, %c0_13], %17 {strides = array<i32>} : memref<18x512xbf16, #tpu.memory_space<vmem>>, vector<18x512xbf16>,
    } else {
    }
    return
  }
  func.func @transform_0(%arg0: i32) -> (i32, i32, i32) {
    %c0_i32 = arith.constant 0 : i32
    %c0_i32_0 = arith.constant 0 : i32
    %c0_i32_1 = arith.constant 0 : i32
    return %arg0, %c0_i32, %c0_i32_0 : i32, i32, i32
  }
  func.func @transform_1(%arg0: i32) -> (i32, i32) {
    %c0_i32 = arith.constant 0 : i32
    %c0_i32_0 = arith.constant 0 : i32
    %c0_i32_1 = arith.constant 0 : i32
    return %c0_i32, %c0_i32_0 : i32, i32
  }
  func.func @transform_2(%arg0: i32) -> (i32, i32) {
    %c0_i32 = arith.constant 0 : i32
    %c0_i32_0 = arith.constant 0 : i32
    %c0_i32_1 = arith.constant 0 : i32
    return %c0_i32, %c0_i32_0 : i32, i32
  }
  func.func @transform_3(%arg0: i32) -> (i32, i32) {
    %c0_i32 = arith.constant 0 : i32
    %c0_i32_0 = arith.constant 0 : i32
    %c0_i32_1 = arith.constant 0 : i32
    return %c0_i32, %c0_i32_0 : i32, i32
  }
}

module attributes {stable_mosaic.version = 11 : i64} {
  func.func @_fc_stack_kernel(%arg0: i32, %arg1: memref<2x1152xbf16, #tpu.memory_space<vmem>>, %arg2: memref<1152x1024xbf16, #tpu.memory_space<vmem>>, %arg3: memref<1x1024xf32, #tpu.memory_space<vmem>>, %arg4: memref<1024x512xbf16, #tpu.memory_space<vmem>>, %arg5: memref<1x512xf32, #tpu.memory_space<vmem>>, %arg6: memref<512x10xbf16, #tpu.memory_space<vmem>>, %arg7: memref<1x10xf32, #tpu.memory_space<vmem>>, %arg8: memref<2x10xf32, #tpu.memory_space<vmem>>, %arg9: memref<2x1024xf32, #tpu.memory_space<vmem>>) attributes {dimension_semantics = [#tpu.dimension_semantics<arbitrary>], iteration_bounds = array<i64: 4>, scalar_prefetch = 0 : i64, scratch_operands = 1 : i64, tpu.core_type = #tpu.core_type<tc>, window_params = [{transform_indices = @transform_0, window_bounds = array<i64: 2, 1152>}, {transform_indices = @transform_1, window_bounds = array<i64: 1152, 1024>}, {pipeline_mode = #tpu.pipeline_mode<synchronous>, transform_indices = @transform_2, window_bounds = array<i64: 1, 1024>}, {pipeline_mode = #tpu.pipeline_mode<synchronous>, transform_indices = @transform_3, window_bounds = array<i64: 1024, 512>}, {pipeline_mode = #tpu.pipeline_mode<synchronous>, transform_indices = @transform_4, window_bounds = array<i64: 1, 512>}, {pipeline_mode = #tpu.pipeline_mode<synchronous>, transform_indices = @transform_5, window_bounds = array<i64: 512, 10>}, {pipeline_mode = #tpu.pipeline_mode<synchronous>, transform_indices = @transform_6, window_bounds = array<i64: 1, 10>}, {pipeline_mode = #tpu.pipeline_mode<synchronous>, transform_indices = @transform_7, window_bounds = array<i64: 2, 10>}]} {
    %c0_i32 = arith.constant 0 : i32
    %0 = arith.cmpi eq, %arg0, %c0_i32 : i32
    %1 = arith.extui %0 : i1 to i32
    %c0_i32_0 = arith.constant 0 : i32
    %2 = arith.cmpi ne, %1, %c0_i32_0 : i32
    scf.if %2 {
      %cst_9 = arith.constant 0.000000e+00 : f32
      %12 = vector.broadcast %cst_9 : f32 to vector<2x1024xf32>
      %c0_10 = arith.constant 0 : index
      %c0_11 = arith.constant 0 : index
      %13 = vector.load %arg9[%c0_10, %c0_11] : memref<2x1024xf32, #tpu.memory_space<vmem>>, vector<2x1024xf32>
      tpu.vector_store %arg9[%c0_10, %c0_11], %12 {strides = array<i32>} : memref<2x1024xf32, #tpu.memory_space<vmem>>, vector<2x1024xf32>,
    } else {
    }
    %c0 = arith.constant 0 : index
    %c0_1 = arith.constant 0 : index
    %3 = vector.load %arg9[%c0, %c0_1] : memref<2x1024xf32, #tpu.memory_space<vmem>>, vector<2x1024xf32>
    %c0_2 = arith.constant 0 : index
    %c0_3 = arith.constant 0 : index
    %4 = vector.load %arg1[%c0_2, %c0_3] : memref<2x1152xbf16, #tpu.memory_space<vmem>>, vector<2x1152xbf16>
    %c0_4 = arith.constant 0 : index
    %c0_5 = arith.constant 0 : index
    %5 = vector.load %arg2[%c0_4, %c0_5] : memref<1152x1024xbf16, #tpu.memory_space<vmem>>, vector<1152x1024xbf16>
    %cst = arith.constant dense<0.000000e+00> : vector<2x1024xf32>
    %6 = tpu.matmul %4, %5, %cst {dimension_numbers = #tpu.dot_dimension_numbers<[1], [0], [0], [1], [0, 0, 1, 1], [], []>} : vector<2x1152xbf16>, vector<1152x1024xbf16>, vector<2x1024xf32> -> vector<2x1024xf32>
    %7 = arith.addf %3, %6 : vector<2x1024xf32>
    %c0_6 = arith.constant 0 : index
    %c0_7 = arith.constant 0 : index
    %8 = vector.load %arg9[%c0_6, %c0_7] : memref<2x1024xf32, #tpu.memory_space<vmem>>, vector<2x1024xf32>
    tpu.vector_store %arg9[%c0_6, %c0_7], %7 {strides = array<i32>} : memref<2x1024xf32, #tpu.memory_space<vmem>>, vector<2x1024xf32>,
    %c3_i32 = arith.constant 3 : i32
    %9 = arith.cmpi eq, %arg0, %c3_i32 : i32
    %10 = arith.extui %9 : i1 to i32
    %c0_i32_8 = arith.constant 0 : i32
    %11 = arith.cmpi ne, %10, %c0_i32_8 : i32
    scf.if %11 {
      %c0_9 = arith.constant 0 : index
      %c0_10 = arith.constant 0 : index
      %12 = vector.load %arg9[%c0_9, %c0_10] : memref<2x1024xf32, #tpu.memory_space<vmem>>, vector<2x1024xf32>
      %c0_11 = arith.constant 0 : index
      %c0_12 = arith.constant 0 : index
      %13 = vector.load %arg3[%c0_11, %c0_12] : memref<1x1024xf32, #tpu.memory_space<vmem>>, vector<1x1024xf32>
      %14 = vector.broadcast %13 : vector<1x1024xf32> to vector<2x1024xf32>
      %15 = arith.addf %12, %14 : vector<2x1024xf32>
      %16 = arith.truncf %15 : vector<2x1024xf32> to vector<2x1024xbf16>
      %c0_13 = arith.constant 0 : index
      %c0_14 = arith.constant 0 : index
      %17 = vector.load %arg4[%c0_13, %c0_14] : memref<1024x512xbf16, #tpu.memory_space<vmem>>, vector<1024x512xbf16>
      %cst_15 = arith.constant dense<0.000000e+00> : vector<2x512xf32>
      %18 = tpu.matmul %16, %17, %cst_15 {dimension_numbers = #tpu.dot_dimension_numbers<[1], [0], [0], [1], [0, 0, 1, 1], [], []>} : vector<2x1024xbf16>, vector<1024x512xbf16>, vector<2x512xf32> -> vector<2x512xf32>
      %c0_16 = arith.constant 0 : index
      %c0_17 = arith.constant 0 : index
      %19 = vector.load %arg5[%c0_16, %c0_17] : memref<1x512xf32, #tpu.memory_space<vmem>>, vector<1x512xf32>
      %20 = vector.broadcast %19 : vector<1x512xf32> to vector<2x512xf32>
      %21 = arith.addf %18, %20 : vector<2x512xf32>
      %22 = arith.truncf %21 : vector<2x512xf32> to vector<2x512xbf16>
      %c0_18 = arith.constant 0 : index
      %c0_19 = arith.constant 0 : index
      %23 = vector.load %arg6[%c0_18, %c0_19] : memref<512x10xbf16, #tpu.memory_space<vmem>>, vector<512x10xbf16>
      %cst_20 = arith.constant dense<0.000000e+00> : vector<2x10xf32>
      %24 = tpu.matmul %22, %23, %cst_20 {dimension_numbers = #tpu.dot_dimension_numbers<[1], [0], [0], [1], [0, 0, 1, 1], [], []>} : vector<2x512xbf16>, vector<512x10xbf16>, vector<2x10xf32> -> vector<2x10xf32>
      %c0_21 = arith.constant 0 : index
      %c0_22 = arith.constant 0 : index
      %25 = vector.load %arg7[%c0_21, %c0_22] : memref<1x10xf32, #tpu.memory_space<vmem>>, vector<1x10xf32>
      %26 = vector.broadcast %25 : vector<1x10xf32> to vector<2x10xf32>
      %27 = arith.addf %24, %26 : vector<2x10xf32>
      %c0_23 = arith.constant 0 : index
      %c0_24 = arith.constant 0 : index
      %28 = vector.load %arg8[%c0_23, %c0_24] : memref<2x10xf32, #tpu.memory_space<vmem>>, vector<2x10xf32>
      tpu.vector_store %arg8[%c0_23, %c0_24], %27 {strides = array<i32>} : memref<2x10xf32, #tpu.memory_space<vmem>>, vector<2x10xf32>,
    } else {
    }
    return
  }
  func.func @transform_0(%arg0: i32) -> (i32, i32) {
    %c0_i32 = arith.constant 0 : i32
    %c0_i32_0 = arith.constant 0 : i32
    return %c0_i32, %arg0 : i32, i32
  }
  func.func @transform_1(%arg0: i32) -> (i32, i32) {
    %c0_i32 = arith.constant 0 : i32
    %c0_i32_0 = arith.constant 0 : i32
    return %arg0, %c0_i32 : i32, i32
  }
  func.func @transform_2(%arg0: i32) -> (i32, i32) {
    %c0_i32 = arith.constant 0 : i32
    %c0_i32_0 = arith.constant 0 : i32
    %c0_i32_1 = arith.constant 0 : i32
    return %c0_i32, %c0_i32_0 : i32, i32
  }
  func.func @transform_3(%arg0: i32) -> (i32, i32) {
    %c0_i32 = arith.constant 0 : i32
    %c0_i32_0 = arith.constant 0 : i32
    %c0_i32_1 = arith.constant 0 : i32
    return %c0_i32, %c0_i32_0 : i32, i32
  }
  func.func @transform_4(%arg0: i32) -> (i32, i32) {
    %c0_i32 = arith.constant 0 : i32
    %c0_i32_0 = arith.constant 0 : i32
    %c0_i32_1 = arith.constant 0 : i32
    return %c0_i32, %c0_i32_0 : i32, i32
  }
  func.func @transform_5(%arg0: i32) -> (i32, i32) {
    %c0_i32 = arith.constant 0 : i32
    %c0_i32_0 = arith.constant 0 : i32
    %c0_i32_1 = arith.constant 0 : i32
    return %c0_i32, %c0_i32_0 : i32, i32
  }
  func.func @transform_6(%arg0: i32) -> (i32, i32) {
    %c0_i32 = arith.constant 0 : i32
    %c0_i32_0 = arith.constant 0 : i32
    %c0_i32_1 = arith.constant 0 : i32
    return %c0_i32, %c0_i32_0 : i32, i32
  }
  func.func @transform_7(%arg0: i32) -> (i32, i32) {
    %c0_i32 = arith.constant 0 : i32
    %c0_i32_0 = arith.constant 0 : i32
    %c0_i32_1 = arith.constant 0 : i32
    return %c0_i32, %c0_i32_0 : i32, i32
  }
}

</mosaic_0001>

<bundles_post_ra>
// kernel: net_forward.4
= control target key start
LH: loop header
LB: loop body
LE: loop exit
PB: predicated region body
PF: predicated region fallthrough
CT: control target
= control target key end

     0   :  { %s1347_s12 = smov 0   ;;  %s2064_s0 = inlined_call_operand.vmem [shape: bf16[4,288,25], index: 0, kind: input, shape index: {}]   ;;  %s2065_s1 = inlined_call_operand.vmem [shape: bf16[25,32], index: 1, kind: input, shape index: {}]   ;;  %s2066_s2 = inlined_call_operand.vmem [shape: f32[1,32], index: 2, kind: input, shape index: {}]   ;;  %s2067_s3 = inlined_call_operand.vmem [shape: bf16[288,32], index: 3, kind: output, shape index: {}]  }
   0x1 LB: > { %s1353_s13 = sadd.s32 4294967295, %s1324_s12   ;;  %p1035_p0 = scmp.ge.s32.totalorder %s1324_s12, 1  ;;  %s1324_s12 = sphi %s1347_s12, %s13_s12  }
   0x2   : > { %p132_p1 = scmp.lt.s32.totalorder %s1324_s12, 5 }
   0x4   : > { %p133_p2 = pnand %p1035_p0, %p132_p1 }
   0x5   : > { %v1298_v0 = vld [vmem:[%s2065_s1] sm:$0xff] (!%p133_p2)   ;;  %vm360_vm0 = vcmask (!%p133_p2), 1043456   ;;  %v1299_v1 = vld [vmem:[%s2065_s1 + $0x8] sm:$0x1f] (!%p133_p2)   ;;  %vm361_vm1 = vcmask (!%p133_p2), 1044480   ;;  %p151_p3 = scmp.lt.s32.totalorder (!%p133_p2), %s1353_s13, 3 }
   0x6   : > { %136 = sbr.rel (%p133_p2) target bundleno = 303 (0x12f), region = 32  ;;  %1244 = vmatprep.subr.bf16.mxu0 (!%p133_p2), %v1298_v0  ;;  %1284 = vmatprep.subr.bf16.mxu1 (!%p133_p2), %v1298_v0  ;;  %v1326_v2 = vmov (!%p133_p2), 65535   ;;  %vm305_vm2 = vcmask (!%p133_p2), 203776   ;;  %v1409_v24 = vld [vmem:[%s2066_s2] ss:$0 sm:$0xff] (!%p133_p2)  ;;  %p1076_p4 = scmp.ne.s32.totalorder (!%p133_p2), %s1353_s13, 0 }
   0x7   : > { %1245 = vmatpush3.bf16.msra.mxu0 (!%p133_p2), %v1298_v0  ;;  %v362_v3 = vsel (!%p133_p2), %vm360_vm0, 4294967295, %v1326_v2  ;;  %1286 = vmatpush3.bf16.msra.mxu1 (!%p133_p2), %v1298_v0 }
   0x8   : > { %v363_v4 = vsel (!%p133_p2), %vm361_vm1, %v362_v3, 0 }
   0x9   : > { %v365_v5 = vand.u32 (!%p133_p2), %v1299_v1, %v363_v4 }
   0xb   : > { %1246 = vmatprep.subr.bf16.mxu0 (!%p133_p2), %v365_v5  ;;  %1285 = vmatprep.subr.bf16.mxu1 (!%p133_p2), %v365_v5 }
   0xc   : > { %1247 = vmatpush3.bf16.msra.mxu0 (!%p133_p2), %v365_v5  ;;  %1287 = vmatpush3.bf16.msra.mxu1 (!%p133_p2), %v365_v5 }
   0xd   : > { %s152_s18 = scalar_select %p151_p3, %s1353_s13, 3 }
   0xe   : > { %vm728_vm3 = vcmask (!%p1076_p4), 257024  }
   0xf   : > { %s1288_s19 = smul.u32 144, %s152_s18 }
  0x11   : > { %s1368_s22 = scalar_lea.vmem %s2064_s0, %s1288_s19 }
  0x12   : > { %v1300_v6 = vld [vmem:[%s1368_s22] sm:$0xff]   ;;  %v1301_v7 = vld [vmem:[%s1368_s22 + $0x8] sm:$0xff]   ;;  %v1302_v8 = vld [vmem:[%s1368_s22 + $0x50] sm:$0xff]  }
  0x13   : > { %1248 = vmatprep.mubr.msk.bf16.mxu0 %vm305_vm2, %v1300_v6  ;;  %v1303_v9 = vld [vmem:[%s1368_s22 + $0x58] sm:$0xff]   ;;  %1268 = vmatprep.mubr.msk.bf16.mxu1 %vm305_vm2, %v1302_v8  ;;  %v1304_v10 = vld [vmem:[%s1368_s22 + $0x10] sm:$0xff]   ;;  %v1306_v11 = vld [vmem:[%s1368_s22 + $0x60] sm:$0xff]  }
  0x14   : > { %1249 = vmatmul.mubr.msk.bf16.vlgmr.msra.gmra.mrb[0].mxu0 %vm305_vm2, %v1301_v7  ;;  %1269 = vmatmul.mubr.msk.bf16.vlgmr.msra.gmra.mrb[0].mxu1 %vm305_vm2, %v1303_v9  ;;  %v1305_v12 = vld [vmem:[%s1368_s22 + $0x18] sm:$0xff]   ;;  %v1308_v13 = vld [vmem:[%s1368_s22 + $0x20] sm:$0xff]   ;;  %v1307_v14 = vld [vmem:[%s1368_s22 + $0x68] sm:$0xff]  }
  0x15   : > { %1252 = vmatprep.mubr.msk.bf16.mxu0 %vm305_vm2, %v1304_v10  ;;  %1272 = vmatprep.mubr.msk.bf16.mxu1 %vm305_vm2, %v1306_v11  ;;  %v1310_v15 = vld [vmem:[%s1368_s22 + $0x70] sm:$0xff]   ;;  %v1309_v16 = vld [vmem:[%s1368_s22 + $0x28] sm:$0xff]   ;;  %v1311_v18 = vld [vmem:[%s1368_s22 + $0x78] sm:$0xff]  }
  0x16   : > { %v1312_v17 = vld [vmem:[%s1368_s22 + $0x30] sm:$0xff]   ;;  %v1314_v19 = vld [vmem:[%s1368_s22 + $0x80] sm:$0xff]   ;;  %v1313_v20 = vld [vmem:[%s1368_s22 + $0x38] sm:$0xff]  }
  0x17   : > { %v1316_v21 = vld [vmem:[%s1368_s22 + $0x40] sm:$0xff]   ;;  %v1315_v22 = vld [vmem:[%s1368_s22 + $0x88] sm:$0xff]  }
  0x18   : > { %v1317_v23 = vld [vmem:[%s1368_s22 + $0x48] sm:$0xff]  }
  0x1c   : > { %1253 = vmatmul.mubr.msk.bf16.gmra.mrb[4].mxu0 %vm305_vm2, %v1305_v12  ;;  %1273 = vmatmul.mubr.msk.bf16.gmra.mrb[4].mxu1 %vm305_vm2, %v1307_v14 }
  0x1d   : > { %1256 = vmatprep.mubr.msk.bf16.mxu0 %vm305_vm2, %v1308_v13  ;;  %1276 = vmatprep.mubr.msk.bf16.mxu1 %vm305_vm2, %v1310_v15 }
  0x24   : > { %1257 = vmatmul.mubr.msk.bf16.gmra.mrb[8].mxu0 %vm305_vm2, %v1309_v16  ;;  %1277 = vmatmul.mubr.msk.bf16.gmra.mrb[8].mxu1 %vm305_vm2, %v1311_v18 }
  0x25   : > { %1260 = vmatprep.mubr.msk.bf16.mxu0 %vm305_vm2, %v1312_v17  ;;  %1280 = vmatprep.mubr.msk.bf16.mxu1 %vm305_vm2, %v1314_v19 }
  0x2c   : > { %1261 = vmatmul.mubr.msk.bf16.gmra.mrb[12].mxu0 %vm305_vm2, %v1313_v20  ;;  %1281 = vmatmul.mubr.msk.bf16.gmra.mrb[12].mxu1 %vm305_vm2, %v1315_v22 }
  0x2d   : > { %1264 = vmatprep.mubr.msk.bf16.mxu0 %vm305_vm2, %v1316_v21 }
  0x34   : > { %1265 = vmatmul.mubr.msk.bf16.gmra.mrb[16].mxu0 %vm305_vm2, %v1317_v23 }
  0xe7   : > { %v1250_v25 = vpop.f32.mrb[0].mxu0  ;;  %v1270_v30 = vpop.f32.mrb[0].mxu1 }
  0xe8   : > { %v410_v26 = vadd.f32 %v1250_v25, %v1409_v24  ;;  %v401_v27 = vpop.f32.mrb[1].mxu0  ;;  %v490_v34 = vadd.f32 %v1270_v30, %v1409_v24  ;;  %v481_v35 = vpop.f32.mrb[1].mxu1 }
  0xe9   : > { %v402_v28 = vadd.f32 %v1409_v24, %v401_v27  ;;  %v1251_v29 = vpop.f32.mrb[2].mxu0  ;;  %v482_v38 = vadd.f32 %v1409_v24, %v481_v35  ;;  %v1271_v39 = vpop.f32.mrb[2].mxu1 }
  0xea   : > { %v1413_v31 = vmax.f32 %v410_v26, 0.0  ;;  %v413_v32 = vadd.f32 %v1251_v29, %v1409_v24  ;;  %v404_v33 = vpop.f32.mrb[3].mxu0  ;;  %v1423_v41 = vmax.f32 %v490_v34, 0.0  ;;  %v493_v42 = vadd.f32 %v1271_v39, %v1409_v24  ;;  %v484_v43 = vpop.f32.mrb[3].mxu1 }
  0xeb   : > { %v1417_v36 = vmax.f32 %v402_v28, 0.0  ;;  %v405_v37 = vadd.f32 %v1409_v24, %v404_v33  ;;  %v1428_v45 = vmax.f32 %v482_v38, 0.0  ;;  %v485_v46 = vadd.f32 %v1409_v24, %v484_v43 }
  0xec   : > { %v1421_v40 = vmax.f32 %v413_v32, 0.0  ;;  %v1431_v47 = vmax.f32 %v493_v42, 0.0 }
  0xed   : > { %v1426_v44 = vmax.f32 %v405_v37, 0.0  ;;  %v1433_v49 = vmax.f32 %v485_v46, 0.0 }
  0xef   : > { %v1254_v48 = vpop.f32.mrb[4].mxu0  ;;  %v1274_v54 = vpop.f32.mrb[4].mxu1 }
  0xf0   : > { %v426_v50 = vadd.f32 %v1254_v48, %v1409_v24  ;;  %v417_v51 = vpop.f32.mrb[5].mxu0  ;;  %v506_v58 = vadd.f32 %v1274_v54, %v1409_v24  ;;  %v497_v59 = vpop.f32.mrb[5].mxu1 }
  0xf1   : > { %v418_v52 = vadd.f32 %v1409_v24, %v417_v51  ;;  %v1255_v53 = vpop.f32.mrb[6].mxu0  ;;  %v498_v62 = vadd.f32 %v1409_v24, %v497_v59  ;;  %v1275_v63 = vpop.f32.mrb[6].mxu1 }
  0xf2   : > { %v1437_v55 = vmax.f32 %v426_v50, 0.0  ;;  %v429_v56 = vadd.f32 %v1255_v53, %v1409_v24  ;;  %v420_v57 = vpop.f32.mrb[7].mxu0  ;;  %v1447_v1 = vmax.f32 %v506_v58, 0.0  ;;  %v509_v2 = vadd.f32 %v1275_v63, %v1409_v24  ;;  %v500_v3 = vpop.f32.mrb[7].mxu1 }
  0xf3   : > { %v1441_v60 = vmax.f32 %v418_v52, 0.0  ;;  %v421_v61 = vadd.f32 %v1409_v24, %v420_v57  ;;  %v1452_v5 = vmax.f32 %v498_v62, 0.0  ;;  %v501_v6 = vadd.f32 %v1409_v24, %v500_v3 }
  0xf4   : > { %v1445_v0 = vmax.f32 %v429_v56, 0.0  ;;  %v1455_v7 = vmax.f32 %v509_v2, 0.0 }
  0xf5   : > { %v1450_v4 = vmax.f32 %v421_v61, 0.0  ;;  %v1457_v9 = vmax.f32 %v501_v6, 0.0 }
  0xf7   : > { %v1258_v8 = vpop.f32.mrb[8].mxu0  ;;  %v1278_v14 = vpop.f32.mrb[8].mxu1 }
  0xf8   : > { %v442_v10 = vadd.f32 %v1258_v8, %v1409_v24  ;;  %v433_v11 = vpop.f32.mrb[9].mxu0  ;;  %v522_v18 = vadd.f32 %v1278_v14, %v1409_v24  ;;  %v513_v19 = vpop.f32.mrb[9].mxu1 }
  0xf9   : > { %v434_v12 = vadd.f32 %v1409_v24, %v433_v11  ;;  %v1259_v13 = vpop.f32.mrb[10].mxu0  ;;  %v514_v22 = vadd.f32 %v1409_v24, %v513_v19  ;;  %v1279_v23 = vpop.f32.mrb[10].mxu1 }
  0xfa   : > { %v1461_v15 = vmax.f32 %v442_v10, 0.0  ;;  %v445_v16 = vadd.f32 %v1259_v13, %v1409_v24  ;;  %v436_v17 = vpop.f32.mrb[11].mxu0  ;;  %v1471_v26 = vmax.f32 %v522_v18, 0.0  ;;  %v525_v27 = vadd.f32 %v1279_v23, %v1409_v24  ;;  %v516_v28 = vpop.f32.mrb[11].mxu1 }
  0xfb   : > { %v1465_v20 = vmax.f32 %v434_v12, 0.0  ;;  %v437_v21 = vadd.f32 %v1409_v24, %v436_v17  ;;  %v1476_v30 = vmax.f32 %v514_v22, 0.0  ;;  %v517_v32 = vadd.f32 %v1409_v24, %v516_v28 }
  0xfc   : > { %v1469_v25 = vmax.f32 %v445_v16, 0.0  ;;  %v1479_v33 = vmax.f32 %v525_v27, 0.0  ;;  %v1152_v27 = vpack.c.bf16 (!%p1076_p4), %v1417_v36, %v1417_v36  ;;  %v1153_v28 = vpack.c.bf16 (!%p1076_p4), %v1426_v44, %v1426_v44 }
  0xfd   : > { %v1474_v29 = vmax.f32 %v437_v21, 0.0  ;;  %v1481_v35 = vmax.f32 %v517_v32, 0.0  ;;  %v1154_v32 = vpack.c.bf16 (!%p1076_p4), %v1413_v31, %v1413_v31 }
  0xfe   : > { %729 = vst.msk [vmem:[%s2067_s3] sm:$0xf] (!%p1076_p4), %vm728_vm3, %v1152_v27  ;;  %730 = vst.msk [vmem:[%s2067_s3 + $0x4] sm:$0xf] (!%p1076_p4), %vm728_vm3, %v1153_v28  ;;  %v1180_v27 = vpack.c.bf16 (!%p1076_p4), %v1476_v30, %v1476_v30 }
  0xff   : > { %v1262_v34 = vpop.f32.mrb[12].mxu0  ;;  %v1282_v43 = vpop.f32.mrb[12].mxu1  ;;  %731 = vst.msk [vmem:[%s2067_s3 + $0x8] sm:$0xf] (!%p1076_p4), %vm728_vm3, %v1154_v32  ;;  %v1181_v28 = vpack.c.bf16 (!%p1076_p4), %v1481_v35, %v1481_v35  ;;  %v1182_v32 = vpack.c.bf16 (!%p1076_p4), %v1471_v26, %v1471_v26 }
 0x100   : > { %v458_v37 = vadd.f32 %v1262_v34, %v1409_v24  ;;  %v449_v38 = vpop.f32.mrb[13].mxu0  ;;  %v538_v51 = vadd.f32 %v1282_v43, %v1409_v24  ;;  %v529_v52 = vpop.f32.mrb[13].mxu1  ;;  %v1156_v34 = vpack.c.bf16 (!%p1076_p4), %v1441_v60, %v1441_v60  ;;  %v1161_v43 = vpack.c.bf16 (!%p1076_p4), %v1474_v29, %v1474_v29  ;;  %757 = vst.msk [vmem:[%s2067_s3 + $0x70] sm:$0xf] (!%p1076_p4), %vm728_vm3, %v1180_v27 }
 0x101   : > { %v450_v39 = vadd.f32 %v1409_v24, %v449_v38  ;;  %v1263_v42 = vpop.f32.mrb[14].mxu0  ;;  %v530_v56 = vadd.f32 %v1409_v24, %v529_v52  ;;  %v1283_v57 = vpop.f32.mrb[14].mxu1  ;;  %v1158_v38 = vpack.c.bf16 (!%p1076_p4), %v1437_v55, %v1437_v55  ;;  %758 = vst.msk [vmem:[%s2067_s3 + $0x74] sm:$0xf] (!%p1076_p4), %vm728_vm3, %v1181_v28  ;;  %759 = vst.msk [vmem:[%s2067_s3 + $0x78] sm:$0xf] (!%p1076_p4), %vm728_vm3, %v1182_v32 }
 0x102   : > { %v1485_v46 = vmax.f32 %v458_v37, 0.0  ;;  %v461_v48 = vadd.f32 %v1263_v42, %v1409_v24  ;;  %v452_v50 = vpop.f32.mrb[15].mxu0  ;;  %v1495_v59 = vmax.f32 %v538_v51, 0.0  ;;  %v541_v61 = vadd.f32 %v1283_v57, %v1409_v24  ;;  %v532_v62 = vpop.f32.mrb[15].mxu1  ;;  %733 = vst.msk [vmem:[%s2067_s3 + $0x10] sm:$0xf] (!%p1076_p4), %vm728_vm3, %v1156_v34 }
 0x103   : > { %v1489_v53 = vmax.f32 %v450_v39, 0.0  ;;  %v453_v54 = vadd.f32 %v1409_v24, %v452_v50  ;;  %v1500_v2 = vmax.f32 %v530_v56, 0.0  ;;  %v533_v3 = vadd.f32 %v1409_v24, %v532_v62  ;;  %735 = vst.msk [vmem:[%s2067_s3 + $0x18] sm:$0xf] (!%p1076_p4), %vm728_vm3, %v1158_v38  ;;  %738 = vst.msk [vmem:[%s2067_s3 + $0x24] sm:$0xf] (!%p1076_p4), %vm728_vm3, %v1161_v43 }
 0x104   : > { %v1493_v58 = vmax.f32 %v461_v48, 0.0  ;;  %v1503_v6 = vmax.f32 %v541_v61, 0.0  ;;  %v1157_v37 = vpack.c.bf16 (!%p1076_p4), %v1450_v4, %v1450_v4  ;;  %v1159_v39 = vpack.c.bf16 (!%p1076_p4), %v1445_v0, %v1445_v0 }
 0x105   : > { %v1498_v63 = vmax.f32 %v453_v54, 0.0  ;;  %v1505_v10 = vmax.f32 %v533_v3, 0.0  ;;  %v1160_v42 = vpack.c.bf16 (!%p1076_p4), %v1465_v20, %v1465_v20  ;;  %v1162_v48 = vpack.c.bf16 (!%p1076_p4), %v1461_v15, %v1461_v15 }
 0x106   : > { %734 = vst.msk [vmem:[%s2067_s3 + $0x14] sm:$0xf] (!%p1076_p4), %vm728_vm3, %v1157_v37  ;;  %v1163_v50 = vpack.c.bf16 (!%p1076_p4), %v1469_v25, %v1469_v25  ;;  %v1164_v51 = vpack.c.bf16 (!%p1076_p4), %v1489_v53, %v1489_v53  ;;  %v1166_v54 = vpack.c.bf16 (!%p1076_p4), %v1485_v46, %v1485_v46  ;;  %736 = vst.msk [vmem:[%s2067_s3 + $0x1c] sm:$0xf] (!%p1076_p4), %vm728_vm3, %v1159_v39 }
 0x107   : > { %v1266_v8 = vpop.f32.mrb[16].mxu0  ;;  %601 = sbr.rel (%p1076_p4) target bundleno = 276 (0x114), region = 36  ;;  %v1165_v52 = vpack.c.bf16 (!%p1076_p4), %v1498_v63, %v1498_v63  ;;  %737 = vst.msk [vmem:[%s2067_s3 + $0x20] sm:$0xf] (!%p1076_p4), %vm728_vm3, %v1160_v42  ;;  %739 = vst.msk [vmem:[%s2067_s3 + $0x28] sm:$0xf] (!%p1076_p4), %vm728_vm3, %v1162_v48  ;;  %v1167_v56 = vpack.c.bf16 (!%p1076_p4), %v1493_v58, %v1493_v58  ;;  %v1184_v34 = vpack.c.bf16 (!%p1076_p4), %v1500_v2, %v1500_v2 }
 0x108   : > { %v474_v11 = vadd.f32 %v1266_v8, %v1409_v24  ;;  %v465_v12 = vpop.f32.mrb[17].mxu0  ;;  %740 = vst.msk [vmem:[%s2067_s3 + $0x2c] sm:$0xf] (!%p1076_p4), %vm728_vm3, %v1163_v50  ;;  %741 = vst.msk [vmem:[%s2067_s3 + $0x30] sm:$0xf] (!%p1076_p4), %vm728_vm3, %v1164_v51  ;;  %v1172_v8 = vpack.c.bf16 (!%p1076_p4), %v1428_v45, %v1428_v45  ;;  %v1185_v37 = vpack.c.bf16 (!%p1076_p4), %v1505_v10, %v1505_v10 }
 0x109   : > { %v466_v13 = vadd.f32 %v1409_v24, %v465_v12  ;;  %v1267_v14 = vpop.f32.mrb[18].mxu0  ;;  %742 = vst.msk [vmem:[%s2067_s3 + $0x34] sm:$0xf] (!%p1076_p4), %vm728_vm3, %v1165_v52  ;;  %743 = vst.msk [vmem:[%s2067_s3 + $0x38] sm:$0xf] (!%p1076_p4), %vm728_vm3, %v1166_v54  ;;  %v1174_v12 = vpack.c.bf16 (!%p1076_p4), %v1423_v41, %v1423_v41  ;;  %v1186_v38 = vpack.c.bf16 (!%p1076_p4), %v1495_v59, %v1495_v59 }
 0x10a   : > { %v1509_v16 = vmax.f32 %v474_v11, 0.0  ;;  %v477_v17 = vadd.f32 %v1267_v14, %v1409_v24  ;;  %v468_v18 = vpop.f32.mrb[19].mxu0  ;;  %v1173_v11 = vpack.c.bf16 (!%p1076_p4), %v1433_v49, %v1433_v49  ;;  %744 = vst.msk [vmem:[%s2067_s3 + $0x3c] sm:$0xf] (!%p1076_p4), %vm728_vm3, %v1167_v56  ;;  %v1176_v14 = vpack.c.bf16 (!%p1076_p4), %v1452_v5, %v1452_v5  ;;  %749 = vst.msk [vmem:[%s2067_s3 + $0x50] sm:$0xf] (!%p1076_p4), %vm728_vm3, %v1172_v8 }
 0x10b   : > { %v1512_v19 = vmax.f32 %v466_v13, 0.0  ;;  %v469_v21 = vadd.f32 %v1409_v24, %v468_v18  ;;  %v1155_v24 = vpack.c.bf16 (!%p1076_p4), %v1421_v40, %v1421_v40  ;;  %v1175_v13 = vpack.c.bf16 (!%p1076_p4), %v1431_v47, %v1431_v47  ;;  %751 = vst.msk [vmem:[%s2067_s3 + $0x58] sm:$0xf] (!%p1076_p4), %vm728_vm3, %v1174_v12  ;;  %761 = vst.msk [vmem:[%s2067_s3 + $0x80] sm:$0xf] (!%p1076_p4), %vm728_vm3, %v1184_v34 }
 0x10c   : > { %v1515_v22 = vmax.f32 %v477_v17, 0.0  ;;  %v1170_v62 = vpack.c.bf16 (!%p1076_p4), %v1509_v16, %v1509_v16  ;;  %v1177_v17 = vpack.c.bf16 (!%p1076_p4), %v1457_v9, %v1457_v9  ;;  %v1178_v18 = vpack.c.bf16 (!%p1076_p4), %v1447_v1, %v1447_v1  ;;  %750 = vst.msk [vmem:[%s2067_s3 + $0x54] sm:$0xf] (!%p1076_p4), %vm728_vm3, %v1173_v11  ;;  %753 = vst.msk [vmem:[%s2067_s3 + $0x60] sm:$0xf] (!%p1076_p4), %vm728_vm3, %v1176_v14 }
 0x10d   : > { %v1517_v23 = vmax.f32 %v469_v21, 0.0  ;;  %732 = vst.msk [vmem:[%s2067_s3 + $0xc] sm:$0xf] (!%p1076_p4), %vm728_vm3, %v1155_v24  ;;  %v1168_v57 = vpack.c.bf16 (!%p1076_p4), %v1512_v19, %v1512_v19  ;;  %v1179_v21 = vpack.c.bf16 (!%p1076_p4), %v1455_v7, %v1455_v7  ;;  %752 = vst.msk [vmem:[%s2067_s3 + $0x5c] sm:$0xf] (!%p1076_p4), %vm728_vm3, %v1175_v13  ;;  %v1183_v24 = vpack.c.bf16 (!%p1076_p4), %v1479_v33, %v1479_v33 }
 0x10e   : > { %v1171_v3 = vpack.c.bf16 %v1515_v22, %v1515_v22  ;;  %747 = vst.msk [vmem:[%s2067_s3 + $0x48] sm:$0xf] %vm728_vm3, %v1170_v62  ;;  %754 = vst.msk [vmem:[%s2067_s3 + $0x64] sm:$0xf] %vm728_vm3, %v1177_v17  ;;  %v1187_v39 = vpack.c.bf16 %v1503_v6, %v1503_v6 }
 0x10f   : > { %v1169_v61 = vpack.c.bf16 %v1517_v23, %v1517_v23  ;;  %745 = vst.msk [vmem:[%s2067_s3 + $0x40] sm:$0xf] %vm728_vm3, %v1168_v57  ;;  %755 = vst.msk [vmem:[%s2067_s3 + $0x68] sm:$0xf] %vm728_vm3, %v1178_v18 }
 0x110   : > { %748 = vst.msk [vmem:[%s2067_s3 + $0x4c] sm:$0xf] %vm728_vm3, %v1171_v3  ;;  %756 = vst.msk [vmem:[%s2067_s3 + $0x6c] sm:$0xf] %vm728_vm3, %v1179_v21 }
 0x111   : > { %746 = vst.msk [vmem:[%s2067_s3 + $0x44] sm:$0xf] %vm728_vm3, %v1169_v61  ;;  %760 = vst.msk [vmem:[%s2067_s3 + $0x7c] sm:$0xf] %vm728_vm3, %v1183_v24 }
 0x112   : > { %762 = vst.msk [vmem:[%s2067_s3 + $0x84] sm:$0xf] %vm728_vm3, %v1185_v37  ;;  %763 = vst.msk [vmem:[%s2067_s3 + $0x88] sm:$0xf] %vm728_vm3, %v1186_v38 }
 0x113   : > { %764 = vst.msk [vmem:[%s2067_s3 + $0x8c] sm:$0xf] %vm728_vm3, %v1187_v39 }
 0x114 PF: > { %p1113_p5 = scmp.eq.s32.totalorder %s1353_s13, 0 }
 0x115   : > { %v769_v42 = vld [vmem:[%s2067_s3] sm:$0xf] (!%p1113_p5)  ;;  %v1188_v43 = vpack.c.bf16 (!%p1113_p5), %v1417_v36, %v1417_v36  ;;  %vm967_vm4 = vcmask (!%p1113_p5), 257024   ;;  %v770_v48 = vld [vmem:[%s2067_s3 + $0x4] sm:$0xf] (!%p1113_p5)  ;;  %v1189_v50 = vpack.c.bf16 (!%p1113_p5), %v1426_v44, %v1426_v44  ;;  %v1190_v51 = vpack.c.bf16 (!%p1113_p5), %v1413_v31, %v1413_v31 }
 0x116   : > { %768 = sbr.rel (%p1113_p5) target bundleno = 303 (0x12f), region = 40  ;;  %v771_v52 = vld [vmem:[%s2067_s3 + $0x8] sm:$0xf] (!%p1113_p5)  ;;  %v1191_v36 = vpack.c.bf16 (!%p1113_p5), %v1421_v40, %v1421_v40  ;;  %v773_v56 = vld [vmem:[%s2067_s3 + $0x10] sm:$0xf] (!%p1113_p5)  ;;  %v1192_v44 = vpack.c.bf16 (!%p1113_p5), %v1441_v60, %v1441_v60  ;;  %v1193_v31 = vpack.c.bf16 (!%p1113_p5), %v1450_v4, %v1450_v4  ;;  %v1194_v57 = vpack.c.bf16 (!%p1113_p5), %v1437_v55, %v1437_v55 }
 0x117   : > { %v931_v61 = vmax.bf16 (!%p1113_p5), %v1188_v43, %v769_v42  ;;  %v932_v62 = vmax.bf16 (!%p1113_p5), %v1189_v50, %v770_v48  ;;  %v933_v3 = vmax.bf16 (!%p1113_p5), %v1190_v51, %v771_v52  ;;  %v774_v40 = vld [vmem:[%s2067_s3 + $0x14] sm:$0xf] (!%p1113_p5)  ;;  %v775_v8 = vld [vmem:[%s2067_s3 + $0x18] sm:$0xf] (!%p1113_p5)  ;;  %v776_v60 = vld [vmem:[%s2067_s3 + $0x1c] sm:$0xf] (!%p1113_p5)  ;;  %v1195_v4 = vpack.c.bf16 (!%p1113_p5), %v1445_v0, %v1445_v0 }
 0x118   : > { %v935_v55 = vmax.bf16 (!%p1113_p5), %v1192_v44, %v773_v56  ;;  %v936_v12 = vmax.bf16 (!%p1113_p5), %v1193_v31, %v774_v40  ;;  %v937_v13 = vmax.bf16 (!%p1113_p5), %v1194_v57, %v775_v8  ;;  %v777_v14 = vld [vmem:[%s2067_s3 + $0x20] sm:$0xf] (!%p1113_p5)  ;;  %v778_v17 = vld [vmem:[%s2067_s3 + $0x24] sm:$0xf] (!%p1113_p5)  ;;  %v779_v18 = vld [vmem:[%s2067_s3 + $0x28] sm:$0xf] (!%p1113_p5)  ;;  %v1196_v21 = vpack.c.bf16 (!%p1113_p5), %v1465_v20, %v1465_v20 }
 0x119   : > { %968 = vst.msk [vmem:[%s2067_s3] sm:$0xf] (!%p1113_p5), %vm967_vm4, %v931_v61  ;;  %969 = vst.msk [vmem:[%s2067_s3 + $0x4] sm:$0xf] (!%p1113_p5), %vm967_vm4, %v932_v62  ;;  %v938_v0 = vmax.bf16 (!%p1113_p5), %v1195_v4, %v776_v60  ;;  %v1197_v27 = vpack.c.bf16 (!%p1113_p5), %v1474_v29, %v1474_v29  ;;  %v1198_v28 = vpack.c.bf16 (!%p1113_p5), %v1461_v15, %v1461_v15  ;;  %v780_v32 = vld [vmem:[%s2067_s3 + $0x2c] sm:$0xf] (!%p1113_p5) }
 0x11a   : > { %v772_v54 = vld [vmem:[%s2067_s3 + $0xc] sm:$0xf] (!%p1113_p5)  ;;  %970 = vst.msk [vmem:[%s2067_s3 + $0x8] sm:$0xf] (!%p1113_p5), %vm967_vm4, %v933_v3  ;;  %v781_v24 = vld [vmem:[%s2067_s3 + $0x30] sm:$0xf] (!%p1113_p5)  ;;  %v1199_v15 = vpack.c.bf16 (!%p1113_p5), %v1469_v25, %v1469_v25  ;;  %v1200_v20 = vpack.c.bf16 (!%p1113_p5), %v1489_v53, %v1489_v53  ;;  %v1201_v29 = vpack.c.bf16 (!%p1113_p5), %v1498_v63, %v1498_v63  ;;  %v1202_v38 = vpack.c.bf16 (!%p1113_p5), %v1485_v46, %v1485_v46 }
 0x11b   : > { %v934_v11 = vmax.bf16 (!%p1113_p5), %v1191_v36, %v772_v54  ;;  %v782_v34 = vld [vmem:[%s2067_s3 + $0x34] sm:$0xf] (!%p1113_p5)  ;;  %972 = vst.msk [vmem:[%s2067_s3 + $0x10] sm:$0xf] (!%p1113_p5), %vm967_vm4, %v935_v55  ;;  %973 = vst.msk [vmem:[%s2067_s3 + $0x14] sm:$0xf] (!%p1113_p5), %vm967_vm4, %v936_v12  ;;  %v939_v25 = vmax.bf16 (!%p1113_p5), %v1196_v21, %v777_v14  ;;  %v940_v53 = vmax.bf16 (!%p1113_p5), %v1197_v27, %v778_v17 }
 0x11c   : > { %974 = vst.msk [vmem:[%s2067_s3 + $0x18] sm:$0xf] (!%p1113_p5), %vm967_vm4, %v937_v13  ;;  %v783_v37 = vld [vmem:[%s2067_s3 + $0x38] sm:$0xf] (!%p1113_p5)  ;;  %v784_v39 = vld [vmem:[%s2067_s3 + $0x3c] sm:$0xf] (!%p1113_p5)  ;;  %v941_v42 = vmax.bf16 (!%p1113_p5), %v1198_v28, %v779_v18  ;;  %v1203_v63 = vpack.c.bf16 (!%p1113_p5), %v1493_v58, %v1493_v58  ;;  %v942_v46 = vmax.bf16 (!%p1113_p5), %v1199_v15, %v780_v32  ;;  %v943_v48 = vmax.bf16 (!%p1113_p5), %v1200_v20, %v781_v24 }
 0x11d   : > { %971 = vst.msk [vmem:[%s2067_s3 + $0xc] sm:$0xf] %vm967_vm4, %v934_v11  ;;  %975 = vst.msk [vmem:[%s2067_s3 + $0x1c] sm:$0xf] %vm967_vm4, %v938_v0  ;;  %v785_v43 = vld [vmem:[%s2067_s3 + $0x40] sm:$0xf]  ;;  %v944_v50 = vmax.bf16 %v1201_v29, %v782_v34  ;;  %v945_v51 = vmax.bf16 %v1202_v38, %v783_v37  ;;  %v1204_v56 = vpack.c.bf16 %v1512_v19, %v1512_v19 }
 0x11e   : > { %v786_v52 = vld [vmem:[%s2067_s3 + $0x44] sm:$0xf]  ;;  %v787_v54 = vld [vmem:[%s2067_s3 + $0x48] sm:$0xf]  ;;  %v788_v58 = vld [vmem:[%s2067_s3 + $0x4c] sm:$0xf]  ;;  %v946_v36 = vmax.bf16 %v1203_v63, %v784_v39  ;;  %v1205_v44 = vpack.c.bf16 %v1517_v23, %v1517_v23  ;;  %v1206_v31 = vpack.c.bf16 %v1509_v16, %v1509_v16  ;;  %v1207_v16 = vpack.c.bf16 %v1515_v22, %v1515_v22 }
 0x11f   : > { %976 = vst.msk [vmem:[%s2067_s3 + $0x20] sm:$0xf] %vm967_vm4, %v939_v25  ;;  %977 = vst.msk [vmem:[%s2067_s3 + $0x24] sm:$0xf] %vm967_vm4, %v940_v53  ;;  %v789_v57 = vld [vmem:[%s2067_s3 + $0x50] sm:$0xf]  ;;  %v1208_v19 = vpack.c.bf16 %v1428_v45, %v1428_v45  ;;  %v1209_v23 = vpack.c.bf16 %v1433_v49, %v1433_v49  ;;  %v1210_v3 = vpack.c.bf16 %v1423_v41, %v1423_v41 }
 0x120   : > { %978 = vst.msk [vmem:[%s2067_s3 + $0x28] sm:$0xf] %vm967_vm4, %v941_v42  ;;  %v790_v61 = vld [vmem:[%s2067_s3 + $0x54] sm:$0xf]  ;;  %v791_v62 = vld [vmem:[%s2067_s3 + $0x58] sm:$0xf]  ;;  %v947_v8 = vmax.bf16 %v1204_v56, %v785_v43  ;;  %v948_v22 = vmax.bf16 %v1205_v44, %v786_v52  ;;  %v949_v60 = vmax.bf16 %v1206_v31, %v787_v54  ;;  %v1211_v45 = vpack.c.bf16 %v1431_v47, %v1431_v47 }
 0x121   : > { %979 = vst.msk [vmem:[%s2067_s3 + $0x2c] sm:$0xf] %vm967_vm4, %v942_v46  ;;  %980 = vst.msk [vmem:[%s2067_s3 + $0x30] sm:$0xf] %vm967_vm4, %v943_v48  ;;  %v792_v40 = vld [vmem:[%s2067_s3 + $0x5c] sm:$0xf]  ;;  %v950_v41 = vmax.bf16 %v1207_v16, %v788_v58  ;;  %v951_v4 = vmax.bf16 %v1208_v19, %v789_v57  ;;  %v952_v11 = vmax.bf16 %v1209_v23, %v790_v61 }
 0x122   : > { %981 = vst.msk [vmem:[%s2067_s3 + $0x34] sm:$0xf] %vm967_vm4, %v944_v50  ;;  %982 = vst.msk [vmem:[%s2067_s3 + $0x38] sm:$0xf] %vm967_vm4, %v945_v51  ;;  %v793_v49 = vld [vmem:[%s2067_s3 + $0x60] sm:$0xf]  ;;  %v953_v55 = vmax.bf16 %v1210_v3, %v791_v62  ;;  %v954_v14 = vmax.bf16 %v1211_v45, %v792_v40  ;;  %v1212_v17 = vpack.c.bf16 %v1452_v5, %v1452_v5 }
 0x123   : > { %983 = vst.msk [vmem:[%s2067_s3 + $0x3c] sm:$0xf] %vm967_vm4, %v946_v36  ;;  %v794_v12 = vld [vmem:[%s2067_s3 + $0x64] sm:$0xf]  ;;  %v795_v13 = vld [vmem:[%s2067_s3 + $0x68] sm:$0xf]  ;;  %v1213_v18 = vpack.c.bf16 %v1457_v9, %v1457_v9  ;;  %v1214_v0 = vpack.c.bf16 %v1447_v1, %v1447_v1  ;;  %v1215_v1 = vpack.c.bf16 %v1455_v7, %v1455_v7  ;;  %v1216_v5 = vpack.c.bf16 %v1476_v30, %v1476_v30 }
 0x124   : > { %v796_v47 = vld [vmem:[%s2067_s3 + $0x6c] sm:$0xf]  ;;  %984 = vst.msk [vmem:[%s2067_s3 + $0x40] sm:$0xf] %vm967_vm4, %v947_v8  ;;  %985 = vst.msk [vmem:[%s2067_s3 + $0x44] sm:$0xf] %vm967_vm4, %v948_v22  ;;  %v1217_v9 = vpack.c.bf16 %v1481_v35, %v1481_v35  ;;  %v1218_v32 = vpack.c.bf16 %v1471_v26, %v1471_v26  ;;  %v955_v34 = vmax.bf16 %v1212_v17, %v793_v49 }
 0x125   : > { %986 = vst.msk [vmem:[%s2067_s3 + $0x48] sm:$0xf] %vm967_vm4, %v949_v60  ;;  %v797_v21 = vld [vmem:[%s2067_s3 + $0x70] sm:$0xf]  ;;  %v798_v27 = vld [vmem:[%s2067_s3 + $0x74] sm:$0xf]  ;;  %v956_v7 = vmax.bf16 %v1213_v18, %v794_v12  ;;  %v957_v15 = vmax.bf16 %v1214_v0, %v795_v13  ;;  %v1219_v30 = vpack.c.bf16 %v1479_v33, %v1479_v33  ;;  %v958_v20 = vmax.bf16 %v1215_v1, %v796_v47 }
 0x126   : > { %v799_v28 = vld [vmem:[%s2067_s3 + $0x78] sm:$0xf]  ;;  %987 = vst.msk [vmem:[%s2067_s3 + $0x4c] sm:$0xf] %vm967_vm4, %v950_v41  ;;  %988 = vst.msk [vmem:[%s2067_s3 + $0x50] sm:$0xf] %vm967_vm4, %v951_v4  ;;  %v959_v35 = vmax.bf16 %v1216_v5, %v797_v21  ;;  %v960_v29 = vmax.bf16 %v1217_v9, %v798_v27  ;;  %v1220_v25 = vpack.c.bf16 %v1500_v2, %v1500_v2 }
 0x127   : > { %989 = vst.msk [vmem:[%s2067_s3 + $0x54] sm:$0xf] %vm967_vm4, %v952_v11  ;;  %990 = vst.msk [vmem:[%s2067_s3 + $0x58] sm:$0xf] %vm967_vm4, %v953_v55  ;;  %v800_v24 = vld [vmem:[%s2067_s3 + $0x7c] sm:$0xf]  ;;  %v961_v37 = vmax.bf16 %v1218_v32, %v799_v28  ;;  %v1221_v53 = vpack.c.bf16 %v1505_v10, %v1505_v10  ;;  %v1222_v42 = vpack.c.bf16 %v1495_v59, %v1495_v59 }
 0x128   : > { %991 = vst.msk [vmem:[%s2067_s3 + $0x5c] sm:$0xf] %vm967_vm4, %v954_v14  ;;  %v801_v26 = vld [vmem:[%s2067_s3 + $0x80] sm:$0xf]  ;;  %v802_v38 = vld [vmem:[%s2067_s3 + $0x84] sm:$0xf]  ;;  %v962_v33 = vmax.bf16 %v1219_v30, %v800_v24  ;;  %v1223_v59 = vpack.c.bf16 %v1503_v6, %v1503_v6 }
 0x129   : > { %v803_v39 = vld [vmem:[%s2067_s3 + $0x88] sm:$0xf]  ;;  %992 = vst.msk [vmem:[%s2067_s3 + $0x60] sm:$0xf] %vm967_vm4, %v955_v34  ;;  %993 = vst.msk [vmem:[%s2067_s3 + $0x64] sm:$0xf] %vm967_vm4, %v956_v7  ;;  %v963_v2 = vmax.bf16 %v1220_v25, %v801_v26  ;;  %v964_v10 = vmax.bf16 %v1221_v53, %v802_v38 }
 0x12a   : > { %994 = vst.msk [vmem:[%s2067_s3 + $0x68] sm:$0xf] %vm967_vm4, %v957_v15  ;;  %v804_v63 = vld [vmem:[%s2067_s3 + $0x8c] sm:$0xf]  ;;  %995 = vst.msk [vmem:[%s2067_s3 + $0x6c] sm:$0xf] %vm967_vm4, %v958_v20  ;;  %v965_v43 = vmax.bf16 %v1222_v42, %v803_v39 }
 0x12b   : > { %996 = vst.msk [vmem:[%s2067_s3 + $0x70] sm:$0xf] %vm967_vm4, %v959_v35  ;;  %997 = vst.msk [vmem:[%s2067_s3 + $0x74] sm:$0xf] %vm967_vm4, %v960_v29  ;;  %v966_v46 = vmax.bf16 %v1223_v59, %v804_v63 }
 0x12c   : > { %998 = vst.msk [vmem:[%s2067_s3 + $0x78] sm:$0xf] %vm967_vm4, %v961_v37  ;;  %999 = vst.msk [vmem:[%s2067_s3 + $0x7c] sm:$0xf] %vm967_vm4, %v962_v33 }
 0x12d   : > { %1000 = vst.msk [vmem:[%s2067_s3 + $0x80] sm:$0xf] %vm967_vm4, %v963_v2  ;;  %1001 = vst.msk [vmem:[%s2067_s3 + $0x84] sm:$0xf] %vm967_vm4, %v964_v10 }
 0x12e   : > { %1002 = vst.msk [vmem:[%s2067_s3 + $0x88] sm:$0xf] %vm967_vm4, %v965_v43  ;;  %1003 = vst.msk [vmem:[%s2067_s3 + $0x8c] sm:$0xf] %vm967_vm4, %v966_v46 }
 0x12f PF: > { %s13_s12 = sadd.s32 1, %s1324_s12  }
 0x130   : > { %p10_p6 = scmp.ge.s32.totalorder %s13_s12, 6  }
 0x132   :  { %12 = sbr.rel (!%p10_p6) target bundleno = 1 (0x1), region = 66 }

// kernel: net_forward.5
= control target key start
LH: loop header
LB: loop body
LE: loop exit
PB: predicated region body
PF: predicated region fallthrough
CT: control target
= control target key end

     0   :  { %s1663_s12 = smov 0   ;;  %s2072_s0 = inlined_call_operand.vmem [shape: bf16[4,72,800], index: 0, kind: input, shape index: {}]   ;;  %s2073_s1 = inlined_call_operand.vmem [shape: bf16[800,64], index: 1, kind: input, shape index: {}]   ;;  %s2074_s2 = inlined_call_operand.vmem [shape: f32[1,64], index: 2, kind: input, shape index: {}]   ;;  %s2075_s3 = inlined_call_operand.vmem [shape: bf16[72,64], index: 3, kind: output, shape index: {}]  }
   0x1 LB: > { %s1669_s13 = sadd.s32 4294967295, %s1639_s12   ;;  %p1223_p0 = scmp.ge.s32.totalorder %s1639_s12, 1  ;;  %s1639_s12 = sphi %s1663_s12, %s13_s12  }
   0x2   : > { %p132_p1 = scmp.lt.s32.totalorder %s1639_s12, 5 }
   0x4   : > { %p133_p2 = pnand %p1223_p0, %p132_p1 }
   0x5   : > { %v1536_v0 = vld [vmem:[%s2073_s1 + $0x40] sm:$0xff] (!%p133_p2)   ;;  %v1540_v4 = vld [vmem:[%s2073_s1 + $0x48] sm:$0xff] (!%p133_p2)   ;;  %v1544_v8 = vld [vmem:[%s2073_s1 + $0x50] sm:$0xff] (!%p133_p2)   ;;  %p151_p3 = scmp.lt.s32.totalorder (!%p133_p2), %s1669_s13, 3  ;;  %v1641_v38 = vmov (!%p133_p2), 0.0   ;;  %vm1642_vm0 = vmmov (!%p133_p2), 0  }
   0x6   : > { %136 = sbr.rel (%p133_p2) target bundleno = 344 (0x158), region = 32  ;;  %v1537_v1 = vld [vmem:[%s2073_s1] sm:$0xff] (!%p133_p2)   ;;  %1356 = vmatprep.subr.bf16.mxu0 (!%p133_p2), %v1536_v0  ;;  %v1541_v5 = vld [vmem:[%s2073_s1 + $0x8] sm:$0xff] (!%p133_p2)   ;;  %v1545_v9 = vld [vmem:[%s2073_s1 + $0x10] sm:$0xff] (!%p133_p2)   ;;  %vm764_vm1 = vcmask (!%p133_p2), 261120   ;;  %p1316_p4 = scmp.ne.s32.totalorder (!%p133_p2), %s1669_s13, 0 }
   0x7   : > { %v1538_v2 = vld [vmem:[%s2073_s1 + $0xc0] sm:$0xff] (!%p133_p2)   ;;  %1357 = vmatpush3.bf16.msra.mxu0 (!%p133_p2), %v1537_v1  ;;  %v1542_v6 = vld [vmem:[%s2073_s1 + $0xc8] sm:$0xff] (!%p133_p2)   ;;  %v1546_v10 = vld [vmem:[%s2073_s1 + $0xd0] sm:$0xff] (!%p133_p2)  }
   0x8   : > { %v1539_v3 = vld [vmem:[%s2073_s1 + $0x80] sm:$0xff] (!%p133_p2)   ;;  %1402 = vmatprep.subr.bf16.mxu1 (!%p133_p2), %v1538_v2  ;;  %1358 = vmatprep.subr.bf16.mxu0 (!%p133_p2), %v1540_v4  ;;  %v1543_v7 = vld [vmem:[%s2073_s1 + $0x88] sm:$0xff] (!%p133_p2)   ;;  %v1547_v11 = vld [vmem:[%s2073_s1 + $0x90] sm:$0xff] (!%p133_p2)  }
   0x9   : > { %1403 = vmatpush3.bf16.msra.mxu1 (!%p133_p2), %v1539_v3  ;;  %v1548_v12 = vld [vmem:[%s2073_s1 + $0x58] sm:$0xff] (!%p133_p2)   ;;  %v1552_v16 = vld [vmem:[%s2073_s1 + $0x60] sm:$0xff] (!%p133_p2)   ;;  %v1556_v20 = vld [vmem:[%s2073_s1 + $0x68] sm:$0xff] (!%p133_p2)  }
   0xa   : > { %1404 = vmatprep.subr.bf16.mxu1 (!%p133_p2), %v1542_v6  ;;  %v1549_v13 = vld [vmem:[%s2073_s1 + $0x18] sm:$0xff] (!%p133_p2)   ;;  %v1553_v17 = vld [vmem:[%s2073_s1 + $0x20] sm:$0xff] (!%p133_p2)   ;;  %v1557_v21 = vld [vmem:[%s2073_s1 + $0x28] sm:$0xff] (!%p133_p2)  }
   0xb   : > { %1359 = vmatpush3.bf16.msra.mxu0 (!%p133_p2), %v1541_v5  ;;  %v1550_v14 = vld [vmem:[%s2073_s1 + $0xd8] sm:$0xff] (!%p133_p2)   ;;  %v1554_v18 = vld [vmem:[%s2073_s1 + $0xe0] sm:$0xff] (!%p133_p2)   ;;  %v1558_v22 = vld [vmem:[%s2073_s1 + $0xe8] sm:$0xff] (!%p133_p2)  }
   0xc   : > { %1360 = vmatprep.subr.bf16.mxu0 (!%p133_p2), %v1544_v8  ;;  %v1551_v15 = vld [vmem:[%s2073_s1 + $0x98] sm:$0xff] (!%p133_p2)   ;;  %v1555_v19 = vld [vmem:[%s2073_s1 + $0xa0] sm:$0xff] (!%p133_p2)   ;;  %v1559_v23 = vld [vmem:[%s2073_s1 + $0xa8] sm:$0xff] (!%p133_p2)  }
   0xd   : > { %1405 = vmatpush3.bf16.msra.mxu1 %v1543_v7  ;;  %s152_s4 = scalar_select %p151_p3, %s1669_s13, 3  ;;  %v1560_v24 = vld [vmem:[%s2073_s1 + $0x70] sm:$0xff]   ;;  %v1564_v28 = vld [vmem:[%s2073_s1 + $0x78] sm:$0xff]   ;;  %v1571_v34 = vld [vmem:[%s2073_s1 + $0x140] sm:$0xff]  }
   0xe   : > { %1406 = vmatprep.subr.bf16.mxu1 %v1546_v10  ;;  %v1561_v25 = vld [vmem:[%s2073_s1 + $0x30] sm:$0xff]   ;;  %v1565_v29 = vld [vmem:[%s2073_s1 + $0x38] sm:$0xff]   ;;  %v1575_v37 = vld [vmem:[%s2073_s1 + $0x100] sm:$0xff]   ;;  %vm1118_vm2 = vcmask (!%p1316_p4), 519168  }
   0xf   : > { %1361 = vmatpush3.bf16.msra.mxu0 %v1545_v9  ;;  %s1525_s15 = smul.u32 252, %s152_s4  ;;  %v1562_v26 = vld [vmem:[%s2073_s1 + $0xf0] sm:$0xff]   ;;  %v1566_v30 = vld [vmem:[%s2073_s1 + $0xf8] sm:$0xff]   ;;  %v1576_v39 = vld [vmem:[%s2073_s1 + $0x148] sm:$0xff]  }
  0x10   : > { %1362 = vmatprep.subr.bf16.mxu0 %v1548_v12  ;;  %v1563_v27 = vld [vmem:[%s2073_s1 + $0xb0] sm:$0xff]   ;;  %v1570_v33 = vld [vmem:[%s2073_s1 + $0xb8] sm:$0xff]   ;;  %v1577_v40 = vld [vmem:[%s2073_s1 + $0x108] sm:$0xff]  }
  0x11   : > { %1407 = vmatpush3.bf16.msra.mxu1 %v1547_v11  ;;  %s1765_s26 = scalar_lea.vmem %s2072_s0, %s1525_s15  ;;  %v1578_v41 = vld [vmem:[%s2073_s1 + $0x180] sm:$0xff]   ;;  %v1585_v46 = vld [vmem:[%s2073_s1 + $0x150] sm:$0xff]   ;;  %v1589_v49 = vld [vmem:[%s2073_s1 + $0x158] sm:$0xff]  }
  0x12   : > { %1408 = vmatprep.subr.bf16.mxu1 %v1550_v14  ;;  %v1567_v31 = vld [vmem:[%s1765_s26] ss:$28 sps:$4 sm:$0xff]   ;;  %v1572_v35 = vld [vmem:[%s1765_s26 + $0x8] ss:$28 sps:$4 sm:$0xff]   ;;  %v1581_v43 = vld [vmem:[%s1765_s26 + $0x38] ss:$28 sps:$4 sm:$0xff]  }
  0x13   : > { %1363 = vmatpush3.bf16.msra.mxu0 %v1549_v13  ;;  %v1569_v32 = vld [vmem:[%s1765_s26 + $0x4] ss:$28 sps:$4 sm:$0xff]   ;;  %v1574_v36 = vld [vmem:[%s1765_s26 + $0xc] ss:$28 sps:$4 sm:$0xff]   ;;  %v1579_v42 = vld [vmem:[%s1765_s26 + $0x3c] ss:$28 sps:$4 sm:$0xff]  }
  0x14   : > { %1364 = vmatprep.subr.bf16.mxu0 %v1552_v16  ;;  %812 = vmatprep.mubr.bf16.mxu0 %v1569_v32  ;;  %v1582_v44 = vld [vmem:[%s1765_s26 + $0x44] ss:$28 sps:$4 sm:$0xff]   ;;  %v1586_v47 = vld [vmem:[%s2073_s1 + $0x110] sm:$0xff]   ;;  %v1591_v51 = vld [vmem:[%s2073_s1 + $0x118] sm:$0xff]  }
  0x15   : > { %1409 = vmatpush3.bf16.msra.mxu1 %v1551_v15  ;;  %884 = vmatprep.mubr.bf16.mxu1 %v1574_v36  ;;  %v1584_v45 = vld [vmem:[%s1765_s26 + $0x40] ss:$28 sps:$4 sm:$0xff]   ;;  %v1587_v48 = vld [vmem:[%s1765_s26 + $0x74] ss:$28 sps:$4 sm:$0xff]   ;;  %v1597_v56 = vld [vmem:[%s1765_s26 + $0xac] ss:$28 sps:$4 sm:$0xff]  }
  0x16   : > { %1410 = vmatprep.subr.bf16.mxu1 %v1554_v18  ;;  %v1590_v50 = vld [vmem:[%s1765_s26 + $0x70] ss:$28 sps:$4 sm:$0xff]   ;;  %v1592_v52 = vld [vmem:[%s1765_s26 + $0x7c] ss:$28 sps:$4 sm:$0xff]   ;;  %v1595_v54 = vld [vmem:[%s2073_s1 + $0x160] sm:$0xff]  }
  0x17   : > { %1365 = vmatpush3.bf16.msra.mxu0 %v1553_v17  ;;  %v1594_v53 = vld [vmem:[%s1765_s26 + $0x78] ss:$28 sps:$4 sm:$0xff]   ;;  %v1596_v55 = vld [vmem:[%s2073_s1 + $0x120] sm:$0xff]   ;;  %v1602_v59 = vld [vmem:[%s2073_s1 + $0x168] sm:$0xff]  }
  0x18   : > { %1366 = vmatprep.subr.bf16.mxu0 %v1556_v20  ;;  %v1600_v57 = vld [vmem:[%s1765_s26 + $0xb4] ss:$28 sps:$4 sm:$0xff]   ;;  %v1599_v58 = vld [vmem:[%s1765_s26 + $0xa8] ss:$28 sps:$4 sm:$0xff]   ;;  %v1612_v5 = vld [vmem:[%s2073_s1 + $0x178] sm:$0xff]  }
  0x19   : > { %1411 = vmatpush3.bf16.msra.mxu1 %v1555_v19  ;;  %v1604_v60 = vld [vmem:[%s2073_s1 + $0x128] sm:$0xff]   ;;  %v1606_v63 = vld [vmem:[%s2073_s1 + $0x170] sm:$0xff]   ;;  %v189_v0 = vld [vmem:[%s1765_s26 + $0xe0] sm:$0xff] }
  0x1a   : > { %1412 = vmatprep.subr.bf16.mxu1 %v1558_v22  ;;  %v1603_v61 = vld [vmem:[%s1765_s26 + $0xb0] ss:$28 sps:$4 sm:$0xff]   ;;  %v1255_v1 = vcombine.high %v189_v0, %v189_v0  ;;  %v1613_v6 = vld [vmem:[%s2073_s1 + $0x138] sm:$0xff]   ;;  %v1254_v7 = vcombine.low %v189_v0, %v189_v0  ;;  %v1620_v13 = vld [vmem:[%s1765_s26 + $0x48] ss:$28 sps:$4 sm:$0xff]  }
  0x1b   : > { %1367 = vmatpush3.bf16.msra.mxu0 %v1557_v21  ;;  %v1605_v62 = vld [vmem:[%s2073_s1 + $0x188] sm:$0xff]   ;;  %v1608_v2 = vld [vmem:[%s2073_s1 + $0x130] sm:$0xff]   ;;  %v1622_v14 = vld [vmem:[%s1765_s26 + $0x84] ss:$28 sps:$4 sm:$0xff]  }
  0x1c   : > { %1368 = vmatprep.subr.bf16.mxu0 %v1560_v24  ;;  %v190_v3 = vld [vmem:[%s1765_s26 + $0xe8] sm:$0xff]  ;;  %v1616_v8 = vld [vmem:[%s1765_s26 + $0x14] ss:$28 sps:$4 sm:$0xff]   ;;  %v1624_v16 = vld [vmem:[%s1765_s26 + $0x80] ss:$28 sps:$4 sm:$0xff]  }
  0x1d   : > { %1413 = vmatpush3.bf16.msra.mxu1 %v1559_v23  ;;  %v1257_v4 = vcombine.high %v190_v3, %v190_v3  ;;  %v1256_v9 = vcombine.low %v190_v3, %v190_v3  ;;  %v1614_v10 = vld [vmem:[%s1765_s26 + $0x10] ss:$28 sps:$4 sm:$0xff]   ;;  %v1617_v12 = vld [vmem:[%s1765_s26 + $0x18] ss:$28 sps:$4 sm:$0xff]   ;;  %v1625_v18 = vld [vmem:[%s1765_s26 + $0x88] ss:$28 sps:$4 sm:$0xff]  }
  0x1e   : > { %1414 = vmatprep.subr.bf16.mxu1 %v1562_v26  ;;  %v1618_v11 = vld [vmem:[%s1765_s26 + $0x4c] ss:$28 sps:$4 sm:$0xff]   ;;  %v1626_v17 = vld [vmem:[%s1765_s26 + $0xbc] ss:$28 sps:$4 sm:$0xff]   ;;  %v191_v19 = vld [vmem:[%s1765_s26 + $0xf0] sm:$0xff] }
  0x1f   : > { %1369 = vmatpush3.bf16.msra.mxu0 %v1561_v25  ;;  %v1621_v15 = vld [vmem:[%s1765_s26 + $0x50] ss:$28 sps:$4 sm:$0xff]   ;;  %v1628_v20 = vld [vmem:[%s1765_s26 + $0xb8] ss:$28 sps:$4 sm:$0xff]   ;;  %v1259_v21 = vcombine.high %v191_v19, %v191_v19  ;;  %v1629_v22 = vld [vmem:[%s1765_s26 + $0xc0] ss:$28 sps:$4 sm:$0xff]   ;;  %v1258_v23 = vcombine.low %v191_v19, %v191_v19 }
  0x20   : > { %1370 = vmatprep.subr.bf16.mxu0 %v1564_v28  ;;  %v1632_v24 = vld [vmem:[%s1765_s26 + $0xf8] ss:$0 sps:$4 sm:$0xff]   ;;  %v1882_v26 = vld [vmem:[%s2074_s2] ss:$0 sm:$0xff] }
  0x21   : > { %1415 = vmatpush3.bf16.msra.mxu1 %v1563_v27 }
  0x22   : > { %1416 = vmatprep.subr.bf16.mxu1 %v1566_v30 }
  0x23   : > { %1371 = vmatpush3.bf16.msra.mxu0 %v1565_v29 }
  0x24   : > { %1448 = vmatprep.subr.bf16.mxu0 %v1571_v34 }
  0x25   : > { %1417 = vmatpush3.bf16.msra.mxu1 %v1570_v33 }
  0x26   : > { %813 = vmatmul.mubr.bf16.vlgmr.msra.gmra.mrb[0].mxu0 %v1567_v31  ;;  %1501 = vmatprep.subr.bf16.mxu1 %v1641_v38 }
  0x27   : > { %1449 = vmatpush3.bf16.msra.mxu0 %v1575_v37  ;;  %820 = vmatprep.mubr.bf16.mxu0 %v1579_v42 }
  0x28   : > { %885 = vmatmul.mubr.bf16.vlgmr.msra.gmra.mrb[0].mxu1 %v1572_v35  ;;  %1450 = vmatprep.subr.bf16.mxu0 %v1576_v39 }
  0x29   : > { %1502 = vmatpush3.bf16.msra.mxu1 %v1578_v41  ;;  %892 = vmatprep.mubr.bf16.mxu1 %v1582_v44 }
  0x2a   : > { %1503 = vmatprep.subr.bf16.mxu1 %v1641_v38 }
  0x2b   : > { %1451 = vmatpush3.bf16.msra.mxu0 %v1577_v40 }
  0x2c   : > { %1452 = vmatprep.subr.bf16.mxu0 %v1585_v46 }
  0x2d   : > { %1504 = vmatpush3.bf16.msra.mxu1 %v1605_v62 }
  0x2e   : > { %821 = vmatmul.mubr.bf16.gmra.mrb[4].mxu0 %v1581_v43 }
  0x2f   : > { %1453 = vmatpush3.bf16.msra.mxu0 %v1586_v47  ;;  %828 = vmatprep.mubr.bf16.mxu0 %v1587_v48 }
  0x30   : > { %893 = vmatmul.mubr.bf16.gmra.mrb[4].mxu1 %v1584_v45  ;;  %1454 = vmatprep.subr.bf16.mxu0 %v1589_v49 }
  0x31   : > { %900 = vmatprep.mubr.bf16.mxu1 %v1592_v52 }
  0x33   : > { %1455 = vmatpush3.bf16.msra.mxu0 %v1591_v51 }
  0x34   : > { %1456 = vmatprep.subr.bf16.mxu0 %v1595_v54 }
  0x36   : > { %829 = vmatmul.mubr.bf16.gmra.mrb[8].mxu0 %v1590_v50 }
  0x37   : > { %836 = vmatprep.mubr.bf16.mxu0 %v1597_v56  ;;  %1457 = vmatpush3.bf16.msra.mxu0 %v1596_v55 }
  0x38   : > { %901 = vmatmul.mubr.bf16.gmra.mrb[8].mxu1 %v1594_v53  ;;  %1458 = vmatprep.subr.bf16.mxu0 %v1602_v59 }
  0x39   : > { %908 = vmatprep.mubr.bf16.mxu1 %v1600_v57 }
  0x3b   : > { %1459 = vmatpush3.bf16.msra.mxu0 %v1604_v60 }
  0x3c   : > { %1460 = vmatprep.subr.bf16.mxu0 %v1606_v63 }
  0x3e   : > { %837 = vmatmul.mubr.bf16.gmra.mrb[12].mxu0 %v1599_v58 }
  0x3f   : > { %844 = vmatprep.mubr.bf16.mxu0 %v1255_v1  ;;  %1461 = vmatpush3.bf16.msra.mxu0 %v1608_v2 }
  0x40   : > { %909 = vmatmul.mubr.bf16.gmra.mrb[12].mxu1 %v1603_v61  ;;  %1462 = vmatprep.subr.bf16.mxu0 %v1612_v5 }
  0x41   : > { %916 = vmatprep.mubr.bf16.mxu1 %v1257_v4 }
  0x43   : > { %1463 = vmatpush3.bf16.msra.mxu0 %v1613_v6 }
  0x46   : > { %845 = vmatmul.mubr.bf16.gmra.mrb[16].mxu0 %v1254_v7 }
  0x47   : > { %956 = vmatprep.mubr.bf16.mxu0 %v1616_v8 }
  0x48   : > { %917 = vmatmul.mubr.bf16.gmra.mrb[16].mxu1 %v1256_v9 }
  0x49   : > { %1505 = vmatprep.mubr.msk.bf16.mxu1 %vm1642_vm0, %v1641_v38 }
  0x4e   : > { %957 = vmatmul.mubr.bf16.vlgmr.msra.gmra.mrb[20].mxu0 %v1614_v10 }
  0x4f   : > { %964 = vmatprep.mubr.bf16.mxu0 %v1618_v11 }
  0x50   : > { %1506 = vmatmul.mubr.msk.bf16.vlgmr.msra.gmra.mrb[20].mxu1 %vm764_vm1, %v1617_v12 }
  0x51   : > { %1509 = vmatprep.mubr.msk.bf16.mxu1 %vm1642_vm0, %v1641_v38 }
  0x56   : > { %965 = vmatmul.mubr.bf16.gmra.mrb[24].mxu0 %v1620_v13 }
  0x57   : > { %972 = vmatprep.mubr.bf16.mxu0 %v1622_v14 }
  0x58   : > { %1510 = vmatmul.mubr.msk.bf16.gmra.mrb[24].mxu1 %vm764_vm1, %v1621_v15 }
  0x59   : > { %1513 = vmatprep.mubr.msk.bf16.mxu1 %vm1642_vm0, %v1641_v38 }
  0x5e   : > { %973 = vmatmul.mubr.bf16.gmra.mrb[28].mxu0 %v1624_v16 }
  0x5f   : > { %980 = vmatprep.mubr.bf16.mxu0 %v1626_v17 }
  0x60   : > { %1514 = vmatmul.mubr.msk.bf16.gmra.mrb[28].mxu1 %vm764_vm1, %v1625_v18 }
  0x61   : > { %1517 = vmatprep.mubr.msk.bf16.mxu1 %vm1642_vm0, %v1641_v38 }
  0x66   : > { %981 = vmatmul.mubr.bf16.gmra.mrb[32].mxu0 %v1628_v20 }
  0x67   : > { %988 = vmatprep.mubr.bf16.mxu0 %v1259_v21 }
  0x68   : > { %1518 = vmatmul.mubr.msk.bf16.gmra.mrb[32].mxu1 %vm764_vm1, %v1629_v22 }
  0x69   : > { %1521 = vmatprep.mubr.msk.bf16.mxu1 %vm1642_vm0, %v1641_v38 }
  0x6e   : > { %989 = vmatmul.mubr.bf16.gmra.mrb[36].mxu0 %v1258_v23 }
  0x70   : > { %1522 = vmatmul.mubr.msk.bf16.gmra.mrb[36].mxu1 %vm764_vm1, %v1632_v24 }
  0xf9   : > { %v1372_v25 = vpop.f32.mrb[0].mxu0 }
  0xfa   : > { %v1373_v27 = vpop.f32.mrb[1].mxu0 }
  0xfb   : > { %v1374_v28 = vadd.f32 %v1373_v27, %v1372_v25  ;;  %v1375_v29 = vpop.f32.mrb[2].mxu0  ;;  %v1418_v30 = vpop.f32.mrb[0].mxu1 }
  0xfc   : > { %v1376_v31 = vpop.f32.mrb[3].mxu0  ;;  %v1419_v34 = vpop.f32.mrb[1].mxu1 }
  0xfd   : > { %v815_v32 = vadd.f32 %v1374_v28, %v1882_v26  ;;  %v1377_v33 = vadd.f32 %v1376_v31, %v1375_v29  ;;  %v1420_v35 = vadd.f32 %v1419_v34, %v1418_v30  ;;  %v1421_v36 = vpop.f32.mrb[2].mxu1 }
  0xfe   : > { %v1422_v38 = vpop.f32.mrb[3].mxu1 }
  0xff   : > { %v818_v37 = vadd.f32 %v1377_v33, %v1882_v26  ;;  %v1886_v39 = vadd.f32 %v1420_v35, %v815_v32  ;;  %v1423_v40 = vadd.f32 %v1422_v38, %v1421_v36 }
 0x101   : > { %v1378_v41 = vpop.f32.mrb[4].mxu0  ;;  %v1888_v42 = vadd.f32 %v1423_v40, %v818_v37 }
 0x102   : > { %v1379_v43 = vpop.f32.mrb[5].mxu0 }
 0x103   : > { %v1380_v44 = vadd.f32 %v1379_v43, %v1378_v41  ;;  %v1381_v45 = vpop.f32.mrb[6].mxu0  ;;  %v1424_v46 = vpop.f32.mrb[4].mxu1 }
 0x104   : > { %v1382_v47 = vpop.f32.mrb[7].mxu0  ;;  %v1425_v50 = vpop.f32.mrb[5].mxu1 }
 0x105   : > { %v823_v48 = vadd.f32 %v1380_v44, %v1882_v26  ;;  %v1383_v49 = vadd.f32 %v1382_v47, %v1381_v45  ;;  %v1426_v51 = vadd.f32 %v1425_v50, %v1424_v46  ;;  %v1427_v52 = vpop.f32.mrb[6].mxu1 }
 0x106   : > { %v1428_v54 = vpop.f32.mrb[7].mxu1 }
 0x107   : > { %v826_v53 = vadd.f32 %v1383_v49, %v1882_v26  ;;  %v1892_v55 = vadd.f32 %v1426_v51, %v823_v48  ;;  %v1429_v56 = vadd.f32 %v1428_v54, %v1427_v52 }
 0x109   : > { %v1384_v57 = vpop.f32.mrb[8].mxu0  ;;  %v1894_v58 = vadd.f32 %v1429_v56, %v826_v53 }
 0x10a   : > { %v1385_v59 = vpop.f32.mrb[9].mxu0 }
 0x10b   : > { %v1386_v60 = vadd.f32 %v1385_v59, %v1384_v57  ;;  %v1387_v61 = vpop.f32.mrb[10].mxu0  ;;  %v1430_v62 = vpop.f32.mrb[8].mxu1 }
 0x10c   : > { %v1388_v63 = vpop.f32.mrb[11].mxu0  ;;  %v1431_v2 = vpop.f32.mrb[9].mxu1 }
 0x10d   : > { %v831_v0 = vadd.f32 %v1386_v60, %v1882_v26  ;;  %v1389_v1 = vadd.f32 %v1388_v63, %v1387_v61  ;;  %v1432_v3 = vadd.f32 %v1431_v2, %v1430_v62  ;;  %v1433_v4 = vpop.f32.mrb[10].mxu1 }
 0x10e   : > { %v1434_v6 = vpop.f32.mrb[11].mxu1 }
 0x10f   : > { %v834_v5 = vadd.f32 %v1389_v1, %v1882_v26  ;;  %v1898_v7 = vadd.f32 %v1432_v3, %v831_v0  ;;  %v1435_v8 = vadd.f32 %v1434_v6, %v1433_v4 }
 0x111   : > { %v1390_v9 = vpop.f32.mrb[12].mxu0  ;;  %v1900_v10 = vadd.f32 %v1435_v8, %v834_v5 }
 0x112   : > { %v1391_v11 = vpop.f32.mrb[13].mxu0 }
 0x113   : > { %v1392_v12 = vadd.f32 %v1391_v11, %v1390_v9  ;;  %v1393_v13 = vpop.f32.mrb[14].mxu0  ;;  %v1436_v14 = vpop.f32.mrb[12].mxu1 }
 0x114   : > { %v1394_v15 = vpop.f32.mrb[15].mxu0  ;;  %v1437_v18 = vpop.f32.mrb[13].mxu1 }
 0x115   : > { %v839_v16 = vadd.f32 %v1392_v12, %v1882_v26  ;;  %v1395_v17 = vadd.f32 %v1394_v15, %v1393_v13  ;;  %v1438_v19 = vadd.f32 %v1437_v18, %v1436_v14  ;;  %v1439_v20 = vpop.f32.mrb[14].mxu1 }
 0x116   : > { %v1440_v22 = vpop.f32.mrb[15].mxu1 }
 0x117   : > { %v842_v21 = vadd.f32 %v1395_v17, %v1882_v26  ;;  %v1904_v23 = vadd.f32 %v1438_v19, %v839_v16  ;;  %v1441_v24 = vadd.f32 %v1440_v22, %v1439_v20 }
 0x119   : > { %v1396_v25 = vpop.f32.mrb[16].mxu0  ;;  %v1906_v27 = vadd.f32 %v1441_v24, %v842_v21 }
 0x11a   : > { %v1397_v28 = vpop.f32.mrb[17].mxu0 }
 0x11b   : > { %v1398_v29 = vadd.f32 %v1397_v28, %v1396_v25  ;;  %v1399_v30 = vpop.f32.mrb[18].mxu0  ;;  %v1442_v31 = vpop.f32.mrb[16].mxu1 }
 0x11c   : > { %v1400_v32 = vpop.f32.mrb[19].mxu0  ;;  %v1443_v34 = vpop.f32.mrb[17].mxu1 }
 0x11d   : > { %v847_v33 = vadd.f32 %v1398_v29, %v1882_v26  ;;  %v1444_v35 = vadd.f32 %v1443_v34, %v1442_v31  ;;  %v1445_v36 = vpop.f32.mrb[18].mxu1 }
 0x11e   : > { %v1446_v37 = vpop.f32.mrb[19].mxu1 }
 0x11f   : > { %v1909_v38 = vadd.f32 %v1444_v35, %v847_v33 }
 0x121   : > { %v1464_v40 = vpop.f32.mrb[20].mxu0 }
 0x122   : > { %v1465_v41 = vpop.f32.mrb[21].mxu0 }
 0x123   : > { %v1466_v43 = vadd.f32 %v1465_v41, %v1464_v40  ;;  %v1467_v44 = vpop.f32.mrb[22].mxu0  ;;  %v1030_v46 = vpop.f32.mrb[20].mxu1 }
 0x124   : > { %v1468_v45 = vpop.f32.mrb[23].mxu0  ;;  %v1507_v49 = vpop.f32.mrb[21].mxu1 }
 0x125   : > { %v1469_v47 = vadd.f32 %v1468_v45, %v1467_v44  ;;  %v959_v48 = vadd.f32 %v1466_v43, %v1886_v39  ;;  %v1033_v50 = vpop.f32.mrb[22].mxu1 }
 0x126   : > { %v1508_v52 = vpop.f32.mrb[23].mxu1 }
 0x127   : > { %v1031_v51 = vadd.f32 %v1030_v46, %v959_v48  ;;  %v962_v26 = vadd.f32 %v1469_v47, %v1888_v42 }
 0x129   : > { %v1913_v53 = vmax.f32 %v1031_v51, 0.0  ;;  %v1034_v54 = vadd.f32 %v1033_v50, %v962_v26  ;;  %v1470_v56 = vpop.f32.mrb[24].mxu0 }
 0x12a   : > { %v1471_v57 = vpop.f32.mrb[25].mxu0 }
 0x12b   : > { %v1915_v59 = vmax.f32 %v1034_v54, 0.0  ;;  %v1472_v60 = vadd.f32 %v1471_v57, %v1470_v56  ;;  %v1473_v61 = vpop.f32.mrb[26].mxu0  ;;  %v1038_v63 = vpop.f32.mrb[24].mxu1 }
 0x12c   : > { %v1474_v62 = vpop.f32.mrb[27].mxu0  ;;  %v1511_v1 = vpop.f32.mrb[25].mxu1 }
 0x12d   : > { %v1475_v0 = vadd.f32 %v1474_v62, %v1473_v61  ;;  %v967_v39 = vadd.f32 %v1472_v60, %v1892_v55  ;;  %v1041_v2 = vpop.f32.mrb[26].mxu1  ;;  %v1339_v56 = vpack.c.bf16 (!%p1316_p4), %v1915_v59, %v1915_v59 }
 0x12e   : > { %v1512_v4 = vpop.f32.mrb[27].mxu1 }
 0x12f   : > { %v1039_v3 = vadd.f32 %v1038_v63, %v967_v39  ;;  %v970_v42 = vadd.f32 %v1475_v0, %v1894_v58  ;;  %1120 = vst.msk [vmem:[%s2075_s3 + $0x4] sm:$0xf] (!%p1316_p4), %vm1118_vm2, %v1339_v56 }
 0x131   : > { %v1919_v5 = vmax.f32 %v1039_v3, 0.0  ;;  %v1042_v6 = vadd.f32 %v1041_v2, %v970_v42  ;;  %v1476_v8 = vpop.f32.mrb[28].mxu0 }
 0x132   : > { %v1477_v9 = vpop.f32.mrb[29].mxu0 }
 0x133   : > { %v1921_v11 = vmax.f32 %v1042_v6, 0.0  ;;  %v1478_v12 = vadd.f32 %v1477_v9, %v1476_v8  ;;  %v1479_v13 = vpop.f32.mrb[30].mxu0  ;;  %v1046_v15 = vpop.f32.mrb[28].mxu1  ;;  %v1340_v57 = vpack.c.bf16 (!%p1316_p4), %v1919_v5, %v1919_v5 }
 0x134   : > { %v1480_v14 = vpop.f32.mrb[31].mxu0  ;;  %v1515_v17 = vpop.f32.mrb[29].mxu1 }
 0x135   : > { %v1481_v16 = vadd.f32 %v1480_v14, %v1479_v13  ;;  %v975_v55 = vadd.f32 %v1478_v12, %v1898_v7  ;;  %v1049_v18 = vpop.f32.mrb[30].mxu1  ;;  %1121 = vst.msk [vmem:[%s2075_s3 + $0x8] sm:$0xf] (!%p1316_p4), %vm1118_vm2, %v1340_v57 }
 0x136   : > { %v1516_v20 = vpop.f32.mrb[31].mxu1 }
 0x137   : > { %v1047_v19 = vadd.f32 %v1046_v15, %v975_v55  ;;  %v978_v58 = vadd.f32 %v1481_v16, %v1900_v10 }
 0x139   : > { %v1925_v21 = vmax.f32 %v1047_v19, 0.0  ;;  %v1050_v22 = vadd.f32 %v1049_v18, %v978_v58  ;;  %v1482_v24 = vpop.f32.mrb[32].mxu0 }
 0x13a   : > { %v1483_v25 = vpop.f32.mrb[33].mxu0 }
 0x13b   : > { %v1927_v28 = vmax.f32 %v1050_v22, 0.0  ;;  %v1484_v29 = vadd.f32 %v1483_v25, %v1482_v24  ;;  %v1485_v30 = vpop.f32.mrb[34].mxu0  ;;  %v1054_v32 = vpop.f32.mrb[32].mxu1  ;;  %v1342_v60 = vpack.c.bf16 (!%p1316_p4), %v1925_v21, %v1925_v21 }
 0x13c   : > { %v1486_v31 = vpop.f32.mrb[35].mxu0  ;;  %v1519_v34 = vpop.f32.mrb[33].mxu1 }
 0x13d   : > { %v1487_v33 = vadd.f32 %v1486_v31, %v1485_v30  ;;  %v983_v7 = vadd.f32 %v1484_v29, %v1904_v23  ;;  %v1057_v35 = vpop.f32.mrb[34].mxu1  ;;  %v1343_v61 = vpack.c.bf16 (!%p1316_p4), %v1927_v28, %v1927_v28  ;;  %1123 = vst.msk [vmem:[%s2075_s3 + $0x10] sm:$0xf] (!%p1316_p4), %vm1118_vm2, %v1342_v60 }
 0x13e   : > { %v1520_v37 = vpop.f32.mrb[35].mxu1 }
 0x13f   : > { %v1055_v36 = vadd.f32 %v1054_v32, %v983_v7  ;;  %v986_v10 = vadd.f32 %v1487_v33, %v1906_v27  ;;  %v1338_v27 = vpack.c.bf16 (!%p1316_p4), %v1913_v53, %v1913_v53  ;;  %1124 = vst.msk [vmem:[%s2075_s3 + $0x14] sm:$0xf] (!%p1316_p4), %vm1118_vm2, %v1343_v61 }
 0x141   : > { %v1931_v40 = vmax.f32 %v1055_v36, 0.0  ;;  %v1058_v41 = vadd.f32 %v1057_v35, %v986_v10  ;;  %v1488_v43 = vpop.f32.mrb[36].mxu0  ;;  %1119 = vst.msk [vmem:[%s2075_s3] sm:$0xf] (!%p1316_p4), %vm1118_vm2, %v1338_v27 }
 0x142   : > { %v1489_v44 = vpop.f32.mrb[37].mxu0 }
 0x143   : > { %v1933_v45 = vmax.f32 %v1058_v41, 0.0  ;;  %v1490_v46 = vadd.f32 %v1489_v44, %v1488_v43  ;;  %v1491_v47 = vpop.f32.mrb[38].mxu0  ;;  %v1062_v49 = vpop.f32.mrb[36].mxu1  ;;  %1085 = sbr.rel (%p1316_p4) target bundleno = 334 (0x14e), region = 36  ;;  %v1344_v62 = vpack.c.bf16 (!%p1316_p4), %v1931_v40, %v1931_v40 }
 0x144   : > { %v1492_v48 = vpop.f32.mrb[39].mxu0  ;;  %v1523_v23 = vpop.f32.mrb[37].mxu1 }
 0x145   : > { %v991_v50 = vadd.f32 %v1490_v46, %v1909_v38  ;;  %v1065_v51 = vpop.f32.mrb[38].mxu1  ;;  %v1341_v38 = vpack.c.bf16 (!%p1316_p4), %v1921_v11, %v1921_v11  ;;  %v1345_v63 = vpack.c.bf16 (!%p1316_p4), %v1933_v45, %v1933_v45  ;;  %1125 = vst.msk [vmem:[%s2075_s3 + $0x18] sm:$0xf] (!%p1316_p4), %vm1118_vm2, %v1344_v62 }
 0x146   : > { %v1524_v52 = vpop.f32.mrb[39].mxu1 }
 0x147   : > { %v1063_v26 = vadd.f32 %v1062_v49, %v991_v50  ;;  %1122 = vst.msk [vmem:[%s2075_s3 + $0xc] sm:$0xf] (!%p1316_p4), %vm1118_vm2, %v1341_v38  ;;  %1126 = vst.msk [vmem:[%s2075_s3 + $0x1c] sm:$0xf] (!%p1316_p4), %vm1118_vm2, %v1345_v63 }
 0x149   : > { %v1076_v54 = vmax.f32 %v1063_v26, 0.0 }
 0x14b   : > { %v1346_v0 = vpack.c.bf16 %v1076_v54, %v1076_v54 }
 0x14d   : > { %1127 = vst.msk [vmem:[%s2075_s3 + $0x20] sm:$0xf] %vm1118_vm2, %v1346_v0 }
 0x14e PF: > { %p1326_p5 = scmp.eq.s32.totalorder %s1669_s13, 0 }
 0x14f   : > { %v1132_v39 = vld [vmem:[%s2075_s3] sm:$0xf] (!%p1326_p5)  ;;  %v1347_v1 = vpack.c.bf16 (!%p1326_p5), %v1913_v53, %v1913_v53  ;;  %vm1182_vm3 = vcmask (!%p1326_p5), 519168   ;;  %v1133_v2 = vld [vmem:[%s2075_s3 + $0x4] sm:$0xf] (!%p1326_p5)  ;;  %v1348_v3 = vpack.c.bf16 (!%p1326_p5), %v1915_v59, %v1915_v59  ;;  %v1349_v42 = vpack.c.bf16 (!%p1326_p5), %v1919_v5, %v1919_v5 }
 0x150   : > { %1131 = sbr.rel (%p1326_p5) target bundleno = 344 (0x158), region = 40  ;;  %v1134_v4 = vld [vmem:[%s2075_s3 + $0x8] sm:$0xf] (!%p1326_p5)  ;;  %v1350_v53 = vpack.c.bf16 (!%p1326_p5), %v1921_v11, %v1921_v11  ;;  %v1136_v8 = vld [vmem:[%s2075_s3 + $0x10] sm:$0xf] (!%p1326_p5)  ;;  %v1351_v59 = vpack.c.bf16 (!%p1326_p5), %v1925_v21, %v1925_v21  ;;  %v1352_v5 = vpack.c.bf16 (!%p1326_p5), %v1927_v28, %v1927_v28  ;;  %v1353_v9 = vpack.c.bf16 (!%p1326_p5), %v1931_v40, %v1931_v40 }
 0x151   : > { %v1173_v12 = vmax.bf16 (!%p1326_p5), %v1347_v1, %v1132_v39  ;;  %v1174_v13 = vmax.bf16 (!%p1326_p5), %v1348_v3, %v1133_v2  ;;  %v1175_v14 = vmax.bf16 (!%p1326_p5), %v1349_v42, %v1134_v4  ;;  %v1137_v11 = vld [vmem:[%s2075_s3 + $0x14] sm:$0xf] (!%p1326_p5)  ;;  %v1138_v15 = vld [vmem:[%s2075_s3 + $0x18] sm:$0xf] (!%p1326_p5)  ;;  %v1354_v55 = vpack.c.bf16 (!%p1326_p5), %v1933_v45, %v1933_v45 }
 0x152   : > { %v1135_v6 = vld [vmem:[%s2075_s3 + $0xc] sm:$0xf] (!%p1326_p5)  ;;  %v1139_v16 = vld [vmem:[%s2075_s3 + $0x1c] sm:$0xf] (!%p1326_p5)  ;;  %v1177_v18 = vmax.bf16 (!%p1326_p5), %v1351_v59, %v1136_v8  ;;  %v1178_v19 = vmax.bf16 (!%p1326_p5), %v1352_v5, %v1137_v11  ;;  %v1179_v58 = vmax.bf16 (!%p1326_p5), %v1353_v9, %v1138_v15  ;;  %v1355_v22 = vpack.c.bf16 (!%p1326_p5), %v1076_v54, %v1076_v54 }
 0x153   : > { %v1176_v17 = vmax.bf16 (!%p1326_p5), %v1350_v53, %v1135_v6  ;;  %1183 = vst.msk [vmem:[%s2075_s3] sm:$0xf] (!%p1326_p5), %vm1182_vm3, %v1173_v12  ;;  %1184 = vst.msk [vmem:[%s2075_s3 + $0x4] sm:$0xf] (!%p1326_p5), %vm1182_vm3, %v1174_v13  ;;  %v1180_v21 = vmax.bf16 (!%p1326_p5), %v1354_v55, %v1139_v16 }
 0x154   : > { %v1140_v20 = vld [vmem:[%s2075_s3 + $0x20] sm:$0xf] (!%p1326_p5)  ;;  %1185 = vst.msk [vmem:[%s2075_s3 + $0x8] sm:$0xf] (!%p1326_p5), %vm1182_vm3, %v1175_v14  ;;  %1187 = vst.msk [vmem:[%s2075_s3 + $0x10] sm:$0xf] (!%p1326_p5), %vm1182_vm3, %v1177_v18 }
 0x155   : > { %1186 = vst.msk [vmem:[%s2075_s3 + $0xc] sm:$0xf] (!%p1326_p5), %vm1182_vm3, %v1176_v17  ;;  %1188 = vst.msk [vmem:[%s2075_s3 + $0x14] sm:$0xf] (!%p1326_p5), %vm1182_vm3, %v1178_v19  ;;  %v1181_v24 = vmax.bf16 (!%p1326_p5), %v1355_v22, %v1140_v20 }
 0x156   : > { %1189 = vst.msk [vmem:[%s2075_s3 + $0x18] sm:$0xf] (!%p1326_p5), %vm1182_vm3, %v1179_v58  ;;  %1190 = vst.msk [vmem:[%s2075_s3 + $0x1c] sm:$0xf] (!%p1326_p5), %vm1182_vm3, %v1180_v21 }
 0x157   : > { %1191 = vst.msk [vmem:[%s2075_s3 + $0x20] sm:$0xf] %vm1182_vm3, %v1181_v24 }
 0x158 PF: > { %s13_s12 = sadd.s32 1, %s1639_s12  }
 0x159   : > { %p10_p6 = scmp.ge.s32.totalorder %s13_s12, 6  }
 0x15b   :  { %12 = sbr.rel (!%p10_p6) target bundleno = 1 (0x1), region = 66 }

// kernel: net_forward.6
= control target key start
LH: loop header
LB: loop body
LE: loop exit
PB: predicated region body
PF: predicated region fallthrough
CT: control target
= control target key end

     0   :  { %s4817_s12 = smov 0   ;;  %s6116_s0 = inlined_call_operand.vmem [shape: bf16[4,18,1600], index: 0, kind: input, shape index: {}]   ;;  %s6117_s1 = inlined_call_operand.vmem [shape: bf16[1600,512], index: 1, kind: input, shape index: {}]   ;;  %s6118_s2 = inlined_call_operand.vmem [shape: f32[1,512], index: 2, kind: input, shape index: {}]   ;;  %s6119_s3 = inlined_call_operand.vmem [shape: bf16[18,512], index: 3, kind: output, shape index: {}]  }
   0x1 LB: > { %s4823_s13 = sadd.s32 4294967295, %s4794_s12   ;;  %p3578_p0 = scmp.ge.s32.totalorder %s4794_s12, 1  ;;  %s4794_s12 = sphi %s4817_s12, %s13_s12  }
   0x2   : > { %p132_p1 = scmp.lt.s32.totalorder %s4794_s12, 5 }
   0x4   : > { %p133_p2 = pnand %p3578_p0, %p132_p1 }
   0x5   : > { %v4156_v0 = vld [vmem:[%s6117_s1 + $0x4] ss:$16 sps:$4 sm:$0xff] (!%p133_p2)   ;;  %v4158_v1 = vld [vmem:[%s6117_s1 + $0xc] ss:$16 sps:$4 sm:$0xff] (!%p133_p2)   ;;  %v4160_v2 = vld [vmem:[%s6117_s1] ss:$16 sps:$4 sm:$0xff] (!%p133_p2)  }
   0x6   : > { %136 = sbr.rel (%p133_p2) target bundleno = 644 (0x284), region = 32  ;;  %2717 = vmatprep.subr.bf16.mxu0 (!%p133_p2), %v4156_v0  ;;  %v4161_v3 = vld [vmem:[%s6117_s1 + $0x8] ss:$16 sps:$4 sm:$0xff] (!%p133_p2)   ;;  %3074 = vmatprep.subr.bf16.mxu1 (!%p133_p2), %v4158_v1  ;;  %v4162_v4 = vld [vmem:[%s6117_s1 + $0x24] ss:$16 sps:$4 sm:$0xff] (!%p133_p2)   ;;  %p151_p3 = scmp.lt.s32.totalorder (!%p133_p2), %s4823_s13, 3 }
   0x7   : > { %2718 = vmatpush1.bf16.msra.mxu0 (!%p133_p2), %v4160_v2  ;;  %3075 = vmatpush1.bf16.msra.mxu1 (!%p133_p2), %v4161_v3  ;;  %v4164_v5 = vld [vmem:[%s6117_s1 + $0x2c] ss:$16 sps:$4 sm:$0xff] (!%p133_p2)   ;;  %v4166_v6 = vld [vmem:[%s6117_s1 + $0x20] ss:$16 sps:$4 sm:$0xff] (!%p133_p2)   ;;  %v4167_v7 = vld [vmem:[%s6117_s1 + $0x28] ss:$16 sps:$4 sm:$0xff] (!%p133_p2)  }
   0x8   : > { %2719 = vmatprep.subr.bf16.mxu0 (!%p133_p2), %v4162_v4  ;;  %3076 = vmatprep.subr.bf16.mxu1 (!%p133_p2), %v4164_v5  ;;  %v4168_v8 = vld [vmem:[%s6117_s1 + $0x44] ss:$16 sps:$4 sm:$0xff] (!%p133_p2)   ;;  %v4170_v9 = vld [vmem:[%s6117_s1 + $0x4c] ss:$16 sps:$4 sm:$0xff] (!%p133_p2)   ;;  %v4172_v10 = vld [vmem:[%s6117_s1 + $0x40] ss:$16 sps:$4 sm:$0xff] (!%p133_p2)  }
   0x9   : > { %v4173_v11 = vld [vmem:[%s6117_s1 + $0x48] ss:$16 sps:$4 sm:$0xff] (!%p133_p2)   ;;  %v4174_v12 = vld [vmem:[%s6117_s1 + $0x64] ss:$16 sps:$4 sm:$0xff] (!%p133_p2)   ;;  %v4176_v13 = vld [vmem:[%s6117_s1 + $0x6c] ss:$16 sps:$4 sm:$0xff] (!%p133_p2)  }
   0xa   : > { %v4178_v14 = vld [vmem:[%s6117_s1 + $0x60] ss:$16 sps:$4 sm:$0xff] (!%p133_p2)   ;;  %v4179_v15 = vld [vmem:[%s6117_s1 + $0x68] ss:$16 sps:$4 sm:$0xff] (!%p133_p2)   ;;  %v4180_v16 = vld [vmem:[%s6117_s1 + $0x84] ss:$16 sps:$4 sm:$0xff] (!%p133_p2)  }
   0xb   : > { %2720 = vmatpush1.bf16.msra.mxu0 (!%p133_p2), %v4166_v6  ;;  %3077 = vmatpush1.bf16.msra.mxu1 (!%p133_p2), %v4167_v7  ;;  %v4182_v17 = vld [vmem:[%s6117_s1 + $0x8c] ss:$16 sps:$4 sm:$0xff] (!%p133_p2)   ;;  %v4184_v18 = vld [vmem:[%s6117_s1 + $0x80] ss:$16 sps:$4 sm:$0xff] (!%p133_p2)   ;;  %v4185_v19 = vld [vmem:[%s6117_s1 + $0x88] ss:$16 sps:$4 sm:$0xff] (!%p133_p2)  }
   0xc   : > { %2721 = vmatprep.subr.bf16.mxu0 (!%p133_p2), %v4168_v8  ;;  %3078 = vmatprep.subr.bf16.mxu1 (!%p133_p2), %v4170_v9  ;;  %v4186_v20 = vld [vmem:[%s6117_s1 + $0xa4] ss:$16 sps:$4 sm:$0xff] (!%p133_p2)   ;;  %v4188_v21 = vld [vmem:[%s6117_s1 + $0xac] ss:$16 sps:$4 sm:$0xff] (!%p133_p2)   ;;  %v4190_v22 = vld [vmem:[%s6117_s1 + $0xa0] ss:$16 sps:$4 sm:$0xff] (!%p133_p2)  }
   0xd   : > { %v4191_v23 = vld [vmem:[%s6117_s1 + $0xa8] ss:$16 sps:$4 sm:$0xff]   ;;  %v4192_v24 = vld [vmem:[%s6117_s1 + $0xc4] ss:$16 sps:$4 sm:$0xff]   ;;  %v4194_v25 = vld [vmem:[%s6117_s1 + $0xcc] ss:$16 sps:$4 sm:$0xff]  }
   0xe   : > { %v4196_v26 = vld [vmem:[%s6117_s1 + $0xc0] ss:$16 sps:$4 sm:$0xff]   ;;  %v4197_v27 = vld [vmem:[%s6117_s1 + $0xc8] ss:$16 sps:$4 sm:$0xff]   ;;  %v4198_v28 = vld [vmem:[%s6117_s1 + $0xe4] ss:$16 sps:$4 sm:$0xff]  }
   0xf   : > { %2722 = vmatpush1.bf16.msra.mxu0 %v4172_v10  ;;  %3079 = vmatpush1.bf16.msra.mxu1 %v4173_v11  ;;  %v4200_v29 = vld [vmem:[%s6117_s1 + $0xec] ss:$16 sps:$4 sm:$0xff]   ;;  %v4202_v30 = vld [vmem:[%s6117_s1 + $0xe0] ss:$16 sps:$4 sm:$0xff]   ;;  %v4203_v31 = vld [vmem:[%s6117_s1 + $0xe8] ss:$16 sps:$4 sm:$0xff]  }
  0x10   : > { %2723 = vmatprep.subr.bf16.mxu0 %v4174_v12  ;;  %3080 = vmatprep.subr.bf16.mxu1 %v4176_v13  ;;  %v4204_v32 = vld [vmem:[%s6117_s1 + $0x104] ss:$16 sps:$4 sm:$0xff]   ;;  %v4206_v33 = vld [vmem:[%s6117_s1 + $0x10c] ss:$16 sps:$4 sm:$0xff]   ;;  %v4208_v34 = vld [vmem:[%s6117_s1 + $0x100] ss:$16 sps:$4 sm:$0xff]  }
  0x11   : > { %v4209_v35 = vld [vmem:[%s6117_s1 + $0x108] ss:$16 sps:$4 sm:$0xff]   ;;  %v4210_v36 = vld [vmem:[%s6117_s1 + $0x124] ss:$16 sps:$4 sm:$0xff]   ;;  %s152_s11 = scalar_select %p151_p3, %s4823_s13, 3  ;;  %vm2710_vm0 = vcmask 523264  }
  0x12   : > { %v4212_v37 = vld [vmem:[%s6117_s1 + $0x12c] ss:$16 sps:$4 sm:$0xff]   ;;  %v4214_v38 = vld [vmem:[%s6117_s1 + $0x120] ss:$16 sps:$4 sm:$0xff]   ;;  %v4215_v39 = vld [vmem:[%s6117_s1 + $0x128] ss:$16 sps:$4 sm:$0xff]  }
  0x13   : > { %2724 = vmatpush1.bf16.msra.mxu0 %v4178_v14  ;;  %3081 = vmatpush1.bf16.msra.mxu1 %v4179_v15  ;;  %v4216_v40 = vld [vmem:[%s6117_s1 + $0x144] ss:$16 sps:$4 sm:$0xff]   ;;  %s4146_s22 = smul.u32 156, %s152_s11  ;;  %v4218_v41 = vld [vmem:[%s6117_s1 + $0x14c] ss:$16 sps:$4 sm:$0xff]   ;;  %p4010_p4 = scmp.ne.s32.totalorder %s4823_s13, 0 }
  0x14   : > { %2725 = vmatprep.subr.bf16.mxu0 %v4180_v16  ;;  %3082 = vmatprep.subr.bf16.mxu1 %v4182_v17  ;;  %v4220_v42 = vld [vmem:[%s6117_s1 + $0x140] ss:$16 sps:$4 sm:$0xff]   ;;  %v4221_v43 = vld [vmem:[%s6117_s1 + $0x148] ss:$16 sps:$4 sm:$0xff]   ;;  %v4222_v44 = vld [vmem:[%s6117_s1 + $0x164] ss:$16 sps:$4 sm:$0xff]  }
  0x15   : > { %s4967_s6 = scalar_lea.vmem %s6116_s0, %s4146_s22  ;;  %v4224_v45 = vld [vmem:[%s6117_s1 + $0x16c] ss:$16 sps:$4 sm:$0xff]   ;;  %v4226_v46 = vld [vmem:[%s6117_s1 + $0x160] ss:$16 sps:$4 sm:$0xff]   ;;  %v4227_v47 = vld [vmem:[%s6117_s1 + $0x168] ss:$16 sps:$4 sm:$0xff]  }
  0x16   : > { %v4254_v48 = vld [vmem:[%s4967_s6 + $0x4] ss:$52 sps:$4 sm:$0xff]   ;;  %v4230_v50 = vld [vmem:[%s6117_s1 + $0x18c] ss:$16 sps:$4 sm:$0xff]   ;;  %v4232_v51 = vld [vmem:[%s6117_s1 + $0x180] ss:$16 sps:$4 sm:$0xff]  }
  0x17   : > { %2726 = vmatpush1.bf16.msra.mxu0 %v4184_v18  ;;  %3083 = vmatpush1.bf16.msra.mxu1 %v4185_v19  ;;  %v4228_v49 = vld [vmem:[%s6117_s1 + $0x184] ss:$16 sps:$4 sm:$0xff]   ;;  %v4233_v52 = vld [vmem:[%s6117_s1 + $0x188] ss:$16 sps:$4 sm:$0xff]   ;;  %v4236_v54 = vld [vmem:[%s6117_s1 + $0x1ac] ss:$16 sps:$4 sm:$0xff]  }
  0x18   : > { %2727 = vmatprep.subr.bf16.mxu0 %v4186_v20  ;;  %3084 = vmatprep.subr.bf16.mxu1 %v4188_v21  ;;  %v4234_v53 = vld [vmem:[%s6117_s1 + $0x1a4] ss:$16 sps:$4 sm:$0xff]   ;;  %v4238_v55 = vld [vmem:[%s6117_s1 + $0x1a0] ss:$16 sps:$4 sm:$0xff]   ;;  %v4239_v56 = vld [vmem:[%s6117_s1 + $0x1a8] ss:$16 sps:$4 sm:$0xff]  }
  0x19   : > { %2749 = vmatprep.mubr.bf16.mxu0 %v4254_v48  ;;  %3106 = vmatprep.mubr.bf16.mxu1 %v4254_v48  ;;  %v4240_v57 = vld [vmem:[%s6117_s1 + $0x1c4] ss:$16 sps:$4 sm:$0xff]   ;;  %v4242_v58 = vld [vmem:[%s6117_s1 + $0x1cc] ss:$16 sps:$4 sm:$0xff]   ;;  %v4244_v59 = vld [vmem:[%s6117_s1 + $0x1c0] ss:$16 sps:$4 sm:$0xff]  }
  0x1a   : > { %v4245_v60 = vld [vmem:[%s6117_s1 + $0x1c8] ss:$16 sps:$4 sm:$0xff]   ;;  %v4246_v61 = vld [vmem:[%s6117_s1 + $0x1e4] ss:$16 sps:$4 sm:$0xff]   ;;  %v4248_v62 = vld [vmem:[%s6117_s1 + $0x1ec] ss:$16 sps:$4 sm:$0xff]  }
  0x1b   : > { %2728 = vmatpush1.bf16.msra.mxu0 %v4190_v22  ;;  %3085 = vmatpush1.bf16.msra.mxu1 %v4191_v23  ;;  %v4250_v63 = vld [vmem:[%s6117_s1 + $0x1e0] ss:$16 sps:$4 sm:$0xff]   ;;  %v4251_v0 = vld [vmem:[%s6117_s1 + $0x1e8] ss:$16 sps:$4 sm:$0xff]   ;;  %v4257_v1 = vld [vmem:[%s6117_s1 + $0x204] ss:$16 sps:$4 sm:$0xff]  }
  0x1c   : > { %2729 = vmatprep.subr.bf16.mxu0 %v4192_v24  ;;  %3086 = vmatprep.subr.bf16.mxu1 %v4194_v25  ;;  %v4260_v2 = vld [vmem:[%s6117_s1 + $0x20c] ss:$16 sps:$4 sm:$0xff]   ;;  %v4252_v3 = vld [vmem:[%s4967_s6] ss:$52 sps:$4 sm:$0xff]   ;;  %v4258_v5 = vld [vmem:[%s6117_s1 + $0x208] ss:$16 sps:$4 sm:$0xff]  }
  0x1d   : > { %v4255_v4 = vld [vmem:[%s6117_s1 + $0x200] ss:$16 sps:$4 sm:$0xff]   ;;  %v4263_v6 = vld [vmem:[%s6117_s1 + $0x224] ss:$16 sps:$4 sm:$0xff]   ;;  %v4266_v7 = vld [vmem:[%s6117_s1 + $0x22c] ss:$16 sps:$4 sm:$0xff]  }
  0x1e   : > { %v4261_v8 = vld [vmem:[%s6117_s1 + $0x220] ss:$16 sps:$4 sm:$0xff]   ;;  %v4264_v9 = vld [vmem:[%s6117_s1 + $0x228] ss:$16 sps:$4 sm:$0xff]   ;;  %v4269_v10 = vld [vmem:[%s6117_s1 + $0x244] ss:$16 sps:$4 sm:$0xff]  }
  0x1f   : > { %2730 = vmatpush1.bf16.msra.mxu0 %v4196_v26  ;;  %3087 = vmatpush1.bf16.msra.mxu1 %v4197_v27  ;;  %v4272_v11 = vld [vmem:[%s6117_s1 + $0x24c] ss:$16 sps:$4 sm:$0xff]   ;;  %v4267_v12 = vld [vmem:[%s6117_s1 + $0x240] ss:$16 sps:$4 sm:$0xff]   ;;  %v4270_v13 = vld [vmem:[%s6117_s1 + $0x248] ss:$16 sps:$4 sm:$0xff]  }
  0x20   : > { %2731 = vmatprep.subr.bf16.mxu0 %v4198_v28  ;;  %3088 = vmatprep.subr.bf16.mxu1 %v4200_v29  ;;  %v4275_v14 = vld [vmem:[%s6117_s1 + $0x264] ss:$16 sps:$4 sm:$0xff]   ;;  %v4278_v15 = vld [vmem:[%s6117_s1 + $0x26c] ss:$16 sps:$4 sm:$0xff]   ;;  %v4273_v16 = vld [vmem:[%s6117_s1 + $0x260] ss:$16 sps:$4 sm:$0xff]  }
  0x21   : > { %v4276_v17 = vld [vmem:[%s6117_s1 + $0x268] ss:$16 sps:$4 sm:$0xff]   ;;  %v4281_v18 = vld [vmem:[%s6117_s1 + $0x284] ss:$16 sps:$4 sm:$0xff]   ;;  %v4284_v19 = vld [vmem:[%s6117_s1 + $0x28c] ss:$16 sps:$4 sm:$0xff]  }
  0x22   : > { %v4279_v20 = vld [vmem:[%s6117_s1 + $0x280] ss:$16 sps:$4 sm:$0xff]   ;;  %v4282_v21 = vld [vmem:[%s6117_s1 + $0x288] ss:$16 sps:$4 sm:$0xff]   ;;  %v4287_v22 = vld [vmem:[%s6117_s1 + $0x2a4] ss:$16 sps:$4 sm:$0xff]  }
  0x23   : > { %2732 = vmatpush1.bf16.msra.mxu0 %v4202_v30  ;;  %3089 = vmatpush1.bf16.msra.mxu1 %v4203_v31  ;;  %v4290_v23 = vld [vmem:[%s6117_s1 + $0x2ac] ss:$16 sps:$4 sm:$0xff]   ;;  %v4285_v26 = vld [vmem:[%s6117_s1 + $0x2a0] ss:$16 sps:$4 sm:$0xff]   ;;  %v4288_v28 = vld [vmem:[%s6117_s1 + $0x2a8] ss:$16 sps:$4 sm:$0xff]  }
  0x24   : > { %2733 = vmatprep.subr.bf16.mxu0 %v4204_v32  ;;  %3090 = vmatprep.subr.bf16.mxu1 %v4206_v33  ;;  %v171_v24 = vld [vmem:[%s4967_s6 + $0x68] sm:$0x11]  ;;  %v4293_v29 = vld [vmem:[%s6117_s1 + $0x2c4] ss:$16 sps:$4 sm:$0xff]   ;;  %v4291_v31 = vld [vmem:[%s6117_s1 + $0x2c0] ss:$16 sps:$4 sm:$0xff]  }
  0x25   : > { %v3594_v25 = vcombine.high %v171_v24, %v171_v24  ;;  %v3593_v27 = vcombine.low %v171_v24, %v171_v24  ;;  %v4296_v30 = vld [vmem:[%s6117_s1 + $0x2cc] ss:$16 sps:$4 sm:$0xff]   ;;  %v4294_v32 = vld [vmem:[%s6117_s1 + $0x2c8] ss:$16 sps:$4 sm:$0xff]   ;;  %v4315_v48 = vld [vmem:[%s6117_s1 + $0x340] ss:$16 sps:$4 sm:$0xff]  }
  0x26   : > { %v4355_v33 = vld [vmem:[%s4967_s6 + $0xc] ss:$52 sps:$4 sm:$0xff]   ;;  %v4456_v24 = vld [vmem:[%s4967_s6 + $0x14] ss:$52 sps:$4 sm:$0xff]  }
  0x27   : > { %2734 = vmatpush1.bf16.msra.mxu0 %v4208_v34  ;;  %3091 = vmatpush1.bf16.msra.mxu1 %v4209_v35  ;;  %v4299_v34 = vld [vmem:[%s6117_s1 + $0x2e4] ss:$16 sps:$4 sm:$0xff]   ;;  %v4302_v35 = vld [vmem:[%s6117_s1 + $0x2ec] ss:$16 sps:$4 sm:$0xff]  }
  0x28   : > { %2735 = vmatprep.subr.bf16.mxu0 %v4210_v36  ;;  %3092 = vmatprep.subr.bf16.mxu1 %v4212_v37  ;;  %v4297_v36 = vld [vmem:[%s6117_s1 + $0x2e0] ss:$16 sps:$4 sm:$0xff]   ;;  %v4300_v37 = vld [vmem:[%s6117_s1 + $0x2e8] ss:$16 sps:$4 sm:$0xff]  }
  0x2b   : > { %2736 = vmatpush1.bf16.msra.mxu0 %v4214_v38  ;;  %3093 = vmatpush1.bf16.msra.mxu1 %v4215_v39  ;;  %v4305_v38 = vld [vmem:[%s6117_s1 + $0x304] ss:$16 sps:$4 sm:$0xff]   ;;  %v4308_v39 = vld [vmem:[%s6117_s1 + $0x30c] ss:$16 sps:$4 sm:$0xff]  }
  0x2c   : > { %2737 = vmatprep.subr.bf16.mxu0 %v4216_v40  ;;  %3094 = vmatprep.subr.bf16.mxu1 %v4218_v41  ;;  %v4303_v40 = vld [vmem:[%s6117_s1 + $0x300] ss:$16 sps:$4 sm:$0xff]   ;;  %v4306_v41 = vld [vmem:[%s6117_s1 + $0x308] ss:$16 sps:$4 sm:$0xff]  }
  0x2f   : > { %2738 = vmatpush1.bf16.msra.mxu0 %v4220_v42  ;;  %3095 = vmatpush1.bf16.msra.mxu1 %v4221_v43  ;;  %v4311_v42 = vld [vmem:[%s6117_s1 + $0x324] ss:$16 sps:$4 sm:$0xff]   ;;  %v4314_v43 = vld [vmem:[%s6117_s1 + $0x32c] ss:$16 sps:$4 sm:$0xff]  }
  0x30   : > { %2739 = vmatprep.subr.bf16.mxu0 %v4222_v44  ;;  %3096 = vmatprep.subr.bf16.mxu1 %v4224_v45  ;;  %v4309_v44 = vld [vmem:[%s6117_s1 + $0x320] ss:$16 sps:$4 sm:$0xff]   ;;  %v4312_v45 = vld [vmem:[%s6117_s1 + $0x328] ss:$16 sps:$4 sm:$0xff]  }
  0x33   : > { %2740 = vmatpush1.bf16.msra.mxu0 %v4226_v46  ;;  %3097 = vmatpush1.bf16.msra.mxu1 %v4227_v47  ;;  %v4317_v46 = vld [vmem:[%s6117_s1 + $0x344] ss:$16 sps:$4 sm:$0xff]   ;;  %v4320_v47 = vld [vmem:[%s6117_s1 + $0x34c] ss:$16 sps:$4 sm:$0xff]  }
  0x34   : > { %2741 = vmatprep.subr.bf16.mxu0 %v4228_v49  ;;  %3098 = vmatprep.subr.bf16.mxu1 %v4230_v50  ;;  %v4318_v49 = vld [vmem:[%s6117_s1 + $0x348] ss:$16 sps:$4 sm:$0xff]   ;;  %v4323_v50 = vld [vmem:[%s6117_s1 + $0x364] ss:$16 sps:$4 sm:$0xff]  }
  0x37   : > { %2742 = vmatpush1.bf16.msra.mxu0 %v4232_v51  ;;  %3099 = vmatpush1.bf16.msra.mxu1 %v4233_v52  ;;  %v4326_v51 = vld [vmem:[%s6117_s1 + $0x36c] ss:$16 sps:$4 sm:$0xff]   ;;  %v4321_v52 = vld [vmem:[%s6117_s1 + $0x360] ss:$16 sps:$4 sm:$0xff]  }
  0x38   : > { %2743 = vmatprep.subr.bf16.mxu0 %v4234_v53  ;;  %3100 = vmatprep.subr.bf16.mxu1 %v4236_v54  ;;  %v4324_v53 = vld [vmem:[%s6117_s1 + $0x368] ss:$16 sps:$4 sm:$0xff]   ;;  %v4329_v54 = vld [vmem:[%s6117_s1 + $0x384] ss:$16 sps:$4 sm:$0xff]  }
  0x3b   : > { %2744 = vmatpush1.bf16.msra.mxu0 %v4238_v55  ;;  %3101 = vmatpush1.bf16.msra.mxu1 %v4239_v56  ;;  %v4332_v55 = vld [vmem:[%s6117_s1 + $0x38c] ss:$16 sps:$4 sm:$0xff]   ;;  %v4327_v56 = vld [vmem:[%s6117_s1 + $0x380] ss:$16 sps:$4 sm:$0xff]  }
  0x3c   : > { %2745 = vmatprep.subr.bf16.mxu0 %v4240_v57  ;;  %3102 = vmatprep.subr.bf16.mxu1 %v4242_v58  ;;  %v4330_v57 = vld [vmem:[%s6117_s1 + $0x388] ss:$16 sps:$4 sm:$0xff]   ;;  %v4335_v58 = vld [vmem:[%s6117_s1 + $0x3a4] ss:$16 sps:$4 sm:$0xff]  }
  0x3f   : > { %2746 = vmatpush1.bf16.msra.mxu0 %v4244_v59  ;;  %3103 = vmatpush1.bf16.msra.mxu1 %v4245_v60  ;;  %v4338_v59 = vld [vmem:[%s6117_s1 + $0x3ac] ss:$16 sps:$4 sm:$0xff]   ;;  %v4333_v60 = vld [vmem:[%s6117_s1 + $0x3a0] ss:$16 sps:$4 sm:$0xff]  }
  0x40   : > { %2747 = vmatprep.subr.bf16.mxu0 %v4246_v61  ;;  %3104 = vmatprep.subr.bf16.mxu1 %v4248_v62  ;;  %v4336_v61 = vld [vmem:[%s6117_s1 + $0x3a8] ss:$16 sps:$4 sm:$0xff]   ;;  %v4342_v62 = vld [vmem:[%s6117_s1 + $0x3c4] ss:$16 sps:$4 sm:$0xff]  }
  0x43   : > { %2748 = vmatpush1.bf16.msra.mxu0 %v4250_v63  ;;  %3105 = vmatpush1.bf16.msra.mxu1 %v4251_v0  ;;  %v4345_v63 = vld [vmem:[%s6117_s1 + $0x3cc] ss:$16 sps:$4 sm:$0xff]   ;;  %v4340_v0 = vld [vmem:[%s6117_s1 + $0x3c0] ss:$16 sps:$4 sm:$0xff]  }
  0x44   : > { %2768 = vmatprep.subr.bf16.mxu0 %v4257_v1  ;;  %3125 = vmatprep.subr.bf16.mxu1 %v4260_v2  ;;  %v4343_v1 = vld [vmem:[%s6117_s1 + $0x3c8] ss:$16 sps:$4 sm:$0xff]   ;;  %v4349_v2 = vld [vmem:[%s6117_s1 + $0x3e4] ss:$16 sps:$4 sm:$0xff]  }
  0x46   : > { %2750 = vmatmul.mubr.bf16.vlgmr.msra.gmra.mrb[0].mxu0 %v4252_v3  ;;  %3107 = vmatmul.mubr.bf16.vlgmr.msra.gmra.mrb[0].mxu1 %v4252_v3  ;;  %v4352_v3 = vld [vmem:[%s6117_s1 + $0x3ec] ss:$16 sps:$4 sm:$0xff]  }
  0x47   : > { %2769 = vmatpush1.bf16.msra.mxu0 %v4255_v4  ;;  %3126 = vmatpush1.bf16.msra.mxu1 %v4258_v5  ;;  %v4347_v4 = vld [vmem:[%s6117_s1 + $0x3e0] ss:$16 sps:$4 sm:$0xff]   ;;  %v4350_v5 = vld [vmem:[%s6117_s1 + $0x3e8] ss:$16 sps:$4 sm:$0xff]  }
  0x48   : > { %2770 = vmatprep.subr.bf16.mxu0 %v4263_v6  ;;  %3127 = vmatprep.subr.bf16.mxu1 %v4266_v7  ;;  %v4358_v6 = vld [vmem:[%s6117_s1 + $0x404] ss:$16 sps:$4 sm:$0xff]   ;;  %v4361_v7 = vld [vmem:[%s6117_s1 + $0x40c] ss:$16 sps:$4 sm:$0xff]  }
  0x49   : > { %2759 = vmatprep.mubr.bf16.mxu0 %v3594_v25  ;;  %3116 = vmatprep.mubr.bf16.mxu1 %v3594_v25  ;;  %v4374_v25 = vld [vmem:[%s6117_s1 + $0x460] ss:$16 sps:$4 sm:$0xff]  }
  0x4b   : > { %2771 = vmatpush1.bf16.msra.mxu0 %v4261_v8  ;;  %3128 = vmatpush1.bf16.msra.mxu1 %v4264_v9  ;;  %v4353_v8 = vld [vmem:[%s4967_s6 + $0x8] ss:$52 sps:$4 sm:$0xff]   ;;  %v172_v9 = vld [vmem:[%s4967_s6 + $0x70] sm:$0x11] }
  0x4c   : > { %2772 = vmatprep.subr.bf16.mxu0 %v4269_v10  ;;  %3129 = vmatprep.subr.bf16.mxu1 %v4272_v11  ;;  %v4356_v10 = vld [vmem:[%s6117_s1 + $0x400] ss:$16 sps:$4 sm:$0xff]   ;;  %v4359_v11 = vld [vmem:[%s6117_s1 + $0x408] ss:$16 sps:$4 sm:$0xff]  }
  0x4e   : > { %2760 = vmatmul.mubr.bf16.gmra.mrb[4].mxu0 %v3593_v27  ;;  %3117 = vmatmul.mubr.bf16.gmra.mrb[4].mxu1 %v3593_v27  ;;  %v4382_v27 = vld [vmem:[%s6117_s1 + $0x484] ss:$16 sps:$4 sm:$0xff]  }
  0x4f   : > { %2773 = vmatpush1.bf16.msra.mxu0 %v4267_v12  ;;  %3130 = vmatpush1.bf16.msra.mxu1 %v4270_v13  ;;  %v4364_v12 = vld [vmem:[%s6117_s1 + $0x424] ss:$16 sps:$4 sm:$0xff]   ;;  %v4367_v13 = vld [vmem:[%s6117_s1 + $0x42c] ss:$16 sps:$4 sm:$0xff]  }
  0x50   : > { %2774 = vmatprep.subr.bf16.mxu0 %v4275_v14  ;;  %3131 = vmatprep.subr.bf16.mxu1 %v4278_v15  ;;  %v3596_v14 = vcombine.high %v172_v9, %v172_v9  ;;  %v4362_v15 = vld [vmem:[%s6117_s1 + $0x420] ss:$16 sps:$4 sm:$0xff]  }
  0x51   : > { %2800 = vmatprep.mubr.bf16.mxu0 %v4355_v33  ;;  %3157 = vmatprep.mubr.bf16.mxu1 %v4355_v33  ;;  %v4386_v33 = vld [vmem:[%s6117_s1 + $0x4a0] ss:$16 sps:$4 sm:$0xff]  }
  0x53   : > { %2775 = vmatpush1.bf16.msra.mxu0 %v4273_v16  ;;  %3132 = vmatpush1.bf16.msra.mxu1 %v4276_v17  ;;  %v4365_v16 = vld [vmem:[%s6117_s1 + $0x428] ss:$16 sps:$4 sm:$0xff]   ;;  %v4370_v17 = vld [vmem:[%s6117_s1 + $0x444] ss:$16 sps:$4 sm:$0xff]  }
  0x54   : > { %2776 = vmatprep.subr.bf16.mxu0 %v4281_v18  ;;  %3133 = vmatprep.subr.bf16.mxu1 %v4284_v19  ;;  %v4373_v18 = vld [vmem:[%s6117_s1 + $0x44c] ss:$16 sps:$4 sm:$0xff]   ;;  %v3595_v19 = vcombine.low %v172_v9, %v172_v9  ;;  %v4448_v9 = vld [vmem:[%s6117_s1 + $0x5e0] ss:$16 sps:$4 sm:$0xff]  }
  0x57   : > { %2777 = vmatpush1.bf16.msra.mxu0 %v4279_v20  ;;  %3134 = vmatpush1.bf16.msra.mxu1 %v4282_v21  ;;  %v4368_v20 = vld [vmem:[%s6117_s1 + $0x440] ss:$16 sps:$4 sm:$0xff]   ;;  %v4371_v21 = vld [vmem:[%s6117_s1 + $0x448] ss:$16 sps:$4 sm:$0xff]  }
  0x58   : > { %2778 = vmatprep.subr.bf16.mxu0 %v4287_v22  ;;  %3135 = vmatprep.subr.bf16.mxu1 %v4290_v23  ;;  %v4376_v22 = vld [vmem:[%s6117_s1 + $0x464] ss:$16 sps:$4 sm:$0xff]   ;;  %v4379_v23 = vld [vmem:[%s6117_s1 + $0x46c] ss:$16 sps:$4 sm:$0xff]  }
  0x5b   : > { %2779 = vmatpush1.bf16.msra.mxu0 %v4285_v26  ;;  %3136 = vmatpush1.bf16.msra.mxu1 %v4288_v28  ;;  %v4377_v26 = vld [vmem:[%s6117_s1 + $0x468] ss:$16 sps:$4 sm:$0xff]   ;;  %v4385_v28 = vld [vmem:[%s6117_s1 + $0x48c] ss:$16 sps:$4 sm:$0xff]  }
  0x5c   : > { %2780 = vmatprep.subr.bf16.mxu0 %v4293_v29  ;;  %3137 = vmatprep.subr.bf16.mxu1 %v4296_v30  ;;  %v4380_v29 = vld [vmem:[%s6117_s1 + $0x480] ss:$16 sps:$4 sm:$0xff]   ;;  %v4383_v30 = vld [vmem:[%s6117_s1 + $0x488] ss:$16 sps:$4 sm:$0xff]  }
  0x5f   : > { %2781 = vmatpush1.bf16.msra.mxu0 %v4291_v31  ;;  %3138 = vmatpush1.bf16.msra.mxu1 %v4294_v32  ;;  %v4388_v31 = vld [vmem:[%s6117_s1 + $0x4a4] ss:$16 sps:$4 sm:$0xff]   ;;  %v4391_v32 = vld [vmem:[%s6117_s1 + $0x4ac] ss:$16 sps:$4 sm:$0xff]  }
  0x60   : > { %2782 = vmatprep.subr.bf16.mxu0 %v4299_v34  ;;  %3139 = vmatprep.subr.bf16.mxu1 %v4302_v35  ;;  %v4389_v34 = vld [vmem:[%s6117_s1 + $0x4a8] ss:$16 sps:$4 sm:$0xff]   ;;  %v4394_v35 = vld [vmem:[%s6117_s1 + $0x4c4] ss:$16 sps:$4 sm:$0xff]  }
  0x63   : > { %2783 = vmatpush1.bf16.msra.mxu0 %v4297_v36  ;;  %3140 = vmatpush1.bf16.msra.mxu1 %v4300_v37  ;;  %v4397_v36 = vld [vmem:[%s6117_s1 + $0x4cc] ss:$16 sps:$4 sm:$0xff]   ;;  %v4392_v37 = vld [vmem:[%s6117_s1 + $0x4c0] ss:$16 sps:$4 sm:$0xff]  }
  0x64   : > { %2784 = vmatprep.subr.bf16.mxu0 %v4305_v38  ;;  %3141 = vmatprep.subr.bf16.mxu1 %v4308_v39  ;;  %v4395_v38 = vld [vmem:[%s6117_s1 + $0x4c8] ss:$16 sps:$4 sm:$0xff]   ;;  %v4400_v39 = vld [vmem:[%s6117_s1 + $0x4e4] ss:$16 sps:$4 sm:$0xff]  }
  0x67   : > { %2785 = vmatpush1.bf16.msra.mxu0 %v4303_v40  ;;  %3142 = vmatpush1.bf16.msra.mxu1 %v4306_v41  ;;  %v4403_v40 = vld [vmem:[%s6117_s1 + $0x4ec] ss:$16 sps:$4 sm:$0xff]   ;;  %v4398_v41 = vld [vmem:[%s6117_s1 + $0x4e0] ss:$16 sps:$4 sm:$0xff]  }
  0x68   : > { %2786 = vmatprep.subr.bf16.mxu0 %v4311_v42  ;;  %3143 = vmatprep.subr.bf16.mxu1 %v4314_v43  ;;  %v4401_v42 = vld [vmem:[%s6117_s1 + $0x4e8] ss:$16 sps:$4 sm:$0xff]   ;;  %v4406_v43 = vld [vmem:[%s6117_s1 + $0x504] ss:$16 sps:$4 sm:$0xff]  }
  0x6b   : > { %2787 = vmatpush1.bf16.msra.mxu0 %v4309_v44  ;;  %3144 = vmatpush1.bf16.msra.mxu1 %v4312_v45  ;;  %v4409_v44 = vld [vmem:[%s6117_s1 + $0x50c] ss:$16 sps:$4 sm:$0xff]   ;;  %v4404_v45 = vld [vmem:[%s6117_s1 + $0x500] ss:$16 sps:$4 sm:$0xff]  }
  0x6c   : > { %2788 = vmatprep.subr.bf16.mxu0 %v4317_v46  ;;  %3145 = vmatprep.subr.bf16.mxu1 %v4320_v47  ;;  %v4407_v46 = vld [vmem:[%s6117_s1 + $0x508] ss:$16 sps:$4 sm:$0xff]   ;;  %v4412_v47 = vld [vmem:[%s6117_s1 + $0x524] ss:$16 sps:$4 sm:$0xff]  }
  0x6f   : > { %2789 = vmatpush1.bf16.msra.mxu0 %v4315_v48  ;;  %3146 = vmatpush1.bf16.msra.mxu1 %v4318_v49  ;;  %v4415_v48 = vld [vmem:[%s6117_s1 + $0x52c] ss:$16 sps:$4 sm:$0xff]   ;;  %v4410_v49 = vld [vmem:[%s6117_s1 + $0x520] ss:$16 sps:$4 sm:$0xff]  }
  0x70   : > { %2790 = vmatprep.subr.bf16.mxu0 %v4323_v50  ;;  %3147 = vmatprep.subr.bf16.mxu1 %v4326_v51  ;;  %v4413_v50 = vld [vmem:[%s6117_s1 + $0x528] ss:$16 sps:$4 sm:$0xff]   ;;  %v4418_v51 = vld [vmem:[%s6117_s1 + $0x544] ss:$16 sps:$4 sm:$0xff]  }
  0x73   : > { %2791 = vmatpush1.bf16.msra.mxu0 %v4321_v52  ;;  %3148 = vmatpush1.bf16.msra.mxu1 %v4324_v53  ;;  %v4421_v52 = vld [vmem:[%s6117_s1 + $0x54c] ss:$16 sps:$4 sm:$0xff]   ;;  %v4416_v53 = vld [vmem:[%s6117_s1 + $0x540] ss:$16 sps:$4 sm:$0xff]  }
  0x74   : > { %2792 = vmatprep.subr.bf16.mxu0 %v4329_v54  ;;  %3149 = vmatprep.subr.bf16.mxu1 %v4332_v55  ;;  %v4419_v54 = vld [vmem:[%s6117_s1 + $0x548] ss:$16 sps:$4 sm:$0xff]   ;;  %v4424_v55 = vld [vmem:[%s6117_s1 + $0x564] ss:$16 sps:$4 sm:$0xff]  }
  0x77   : > { %2793 = vmatpush1.bf16.msra.mxu0 %v4327_v56  ;;  %3150 = vmatpush1.bf16.msra.mxu1 %v4330_v57  ;;  %v4427_v56 = vld [vmem:[%s6117_s1 + $0x56c] ss:$16 sps:$4 sm:$0xff]   ;;  %v4422_v57 = vld [vmem:[%s6117_s1 + $0x560] ss:$16 sps:$4 sm:$0xff]  }
  0x78   : > { %2794 = vmatprep.subr.bf16.mxu0 %v4335_v58  ;;  %3151 = vmatprep.subr.bf16.mxu1 %v4338_v59  ;;  %v4425_v58 = vld [vmem:[%s6117_s1 + $0x568] ss:$16 sps:$4 sm:$0xff]   ;;  %v4430_v59 = vld [vmem:[%s6117_s1 + $0x584] ss:$16 sps:$4 sm:$0xff]  }
  0x7b   : > { %2795 = vmatpush1.bf16.msra.mxu0 %v4333_v60  ;;  %3152 = vmatpush1.bf16.msra.mxu1 %v4336_v61  ;;  %v4433_v60 = vld [vmem:[%s6117_s1 + $0x58c] ss:$16 sps:$4 sm:$0xff]   ;;  %v4428_v61 = vld [vmem:[%s6117_s1 + $0x580] ss:$16 sps:$4 sm:$0xff]  }
  0x7c   : > { %2796 = vmatprep.subr.bf16.mxu0 %v4342_v62  ;;  %3153 = vmatprep.subr.bf16.mxu1 %v4345_v63  ;;  %v4431_v62 = vld [vmem:[%s6117_s1 + $0x588] ss:$16 sps:$4 sm:$0xff]   ;;  %v4436_v63 = vld [vmem:[%s6117_s1 + $0x5a4] ss:$16 sps:$4 sm:$0xff]  }
  0x7f   : > { %2797 = vmatpush1.bf16.msra.mxu0 %v4340_v0  ;;  %3154 = vmatpush1.bf16.msra.mxu1 %v4343_v1  ;;  %v4439_v0 = vld [vmem:[%s6117_s1 + $0x5ac] ss:$16 sps:$4 sm:$0xff]   ;;  %v4434_v1 = vld [vmem:[%s6117_s1 + $0x5a0] ss:$16 sps:$4 sm:$0xff]  }
  0x80   : > { %2798 = vmatprep.subr.bf16.mxu0 %v4349_v2  ;;  %3155 = vmatprep.subr.bf16.mxu1 %v4352_v3  ;;  %v4437_v2 = vld [vmem:[%s6117_s1 + $0x5a8] ss:$16 sps:$4 sm:$0xff]   ;;  %v4443_v3 = vld [vmem:[%s6117_s1 + $0x5c4] ss:$16 sps:$4 sm:$0xff]  }
  0x83   : > { %2799 = vmatpush1.bf16.msra.mxu0 %v4347_v4  ;;  %3156 = vmatpush1.bf16.msra.mxu1 %v4350_v5  ;;  %v4446_v4 = vld [vmem:[%s6117_s1 + $0x5cc] ss:$16 sps:$4 sm:$0xff]   ;;  %v4441_v5 = vld [vmem:[%s6117_s1 + $0x5c0] ss:$16 sps:$4 sm:$0xff]  }
  0x84   : > { %2819 = vmatprep.subr.bf16.mxu0 %v4358_v6  ;;  %3176 = vmatprep.subr.bf16.mxu1 %v4361_v7  ;;  %v4444_v6 = vld [vmem:[%s6117_s1 + $0x5c8] ss:$16 sps:$4 sm:$0xff]   ;;  %v4450_v7 = vld [vmem:[%s6117_s1 + $0x5e4] ss:$16 sps:$4 sm:$0xff]  }
  0x86   : > { %2801 = vmatmul.mubr.bf16.vlgmr.msra.gmra.mrb[0].mxu0 %v4353_v8  ;;  %3158 = vmatmul.mubr.bf16.vlgmr.msra.gmra.mrb[0].mxu1 %v4353_v8  ;;  %v4453_v8 = vld [vmem:[%s6117_s1 + $0x5ec] ss:$16 sps:$4 sm:$0xff]  }
  0x87   : > { %2820 = vmatpush1.bf16.msra.mxu0 %v4356_v10  ;;  %3177 = vmatpush1.bf16.msra.mxu1 %v4359_v11  ;;  %v4451_v10 = vld [vmem:[%s6117_s1 + $0x5e8] ss:$16 sps:$4 sm:$0xff]   ;;  %v4459_v11 = vld [vmem:[%s6117_s1 + $0x604] ss:$16 sps:$4 sm:$0xff]  }
  0x88   : > { %2821 = vmatprep.subr.bf16.mxu0 %v4364_v12  ;;  %3178 = vmatprep.subr.bf16.mxu1 %v4367_v13  ;;  %v4462_v12 = vld [vmem:[%s6117_s1 + $0x60c] ss:$16 sps:$4 sm:$0xff]   ;;  %v4454_v13 = vld [vmem:[%s4967_s6 + $0x10] ss:$52 sps:$4 sm:$0xff]  }
  0x89   : > { %2810 = vmatprep.mubr.bf16.mxu0 %v3596_v14  ;;  %3167 = vmatprep.mubr.bf16.mxu1 %v3596_v14  ;;  %v4457_v14 = vld [vmem:[%s6117_s1 + $0x600] ss:$16 sps:$4 sm:$0xff]  }
  0x8b   : > { %2822 = vmatpush1.bf16.msra.mxu0 %v4362_v15  ;;  %3179 = vmatpush1.bf16.msra.mxu1 %v4365_v16  ;;  %v173_v15 = vld [vmem:[%s4967_s6 + $0x78] sm:$0x11] }
  0x8c   : > { %2823 = vmatprep.subr.bf16.mxu0 %v4370_v17  ;;  %3180 = vmatprep.subr.bf16.mxu1 %v4373_v18  ;;  %v4460_v16 = vld [vmem:[%s6117_s1 + $0x608] ss:$16 sps:$4 sm:$0xff]   ;;  %v4465_v17 = vld [vmem:[%s6117_s1 + $0x624] ss:$16 sps:$4 sm:$0xff]   ;;  %v4468_v18 = vld [vmem:[%s6117_s1 + $0x62c] ss:$16 sps:$4 sm:$0xff]  }
  0x8e   : > { %2811 = vmatmul.mubr.bf16.gmra.mrb[4].mxu0 %v3595_v19  ;;  %3168 = vmatmul.mubr.bf16.gmra.mrb[4].mxu1 %v3595_v19  ;;  %v3598_v19 = vcombine.high %v173_v15, %v173_v15 }
  0x8f   : > { %2824 = vmatpush1.bf16.msra.mxu0 %v4368_v20  ;;  %3181 = vmatpush1.bf16.msra.mxu1 %v4371_v21  ;;  %v4463_v20 = vld [vmem:[%s6117_s1 + $0x620] ss:$16 sps:$4 sm:$0xff]   ;;  %v4466_v21 = vld [vmem:[%s6117_s1 + $0x628] ss:$16 sps:$4 sm:$0xff]  }
  0x90   : > { %2825 = vmatprep.subr.bf16.mxu0 %v4376_v22  ;;  %3182 = vmatprep.subr.bf16.mxu1 %v4379_v23  ;;  %v4471_v22 = vld [vmem:[%s6117_s1 + $0x644] ss:$16 sps:$4 sm:$0xff]   ;;  %v4474_v23 = vld [vmem:[%s6117_s1 + $0x64c] ss:$16 sps:$4 sm:$0xff]  }
  0x91   : > { %2851 = vmatprep.mubr.bf16.mxu0 %v4456_v24  ;;  %3208 = vmatprep.mubr.bf16.mxu1 %v4456_v24  ;;  %v4469_v24 = vld [vmem:[%s6117_s1 + $0x640] ss:$16 sps:$4 sm:$0xff]  }
  0x93   : > { %2826 = vmatpush1.bf16.msra.mxu0 %v4374_v25  ;;  %3183 = vmatpush1.bf16.msra.mxu1 %v4377_v26  ;;  %v3597_v25 = vcombine.low %v173_v15, %v173_v15  ;;  %v4472_v26 = vld [vmem:[%s6117_s1 + $0x648] ss:$16 sps:$4 sm:$0xff]  }
  0x94   : > { %2827 = vmatprep.subr.bf16.mxu0 %v4382_v27  ;;  %3184 = vmatprep.subr.bf16.mxu1 %v4385_v28  ;;  %v4477_v27 = vld [vmem:[%s6117_s1 + $0x664] ss:$16 sps:$4 sm:$0xff]   ;;  %v4480_v28 = vld [vmem:[%s6117_s1 + $0x66c] ss:$16 sps:$4 sm:$0xff]   ;;  %v4552_v15 = vld [vmem:[%s6117_s1 + $0x7e8] ss:$16 sps:$4 sm:$0xff]  }
  0x97   : > { %2828 = vmatpush1.bf16.msra.mxu0 %v4380_v29  ;;  %3185 = vmatpush1.bf16.msra.mxu1 %v4383_v30  ;;  %v4557_v29 = vld [vmem:[%s4967_s6 + $0x1c] ss:$52 sps:$4 sm:$0xff]  }
  0x98   : > { %2829 = vmatprep.subr.bf16.mxu0 %v4388_v31  ;;  %3186 = vmatprep.subr.bf16.mxu1 %v4391_v32  ;;  %v4475_v30 = vld [vmem:[%s6117_s1 + $0x660] ss:$16 sps:$4 sm:$0xff]   ;;  %v4478_v31 = vld [vmem:[%s6117_s1 + $0x668] ss:$16 sps:$4 sm:$0xff]   ;;  %v4483_v32 = vld [vmem:[%s6117_s1 + $0x684] ss:$16 sps:$4 sm:$0xff]  }
  0x9b   : > { %2830 = vmatpush1.bf16.msra.mxu0 %v4386_v33  ;;  %3187 = vmatpush1.bf16.msra.mxu1 %v4389_v34  ;;  %v4486_v33 = vld [vmem:[%s6117_s1 + $0x68c] ss:$16 sps:$4 sm:$0xff]   ;;  %v4481_v34 = vld [vmem:[%s6117_s1 + $0x680] ss:$16 sps:$4 sm:$0xff]  }
  0x9c   : > { %2831 = vmatprep.subr.bf16.mxu0 %v4394_v35  ;;  %3188 = vmatprep.subr.bf16.mxu1 %v4397_v36  ;;  %v4484_v35 = vld [vmem:[%s6117_s1 + $0x688] ss:$16 sps:$4 sm:$0xff]   ;;  %v4489_v36 = vld [vmem:[%s6117_s1 + $0x6a4] ss:$16 sps:$4 sm:$0xff]  }
  0x9f   : > { %2832 = vmatpush1.bf16.msra.mxu0 %v4392_v37  ;;  %3189 = vmatpush1.bf16.msra.mxu1 %v4395_v38  ;;  %v4492_v37 = vld [vmem:[%s6117_s1 + $0x6ac] ss:$16 sps:$4 sm:$0xff]   ;;  %v4487_v38 = vld [vmem:[%s6117_s1 + $0x6a0] ss:$16 sps:$4 sm:$0xff]  }
  0xa0   : > { %2833 = vmatprep.subr.bf16.mxu0 %v4400_v39  ;;  %3190 = vmatprep.subr.bf16.mxu1 %v4403_v40  ;;  %v4490_v39 = vld [vmem:[%s6117_s1 + $0x6a8] ss:$16 sps:$4 sm:$0xff]   ;;  %v4495_v40 = vld [vmem:[%s6117_s1 + $0x6c4] ss:$16 sps:$4 sm:$0xff]  }
  0xa3   : > { %2834 = vmatpush1.bf16.msra.mxu0 %v4398_v41  ;;  %3191 = vmatpush1.bf16.msra.mxu1 %v4401_v42  ;;  %v4498_v41 = vld [vmem:[%s6117_s1 + $0x6cc] ss:$16 sps:$4 sm:$0xff]   ;;  %v4493_v42 = vld [vmem:[%s6117_s1 + $0x6c0] ss:$16 sps:$4 sm:$0xff]  }
  0xa4   : > { %2835 = vmatprep.subr.bf16.mxu0 %v4406_v43  ;;  %3192 = vmatprep.subr.bf16.mxu1 %v4409_v44  ;;  %v4496_v43 = vld [vmem:[%s6117_s1 + $0x6c8] ss:$16 sps:$4 sm:$0xff]   ;;  %v4501_v44 = vld [vmem:[%s6117_s1 + $0x6e4] ss:$16 sps:$4 sm:$0xff]  }
  0xa7   : > { %2836 = vmatpush1.bf16.msra.mxu0 %v4404_v45  ;;  %3193 = vmatpush1.bf16.msra.mxu1 %v4407_v46  ;;  %v4504_v45 = vld [vmem:[%s6117_s1 + $0x6ec] ss:$16 sps:$4 sm:$0xff]   ;;  %v4499_v46 = vld [vmem:[%s6117_s1 + $0x6e0] ss:$16 sps:$4 sm:$0xff]  }
  0xa8   : > { %2837 = vmatprep.subr.bf16.mxu0 %v4412_v47  ;;  %3194 = vmatprep.subr.bf16.mxu1 %v4415_v48  ;;  %v4502_v47 = vld [vmem:[%s6117_s1 + $0x6e8] ss:$16 sps:$4 sm:$0xff]   ;;  %v4507_v48 = vld [vmem:[%s6117_s1 + $0x704] ss:$16 sps:$4 sm:$0xff]  }
  0xab   : > { %2838 = vmatpush1.bf16.msra.mxu0 %v4410_v49  ;;  %3195 = vmatpush1.bf16.msra.mxu1 %v4413_v50  ;;  %v4510_v49 = vld [vmem:[%s6117_s1 + $0x70c] ss:$16 sps:$4 sm:$0xff]   ;;  %v4505_v50 = vld [vmem:[%s6117_s1 + $0x700] ss:$16 sps:$4 sm:$0xff]  }
  0xac   : > { %2839 = vmatprep.subr.bf16.mxu0 %v4418_v51  ;;  %3196 = vmatprep.subr.bf16.mxu1 %v4421_v52  ;;  %v4508_v51 = vld [vmem:[%s6117_s1 + $0x708] ss:$16 sps:$4 sm:$0xff]   ;;  %v4513_v52 = vld [vmem:[%s6117_s1 + $0x724] ss:$16 sps:$4 sm:$0xff]  }
  0xaf   : > { %2840 = vmatpush1.bf16.msra.mxu0 %v4416_v53  ;;  %3197 = vmatpush1.bf16.msra.mxu1 %v4419_v54  ;;  %v4516_v53 = vld [vmem:[%s6117_s1 + $0x72c] ss:$16 sps:$4 sm:$0xff]   ;;  %v4511_v54 = vld [vmem:[%s6117_s1 + $0x720] ss:$16 sps:$4 sm:$0xff]  }
  0xb0   : > { %2841 = vmatprep.subr.bf16.mxu0 %v4424_v55  ;;  %3198 = vmatprep.subr.bf16.mxu1 %v4427_v56  ;;  %v4514_v55 = vld [vmem:[%s6117_s1 + $0x728] ss:$16 sps:$4 sm:$0xff]   ;;  %v4519_v56 = vld [vmem:[%s6117_s1 + $0x744] ss:$16 sps:$4 sm:$0xff]  }
  0xb3   : > { %2842 = vmatpush1.bf16.msra.mxu0 %v4422_v57  ;;  %3199 = vmatpush1.bf16.msra.mxu1 %v4425_v58  ;;  %v4522_v57 = vld [vmem:[%s6117_s1 + $0x74c] ss:$16 sps:$4 sm:$0xff]   ;;  %v4517_v58 = vld [vmem:[%s6117_s1 + $0x740] ss:$16 sps:$4 sm:$0xff]  }
  0xb4   : > { %2843 = vmatprep.subr.bf16.mxu0 %v4430_v59  ;;  %3200 = vmatprep.subr.bf16.mxu1 %v4433_v60  ;;  %v4520_v59 = vld [vmem:[%s6117_s1 + $0x748] ss:$16 sps:$4 sm:$0xff]   ;;  %v4525_v60 = vld [vmem:[%s6117_s1 + $0x764] ss:$16 sps:$4 sm:$0xff]  }
  0xb7   : > { %2844 = vmatpush1.bf16.msra.mxu0 %v4428_v61  ;;  %3201 = vmatpush1.bf16.msra.mxu1 %v4431_v62  ;;  %v4528_v61 = vld [vmem:[%s6117_s1 + $0x76c] ss:$16 sps:$4 sm:$0xff]   ;;  %v4523_v62 = vld [vmem:[%s6117_s1 + $0x760] ss:$16 sps:$4 sm:$0xff]  }
  0xb8   : > { %2845 = vmatprep.subr.bf16.mxu0 %v4436_v63  ;;  %3202 = vmatprep.subr.bf16.mxu1 %v4439_v0  ;;  %v4526_v63 = vld [vmem:[%s6117_s1 + $0x768] ss:$16 sps:$4 sm:$0xff]   ;;  %v4531_v0 = vld [vmem:[%s6117_s1 + $0x784] ss:$16 sps:$4 sm:$0xff]  }
  0xbb   : > { %2846 = vmatpush1.bf16.msra.mxu0 %v4434_v1  ;;  %3203 = vmatpush1.bf16.msra.mxu1 %v4437_v2  ;;  %v4534_v1 = vld [vmem:[%s6117_s1 + $0x78c] ss:$16 sps:$4 sm:$0xff]   ;;  %v4529_v2 = vld [vmem:[%s6117_s1 + $0x780] ss:$16 sps:$4 sm:$0xff]  }
  0xbc   : > { %2847 = vmatprep.subr.bf16.mxu0 %v4443_v3  ;;  %3204 = vmatprep.subr.bf16.mxu1 %v4446_v4  ;;  %v4532_v3 = vld [vmem:[%s6117_s1 + $0x788] ss:$16 sps:$4 sm:$0xff]   ;;  %v4537_v4 = vld [vmem:[%s6117_s1 + $0x7a4] ss:$16 sps:$4 sm:$0xff]  }
  0xbf   : > { %2848 = vmatpush1.bf16.msra.mxu0 %v4441_v5  ;;  %3205 = vmatpush1.bf16.msra.mxu1 %v4444_v6  ;;  %v4540_v5 = vld [vmem:[%s6117_s1 + $0x7ac] ss:$16 sps:$4 sm:$0xff]   ;;  %v4535_v6 = vld [vmem:[%s6117_s1 + $0x7a0] ss:$16 sps:$4 sm:$0xff]  }
  0xc0   : > { %2849 = vmatprep.subr.bf16.mxu0 %v4450_v7  ;;  %3206 = vmatprep.subr.bf16.mxu1 %v4453_v8  ;;  %v4538_v7 = vld [vmem:[%s6117_s1 + $0x7a8] ss:$16 sps:$4 sm:$0xff]   ;;  %v4544_v8 = vld [vmem:[%s6117_s1 + $0x7c4] ss:$16 sps:$4 sm:$0xff]  }
  0xc3   : > { %2850 = vmatpush1.bf16.msra.mxu0 %v4448_v9  ;;  %3207 = vmatpush1.bf16.msra.mxu1 %v4451_v10  ;;  %v4547_v9 = vld [vmem:[%s6117_s1 + $0x7cc] ss:$16 sps:$4 sm:$0xff]   ;;  %v4542_v10 = vld [vmem:[%s6117_s1 + $0x7c0] ss:$16 sps:$4 sm:$0xff]  }
  0xc4   : > { %2870 = vmatprep.subr.bf16.mxu0 %v4459_v11  ;;  %3227 = vmatprep.subr.bf16.mxu1 %v4462_v12  ;;  %v4545_v11 = vld [vmem:[%s6117_s1 + $0x7c8] ss:$16 sps:$4 sm:$0xff]   ;;  %v4551_v12 = vld [vmem:[%s6117_s1 + $0x7e4] ss:$16 sps:$4 sm:$0xff]  }
  0xc6   : > { %2852 = vmatmul.mubr.bf16.vlgmr.msra.gmra.mrb[0].mxu0 %v4454_v13  ;;  %3209 = vmatmul.mubr.bf16.vlgmr.msra.gmra.mrb[0].mxu1 %v4454_v13  ;;  %v4554_v13 = vld [vmem:[%s6117_s1 + $0x7ec] ss:$16 sps:$4 sm:$0xff]  }
  0xc7   : > { %2871 = vmatpush1.bf16.msra.mxu0 %v4457_v14  ;;  %3228 = vmatpush1.bf16.msra.mxu1 %v4460_v16  ;;  %v4549_v14 = vld [vmem:[%s6117_s1 + $0x7e0] ss:$16 sps:$4 sm:$0xff]   ;;  %v4560_v16 = vld [vmem:[%s6117_s1 + $0x804] ss:$16 sps:$4 sm:$0xff]  }
  0xc8   : > { %2872 = vmatprep.subr.bf16.mxu0 %v4465_v17  ;;  %3229 = vmatprep.subr.bf16.mxu1 %v4468_v18  ;;  %v4563_v17 = vld [vmem:[%s6117_s1 + $0x80c] ss:$16 sps:$4 sm:$0xff]  }
  0xc9   : > { %2861 = vmatprep.mubr.bf16.mxu0 %v3598_v19  ;;  %3218 = vmatprep.mubr.bf16.mxu1 %v3598_v19  ;;  %v4555_v18 = vld [vmem:[%s4967_s6 + $0x18] ss:$52 sps:$4 sm:$0xff]   ;;  %v4558_v19 = vld [vmem:[%s6117_s1 + $0x800] ss:$16 sps:$4 sm:$0xff]  }
  0xcb   : > { %2873 = vmatpush1.bf16.msra.mxu0 %v4463_v20  ;;  %3230 = vmatpush1.bf16.msra.mxu1 %v4466_v21  ;;  %v4561_v20 = vld [vmem:[%s6117_s1 + $0x808] ss:$16 sps:$4 sm:$0xff]   ;;  %v174_v21 = vld [vmem:[%s4967_s6 + $0x80] sm:$0x11] }
  0xcc   : > { %2874 = vmatprep.subr.bf16.mxu0 %v4471_v22  ;;  %3231 = vmatprep.subr.bf16.mxu1 %v4474_v23  ;;  %v4566_v22 = vld [vmem:[%s6117_s1 + $0x824] ss:$16 sps:$4 sm:$0xff]   ;;  %v4569_v23 = vld [vmem:[%s6117_s1 + $0x82c] ss:$16 sps:$4 sm:$0xff]  }
  0xce   : > { %2862 = vmatmul.mubr.bf16.gmra.mrb[4].mxu0 %v3597_v25  ;;  %3219 = vmatmul.mubr.bf16.gmra.mrb[4].mxu1 %v3597_v25  ;;  %v4564_v25 = vld [vmem:[%s6117_s1 + $0x820] ss:$16 sps:$4 sm:$0xff]  }
  0xcf   : > { %2875 = vmatpush1.bf16.msra.mxu0 %v4469_v24  ;;  %3232 = vmatpush1.bf16.msra.mxu1 %v4472_v26  ;;  %v3600_v24 = vcombine.high %v174_v21, %v174_v21  ;;  %v4567_v26 = vld [vmem:[%s6117_s1 + $0x828] ss:$16 sps:$4 sm:$0xff]  }
  0xd0   : > { %2876 = vmatprep.subr.bf16.mxu0 %v4477_v27  ;;  %3233 = vmatprep.subr.bf16.mxu1 %v4480_v28  ;;  %v4572_v27 = vld [vmem:[%s6117_s1 + $0x844] ss:$16 sps:$4 sm:$0xff]   ;;  %v4575_v28 = vld [vmem:[%s6117_s1 + $0x84c] ss:$16 sps:$4 sm:$0xff]  }
  0xd1   : > { %2902 = vmatprep.mubr.bf16.mxu0 %v4557_v29  ;;  %3259 = vmatprep.mubr.bf16.mxu1 %v4557_v29  ;;  %v4570_v29 = vld [vmem:[%s6117_s1 + $0x840] ss:$16 sps:$4 sm:$0xff]  }
  0xd3   : > { %2877 = vmatpush1.bf16.msra.mxu0 %v4475_v30  ;;  %3234 = vmatpush1.bf16.msra.mxu1 %v4478_v31  ;;  %v3599_v30 = vcombine.low %v174_v21, %v174_v21  ;;  %v4573_v31 = vld [vmem:[%s6117_s1 + $0x848] ss:$16 sps:$4 sm:$0xff]   ;;  %v4661_v21 = vld [vmem:[%s6117_s1 + $0xa04] ss:$16 sps:$4 sm:$0xff]  }
  0xd4   : > { %2878 = vmatprep.subr.bf16.mxu0 %v4483_v32  ;;  %3235 = vmatprep.subr.bf16.mxu1 %v4486_v33  ;;  %v4578_v32 = vld [vmem:[%s6117_s1 + $0x864] ss:$16 sps:$4 sm:$0xff]   ;;  %v4581_v33 = vld [vmem:[%s6117_s1 + $0x86c] ss:$16 sps:$4 sm:$0xff]  }
  0xd7   : > { %2879 = vmatpush1.bf16.msra.mxu0 %v4481_v34  ;;  %3236 = vmatpush1.bf16.msra.mxu1 %v4484_v35  ;;  %v4658_v34 = vld [vmem:[%s4967_s6 + $0x24] ss:$52 sps:$4 sm:$0xff]   ;;  %v4576_v35 = vld [vmem:[%s6117_s1 + $0x860] ss:$16 sps:$4 sm:$0xff]  }
  0xd8   : > { %2880 = vmatprep.subr.bf16.mxu0 %v4489_v36  ;;  %3237 = vmatprep.subr.bf16.mxu1 %v4492_v37  ;;  %v4579_v36 = vld [vmem:[%s6117_s1 + $0x868] ss:$16 sps:$4 sm:$0xff]   ;;  %v4584_v37 = vld [vmem:[%s6117_s1 + $0x884] ss:$16 sps:$4 sm:$0xff]  }
  0xdb   : > { %2881 = vmatpush1.bf16.msra.mxu0 %v4487_v38  ;;  %3238 = vmatpush1.bf16.msra.mxu1 %v4490_v39  ;;  %v4587_v38 = vld [vmem:[%s6117_s1 + $0x88c] ss:$16 sps:$4 sm:$0xff]   ;;  %v4582_v39 = vld [vmem:[%s6117_s1 + $0x880] ss:$16 sps:$4 sm:$0xff]  }
  0xdc   : > { %2882 = vmatprep.subr.bf16.mxu0 %v4495_v40  ;;  %3239 = vmatprep.subr.bf16.mxu1 %v4498_v41  ;;  %v4585_v40 = vld [vmem:[%s6117_s1 + $0x888] ss:$16 sps:$4 sm:$0xff]   ;;  %v4590_v41 = vld [vmem:[%s6117_s1 + $0x8a4] ss:$16 sps:$4 sm:$0xff]  }
  0xdf   : > { %2883 = vmatpush1.bf16.msra.mxu0 %v4493_v42  ;;  %3240 = vmatpush1.bf16.msra.mxu1 %v4496_v43  ;;  %v4593_v42 = vld [vmem:[%s6117_s1 + $0x8ac] ss:$16 sps:$4 sm:$0xff]   ;;  %v4588_v43 = vld [vmem:[%s6117_s1 + $0x8a0] ss:$16 sps:$4 sm:$0xff]  }
  0xe0   : > { %2884 = vmatprep.subr.bf16.mxu0 %v4501_v44  ;;  %3241 = vmatprep.subr.bf16.mxu1 %v4504_v45  ;;  %v4591_v44 = vld [vmem:[%s6117_s1 + $0x8a8] ss:$16 sps:$4 sm:$0xff]   ;;  %v4596_v45 = vld [vmem:[%s6117_s1 + $0x8c4] ss:$16 sps:$4 sm:$0xff]  }
  0xe3   : > { %2885 = vmatpush1.bf16.msra.mxu0 %v4499_v46  ;;  %3242 = vmatpush1.bf16.msra.mxu1 %v4502_v47  ;;  %v4599_v46 = vld [vmem:[%s6117_s1 + $0x8cc] ss:$16 sps:$4 sm:$0xff]   ;;  %v4594_v47 = vld [vmem:[%s6117_s1 + $0x8c0] ss:$16 sps:$4 sm:$0xff]  }
  0xe4   : > { %2886 = vmatprep.subr.bf16.mxu0 %v4507_v48  ;;  %3243 = vmatprep.subr.bf16.mxu1 %v4510_v49  ;;  %v4597_v48 = vld [vmem:[%s6117_s1 + $0x8c8] ss:$16 sps:$4 sm:$0xff]   ;;  %v4602_v49 = vld [vmem:[%s6117_s1 + $0x8e4] ss:$16 sps:$4 sm:$0xff]  }
  0xe7   : > { %2887 = vmatpush1.bf16.msra.mxu0 %v4505_v50  ;;  %3244 = vmatpush1.bf16.msra.mxu1 %v4508_v51  ;;  %v4605_v50 = vld [vmem:[%s6117_s1 + $0x8ec] ss:$16 sps:$4 sm:$0xff]   ;;  %v4600_v51 = vld [vmem:[%s6117_s1 + $0x8e0] ss:$16 sps:$4 sm:$0xff]  }
  0xe8   : > { %2888 = vmatprep.subr.bf16.mxu0 %v4513_v52  ;;  %3245 = vmatprep.subr.bf16.mxu1 %v4516_v53  ;;  %v4603_v52 = vld [vmem:[%s6117_s1 + $0x8e8] ss:$16 sps:$4 sm:$0xff]   ;;  %v4608_v53 = vld [vmem:[%s6117_s1 + $0x904] ss:$16 sps:$4 sm:$0xff]  }
  0xeb   : > { %2889 = vmatpush1.bf16.msra.mxu0 %v4511_v54  ;;  %3246 = vmatpush1.bf16.msra.mxu1 %v4514_v55  ;;  %v4611_v54 = vld [vmem:[%s6117_s1 + $0x90c] ss:$16 sps:$4 sm:$0xff]   ;;  %v4606_v55 = vld [vmem:[%s6117_s1 + $0x900] ss:$16 sps:$4 sm:$0xff]  }
  0xec   : > { %2890 = vmatprep.subr.bf16.mxu0 %v4519_v56  ;;  %3247 = vmatprep.subr.bf16.mxu1 %v4522_v57  ;;  %v4609_v56 = vld [vmem:[%s6117_s1 + $0x908] ss:$16 sps:$4 sm:$0xff]   ;;  %v4614_v57 = vld [vmem:[%s6117_s1 + $0x924] ss:$16 sps:$4 sm:$0xff]  }
  0xef   : > { %2891 = vmatpush1.bf16.msra.mxu0 %v4517_v58  ;;  %3248 = vmatpush1.bf16.msra.mxu1 %v4520_v59  ;;  %v4617_v58 = vld [vmem:[%s6117_s1 + $0x92c] ss:$16 sps:$4 sm:$0xff]   ;;  %v4612_v59 = vld [vmem:[%s6117_s1 + $0x920] ss:$16 sps:$4 sm:$0xff]  }
  0xf0   : > { %2892 = vmatprep.subr.bf16.mxu0 %v4525_v60  ;;  %3249 = vmatprep.subr.bf16.mxu1 %v4528_v61  ;;  %v4615_v60 = vld [vmem:[%s6117_s1 + $0x928] ss:$16 sps:$4 sm:$0xff]   ;;  %v4620_v61 = vld [vmem:[%s6117_s1 + $0x944] ss:$16 sps:$4 sm:$0xff]  }
  0xf3   : > { %2893 = vmatpush1.bf16.msra.mxu0 %v4523_v62  ;;  %3250 = vmatpush1.bf16.msra.mxu1 %v4526_v63  ;;  %v4623_v62 = vld [vmem:[%s6117_s1 + $0x94c] ss:$16 sps:$4 sm:$0xff]   ;;  %v4618_v63 = vld [vmem:[%s6117_s1 + $0x940] ss:$16 sps:$4 sm:$0xff]  }
  0xf4   : > { %2894 = vmatprep.subr.bf16.mxu0 %v4531_v0  ;;  %3251 = vmatprep.subr.bf16.mxu1 %v4534_v1  ;;  %v4621_v0 = vld [vmem:[%s6117_s1 + $0x948] ss:$16 sps:$4 sm:$0xff]   ;;  %v4626_v1 = vld [vmem:[%s6117_s1 + $0x964] ss:$16 sps:$4 sm:$0xff]  }
  0xf7   : > { %2895 = vmatpush1.bf16.msra.mxu0 %v4529_v2  ;;  %3252 = vmatpush1.bf16.msra.mxu1 %v4532_v3  ;;  %v4629_v2 = vld [vmem:[%s6117_s1 + $0x96c] ss:$16 sps:$4 sm:$0xff]   ;;  %v4624_v3 = vld [vmem:[%s6117_s1 + $0x960] ss:$16 sps:$4 sm:$0xff]  }
  0xf8   : > { %2896 = vmatprep.subr.bf16.mxu0 %v4537_v4  ;;  %3253 = vmatprep.subr.bf16.mxu1 %v4540_v5  ;;  %v4627_v4 = vld [vmem:[%s6117_s1 + $0x968] ss:$16 sps:$4 sm:$0xff]   ;;  %v4632_v5 = vld [vmem:[%s6117_s1 + $0x984] ss:$16 sps:$4 sm:$0xff]  }
  0xfb   : > { %2897 = vmatpush1.bf16.msra.mxu0 %v4535_v6  ;;  %3254 = vmatpush1.bf16.msra.mxu1 %v4538_v7  ;;  %v4635_v6 = vld [vmem:[%s6117_s1 + $0x98c] ss:$16 sps:$4 sm:$0xff]   ;;  %v4630_v7 = vld [vmem:[%s6117_s1 + $0x980] ss:$16 sps:$4 sm:$0xff]  }
  0xfc   : > { %2898 = vmatprep.subr.bf16.mxu0 %v4544_v8  ;;  %3255 = vmatprep.subr.bf16.mxu1 %v4547_v9  ;;  %v4633_v8 = vld [vmem:[%s6117_s1 + $0x988] ss:$16 sps:$4 sm:$0xff]   ;;  %v4638_v9 = vld [vmem:[%s6117_s1 + $0x9a4] ss:$16 sps:$4 sm:$0xff]  }
  0xff   : > { %2899 = vmatpush1.bf16.msra.mxu0 %v4542_v10  ;;  %3256 = vmatpush1.bf16.msra.mxu1 %v4545_v11  ;;  %v4641_v10 = vld [vmem:[%s6117_s1 + $0x9ac] ss:$16 sps:$4 sm:$0xff]   ;;  %v4636_v11 = vld [vmem:[%s6117_s1 + $0x9a0] ss:$16 sps:$4 sm:$0xff]  }
 0x100   : > { %2900 = vmatprep.subr.bf16.mxu0 %v4551_v12  ;;  %3257 = vmatprep.subr.bf16.mxu1 %v4554_v13  ;;  %v4639_v12 = vld [vmem:[%s6117_s1 + $0x9a8] ss:$16 sps:$4 sm:$0xff]   ;;  %v4645_v13 = vld [vmem:[%s6117_s1 + $0x9c4] ss:$16 sps:$4 sm:$0xff]  }
 0x103   : > { %2901 = vmatpush1.bf16.msra.mxu0 %v4549_v14  ;;  %3258 = vmatpush1.bf16.msra.mxu1 %v4552_v15  ;;  %v4648_v14 = vld [vmem:[%s6117_s1 + $0x9cc] ss:$16 sps:$4 sm:$0xff]   ;;  %v4643_v15 = vld [vmem:[%s6117_s1 + $0x9c0] ss:$16 sps:$4 sm:$0xff]  }
 0x104   : > { %2921 = vmatprep.subr.bf16.mxu0 %v4560_v16  ;;  %3278 = vmatprep.subr.bf16.mxu1 %v4563_v17  ;;  %v4646_v16 = vld [vmem:[%s6117_s1 + $0x9c8] ss:$16 sps:$4 sm:$0xff]   ;;  %v4652_v17 = vld [vmem:[%s6117_s1 + $0x9e4] ss:$16 sps:$4 sm:$0xff]  }
 0x106   : > { %2903 = vmatmul.mubr.bf16.vlgmr.msra.gmra.mrb[0].mxu0 %v4555_v18  ;;  %3260 = vmatmul.mubr.bf16.vlgmr.msra.gmra.mrb[0].mxu1 %v4555_v18  ;;  %v4655_v18 = vld [vmem:[%s6117_s1 + $0x9ec] ss:$16 sps:$4 sm:$0xff]  }
 0x107   : > { %2922 = vmatpush1.bf16.msra.mxu0 %v4558_v19  ;;  %3279 = vmatpush1.bf16.msra.mxu1 %v4561_v20  ;;  %v4650_v19 = vld [vmem:[%s6117_s1 + $0x9e0] ss:$16 sps:$4 sm:$0xff]   ;;  %v4653_v20 = vld [vmem:[%s6117_s1 + $0x9e8] ss:$16 sps:$4 sm:$0xff]  }
 0x108   : > { %2923 = vmatprep.subr.bf16.mxu0 %v4566_v22  ;;  %3280 = vmatprep.subr.bf16.mxu1 %v4569_v23  ;;  %v4664_v22 = vld [vmem:[%s6117_s1 + $0xa0c] ss:$16 sps:$4 sm:$0xff]   ;;  %v4656_v23 = vld [vmem:[%s4967_s6 + $0x20] ss:$52 sps:$4 sm:$0xff]  }
 0x109   : > { %2912 = vmatprep.mubr.bf16.mxu0 %v3600_v24  ;;  %3269 = vmatprep.mubr.bf16.mxu1 %v3600_v24  ;;  %v175_v24 = vld [vmem:[%s4967_s6 + $0x88] sm:$0x11] }
 0x10b   : > { %2924 = vmatpush1.bf16.msra.mxu0 %v4564_v25  ;;  %3281 = vmatpush1.bf16.msra.mxu1 %v4567_v26  ;;  %v4659_v25 = vld [vmem:[%s6117_s1 + $0xa00] ss:$16 sps:$4 sm:$0xff]   ;;  %v4662_v26 = vld [vmem:[%s6117_s1 + $0xa08] ss:$16 sps:$4 sm:$0xff]  }
 0x10c   : > { %2925 = vmatprep.subr.bf16.mxu0 %v4572_v27  ;;  %3282 = vmatprep.subr.bf16.mxu1 %v4575_v28  ;;  %v4667_v27 = vld [vmem:[%s6117_s1 + $0xa24] ss:$16 sps:$4 sm:$0xff]   ;;  %v4670_v28 = vld [vmem:[%s6117_s1 + $0xa2c] ss:$16 sps:$4 sm:$0xff]  }
 0x10e   : > { %2913 = vmatmul.mubr.bf16.gmra.mrb[4].mxu0 %v3599_v30  ;;  %3270 = vmatmul.mubr.bf16.gmra.mrb[4].mxu1 %v3599_v30  ;;  %v4665_v30 = vld [vmem:[%s6117_s1 + $0xa20] ss:$16 sps:$4 sm:$0xff]  }
 0x10f   : > { %2926 = vmatpush1.bf16.msra.mxu0 %v4570_v29  ;;  %3283 = vmatpush1.bf16.msra.mxu1 %v4573_v31  ;;  %v3602_v29 = vcombine.high %v175_v24, %v175_v24  ;;  %v4668_v31 = vld [vmem:[%s6117_s1 + $0xa28] ss:$16 sps:$4 sm:$0xff]  }
 0x110   : > { %2927 = vmatprep.subr.bf16.mxu0 %v4578_v32  ;;  %3284 = vmatprep.subr.bf16.mxu1 %v4581_v33  ;;  %v4673_v32 = vld [vmem:[%s6117_s1 + $0xa44] ss:$16 sps:$4 sm:$0xff]   ;;  %v4676_v33 = vld [vmem:[%s6117_s1 + $0xa4c] ss:$16 sps:$4 sm:$0xff]  }
 0x111   : > { %2953 = vmatprep.mubr.bf16.mxu0 %v4658_v34  ;;  %3310 = vmatprep.mubr.bf16.mxu1 %v4658_v34  ;;  %v3601_v34 = vcombine.low %v175_v24, %v175_v24  ;;  %v4751_v24 = vld [vmem:[%s6117_s1 + $0xbe0] ss:$16 sps:$4 sm:$0xff]  }
 0x113   : > { %2928 = vmatpush1.bf16.msra.mxu0 %v4576_v35  ;;  %3285 = vmatpush1.bf16.msra.mxu1 %v4579_v36  ;;  %v4671_v35 = vld [vmem:[%s6117_s1 + $0xa40] ss:$16 sps:$4 sm:$0xff]   ;;  %v4674_v36 = vld [vmem:[%s6117_s1 + $0xa48] ss:$16 sps:$4 sm:$0xff]  }
 0x114   : > { %2929 = vmatprep.subr.bf16.mxu0 %v4584_v37  ;;  %3286 = vmatprep.subr.bf16.mxu1 %v4587_v38  ;;  %v4679_v37 = vld [vmem:[%s6117_s1 + $0xa64] ss:$16 sps:$4 sm:$0xff]   ;;  %v4682_v38 = vld [vmem:[%s6117_s1 + $0xa6c] ss:$16 sps:$4 sm:$0xff]  }
 0x117   : > { %2930 = vmatpush1.bf16.msra.mxu0 %v4582_v39  ;;  %3287 = vmatpush1.bf16.msra.mxu1 %v4585_v40  ;;  %v4759_v39 = vld [vmem:[%s4967_s6 + $0x2c] ss:$52 sps:$4 sm:$0xff]  }
 0x118   : > { %2931 = vmatprep.subr.bf16.mxu0 %v4590_v41  ;;  %3288 = vmatprep.subr.bf16.mxu1 %v4593_v42  ;;  %v4677_v40 = vld [vmem:[%s6117_s1 + $0xa60] ss:$16 sps:$4 sm:$0xff]   ;;  %v4680_v41 = vld [vmem:[%s6117_s1 + $0xa68] ss:$16 sps:$4 sm:$0xff]   ;;  %v4685_v42 = vld [vmem:[%s6117_s1 + $0xa84] ss:$16 sps:$4 sm:$0xff]  }
 0x11b   : > { %2932 = vmatpush1.bf16.msra.mxu0 %v4588_v43  ;;  %3289 = vmatpush1.bf16.msra.mxu1 %v4591_v44  ;;  %v4688_v43 = vld [vmem:[%s6117_s1 + $0xa8c] ss:$16 sps:$4 sm:$0xff]   ;;  %v4683_v44 = vld [vmem:[%s6117_s1 + $0xa80] ss:$16 sps:$4 sm:$0xff]  }
 0x11c   : > { %2933 = vmatprep.subr.bf16.mxu0 %v4596_v45  ;;  %3290 = vmatprep.subr.bf16.mxu1 %v4599_v46  ;;  %v4686_v45 = vld [vmem:[%s6117_s1 + $0xa88] ss:$16 sps:$4 sm:$0xff]   ;;  %v4691_v46 = vld [vmem:[%s6117_s1 + $0xaa4] ss:$16 sps:$4 sm:$0xff]  }
 0x11f   : > { %2934 = vmatpush1.bf16.msra.mxu0 %v4594_v47  ;;  %3291 = vmatpush1.bf16.msra.mxu1 %v4597_v48  ;;  %v4694_v47 = vld [vmem:[%s6117_s1 + $0xaac] ss:$16 sps:$4 sm:$0xff]   ;;  %v4689_v48 = vld [vmem:[%s6117_s1 + $0xaa0] ss:$16 sps:$4 sm:$0xff]  }
 0x120   : > { %2935 = vmatprep.subr.bf16.mxu0 %v4602_v49  ;;  %3292 = vmatprep.subr.bf16.mxu1 %v4605_v50  ;;  %v4692_v49 = vld [vmem:[%s6117_s1 + $0xaa8] ss:$16 sps:$4 sm:$0xff]   ;;  %v4697_v50 = vld [vmem:[%s6117_s1 + $0xac4] ss:$16 sps:$4 sm:$0xff]  }
 0x123   : > { %2936 = vmatpush1.bf16.msra.mxu0 %v4600_v51  ;;  %3293 = vmatpush1.bf16.msra.mxu1 %v4603_v52  ;;  %v4700_v51 = vld [vmem:[%s6117_s1 + $0xacc] ss:$16 sps:$4 sm:$0xff]   ;;  %v4695_v52 = vld [vmem:[%s6117_s1 + $0xac0] ss:$16 sps:$4 sm:$0xff]  }
 0x124   : > { %2937 = vmatprep.subr.bf16.mxu0 %v4608_v53  ;;  %3294 = vmatprep.subr.bf16.mxu1 %v4611_v54  ;;  %v4698_v53 = vld [vmem:[%s6117_s1 + $0xac8] ss:$16 sps:$4 sm:$0xff]   ;;  %v4703_v54 = vld [vmem:[%s6117_s1 + $0xae4] ss:$16 sps:$4 sm:$0xff]  }
 0x127   : > { %2938 = vmatpush1.bf16.msra.mxu0 %v4606_v55  ;;  %3295 = vmatpush1.bf16.msra.mxu1 %v4609_v56  ;;  %v4706_v55 = vld [vmem:[%s6117_s1 + $0xaec] ss:$16 sps:$4 sm:$0xff]   ;;  %v4701_v56 = vld [vmem:[%s6117_s1 + $0xae0] ss:$16 sps:$4 sm:$0xff]  }
 0x128   : > { %2939 = vmatprep.subr.bf16.mxu0 %v4614_v57  ;;  %3296 = vmatprep.subr.bf16.mxu1 %v4617_v58  ;;  %v4704_v57 = vld [vmem:[%s6117_s1 + $0xae8] ss:$16 sps:$4 sm:$0xff]   ;;  %v4709_v58 = vld [vmem:[%s6117_s1 + $0xb04] ss:$16 sps:$4 sm:$0xff]  }
 0x12b   : > { %2940 = vmatpush1.bf16.msra.mxu0 %v4612_v59  ;;  %3297 = vmatpush1.bf16.msra.mxu1 %v4615_v60  ;;  %v4712_v59 = vld [vmem:[%s6117_s1 + $0xb0c] ss:$16 sps:$4 sm:$0xff]   ;;  %v4707_v60 = vld [vmem:[%s6117_s1 + $0xb00] ss:$16 sps:$4 sm:$0xff]  }
 0x12c   : > { %2941 = vmatprep.subr.bf16.mxu0 %v4620_v61  ;;  %3298 = vmatprep.subr.bf16.mxu1 %v4623_v62  ;;  %v4710_v61 = vld [vmem:[%s6117_s1 + $0xb08] ss:$16 sps:$4 sm:$0xff]   ;;  %v4715_v62 = vld [vmem:[%s6117_s1 + $0xb24] ss:$16 sps:$4 sm:$0xff]  }
 0x12f   : > { %2942 = vmatpush1.bf16.msra.mxu0 %v4618_v63  ;;  %3299 = vmatpush1.bf16.msra.mxu1 %v4621_v0  ;;  %v4718_v63 = vld [vmem:[%s6117_s1 + $0xb2c] ss:$16 sps:$4 sm:$0xff]   ;;  %v4713_v0 = vld [vmem:[%s6117_s1 + $0xb20] ss:$16 sps:$4 sm:$0xff]  }
 0x130   : > { %2943 = vmatprep.subr.bf16.mxu0 %v4626_v1  ;;  %3300 = vmatprep.subr.bf16.mxu1 %v4629_v2  ;;  %v4716_v1 = vld [vmem:[%s6117_s1 + $0xb28] ss:$16 sps:$4 sm:$0xff]   ;;  %v4721_v2 = vld [vmem:[%s6117_s1 + $0xb44] ss:$16 sps:$4 sm:$0xff]  }
 0x133   : > { %2944 = vmatpush1.bf16.msra.mxu0 %v4624_v3  ;;  %3301 = vmatpush1.bf16.msra.mxu1 %v4627_v4  ;;  %v4724_v3 = vld [vmem:[%s6117_s1 + $0xb4c] ss:$16 sps:$4 sm:$0xff]   ;;  %v4719_v4 = vld [vmem:[%s6117_s1 + $0xb40] ss:$16 sps:$4 sm:$0xff]  }
 0x134   : > { %2945 = vmatprep.subr.bf16.mxu0 %v4632_v5  ;;  %3302 = vmatprep.subr.bf16.mxu1 %v4635_v6  ;;  %v4722_v5 = vld [vmem:[%s6117_s1 + $0xb48] ss:$16 sps:$4 sm:$0xff]   ;;  %v4727_v6 = vld [vmem:[%s6117_s1 + $0xb64] ss:$16 sps:$4 sm:$0xff]  }
 0x137   : > { %2946 = vmatpush1.bf16.msra.mxu0 %v4630_v7  ;;  %3303 = vmatpush1.bf16.msra.mxu1 %v4633_v8  ;;  %v4730_v7 = vld [vmem:[%s6117_s1 + $0xb6c] ss:$16 sps:$4 sm:$0xff]   ;;  %v4725_v8 = vld [vmem:[%s6117_s1 + $0xb60] ss:$16 sps:$4 sm:$0xff]  }
 0x138   : > { %2947 = vmatprep.subr.bf16.mxu0 %v4638_v9  ;;  %3304 = vmatprep.subr.bf16.mxu1 %v4641_v10  ;;  %v4728_v9 = vld [vmem:[%s6117_s1 + $0xb68] ss:$16 sps:$4 sm:$0xff]   ;;  %v4733_v10 = vld [vmem:[%s6117_s1 + $0xb84] ss:$16 sps:$4 sm:$0xff]  }
 0x13b   : > { %2948 = vmatpush1.bf16.msra.mxu0 %v4636_v11  ;;  %3305 = vmatpush1.bf16.msra.mxu1 %v4639_v12  ;;  %v4736_v11 = vld [vmem:[%s6117_s1 + $0xb8c] ss:$16 sps:$4 sm:$0xff]   ;;  %v4731_v12 = vld [vmem:[%s6117_s1 + $0xb80] ss:$16 sps:$4 sm:$0xff]  }
 0x13c   : > { %2949 = vmatprep.subr.bf16.mxu0 %v4645_v13  ;;  %3306 = vmatprep.subr.bf16.mxu1 %v4648_v14  ;;  %v4734_v13 = vld [vmem:[%s6117_s1 + $0xb88] ss:$16 sps:$4 sm:$0xff]   ;;  %v4739_v14 = vld [vmem:[%s6117_s1 + $0xba4] ss:$16 sps:$4 sm:$0xff]  }
 0x13f   : > { %2950 = vmatpush1.bf16.msra.mxu0 %v4643_v15  ;;  %3307 = vmatpush1.bf16.msra.mxu1 %v4646_v16  ;;  %v4742_v15 = vld [vmem:[%s6117_s1 + $0xbac] ss:$16 sps:$4 sm:$0xff]   ;;  %v4737_v16 = vld [vmem:[%s6117_s1 + $0xba0] ss:$16 sps:$4 sm:$0xff]  }
 0x140   : > { %2951 = vmatprep.subr.bf16.mxu0 %v4652_v17  ;;  %3308 = vmatprep.subr.bf16.mxu1 %v4655_v18  ;;  %v4740_v17 = vld [vmem:[%s6117_s1 + $0xba8] ss:$16 sps:$4 sm:$0xff]   ;;  %v4747_v18 = vld [vmem:[%s6117_s1 + $0xbc4] ss:$16 sps:$4 sm:$0xff]  }
 0x143   : > { %2952 = vmatpush1.bf16.msra.mxu0 %v4650_v19  ;;  %3309 = vmatpush1.bf16.msra.mxu1 %v4653_v20  ;;  %v4750_v19 = vld [vmem:[%s6117_s1 + $0xbcc] ss:$16 sps:$4 sm:$0xff]   ;;  %v4745_v20 = vld [vmem:[%s6117_s1 + $0xbc0] ss:$16 sps:$4 sm:$0xff]  }
 0x144   : > { %2972 = vmatprep.subr.bf16.mxu0 %v4661_v21  ;;  %3329 = vmatprep.subr.bf16.mxu1 %v4664_v22  ;;  %v4748_v21 = vld [vmem:[%s6117_s1 + $0xbc8] ss:$16 sps:$4 sm:$0xff]   ;;  %v4753_v22 = vld [vmem:[%s6117_s1 + $0xbe4] ss:$16 sps:$4 sm:$0xff]  }
 0x146   : > { %2954 = vmatmul.mubr.bf16.vlgmr.msra.gmra.mrb[0].mxu0 %v4656_v23  ;;  %3311 = vmatmul.mubr.bf16.vlgmr.msra.gmra.mrb[0].mxu1 %v4656_v23  ;;  %v4756_v23 = vld [vmem:[%s6117_s1 + $0xbec] ss:$16 sps:$4 sm:$0xff]  }
 0x147   : > { %2973 = vmatpush1.bf16.msra.mxu0 %v4659_v25  ;;  %3330 = vmatpush1.bf16.msra.mxu1 %v4662_v26  ;;  %v4754_v25 = vld [vmem:[%s6117_s1 + $0xbe8] ss:$16 sps:$4 sm:$0xff]   ;;  %v4762_v26 = vld [vmem:[%s6117_s1 + $0xc04] ss:$16 sps:$4 sm:$0xff]  }
 0x148   : > { %2974 = vmatprep.subr.bf16.mxu0 %v4667_v27  ;;  %3331 = vmatprep.subr.bf16.mxu1 %v4670_v28  ;;  %v4765_v27 = vld [vmem:[%s6117_s1 + $0xc0c] ss:$16 sps:$4 sm:$0xff]  }
 0x149   : > { %2963 = vmatprep.mubr.bf16.mxu0 %v3602_v29  ;;  %3320 = vmatprep.mubr.bf16.mxu1 %v3602_v29  ;;  %v4757_v28 = vld [vmem:[%s4967_s6 + $0x28] ss:$52 sps:$4 sm:$0xff]   ;;  %v176_v29 = vld [vmem:[%s4967_s6 + $0x90] sm:$0x11] }
 0x14b   : > { %2975 = vmatpush1.bf16.msra.mxu0 %v4665_v30  ;;  %3332 = vmatpush1.bf16.msra.mxu1 %v4668_v31  ;;  %v4760_v30 = vld [vmem:[%s6117_s1 + $0xc00] ss:$16 sps:$4 sm:$0xff]   ;;  %v4763_v31 = vld [vmem:[%s6117_s1 + $0xc08] ss:$16 sps:$4 sm:$0xff]  }
 0x14c   : > { %2976 = vmatprep.subr.bf16.mxu0 %v4673_v32  ;;  %3333 = vmatprep.subr.bf16.mxu1 %v4676_v33  ;;  %v4768_v32 = vld [vmem:[%s6117_s1 + $0xc24] ss:$16 sps:$4 sm:$0xff]   ;;  %v4771_v33 = vld [vmem:[%s6117_s1 + $0xc2c] ss:$16 sps:$4 sm:$0xff]  }
 0x14e   : > { %2964 = vmatmul.mubr.bf16.gmra.mrb[4].mxu0 %v3601_v34  ;;  %3321 = vmatmul.mubr.bf16.gmra.mrb[4].mxu1 %v3601_v34  ;;  %v3604_v34 = vcombine.high %v176_v29, %v176_v29 }
 0x14f   : > { %2977 = vmatpush1.bf16.msra.mxu0 %v4671_v35  ;;  %3334 = vmatpush1.bf16.msra.mxu1 %v4674_v36  ;;  %v4766_v35 = vld [vmem:[%s6117_s1 + $0xc20] ss:$16 sps:$4 sm:$0xff]   ;;  %v4769_v36 = vld [vmem:[%s6117_s1 + $0xc28] ss:$16 sps:$4 sm:$0xff]  }
 0x150   : > { %2978 = vmatprep.subr.bf16.mxu0 %v4679_v37  ;;  %3335 = vmatprep.subr.bf16.mxu1 %v4682_v38  ;;  %v4776_v37 = vld [vmem:[%s6117_s1 + $0xc44] ss:$16 sps:$4 sm:$0xff]   ;;  %v4779_v38 = vld [vmem:[%s6117_s1 + $0xc4c] ss:$16 sps:$4 sm:$0xff]  }
 0x151   : > { %3004 = vmatprep.mubr.bf16.mxu0 %v4759_v39  ;;  %3361 = vmatprep.mubr.bf16.mxu1 %v4759_v39  ;;  %v3603_v39 = vcombine.low %v176_v29, %v176_v29 }
 0x153   : > { %2979 = vmatpush1.bf16.msra.mxu0 %v4677_v40  ;;  %3336 = vmatpush1.bf16.msra.mxu1 %v4680_v41  ;;  %v4774_v40 = vld [vmem:[%s6117_s1 + $0xc40] ss:$16 sps:$4 sm:$0xff]   ;;  %v4777_v41 = vld [vmem:[%s6117_s1 + $0xc48] ss:$16 sps:$4 sm:$0xff]  }
 0x154   : > { %2980 = vmatprep.subr.bf16.mxu0 %v4685_v42  ;;  %3337 = vmatprep.subr.bf16.mxu1 %v4688_v43  ;;  %v4782_v42 = vld [vmem:[%s6117_s1 + $0xc64] ss:$16 sps:$4 sm:$0xff]   ;;  %v4785_v43 = vld [vmem:[%s6117_s1 + $0xc6c] ss:$16 sps:$4 sm:$0xff]  }
 0x157   : > { %2981 = vmatpush1.bf16.msra.mxu0 %v4683_v44  ;;  %3338 = vmatpush1.bf16.msra.mxu1 %v4686_v45  ;;  %v4780_v44 = vld [vmem:[%s6117_s1 + $0xc60] ss:$16 sps:$4 sm:$0xff]   ;;  %v4783_v45 = vld [vmem:[%s6117_s1 + $0xc68] ss:$16 sps:$4 sm:$0xff]  }
 0x158   : > { %2982 = vmatprep.subr.bf16.mxu0 %v4691_v46  ;;  %3339 = vmatprep.subr.bf16.mxu1 %v4694_v47  ;;  %v4796_v46 = vmov 0   ;;  %v4786_v47 = vld [vmem:[%s4967_s6 + $0x30] ss:$52 sps:$4 sm:$0xff]  }
 0x15b   : > { %2983 = vmatpush1.bf16.msra.mxu0 %v4689_v48  ;;  %3340 = vmatpush1.bf16.msra.mxu1 %v4692_v49  ;;  %v4787_v48 = vld [vmem:[%s4967_s6 + $0x98] ss:$0 sps:$4 sm:$0x11]   ;;  %v580_v49 = vlaneseq }
 0x15c   : > { %2984 = vmatprep.subr.bf16.mxu0 %v4697_v50  ;;  %3341 = vmatprep.subr.bf16.mxu1 %v4700_v51 }
 0x15d   : > { %v581_v50 = vshrl.u32 %v580_v49, 7 }
 0x15f   : > { %2985 = vmatpush1.bf16.msra.mxu0 %v4695_v52  ;;  %3342 = vmatpush1.bf16.msra.mxu1 %v4698_v53  ;;  %v582_v51 = vsub.s32 0, %v581_v50  ;;  %v590_v52 = vsub.s32 2, %v581_v50  ;;  %v578_v53 = vld [vmem:[%s6118_s2] sm:$0xf] }
 0x160   : > { %2986 = vmatprep.subr.bf16.mxu0 %v4703_v54  ;;  %3343 = vmatprep.subr.bf16.mxu1 %v4706_v55  ;;  %v586_v54 = vsub.s32 1, %v581_v50  ;;  %v594_v55 = vsub.s32 3, %v581_v50 }
 0x163   : > { %2987 = vmatpush1.bf16.msra.mxu0 %v4701_v56  ;;  %3344 = vmatpush1.bf16.msra.mxu1 %v4704_v57  ;;  %v583_v56 = vrot.slane %v578_v53, %v582_v51  ;;  %v591_v57 = vrot.slane %v578_v53, %v590_v52 }
 0x164   : > { %2988 = vmatprep.subr.bf16.mxu0 %v4709_v58  ;;  %3345 = vmatprep.subr.bf16.mxu1 %v4712_v59  ;;  %v587_v58 = vrot.slane %v578_v53, %v586_v54  ;;  %v595_v59 = vrot.slane %v578_v53, %v594_v55 }
 0x167   : > { %2989 = vmatpush1.bf16.msra.mxu0 %v4707_v60  ;;  %3346 = vmatpush1.bf16.msra.mxu1 %v4710_v61 }
 0x168   : > { %2990 = vmatprep.subr.bf16.mxu0 %v4715_v62  ;;  %3347 = vmatprep.subr.bf16.mxu1 %v4718_v63 }
 0x16b   : > { %2991 = vmatpush1.bf16.msra.mxu0 %v4713_v0  ;;  %3348 = vmatpush1.bf16.msra.mxu1 %v4716_v1 }
 0x16c   : > { %2992 = vmatprep.subr.bf16.mxu0 %v4721_v2  ;;  %3349 = vmatprep.subr.bf16.mxu1 %v4724_v3 }
 0x16f   : > { %2993 = vmatpush1.bf16.msra.mxu0 %v4719_v4  ;;  %3350 = vmatpush1.bf16.msra.mxu1 %v4722_v5 }
 0x170   : > { %2994 = vmatprep.subr.bf16.mxu0 %v4727_v6  ;;  %3351 = vmatprep.subr.bf16.mxu1 %v4730_v7 }
 0x173   : > { %2995 = vmatpush1.bf16.msra.mxu0 %v4725_v8  ;;  %3352 = vmatpush1.bf16.msra.mxu1 %v4728_v9 }
 0x174   : > { %2996 = vmatprep.subr.bf16.mxu0 %v4733_v10  ;;  %3353 = vmatprep.subr.bf16.mxu1 %v4736_v11 }
 0x177   : > { %2997 = vmatpush1.bf16.msra.mxu0 %v4731_v12  ;;  %3354 = vmatpush1.bf16.msra.mxu1 %v4734_v13 }
 0x178   : > { %2998 = vmatprep.subr.bf16.mxu0 %v4739_v14  ;;  %3355 = vmatprep.subr.bf16.mxu1 %v4742_v15 }
 0x17b   : > { %2999 = vmatpush1.bf16.msra.mxu0 %v4737_v16  ;;  %3356 = vmatpush1.bf16.msra.mxu1 %v4740_v17 }
 0x17c   : > { %3000 = vmatprep.subr.bf16.mxu0 %v4747_v18  ;;  %3357 = vmatprep.subr.bf16.mxu1 %v4750_v19 }
 0x17f   : > { %3001 = vmatpush1.bf16.msra.mxu0 %v4745_v20  ;;  %3358 = vmatpush1.bf16.msra.mxu1 %v4748_v21 }
 0x180   : > { %3002 = vmatprep.subr.bf16.mxu0 %v4753_v22  ;;  %3359 = vmatprep.subr.bf16.mxu1 %v4756_v23 }
 0x183   : > { %3003 = vmatpush1.bf16.msra.mxu0 %v4751_v24  ;;  %3360 = vmatpush1.bf16.msra.mxu1 %v4754_v25 }
 0x184   : > { %3023 = vmatprep.subr.bf16.mxu0 %v4762_v26  ;;  %3380 = vmatprep.subr.bf16.mxu1 %v4765_v27 }
 0x186   : > { %3005 = vmatmul.mubr.bf16.vlgmr.msra.gmra.mrb[0].mxu0 %v4757_v28  ;;  %3362 = vmatmul.mubr.bf16.vlgmr.msra.gmra.mrb[0].mxu1 %v4757_v28 }
 0x187   : > { %3024 = vmatpush1.bf16.msra.mxu0 %v4760_v30  ;;  %3381 = vmatpush1.bf16.msra.mxu1 %v4763_v31 }
 0x188   : > { %3025 = vmatprep.subr.bf16.mxu0 %v4768_v32  ;;  %3382 = vmatprep.subr.bf16.mxu1 %v4771_v33 }
 0x189   : > { %3014 = vmatprep.mubr.bf16.mxu0 %v3604_v34  ;;  %3371 = vmatprep.mubr.bf16.mxu1 %v3604_v34 }
 0x18b   : > { %3026 = vmatpush1.bf16.msra.mxu0 %v4766_v35  ;;  %3383 = vmatpush1.bf16.msra.mxu1 %v4769_v36 }
 0x18c   : > { %3027 = vmatprep.subr.bf16.mxu0 %v4776_v37  ;;  %3384 = vmatprep.subr.bf16.mxu1 %v4779_v38 }
 0x18e   : > { %3015 = vmatmul.mubr.bf16.gmra.mrb[4].mxu0 %v3603_v39  ;;  %3372 = vmatmul.mubr.bf16.gmra.mrb[4].mxu1 %v3603_v39 }
 0x18f   : > { %3028 = vmatpush1.bf16.msra.mxu0 %v4774_v40  ;;  %3385 = vmatpush1.bf16.msra.mxu1 %v4777_v41 }
 0x190   : > { %3029 = vmatprep.subr.bf16.mxu0 %v4782_v42  ;;  %3386 = vmatprep.subr.bf16.mxu1 %v4785_v43 }
 0x191   : > { %3055 = vmatprep.mubr.bf16.mxu0 %v4796_v46  ;;  %3412 = vmatprep.mubr.bf16.mxu1 %v4796_v46 }
 0x193   : > { %3030 = vmatpush1.bf16.msra.mxu0 %v4780_v44  ;;  %3387 = vmatpush1.bf16.msra.mxu1 %v4783_v45 }
 0x196   : > { %4006 = vmatmul.mubr.msk.bf16.vlgmr.msra.gmra.mrb[0].mxu0 %vm2710_vm0, %v4786_v47  ;;  %4008 = vmatmul.mubr.msk.bf16.vlgmr.msra.gmra.mrb[0].mxu1 %vm2710_vm0, %v4786_v47 }
 0x197   : > { %3065 = vmatprep.mubr.bf16.mxu0 %v4796_v46  ;;  %3422 = vmatprep.mubr.bf16.mxu1 %v4796_v46 }
 0x19e   : > { %4007 = vmatmul.mubr.msk.bf16.gmra.mrb[4].mxu0 %vm2710_vm0, %v4787_v48  ;;  %4009 = vmatmul.mubr.msk.bf16.gmra.mrb[4].mxu1 %vm2710_vm0, %v4787_v48 }
 0x269   : > { %v3057_v60 = vpop.f32.mrb[0].mxu0  ;;  %v3414_v61 = vpop.f32.mrb[0].mxu1 }
 0x26a   : > { %v4038_v62 = vadd.f32 %v3057_v60, %v583_v56  ;;  %v4044_v63 = vadd.f32 %v3414_v61, %v591_v57  ;;  %v3059_v0 = vpop.f32.mrb[1].mxu0  ;;  %v3416_v1 = vpop.f32.mrb[1].mxu1 }
 0x26b   : > { %v4039_v2 = vadd.f32 %v3059_v0, %v587_v58  ;;  %v4045_v3 = vadd.f32 %v3416_v1, %v595_v59  ;;  %v3061_v4 = vpop.f32.mrb[2].mxu0  ;;  %v3418_v5 = vpop.f32.mrb[2].mxu1 }
 0x26c   : > { %v3431_v6 = vmax.f32 %v4038_v62, 0.0  ;;  %v3433_v7 = vmax.f32 %v4044_v63, 0.0  ;;  %v4040_v8 = vadd.f32 %v3061_v4, %v583_v56  ;;  %v4046_v9 = vadd.f32 %v3418_v5, %v591_v57  ;;  %v3063_v10 = vpop.f32.mrb[3].mxu0  ;;  %v3420_v11 = vpop.f32.mrb[3].mxu1 }
 0x26d   : > { %v3432_v12 = vmax.f32 %v4039_v2, 0.0  ;;  %v3434_v13 = vmax.f32 %v4045_v3, 0.0  ;;  %v4041_v14 = vadd.f32 %v3063_v10, %v587_v58  ;;  %v4047_v15 = vadd.f32 %v3420_v11, %v595_v59 }
 0x26e   : > { %v3435_v16 = vmax.f32 %v4040_v8, 0.0  ;;  %v3437_v17 = vmax.f32 %v4046_v9, 0.0 }
 0x26f   : > { %v3436_v18 = vmax.f32 %v4041_v14, 0.0  ;;  %v3438_v19 = vmax.f32 %v4047_v15, 0.0  ;;  %3454 = sbr.rel (%p4010_p4) target bundleno = 634 (0x27a), region = 36  ;;  %v4026_v36 = vpack.c.bf16 (!%p4010_p4), %v3432_v12, %v3431_v6  ;;  %v4027_v37 = vpack.c.bf16 (!%p4010_p4), %v3434_v13, %v3433_v7 }
 0x271   : > { %v3067_v20 = vpop.f32.mrb[4].mxu0  ;;  %v3424_v21 = vpop.f32.mrb[4].mxu1  ;;  %v4028_v38 = vpack.c.bf16 (!%p4010_p4), %v3436_v18, %v3435_v16  ;;  %v4029_v39 = vpack.c.bf16 (!%p4010_p4), %v3438_v19, %v3437_v17  ;;  %3487 = vst [vmem:[%s6119_s3] sm:$0xff] (!%p4010_p4), %v4026_v36  ;;  %3488 = vst [vmem:[%s6119_s3 + $0x8] sm:$0xff] (!%p4010_p4), %v4027_v37 }
 0x272   : > { %v4042_v22 = vadd.f32 %v3067_v20, %v583_v56  ;;  %v4048_v23 = vadd.f32 %v3424_v21, %v591_v57  ;;  %v3069_v24 = vpop.f32.mrb[5].mxu0  ;;  %v3426_v25 = vpop.f32.mrb[5].mxu1 }
 0x273   : > { %v4043_v26 = vadd.f32 %v3069_v24, %v587_v58  ;;  %v4049_v27 = vadd.f32 %v3426_v25, %v595_v59  ;;  %v3071_v28 = vpop.f32.mrb[6].mxu0  ;;  %v3428_v29 = vpop.f32.mrb[6].mxu1  ;;  %3489 = vst [vmem:[%s6119_s3 + $0x10] sm:$0xff] (!%p4010_p4), %v4028_v38  ;;  %3490 = vst [vmem:[%s6119_s3 + $0x18] sm:$0xff] (!%p4010_p4), %v4029_v39 }
 0x274   : > { %v3439_v30 = vmax.f32 %v4042_v22, 0.0  ;;  %v3441_v31 = vmax.f32 %v4048_v23, 0.0  ;;  %v3072_v32 = vpop.f32.mrb[7].mxu0  ;;  %v3429_v33 = vpop.f32.mrb[7].mxu1 }
 0x275   : > { %v3440_v34 = vmax.f32 %v4043_v26, 0.0  ;;  %v3442_v35 = vmax.f32 %v4049_v27, 0.0 }
 0x277   : > { %v4030_v40 = vpack.c.bf16 %v3440_v34, %v3439_v30  ;;  %v4031_v41 = vpack.c.bf16 %v3442_v35, %v3441_v31 }
 0x279   : > { %3491 = vst [vmem:[%s6119_s3 + $0x20] sm:$0x11] %v4030_v40  ;;  %3492 = vst [vmem:[%s6119_s3 + $0x28] sm:$0x11] %v4031_v41 }
 0x27a PF: > { %p4017_p5 = scmp.eq.s32.totalorder %s4823_s13, 0 }
 0x27b   : > { %v4032_v43 = vpack.c.bf16 (!%p4017_p5), %v3432_v12, %v3431_v6  ;;  %v4033_v45 = vpack.c.bf16 (!%p4017_p5), %v3434_v13, %v3433_v7  ;;  %v4034_v47 = vpack.c.bf16 (!%p4017_p5), %v3436_v18, %v3435_v16  ;;  %v4035_v48 = vpack.c.bf16 (!%p4017_p5), %v3438_v19, %v3437_v17 }
 0x27c   : > { %3496 = sbr.rel (%p4017_p5) target bundleno = 644 (0x284), region = 40  ;;  %v3497_v42 = vld [vmem:[%s6119_s3] sm:$0xff] (!%p4017_p5)  ;;  %v3498_v44 = vld [vmem:[%s6119_s3 + $0x8] sm:$0xff] (!%p4017_p5)  ;;  %v4036_v51 = vpack.c.bf16 (!%p4017_p5), %v3440_v34, %v3439_v30  ;;  %v4037_v53 = vpack.c.bf16 (!%p4017_p5), %v3442_v35, %v3441_v31 }
 0x27d   : > { %v3535_v54 = vmax.bf16 (!%p4017_p5), %v4032_v43, %v3497_v42  ;;  %v3536_v55 = vmax.bf16 (!%p4017_p5), %v4033_v45, %v3498_v44 }
 0x27e   : > { %v3499_v46 = vld [vmem:[%s6119_s3 + $0x10] sm:$0xff] (!%p4017_p5)  ;;  %v3500_v49 = vld [vmem:[%s6119_s3 + $0x18] sm:$0xff] (!%p4017_p5) }
 0x27f   : > { %v3537_v56 = vmax.bf16 (!%p4017_p5), %v4034_v47, %v3499_v46  ;;  %v3538_v57 = vmax.bf16 (!%p4017_p5), %v4035_v48, %v3500_v49  ;;  %3541 = vst [vmem:[%s6119_s3] sm:$0xff] (!%p4017_p5), %v3535_v54  ;;  %3542 = vst [vmem:[%s6119_s3 + $0x8] sm:$0xff] (!%p4017_p5), %v3536_v55 }
 0x280   : > { %v3501_v50 = vld [vmem:[%s6119_s3 + $0x20] sm:$0x11] (!%p4017_p5)  ;;  %v3502_v52 = vld [vmem:[%s6119_s3 + $0x28] sm:$0x11] (!%p4017_p5) }
 0x281   : > { %v3539_v58 = vmax.bf16 (!%p4017_p5), %v4036_v51, %v3501_v50  ;;  %v3540_v59 = vmax.bf16 (!%p4017_p5), %v4037_v53, %v3502_v52  ;;  %3543 = vst [vmem:[%s6119_s3 + $0x10] sm:$0xff] (!%p4017_p5), %v3537_v56  ;;  %3544 = vst [vmem:[%s6119_s3 + $0x18] sm:$0xff] (!%p4017_p5), %v3538_v57 }
 0x283   : > { %3545 = vst [vmem:[%s6119_s3 + $0x20] sm:$0x11] %v3539_v58  ;;  %3546 = vst [vmem:[%s6119_s3 + $0x28] sm:$0x11] %v3540_v59 }
 0x284 PF: > { %s13_s12 = sadd.s32 1, %s4794_s12  }
 0x285   : > { %p10_p6 = scmp.ge.s32.totalorder %s13_s12, 6  }
 0x287   :  { %12 = sbr.rel (!%p10_p6) target bundleno = 1 (0x1), region = 66 }

// kernel: net_forward.7
= control target key start
LH: loop header
LB: loop body
LE: loop exit
PB: predicated region body
PF: predicated region fallthrough
CT: control target
= control target key end

     0   :  { %12 = vsyncpa [#allocation4], 0  ;;  %s8652_s24 = smov 0   ;;  %s10318_s0 = inlined_call_operand.vmem [shape: bf16[2,4608], index: 0, kind: input, shape index: {}]   ;;  %s10319_s1 = inlined_call_operand.vmem [shape: bf16[4608,1024], index: 1, kind: input, shape index: {}]   ;;  %s10320_s2 = inlined_call_operand.vmem [shape: f32[1,1024], index: 2, kind: input, shape index: {}]   ;;  %s10321_s3 = inlined_call_operand.vmem [shape: bf16[1024,512], index: 3, kind: input, shape index: {}]   ;;  %s10322_s4 = inlined_call_operand.vmem [shape: f32[1,512], index: 4, kind: input, shape index: {}]   ;;  %s10323_s5 = inlined_call_operand.vmem [shape: bf16[512,10], index: 5, kind: input, shape index: {}]   ;;  %s10324_s6 = inlined_call_operand.vmem [shape: f32[1,10], index: 6, kind: input, shape index: {}]   ;;  %s10325_s7 = inlined_call_operand.hbm [shape: f32[2,10], index: 7, kind: output, shape index: {}]  }
   0x1 LB: > { %s8658_s25 = sadd.s32 4294967295, %s8605_s24   ;;  %p7121_p0 = scmp.ge.s32.totalorder %s8605_s24, 1  ;;  %s8605_s24 = sphi %s8652_s24, %s18_s24  }
   0x2   : > { %p245_p1 = scmp.lt.s32.totalorder %s8605_s24, 5 }
   0x4   : > { %p246_p2 = pnand %p7121_p0, %p245_p1 }
   0x5   : > { %s277_s26 = smul.u32 (!%p246_p2), 9, %s8658_s25  ;;  %p7124_p5 = scmp.ne.s32.totalorder (!%p246_p2), %s8658_s25, 0 }
   0x6   : > { %249 = sbr.rel (%p246_p2) target bundleno = 1494 (0x5d6), region = 48 }
   0x7   : > { %s282_s27 = smul.u32 (!%p246_p2), 144, %s8658_s25  ;;  %p278_p3 = scmp.lt.s32.totalorder (!%p246_p2), %s277_s26, 35 }
   0x9   : > { %p283_p4 = scmp.lt.s32.totalorder (!%p246_p2), %s282_s27, 575 }
   0xd   : > { %s10327_s26 = smov (!%p278_p3, %s277_s26), 35  ;;  %s10329_s27 = smov (!%p283_p4, %s282_s27), 575 }
   0xe   : > { %s8667_s30 = scalar_lea.vmem %s10318_s0, %s10327_s26  ;;  %s7996_s8 = sshll.u32 %s10329_s27, 5  ;;  %v8607_v0 = vmov (!%p7124_p5), 0.0  }
   0xf   : > { %s8672_s11 = scalar_lea.vmem %s10319_s1, %s7996_s8  ;;  %293 = sbr.rel (%p7124_p5) target bundleno = 22 (0x16), region = 52  ;;  %294 = vst [vmem:[#allocation2] sm:$0xff] (!%p7124_p5), %v8607_v0  ;;  %295 = vst [vmem:[#allocation2 + $0x8] sm:$0xff] (!%p7124_p5), %v8607_v0 }
  0x16 PF: > { %v300_v1 = vld [vmem:[%s8672_s11] sm:$0xff]  ;;  %v301_v3 = vld [vmem:[%s8672_s11 + $0x8] sm:$0xff]  ;;  %v8608_v33 = vmov 1966171168   ;;  %v882_v35 = vlaneseq  ;;  %p7702_p6 = scmp.ne.s32.totalorder %s8658_s25, 3 }
  0x17   : > { %v304_v2 = vld [vmem:[%s8672_s11 + $0x20] sm:$0xff]  ;;  %v305_v5 = vld [vmem:[%s8672_s11 + $0x28] sm:$0xff]  ;;  %v880_v34 = vunpack.c.l.s4 %v8608_v33  ;;  %vm7061_vm0 = vcmask (!%p7702_p6), 74752  }
  0x18   : > { %v7127_v4 = vcombine.high %v300_v1, %v304_v2  ;;  %v7126_v6 = vcombine.low %v300_v1, %v304_v2  ;;  %v308_v7 = vld [vmem:[%s8672_s11 + $0x40] sm:$0xff]  ;;  %v7129_v9 = vcombine.high %v301_v3, %v305_v5  ;;  %v7128_v10 = vcombine.low %v301_v3, %v305_v5  ;;  %v309_v12 = vld [vmem:[%s8672_s11 + $0x48] sm:$0xff] }
  0x19   : > { %v312_v8 = vld [vmem:[%s8672_s11 + $0x60] sm:$0xff]  ;;  %v313_v13 = vld [vmem:[%s8672_s11 + $0x68] sm:$0xff]  ;;  %v881_v44 = vunpack.c.0.s8 %v880_v34  ;;  %v8697_v45 = vshrl.u32 %v882_v35, 7 }
  0x1a   : > { %v7135_v11 = vcombine.high %v308_v7, %v312_v8  ;;  %v316_v14 = vld [vmem:[%s8672_s11 + $0x80] sm:$0xff]  ;;  %3830 = vmatprep.subr.bf16.mxu0 %v7127_v4  ;;  %v7137_v15 = vcombine.high %v309_v12, %v313_v13  ;;  %v317_v17 = vld [vmem:[%s8672_s11 + $0x88] sm:$0xff]  ;;  %4035 = vmatprep.subr.bf16.mxu1 %v7129_v9  ;;  %v7134_v19 = vcombine.low %v308_v7, %v312_v8 }
  0x1b   : > { %v320_v16 = vld [vmem:[%s8672_s11 + $0xa0] sm:$0xff]  ;;  %v321_v18 = vld [vmem:[%s8672_s11 + $0xa8] sm:$0xff]  ;;  %3831 = vmatpush1.bf16.msra.mxu0 %v7126_v6  ;;  %4036 = vmatpush1.bf16.msra.mxu1 %v7128_v10  ;;  %v7136_v20 = vcombine.low %v309_v12, %v313_v13  ;;  %v8704_v54 = vsub.s32 %v881_v44, %v8697_v45 }
  0x1c   : > { %3832 = vmatprep.subr.bf16.mxu0 %v7135_v11  ;;  %v7143_v21 = vcombine.high %v316_v14, %v320_v16  ;;  %4037 = vmatprep.subr.bf16.mxu1 %v7137_v15  ;;  %v7145_v22 = vcombine.high %v317_v17, %v321_v18  ;;  %v324_v23 = vld [vmem:[%s8672_s11 + $0xc0] sm:$0xff]  ;;  %v325_v25 = vld [vmem:[%s8672_s11 + $0xc8] sm:$0xff]  ;;  %v7142_v27 = vcombine.low %v316_v14, %v320_v16 }
  0x1d   : > { %v328_v24 = vld [vmem:[%s8672_s11 + $0xe0] sm:$0xff]  ;;  %v329_v26 = vld [vmem:[%s8672_s11 + $0xe8] sm:$0xff]  ;;  %v7144_v28 = vcombine.low %v317_v17, %v321_v18 }
  0x1e   : > { %v7151_v29 = vcombine.high %v324_v23, %v328_v24  ;;  %v7153_v30 = vcombine.high %v325_v25, %v329_v26  ;;  %v332_v31 = vld [vmem:[%s8672_s11 + $0x100] sm:$0xff]  ;;  %v333_v36 = vld [vmem:[%s8672_s11 + $0x108] sm:$0xff]  ;;  %v7150_v38 = vcombine.low %v324_v23, %v328_v24  ;;  %v7152_v39 = vcombine.low %v325_v25, %v329_v26 }
  0x1f   : > { %3833 = vmatpush1.bf16.msra.mxu0 %v7134_v19  ;;  %4038 = vmatpush1.bf16.msra.mxu1 %v7136_v20  ;;  %v336_v32 = vld [vmem:[%s8672_s11 + $0x120] sm:$0xff]  ;;  %v337_v37 = vld [vmem:[%s8672_s11 + $0x128] sm:$0xff] }
  0x20   : > { %3834 = vmatprep.subr.bf16.mxu0 %v7143_v21  ;;  %4039 = vmatprep.subr.bf16.mxu1 %v7145_v22  ;;  %v7159_v40 = vcombine.high %v332_v31, %v336_v32  ;;  %v7161_v41 = vcombine.high %v333_v36, %v337_v37  ;;  %v340_v42 = vld [vmem:[%s8672_s11 + $0x140] sm:$0xff]  ;;  %v341_v46 = vld [vmem:[%s8672_s11 + $0x148] sm:$0xff]  ;;  %v7158_v48 = vcombine.low %v332_v31, %v336_v32 }
  0x21   : > { %v344_v43 = vld [vmem:[%s8672_s11 + $0x160] sm:$0xff]  ;;  %v345_v47 = vld [vmem:[%s8672_s11 + $0x168] sm:$0xff]  ;;  %v7160_v49 = vcombine.low %v333_v36, %v337_v37 }
  0x22   : > { %v7167_v50 = vcombine.high %v340_v42, %v344_v43  ;;  %v7169_v51 = vcombine.high %v341_v46, %v345_v47  ;;  %v348_v52 = vld [vmem:[%s8672_s11 + $0x180] sm:$0xff]  ;;  %v349_v55 = vld [vmem:[%s8672_s11 + $0x188] sm:$0xff]  ;;  %v7166_v57 = vcombine.low %v340_v42, %v344_v43  ;;  %v7168_v58 = vcombine.low %v341_v46, %v345_v47 }
  0x23   : > { %3835 = vmatpush1.bf16.msra.mxu0 %v7142_v27  ;;  %4040 = vmatpush1.bf16.msra.mxu1 %v7144_v28  ;;  %v352_v53 = vld [vmem:[%s8672_s11 + $0x1a0] sm:$0xff]  ;;  %v353_v56 = vld [vmem:[%s8672_s11 + $0x1a8] sm:$0xff] }
  0x24   : > { %3836 = vmatprep.subr.bf16.mxu0 %v7151_v29  ;;  %4041 = vmatprep.subr.bf16.mxu1 %v7153_v30  ;;  %v7175_v59 = vcombine.high %v348_v52, %v352_v53  ;;  %v8709_v60 = vld [vmem:[%s8667_s30] sm:$0xff]  ;;  %v7177_v61 = vcombine.high %v349_v55, %v353_v56  ;;  %v357_v1 = vld [vmem:[%s8672_s11 + $0x1c8] sm:$0xff]  ;;  %v7174_v3 = vcombine.low %v348_v52, %v352_v53 }
  0x25   : > { %v356_v62 = vld [vmem:[%s8672_s11 + $0x1c0] sm:$0xff]  ;;  %v8715_v0 = vrot.slane %v8709_v60, %v8704_v54  ;;  %v361_v2 = vld [vmem:[%s8672_s11 + $0x1e8] sm:$0xff]  ;;  %v7176_v5 = vcombine.low %v349_v55, %v353_v56 }
  0x26   : > { %v360_v63 = vld [vmem:[%s8672_s11 + $0x1e0] sm:$0xff]  ;;  %v7185_v7 = vcombine.high %v357_v1, %v361_v2  ;;  %v365_v11 = vld [vmem:[%s8672_s11 + $0x208] sm:$0xff]  ;;  %v7184_v14 = vcombine.low %v357_v1, %v361_v2 }
  0x27   : > { %3837 = vmatpush1.bf16.msra.mxu0 %v7150_v38  ;;  %4042 = vmatpush1.bf16.msra.mxu1 %v7152_v39  ;;  %v893_v4 = vcombine.high %v8715_v0, %v8715_v0  ;;  %v7183_v6 = vcombine.high %v356_v62, %v360_v63  ;;  %v364_v8 = vld [vmem:[%s8672_s11 + $0x200] sm:$0xff]  ;;  %v369_v12 = vld [vmem:[%s8672_s11 + $0x228] sm:$0xff]  ;;  %v7182_v13 = vcombine.low %v356_v62, %v360_v63 }
  0x28   : > { %3838 = vmatprep.subr.bf16.mxu0 %v7159_v40  ;;  %4043 = vmatprep.subr.bf16.mxu1 %v7161_v41  ;;  %v368_v9 = vld [vmem:[%s8672_s11 + $0x220] sm:$0xff]  ;;  %v7193_v16 = vcombine.high %v365_v11, %v369_v12  ;;  %v373_v19 = vld [vmem:[%s8672_s11 + $0x248] sm:$0xff]  ;;  %v7192_v22 = vcombine.low %v365_v11, %v369_v12 }
  0x29   : > { %v8724_v10 = vrot.slane %v893_v4, %v8704_v54  ;;  %v7191_v15 = vcombine.high %v364_v8, %v368_v9  ;;  %v372_v17 = vld [vmem:[%s8672_s11 + $0x240] sm:$0xff]  ;;  %v377_v20 = vld [vmem:[%s8672_s11 + $0x268] sm:$0xff]  ;;  %v7190_v21 = vcombine.low %v364_v8, %v368_v9 }
  0x2a   : > { %v376_v18 = vld [vmem:[%s8672_s11 + $0x260] sm:$0xff]  ;;  %v7201_v24 = vcombine.high %v373_v19, %v377_v20  ;;  %v381_v27 = vld [vmem:[%s8672_s11 + $0x288] sm:$0xff]  ;;  %v7200_v30 = vcombine.low %v373_v19, %v377_v20 }
  0x2b   : > { %3839 = vmatpush1.bf16.msra.mxu0 %v7158_v48  ;;  %4044 = vmatpush1.bf16.msra.mxu1 %v7160_v49  ;;  %v7199_v23 = vcombine.high %v372_v17, %v376_v18  ;;  %v380_v25 = vld [vmem:[%s8672_s11 + $0x280] sm:$0xff]  ;;  %v385_v28 = vld [vmem:[%s8672_s11 + $0x2a8] sm:$0xff]  ;;  %v7198_v29 = vcombine.low %v372_v17, %v376_v18 }
  0x2c   : > { %3840 = vmatprep.subr.bf16.mxu0 %v7167_v50  ;;  %4045 = vmatprep.subr.bf16.mxu1 %v7169_v51  ;;  %v384_v26 = vld [vmem:[%s8672_s11 + $0x2a0] sm:$0xff]  ;;  %v7209_v32 = vcombine.high %v381_v27, %v385_v28  ;;  %v389_v35 = vld [vmem:[%s8672_s11 + $0x2c8] sm:$0xff]  ;;  %v7208_v38 = vcombine.low %v381_v27, %v385_v28 }
  0x2d   : > { %3862 = vmatprep.mubr.bf16.mxu0 %v8724_v10  ;;  %4067 = vmatprep.mubr.bf16.mxu1 %v8724_v10  ;;  %v7207_v31 = vcombine.high %v380_v25, %v384_v26  ;;  %v388_v33 = vld [vmem:[%s8672_s11 + $0x2c0] sm:$0xff]  ;;  %v393_v36 = vld [vmem:[%s8672_s11 + $0x2e8] sm:$0xff]  ;;  %v7206_v37 = vcombine.low %v380_v25, %v384_v26 }
  0x2e   : > { %v392_v34 = vld [vmem:[%s8672_s11 + $0x2e0] sm:$0xff]  ;;  %v7217_v40 = vcombine.high %v389_v35, %v393_v36  ;;  %v397_v43 = vld [vmem:[%s8672_s11 + $0x308] sm:$0xff]  ;;  %v7216_v47 = vcombine.low %v389_v35, %v393_v36 }
  0x2f   : > { %3841 = vmatpush1.bf16.msra.mxu0 %v7166_v57  ;;  %4046 = vmatpush1.bf16.msra.mxu1 %v7168_v58  ;;  %v7215_v39 = vcombine.high %v388_v33, %v392_v34  ;;  %v396_v41 = vld [vmem:[%s8672_s11 + $0x300] sm:$0xff]  ;;  %v401_v44 = vld [vmem:[%s8672_s11 + $0x328] sm:$0xff]  ;;  %v7214_v46 = vcombine.low %v388_v33, %v392_v34  ;;  %v8774_v33 = vcombine.high %v8724_v10, %v8724_v10 }
  0x30   : > { %3842 = vmatprep.subr.bf16.mxu0 %v7175_v59  ;;  %4047 = vmatprep.subr.bf16.mxu1 %v7177_v61  ;;  %v400_v42 = vld [vmem:[%s8672_s11 + $0x320] sm:$0xff]  ;;  %v7225_v49 = vcombine.high %v397_v43, %v401_v44  ;;  %v405_v52 = vld [vmem:[%s8672_s11 + $0x348] sm:$0xff]  ;;  %v7224_v56 = vcombine.low %v397_v43, %v401_v44 }
  0x31   : > { %v7223_v48 = vcombine.high %v396_v41, %v400_v42  ;;  %v404_v50 = vld [vmem:[%s8672_s11 + $0x340] sm:$0xff]  ;;  %v409_v53 = vld [vmem:[%s8672_s11 + $0x368] sm:$0xff]  ;;  %v7222_v55 = vcombine.low %v396_v41, %v400_v42 }
  0x32   : > { %v408_v51 = vld [vmem:[%s8672_s11 + $0x360] sm:$0xff]  ;;  %v7233_v58 = vcombine.high %v405_v52, %v409_v53  ;;  %v413_v62 = vld [vmem:[%s8672_s11 + $0x388] sm:$0xff]  ;;  %v7232_v2 = vcombine.low %v405_v52, %v409_v53 }
  0x33   : > { %3843 = vmatpush1.bf16.msra.mxu0 %v7174_v3  ;;  %4048 = vmatpush1.bf16.msra.mxu1 %v7176_v5  ;;  %v7231_v57 = vcombine.high %v404_v50, %v408_v51  ;;  %v412_v59 = vld [vmem:[%s8672_s11 + $0x380] sm:$0xff]  ;;  %v417_v63 = vld [vmem:[%s8672_s11 + $0x3a8] sm:$0xff]  ;;  %v7230_v1 = vcombine.low %v404_v50, %v408_v51 }
  0x34   : > { %3844 = vmatprep.subr.bf16.mxu0 %v7183_v6  ;;  %4049 = vmatprep.subr.bf16.mxu1 %v7185_v7  ;;  %v416_v61 = vld [vmem:[%s8672_s11 + $0x3a0] sm:$0xff]  ;;  %v7241_v4 = vcombine.high %v413_v62, %v417_v63  ;;  %v421_v7 = vld [vmem:[%s8672_s11 + $0x3c8] sm:$0xff]  ;;  %v7240_v11 = vcombine.low %v413_v62, %v417_v63 }
  0x35   : > { %v7239_v3 = vcombine.high %v412_v59, %v416_v61  ;;  %v420_v5 = vld [vmem:[%s8672_s11 + $0x3c0] sm:$0xff]  ;;  %v425_v8 = vld [vmem:[%s8672_s11 + $0x3e8] sm:$0xff]  ;;  %v7238_v9 = vcombine.low %v412_v59, %v416_v61 }
  0x36   : > { %v424_v6 = vld [vmem:[%s8672_s11 + $0x3e0] sm:$0xff]  ;;  %v433_v17 = vld [vmem:[%s8672_s11 + $0x428] sm:$0xff]  ;;  %v7248_v19 = vcombine.low %v421_v7, %v425_v8 }
  0x37   : > { %3845 = vmatpush1.bf16.msra.mxu0 %v7182_v13  ;;  %4050 = vmatpush1.bf16.msra.mxu1 %v7184_v14  ;;  %v7247_v12 = vcombine.high %v420_v5, %v424_v6  ;;  %v7249_v13 = vcombine.high %v421_v7, %v425_v8  ;;  %v428_v14 = vld [vmem:[%s8672_s11 + $0x400] sm:$0xff]  ;;  %v7246_v18 = vcombine.low %v420_v5, %v424_v6  ;;  %v437_v25 = vld [vmem:[%s8672_s11 + $0x448] sm:$0xff] }
  0x38   : > { %3846 = vmatprep.subr.bf16.mxu0 %v7191_v15  ;;  %4051 = vmatprep.subr.bf16.mxu1 %v7193_v16  ;;  %v432_v15 = vld [vmem:[%s8672_s11 + $0x420] sm:$0xff]  ;;  %v429_v16 = vld [vmem:[%s8672_s11 + $0x408] sm:$0xff] }
  0x39   : > { %v7255_v20 = vcombine.high %v428_v14, %v432_v15  ;;  %v441_v26 = vld [vmem:[%s8672_s11 + $0x468] sm:$0xff]  ;;  %v7254_v27 = vcombine.low %v428_v14, %v432_v15  ;;  %v7256_v28 = vcombine.low %v429_v16, %v433_v17 }
  0x3a   : > { %v449_v34 = vld [vmem:[%s8672_s11 + $0x4a8] sm:$0xff]  ;;  %v7264_v36 = vcombine.low %v437_v25, %v441_v26 }
  0x3b   : > { %3847 = vmatpush1.bf16.msra.mxu0 %v7190_v21  ;;  %4052 = vmatpush1.bf16.msra.mxu1 %v7192_v22  ;;  %v7257_v21 = vcombine.high %v429_v16, %v433_v17  ;;  %v436_v22 = vld [vmem:[%s8672_s11 + $0x440] sm:$0xff]  ;;  %v453_v41 = vld [vmem:[%s8672_s11 + $0x4c8] sm:$0xff] }
  0x3c   : > { %3848 = vmatprep.subr.bf16.mxu0 %v7199_v23  ;;  %4053 = vmatprep.subr.bf16.mxu1 %v7201_v24  ;;  %v440_v23 = vld [vmem:[%s8672_s11 + $0x460] sm:$0xff]  ;;  %v8766_v24 = vrot.slane %v8715_v0, %v8704_v54  ;;  %v445_v0 = vld [vmem:[%s8672_s11 + $0x488] sm:$0xff] }
  0x3d   : > { %v7262_v35 = vcombine.low %v436_v22, %v440_v23  ;;  %v457_v42 = vld [vmem:[%s8672_s11 + $0x4e8] sm:$0xff]  ;;  %v7272_v44 = vcombine.low %v445_v0, %v449_v34 }
  0x3e   : > { %v461_v50 = vld [vmem:[%s8672_s11 + $0x508] sm:$0xff]  ;;  %v7280_v53 = vcombine.low %v453_v41, %v457_v42 }
  0x3f   : > { %3849 = vmatpush1.bf16.msra.mxu0 %v7198_v29  ;;  %4054 = vmatpush1.bf16.msra.mxu1 %v7200_v30  ;;  %v7263_v29 = vcombine.high %v436_v22, %v440_v23  ;;  %v7265_v30 = vcombine.high %v437_v25, %v441_v26  ;;  %v465_v51 = vld [vmem:[%s8672_s11 + $0x528] sm:$0xff] }
  0x40   : > { %3850 = vmatprep.subr.bf16.mxu0 %v7207_v31  ;;  %4055 = vmatprep.subr.bf16.mxu1 %v7209_v32  ;;  %v444_v31 = vld [vmem:[%s8672_s11 + $0x480] sm:$0xff]  ;;  %v469_v59 = vld [vmem:[%s8672_s11 + $0x548] sm:$0xff]  ;;  %v7288_v63 = vcombine.low %v461_v50, %v465_v51 }
  0x41   : > { %v448_v32 = vld [vmem:[%s8672_s11 + $0x4a0] sm:$0xff]  ;;  %v473_v61 = vld [vmem:[%s8672_s11 + $0x568] sm:$0xff] }
  0x42   : > { %v7270_v43 = vcombine.low %v444_v31, %v448_v32  ;;  %v477_v5 = vld [vmem:[%s8672_s11 + $0x588] sm:$0xff]  ;;  %v7296_v8 = vcombine.low %v469_v59, %v473_v61 }
  0x43   : > { %3851 = vmatpush1.bf16.msra.mxu0 %v7206_v37  ;;  %4056 = vmatpush1.bf16.msra.mxu1 %v7208_v38  ;;  %v7271_v37 = vcombine.high %v444_v31, %v448_v32  ;;  %v7273_v38 = vcombine.high %v445_v0, %v449_v34  ;;  %v481_v6 = vld [vmem:[%s8672_s11 + $0x5a8] sm:$0xff] }
  0x44   : > { %3852 = vmatprep.subr.bf16.mxu0 %v7215_v39  ;;  %4057 = vmatprep.subr.bf16.mxu1 %v7217_v40  ;;  %v452_v39 = vld [vmem:[%s8672_s11 + $0x4c0] sm:$0xff]  ;;  %v485_v14 = vld [vmem:[%s8672_s11 + $0x5c8] sm:$0xff]  ;;  %v7304_v17 = vcombine.low %v477_v5, %v481_v6 }
  0x45   : > { %v456_v40 = vld [vmem:[%s8672_s11 + $0x4e0] sm:$0xff]  ;;  %v489_v15 = vld [vmem:[%s8672_s11 + $0x5e8] sm:$0xff] }
  0x46   : > { %v7278_v52 = vcombine.low %v452_v39, %v456_v40  ;;  %v493_v22 = vld [vmem:[%s8672_s11 + $0x608] sm:$0xff]  ;;  %v7312_v26 = vcombine.low %v485_v14, %v489_v15 }
  0x47   : > { %3853 = vmatpush1.bf16.msra.mxu0 %v7214_v46  ;;  %4058 = vmatpush1.bf16.msra.mxu1 %v7216_v47  ;;  %v7279_v46 = vcombine.high %v452_v39, %v456_v40  ;;  %v7281_v47 = vcombine.high %v453_v41, %v457_v42  ;;  %v497_v23 = vld [vmem:[%s8672_s11 + $0x628] sm:$0xff] }
  0x48   : > { %3854 = vmatprep.subr.bf16.mxu0 %v7223_v48  ;;  %4059 = vmatprep.subr.bf16.mxu1 %v7225_v49  ;;  %v460_v48 = vld [vmem:[%s8672_s11 + $0x500] sm:$0xff]  ;;  %v501_v31 = vld [vmem:[%s8672_s11 + $0x648] sm:$0xff]  ;;  %v7320_v34 = vcombine.low %v493_v22, %v497_v23 }
  0x49   : > { %v464_v49 = vld [vmem:[%s8672_s11 + $0x520] sm:$0xff]  ;;  %v505_v32 = vld [vmem:[%s8672_s11 + $0x668] sm:$0xff] }
  0x4a   : > { %v7286_v62 = vcombine.low %v460_v48, %v464_v49  ;;  %v509_v39 = vld [vmem:[%s8672_s11 + $0x688] sm:$0xff]  ;;  %v7328_v42 = vcombine.low %v501_v31, %v505_v32 }
  0x4b   : > { %3855 = vmatpush1.bf16.msra.mxu0 %v7222_v55  ;;  %4060 = vmatpush1.bf16.msra.mxu1 %v7224_v56  ;;  %v7287_v55 = vcombine.high %v460_v48, %v464_v49  ;;  %v7289_v56 = vcombine.high %v461_v50, %v465_v51  ;;  %v513_v40 = vld [vmem:[%s8672_s11 + $0x6a8] sm:$0xff] }
  0x4c   : > { %3856 = vmatprep.subr.bf16.mxu0 %v7231_v57  ;;  %4061 = vmatprep.subr.bf16.mxu1 %v7233_v58  ;;  %v468_v57 = vld [vmem:[%s8672_s11 + $0x540] sm:$0xff]  ;;  %v517_v48 = vld [vmem:[%s8672_s11 + $0x6c8] sm:$0xff]  ;;  %v7336_v51 = vcombine.low %v509_v39, %v513_v40 }
  0x4d   : > { %v472_v58 = vld [vmem:[%s8672_s11 + $0x560] sm:$0xff]  ;;  %v521_v49 = vld [vmem:[%s8672_s11 + $0x6e8] sm:$0xff] }
  0x4e   : > { %v7294_v7 = vcombine.low %v468_v57, %v472_v58 }
  0x4f   : > { %3857 = vmatpush1.bf16.msra.mxu0 %v7230_v1  ;;  %4062 = vmatpush1.bf16.msra.mxu1 %v7232_v2  ;;  %v7295_v1 = vcombine.high %v468_v57, %v472_v58  ;;  %v7297_v2 = vcombine.high %v469_v59, %v473_v61  ;;  %v525_v57 = vld [vmem:[%s8672_s11 + $0x708] sm:$0xff]  ;;  %v7344_v61 = vcombine.low %v517_v48, %v521_v49 }
  0x50   : > { %3858 = vmatprep.subr.bf16.mxu0 %v7239_v3  ;;  %4063 = vmatprep.subr.bf16.mxu1 %v7241_v4  ;;  %v476_v3 = vld [vmem:[%s8672_s11 + $0x580] sm:$0xff]  ;;  %v529_v58 = vld [vmem:[%s8672_s11 + $0x728] sm:$0xff] }
  0x51   : > { %v480_v4 = vld [vmem:[%s8672_s11 + $0x5a0] sm:$0xff] }
  0x52   : > { %v7302_v16 = vcombine.low %v476_v3, %v480_v4 }
  0x53   : > { %3859 = vmatpush1.bf16.msra.mxu0 %v7238_v9  ;;  %4064 = vmatpush1.bf16.msra.mxu1 %v7240_v11  ;;  %v7303_v9 = vcombine.high %v476_v3, %v480_v4  ;;  %v7305_v11 = vcombine.high %v477_v5, %v481_v6  ;;  %v533_v3 = vld [vmem:[%s8672_s11 + $0x748] sm:$0xff]  ;;  %v7352_v6 = vcombine.low %v525_v57, %v529_v58 }
  0x54   : > { %3860 = vmatprep.subr.bf16.mxu0 %v7247_v12  ;;  %4065 = vmatprep.subr.bf16.mxu1 %v7249_v13  ;;  %v484_v12 = vld [vmem:[%s8672_s11 + $0x5c0] sm:$0xff]  ;;  %v537_v4 = vld [vmem:[%s8672_s11 + $0x768] sm:$0xff] }
  0x55   : > { %v488_v13 = vld [vmem:[%s8672_s11 + $0x5e0] sm:$0xff] }
  0x56   : > { %v7310_v25 = vcombine.low %v484_v12, %v488_v13 }
  0x57   : > { %3861 = vmatpush1.bf16.msra.mxu0 %v7246_v18  ;;  %4066 = vmatpush1.bf16.msra.mxu1 %v7248_v19  ;;  %v7311_v18 = vcombine.high %v484_v12, %v488_v13  ;;  %v7313_v19 = vcombine.high %v485_v14, %v489_v15  ;;  %v541_v12 = vld [vmem:[%s8672_s11 + $0x788] sm:$0xff]  ;;  %v7360_v15 = vcombine.low %v533_v3, %v537_v4 }
  0x58   : > { %3871 = vmatprep.subr.bf16.mxu0 %v7255_v20  ;;  %4076 = vmatprep.subr.bf16.mxu1 %v7257_v21  ;;  %v492_v20 = vld [vmem:[%s8672_s11 + $0x600] sm:$0xff]  ;;  %v545_v13 = vld [vmem:[%s8672_s11 + $0x7a8] sm:$0xff] }
  0x59   : > { %v496_v21 = vld [vmem:[%s8672_s11 + $0x620] sm:$0xff] }
  0x5a   : > { %3863 = vmatmul.mubr.bf16.vlgmr.msra.gmra.mrb[0].mxu0 %v8766_v24  ;;  %4068 = vmatmul.mubr.bf16.vlgmr.msra.gmra.mrb[0].mxu1 %v8766_v24  ;;  %v7318_v0 = vcombine.low %v492_v20, %v496_v21 }
  0x5b   : > { %3872 = vmatpush1.bf16.msra.mxu0 %v7254_v27  ;;  %4077 = vmatpush1.bf16.msra.mxu1 %v7256_v28  ;;  %v7319_v27 = vcombine.high %v492_v20, %v496_v21  ;;  %v7321_v28 = vcombine.high %v493_v22, %v497_v23  ;;  %v878_v20 = vcombine.high %v8709_v60, %v8709_v60  ;;  %v549_v21 = vld [vmem:[%s8672_s11 + $0x7c8] sm:$0xff] }
  0x5c   : > { %3873 = vmatprep.subr.bf16.mxu0 %v7263_v29  ;;  %4078 = vmatprep.subr.bf16.mxu1 %v7265_v30  ;;  %v500_v29 = vld [vmem:[%s8672_s11 + $0x640] sm:$0xff]  ;;  %v553_v22 = vld [vmem:[%s8672_s11 + $0x7e8] sm:$0xff] }
  0x5d   : > { %3903 = vmatprep.mubr.bf16.mxu0 %v8774_v33  ;;  %4108 = vmatprep.mubr.bf16.mxu1 %v8774_v33  ;;  %v504_v30 = vld [vmem:[%s8672_s11 + $0x660] sm:$0xff]  ;;  %v557_v60 = vld [vmem:[%s8672_s11 + $0x808] sm:$0xff] }
  0x5e   : > { %v7326_v41 = vcombine.low %v500_v29, %v504_v30 }
  0x5f   : > { %3874 = vmatpush1.bf16.msra.mxu0 %v7262_v35  ;;  %4079 = vmatpush1.bf16.msra.mxu1 %v7264_v36  ;;  %v7327_v35 = vcombine.high %v500_v29, %v504_v30  ;;  %v7329_v36 = vcombine.high %v501_v31, %v505_v32  ;;  %v560_v29 = vld [vmem:[%s8672_s11 + $0x820] sm:$0xff]  ;;  %v8839_v30 = vrot.slane %v878_v20, %v8704_v54  ;;  %v561_v31 = vld [vmem:[%s8672_s11 + $0x828] sm:$0xff] }
  0x60   : > { %3875 = vmatprep.subr.bf16.mxu0 %v7271_v37  ;;  %4080 = vmatprep.subr.bf16.mxu1 %v7273_v38  ;;  %v508_v37 = vld [vmem:[%s8672_s11 + $0x680] sm:$0xff] }
  0x61   : > { %v512_v38 = vld [vmem:[%s8672_s11 + $0x6a0] sm:$0xff] }
  0x62   : > { %v7334_v50 = vcombine.low %v508_v37, %v512_v38  ;;  %v604_v20 = vld [vmem:[%s8672_s11 + $0x980] sm:$0xff] }
  0x63   : > { %3876 = vmatpush1.bf16.msra.mxu0 %v7270_v43  ;;  %4081 = vmatpush1.bf16.msra.mxu1 %v7272_v44  ;;  %v7335_v43 = vcombine.high %v508_v37, %v512_v38  ;;  %v7337_v44 = vcombine.high %v509_v39, %v513_v40  ;;  %v568_v37 = vld [vmem:[%s8672_s11 + $0x860] sm:$0xff]  ;;  %v894_v38 = vcombine.high %v8839_v30, %v8839_v30  ;;  %v565_v40 = vld [vmem:[%s8672_s11 + $0x848] sm:$0xff] }
  0x64   : > { %3877 = vmatprep.subr.bf16.mxu0 %v7279_v46  ;;  %4082 = vmatprep.subr.bf16.mxu1 %v7281_v47  ;;  %v516_v46 = vld [vmem:[%s8672_s11 + $0x6c0] sm:$0xff]  ;;  %v8849_v39 = vcombine.high %v8766_v24, %v8766_v24 }
  0x65   : > { %v520_v47 = vld [vmem:[%s8672_s11 + $0x6e0] sm:$0xff] }
  0x66   : > { %v7342_v59 = vcombine.low %v516_v46, %v520_v47 }
  0x67   : > { %3878 = vmatpush1.bf16.msra.mxu0 %v7278_v52  ;;  %4083 = vmatpush1.bf16.msra.mxu1 %v7280_v53  ;;  %v7343_v52 = vcombine.high %v516_v46, %v520_v47  ;;  %v7345_v53 = vcombine.high %v517_v48, %v521_v49  ;;  %v572_v47 = vld [vmem:[%s8672_s11 + $0x880] sm:$0xff]  ;;  %v8856_v49 = vrot.slane %v894_v38, %v8704_v54 }
  0x68   : > { %3879 = vmatprep.subr.bf16.mxu0 %v7287_v55  ;;  %4084 = vmatprep.subr.bf16.mxu1 %v7289_v56  ;;  %v524_v55 = vld [vmem:[%s8672_s11 + $0x700] sm:$0xff] }
  0x69   : > { %v528_v56 = vld [vmem:[%s8672_s11 + $0x720] sm:$0xff] }
  0x6a   : > { %v7350_v5 = vcombine.low %v524_v55, %v528_v56  ;;  %v576_v48 = vld [vmem:[%s8672_s11 + $0x8a0] sm:$0xff] }
  0x6b   : > { %3880 = vmatpush1.bf16.msra.mxu0 %v7286_v62  ;;  %4085 = vmatpush1.bf16.msra.mxu1 %v7288_v63  ;;  %v7351_v62 = vcombine.high %v524_v55, %v528_v56  ;;  %v7353_v63 = vcombine.high %v525_v57, %v529_v58  ;;  %v7399_v55 = vcombine.high %v572_v47, %v576_v48  ;;  %v580_v57 = vld [vmem:[%s8672_s11 + $0x8c0] sm:$0xff] }
  0x6c   : > { %3881 = vmatprep.subr.bf16.mxu0 %v7295_v1  ;;  %4086 = vmatprep.subr.bf16.mxu1 %v7297_v2  ;;  %v532_v1 = vld [vmem:[%s8672_s11 + $0x740] sm:$0xff] }
  0x6d   : > { %v536_v2 = vld [vmem:[%s8672_s11 + $0x760] sm:$0xff] }
  0x6e   : > { %v7358_v14 = vcombine.low %v532_v1, %v536_v2  ;;  %v584_v58 = vld [vmem:[%s8672_s11 + $0x8e0] sm:$0xff] }
  0x6f   : > { %3882 = vmatpush1.bf16.msra.mxu0 %v7294_v7  ;;  %4087 = vmatpush1.bf16.msra.mxu1 %v7296_v8  ;;  %v7359_v7 = vcombine.high %v532_v1, %v536_v2  ;;  %v7361_v8 = vcombine.high %v533_v3, %v537_v4  ;;  %v7407_v1 = vcombine.high %v580_v57, %v584_v58  ;;  %v588_v3 = vld [vmem:[%s8672_s11 + $0x900] sm:$0xff] }
  0x70   : > { %3883 = vmatprep.subr.bf16.mxu0 %v7303_v9  ;;  %4088 = vmatprep.subr.bf16.mxu1 %v7305_v11  ;;  %v540_v9 = vld [vmem:[%s8672_s11 + $0x780] sm:$0xff] }
  0x71   : > { %v544_v11 = vld [vmem:[%s8672_s11 + $0x7a0] sm:$0xff] }
  0x72   : > { %v7366_v23 = vcombine.low %v540_v9, %v544_v11  ;;  %v592_v4 = vld [vmem:[%s8672_s11 + $0x920] sm:$0xff] }
  0x73   : > { %3884 = vmatpush1.bf16.msra.mxu0 %v7302_v16  ;;  %4089 = vmatpush1.bf16.msra.mxu1 %v7304_v17  ;;  %v7367_v16 = vcombine.high %v540_v9, %v544_v11  ;;  %v7369_v17 = vcombine.high %v541_v12, %v545_v13  ;;  %v7415_v9 = vcombine.high %v588_v3, %v592_v4  ;;  %v624_v38 = vld [vmem:[%s8672_s11 + $0xa20] sm:$0xff] }
  0x74   : > { %3885 = vmatprep.subr.bf16.mxu0 %v7311_v18  ;;  %4090 = vmatprep.subr.bf16.mxu1 %v7313_v19  ;;  %v548_v18 = vld [vmem:[%s8672_s11 + $0x7c0] sm:$0xff] }
  0x75   : > { %v552_v19 = vld [vmem:[%s8672_s11 + $0x7e0] sm:$0xff] }
  0x76   : > { %v7374_v32 = vcombine.low %v548_v18, %v552_v19 }
  0x77   : > { %3886 = vmatpush1.bf16.msra.mxu0 %v7310_v25  ;;  %4091 = vmatpush1.bf16.msra.mxu1 %v7312_v26  ;;  %v7368_v25 = vcombine.low %v541_v12, %v545_v13  ;;  %v7375_v26 = vcombine.high %v548_v18, %v552_v19  ;;  %v596_v12 = vld [vmem:[%s8672_s11 + $0x940] sm:$0xff] }
  0x78   : > { %3887 = vmatprep.subr.bf16.mxu0 %v7319_v27  ;;  %4092 = vmatprep.subr.bf16.mxu1 %v7321_v28  ;;  %v7377_v27 = vcombine.high %v549_v21, %v553_v22  ;;  %v556_v28 = vld [vmem:[%s8672_s11 + $0x800] sm:$0xff] }
  0x79   : > { %v600_v13 = vld [vmem:[%s8672_s11 + $0x960] sm:$0xff] }
  0x7a   : > { %v7423_v18 = vcombine.high %v596_v12, %v600_v13 }
  0x7b   : > { %3888 = vmatpush1.bf16.msra.mxu0 %v7318_v0  ;;  %4093 = vmatpush1.bf16.msra.mxu1 %v7320_v34  ;;  %v7376_v0 = vcombine.low %v549_v21, %v553_v22  ;;  %v7383_v34 = vcombine.high %v556_v28, %v560_v29  ;;  %v608_v21 = vld [vmem:[%s8672_s11 + $0x9a0] sm:$0xff]  ;;  %v605_v22 = vld [vmem:[%s8672_s11 + $0x988] sm:$0xff] }
  0x7c   : > { %3889 = vmatprep.subr.bf16.mxu0 %v7327_v35  ;;  %4094 = vmatprep.subr.bf16.mxu1 %v7329_v36  ;;  %v7385_v35 = vcombine.high %v557_v60, %v561_v31  ;;  %v564_v36 = vld [vmem:[%s8672_s11 + $0x840] sm:$0xff] }
  0x7f   : > { %3890 = vmatpush1.bf16.msra.mxu0 %v7326_v41  ;;  %4095 = vmatpush1.bf16.msra.mxu1 %v7328_v42  ;;  %v569_v41 = vld [vmem:[%s8672_s11 + $0x868] sm:$0xff]  ;;  %v7382_v42 = vcombine.low %v556_v28, %v560_v29  ;;  %v612_v29 = vld [vmem:[%s8672_s11 + $0x9c0] sm:$0xff] }
  0x80   : > { %3891 = vmatprep.subr.bf16.mxu0 %v7335_v43  ;;  %4096 = vmatprep.subr.bf16.mxu1 %v7337_v44  ;;  %v7384_v43 = vcombine.low %v557_v60, %v561_v31  ;;  %v7391_v44 = vcombine.high %v564_v36, %v568_v37  ;;  %v7393_v46 = vcombine.high %v565_v40, %v569_v41  ;;  %v616_v60 = vld [vmem:[%s8672_s11 + $0x9e0] sm:$0xff]  ;;  %v613_v31 = vld [vmem:[%s8672_s11 + $0x9c8] sm:$0xff] }
  0x83   : > { %3892 = vmatpush1.bf16.msra.mxu0 %v7334_v50  ;;  %4097 = vmatpush1.bf16.msra.mxu1 %v7336_v51  ;;  %v573_v50 = vld [vmem:[%s8672_s11 + $0x888] sm:$0xff] }
  0x84   : > { %3893 = vmatprep.subr.bf16.mxu0 %v7343_v52  ;;  %4098 = vmatprep.subr.bf16.mxu1 %v7345_v53  ;;  %v577_v51 = vld [vmem:[%s8672_s11 + $0x8a8] sm:$0xff]  ;;  %v7390_v52 = vcombine.low %v564_v36, %v568_v37  ;;  %v7392_v53 = vcombine.low %v565_v40, %v569_v41  ;;  %v620_v37 = vld [vmem:[%s8672_s11 + $0xa00] sm:$0xff] }
  0x85   : > { %v7401_v56 = vcombine.high %v573_v50, %v577_v51  ;;  %v621_v40 = vld [vmem:[%s8672_s11 + $0xa08] sm:$0xff] }
  0x86   : > { %v625_v41 = vld [vmem:[%s8672_s11 + $0xa28] sm:$0xff] }
  0x87   : > { %3894 = vmatpush1.bf16.msra.mxu0 %v7342_v59  ;;  %4099 = vmatpush1.bf16.msra.mxu1 %v7344_v61  ;;  %v581_v59 = vld [vmem:[%s8672_s11 + $0x8c8] sm:$0xff] }
  0x88   : > { %3895 = vmatprep.subr.bf16.mxu0 %v7351_v62  ;;  %4100 = vmatprep.subr.bf16.mxu1 %v7353_v63  ;;  %v585_v61 = vld [vmem:[%s8672_s11 + $0x8e8] sm:$0xff]  ;;  %v7398_v62 = vcombine.low %v572_v47, %v576_v48  ;;  %v7400_v63 = vcombine.low %v573_v50, %v577_v51  ;;  %v628_v47 = vld [vmem:[%s8672_s11 + $0xa40] sm:$0xff] }
  0x89   : > { %v7409_v2 = vcombine.high %v581_v59, %v585_v61  ;;  %v632_v48 = vld [vmem:[%s8672_s11 + $0xa60] sm:$0xff]  ;;  %v629_v50 = vld [vmem:[%s8672_s11 + $0xa48] sm:$0xff] }
  0x8a   : > { %v633_v51 = vld [vmem:[%s8672_s11 + $0xa68] sm:$0xff] }
  0x8b   : > { %3896 = vmatpush1.bf16.msra.mxu0 %v7350_v5  ;;  %4101 = vmatpush1.bf16.msra.mxu1 %v7352_v6  ;;  %v589_v5 = vld [vmem:[%s8672_s11 + $0x908] sm:$0xff] }
  0x8c   : > { %3897 = vmatprep.subr.bf16.mxu0 %v7359_v7  ;;  %4102 = vmatprep.subr.bf16.mxu1 %v7361_v8  ;;  %v593_v6 = vld [vmem:[%s8672_s11 + $0x928] sm:$0xff]  ;;  %v7406_v7 = vcombine.low %v580_v57, %v584_v58  ;;  %v7408_v8 = vcombine.low %v581_v59, %v585_v61  ;;  %v636_v57 = vld [vmem:[%s8672_s11 + $0xa80] sm:$0xff] }
  0x8d   : > { %v7417_v11 = vcombine.high %v589_v5, %v593_v6  ;;  %v640_v58 = vld [vmem:[%s8672_s11 + $0xaa0] sm:$0xff]  ;;  %v637_v59 = vld [vmem:[%s8672_s11 + $0xa88] sm:$0xff] }
  0x8e   : > { %v641_v61 = vld [vmem:[%s8672_s11 + $0xaa8] sm:$0xff] }
  0x8f   : > { %3898 = vmatpush1.bf16.msra.mxu0 %v7358_v14  ;;  %4103 = vmatpush1.bf16.msra.mxu1 %v7360_v15  ;;  %v597_v14 = vld [vmem:[%s8672_s11 + $0x948] sm:$0xff] }
  0x90   : > { %3899 = vmatprep.subr.bf16.mxu0 %v7367_v16  ;;  %4104 = vmatprep.subr.bf16.mxu1 %v7369_v17  ;;  %v601_v15 = vld [vmem:[%s8672_s11 + $0x968] sm:$0xff]  ;;  %v7414_v16 = vcombine.low %v588_v3, %v592_v4  ;;  %v7416_v17 = vcombine.low %v589_v5, %v593_v6  ;;  %v644_v3 = vld [vmem:[%s8672_s11 + $0xac0] sm:$0xff] }
  0x91   : > { %v7425_v19 = vcombine.high %v597_v14, %v601_v15  ;;  %v648_v4 = vld [vmem:[%s8672_s11 + $0xae0] sm:$0xff]  ;;  %v645_v5 = vld [vmem:[%s8672_s11 + $0xac8] sm:$0xff] }
  0x92   : > { %v649_v6 = vld [vmem:[%s8672_s11 + $0xae8] sm:$0xff] }
  0x93   : > { %3900 = vmatpush1.bf16.msra.mxu0 %v7366_v23  ;;  %4105 = vmatpush1.bf16.msra.mxu1 %v7368_v25  ;;  %v609_v23 = vld [vmem:[%s8672_s11 + $0x9a8] sm:$0xff]  ;;  %v7422_v25 = vcombine.low %v596_v12, %v600_v13  ;;  %v652_v12 = vld [vmem:[%s8672_s11 + $0xb00] sm:$0xff] }
  0x94   : > { %3901 = vmatprep.subr.bf16.mxu0 %v7375_v26  ;;  %4106 = vmatprep.subr.bf16.mxu1 %v7377_v27  ;;  %v7424_v26 = vcombine.low %v597_v14, %v601_v15  ;;  %v7431_v27 = vcombine.high %v604_v20, %v608_v21  ;;  %v7433_v28 = vcombine.high %v605_v22, %v609_v23  ;;  %v656_v13 = vld [vmem:[%s8672_s11 + $0xb20] sm:$0xff]  ;;  %v653_v14 = vld [vmem:[%s8672_s11 + $0xb08] sm:$0xff] }
  0x95   : > { %v657_v15 = vld [vmem:[%s8672_s11 + $0xb28] sm:$0xff] }
  0x97   : > { %3902 = vmatpush1.bf16.msra.mxu0 %v7374_v32  ;;  %4107 = vmatpush1.bf16.msra.mxu1 %v7376_v0  ;;  %v617_v32 = vld [vmem:[%s8672_s11 + $0x9e8] sm:$0xff]  ;;  %v7430_v0 = vcombine.low %v604_v20, %v608_v21  ;;  %v660_v20 = vld [vmem:[%s8672_s11 + $0xb40] sm:$0xff] }
  0x98   : > { %3912 = vmatprep.subr.bf16.mxu0 %v7383_v34  ;;  %4117 = vmatprep.subr.bf16.mxu1 %v7385_v35  ;;  %v7432_v34 = vcombine.low %v605_v22, %v609_v23  ;;  %v7439_v35 = vcombine.high %v612_v29, %v616_v60  ;;  %v7441_v36 = vcombine.high %v613_v31, %v617_v32  ;;  %v664_v21 = vld [vmem:[%s8672_s11 + $0xb60] sm:$0xff]  ;;  %v661_v22 = vld [vmem:[%s8672_s11 + $0xb48] sm:$0xff] }
  0x99   : > { %v665_v23 = vld [vmem:[%s8672_s11 + $0xb68] sm:$0xff] }
  0x9a   : > { %3904 = vmatmul.mubr.bf16.vlgmr.msra.gmra.mrb[0].mxu0 %v8849_v39  ;;  %4109 = vmatmul.mubr.bf16.vlgmr.msra.gmra.mrb[0].mxu1 %v8849_v39 }
  0x9b   : > { %3913 = vmatpush1.bf16.msra.mxu0 %v7382_v42  ;;  %4118 = vmatpush1.bf16.msra.mxu1 %v7384_v43  ;;  %v7438_v42 = vcombine.low %v612_v29, %v616_v60  ;;  %v7440_v43 = vcombine.low %v613_v31, %v617_v32  ;;  %v668_v29 = vld [vmem:[%s8672_s11 + $0xb80] sm:$0xff]  ;;  %v669_v31 = vld [vmem:[%s8672_s11 + $0xb88] sm:$0xff] }
  0x9c   : > { %3914 = vmatprep.subr.bf16.mxu0 %v7391_v44  ;;  %4119 = vmatprep.subr.bf16.mxu1 %v7393_v46  ;;  %v7447_v44 = vcombine.high %v620_v37, %v624_v38  ;;  %v7449_v46 = vcombine.high %v621_v40, %v625_v41  ;;  %v672_v60 = vld [vmem:[%s8672_s11 + $0xba0] sm:$0xff]  ;;  %v673_v32 = vld [vmem:[%s8672_s11 + $0xba8] sm:$0xff] }
  0x9d   : > { %3944 = vmatprep.mubr.bf16.mxu0 %v8856_v49  ;;  %4149 = vmatprep.mubr.bf16.mxu1 %v8856_v49 }
  0x9f   : > { %3915 = vmatpush1.bf16.msra.mxu0 %v7390_v52  ;;  %4120 = vmatpush1.bf16.msra.mxu1 %v7392_v53  ;;  %v7446_v52 = vcombine.low %v620_v37, %v624_v38  ;;  %v7448_v53 = vcombine.low %v621_v40, %v625_v41  ;;  %v676_v37 = vld [vmem:[%s8672_s11 + $0xbc0] sm:$0xff]  ;;  %v677_v40 = vld [vmem:[%s8672_s11 + $0xbc8] sm:$0xff] }
  0xa0   : > { %3916 = vmatprep.subr.bf16.mxu0 %v7399_v55  ;;  %4121 = vmatprep.subr.bf16.mxu1 %v7401_v56  ;;  %v7455_v55 = vcombine.high %v628_v47, %v632_v48  ;;  %v7457_v56 = vcombine.high %v629_v50, %v633_v51  ;;  %v680_v38 = vld [vmem:[%s8672_s11 + $0xbe0] sm:$0xff]  ;;  %v681_v41 = vld [vmem:[%s8672_s11 + $0xbe8] sm:$0xff] }
  0xa3   : > { %3917 = vmatpush1.bf16.msra.mxu0 %v7398_v62  ;;  %4122 = vmatpush1.bf16.msra.mxu1 %v7400_v63  ;;  %v7454_v62 = vcombine.low %v628_v47, %v632_v48  ;;  %v7456_v63 = vcombine.low %v629_v50, %v633_v51  ;;  %v684_v47 = vld [vmem:[%s8672_s11 + $0xc00] sm:$0xff]  ;;  %v685_v50 = vld [vmem:[%s8672_s11 + $0xc08] sm:$0xff] }
  0xa4   : > { %3918 = vmatprep.subr.bf16.mxu0 %v7407_v1  ;;  %4123 = vmatprep.subr.bf16.mxu1 %v7409_v2  ;;  %v7463_v1 = vcombine.high %v636_v57, %v640_v58  ;;  %v7465_v2 = vcombine.high %v637_v59, %v641_v61  ;;  %v688_v48 = vld [vmem:[%s8672_s11 + $0xc20] sm:$0xff]  ;;  %v689_v51 = vld [vmem:[%s8672_s11 + $0xc28] sm:$0xff] }
  0xa7   : > { %3919 = vmatpush1.bf16.msra.mxu0 %v7406_v7  ;;  %4124 = vmatpush1.bf16.msra.mxu1 %v7408_v8  ;;  %v7462_v7 = vcombine.low %v636_v57, %v640_v58  ;;  %v7464_v8 = vcombine.low %v637_v59, %v641_v61  ;;  %v692_v57 = vld [vmem:[%s8672_s11 + $0xc40] sm:$0xff]  ;;  %v8924_v59 = vrot.slane %v8839_v30, %v8704_v54  ;;  %v693_v61 = vld [vmem:[%s8672_s11 + $0xc48] sm:$0xff] }
  0xa8   : > { %3920 = vmatprep.subr.bf16.mxu0 %v7415_v9  ;;  %4125 = vmatprep.subr.bf16.mxu1 %v7417_v11  ;;  %v7471_v9 = vcombine.high %v644_v3, %v648_v4  ;;  %v7473_v11 = vcombine.high %v645_v5, %v649_v6  ;;  %v696_v58 = vld [vmem:[%s8672_s11 + $0xc60] sm:$0xff]  ;;  %v701_v30 = vld [vmem:[%s8672_s11 + $0xc88] sm:$0xff] }
  0xab   : > { %3921 = vmatpush1.bf16.msra.mxu0 %v7414_v16  ;;  %4126 = vmatpush1.bf16.msra.mxu1 %v7416_v17  ;;  %v7470_v16 = vcombine.low %v644_v3, %v648_v4  ;;  %v7472_v17 = vcombine.low %v645_v5, %v649_v6  ;;  %v700_v4 = vld [vmem:[%s8672_s11 + $0xc80] sm:$0xff]  ;;  %v8932_v6 = vcombine.high %v8856_v49, %v8856_v49 }
  0xac   : > { %3922 = vmatprep.subr.bf16.mxu0 %v7423_v18  ;;  %4127 = vmatprep.subr.bf16.mxu1 %v7425_v19  ;;  %v7479_v18 = vcombine.high %v652_v12, %v656_v13  ;;  %v7481_v19 = vcombine.high %v653_v14, %v657_v15  ;;  %v704_v5 = vld [vmem:[%s8672_s11 + $0xca0] sm:$0xff] }
  0xaf   : > { %3923 = vmatpush1.bf16.msra.mxu0 %v7422_v25  ;;  %4128 = vmatpush1.bf16.msra.mxu1 %v7424_v26  ;;  %v7478_v25 = vcombine.low %v652_v12, %v656_v13  ;;  %v7480_v26 = vcombine.low %v653_v14, %v657_v15  ;;  %v708_v13 = vld [vmem:[%s8672_s11 + $0xcc0] sm:$0xff]  ;;  %v709_v15 = vld [vmem:[%s8672_s11 + $0xcc8] sm:$0xff] }
  0xb0   : > { %3924 = vmatprep.subr.bf16.mxu0 %v7431_v27  ;;  %4129 = vmatprep.subr.bf16.mxu1 %v7433_v28  ;;  %v7487_v27 = vcombine.high %v660_v20, %v664_v21  ;;  %v7489_v28 = vcombine.high %v661_v22, %v665_v23  ;;  %v712_v14 = vld [vmem:[%s8672_s11 + $0xce0] sm:$0xff] }
  0xb3   : > { %3925 = vmatpush1.bf16.msra.mxu0 %v7430_v0  ;;  %4130 = vmatpush1.bf16.msra.mxu1 %v7432_v34  ;;  %v7486_v0 = vcombine.low %v660_v20, %v664_v21  ;;  %v7488_v34 = vcombine.low %v661_v22, %v665_v23  ;;  %v716_v21 = vld [vmem:[%s8672_s11 + $0xd00] sm:$0xff]  ;;  %v717_v23 = vld [vmem:[%s8672_s11 + $0xd08] sm:$0xff] }
  0xb4   : > { %3926 = vmatprep.subr.bf16.mxu0 %v7439_v35  ;;  %4131 = vmatprep.subr.bf16.mxu1 %v7441_v36  ;;  %v7495_v35 = vcombine.high %v668_v29, %v672_v60  ;;  %v7497_v36 = vcombine.high %v669_v31, %v673_v32  ;;  %v720_v22 = vld [vmem:[%s8672_s11 + $0xd20] sm:$0xff] }
  0xb7   : > { %3927 = vmatpush1.bf16.msra.mxu0 %v7438_v42  ;;  %4132 = vmatpush1.bf16.msra.mxu1 %v7440_v43  ;;  %v7494_v42 = vcombine.low %v668_v29, %v672_v60  ;;  %v7496_v43 = vcombine.low %v669_v31, %v673_v32  ;;  %v724_v60 = vld [vmem:[%s8672_s11 + $0xd40] sm:$0xff]  ;;  %v725_v32 = vld [vmem:[%s8672_s11 + $0xd48] sm:$0xff] }
  0xb8   : > { %3928 = vmatprep.subr.bf16.mxu0 %v7447_v44  ;;  %4133 = vmatprep.subr.bf16.mxu1 %v7449_v46  ;;  %v7503_v44 = vcombine.high %v676_v37, %v680_v38  ;;  %v7505_v46 = vcombine.high %v677_v40, %v681_v41  ;;  %v728_v31 = vld [vmem:[%s8672_s11 + $0xd60] sm:$0xff] }
  0xbb   : > { %3929 = vmatpush1.bf16.msra.mxu0 %v7446_v52  ;;  %4134 = vmatpush1.bf16.msra.mxu1 %v7448_v53  ;;  %v7502_v52 = vcombine.low %v676_v37, %v680_v38  ;;  %v7504_v53 = vcombine.low %v677_v40, %v681_v41  ;;  %v732_v38 = vld [vmem:[%s8672_s11 + $0xd80] sm:$0xff]  ;;  %v733_v41 = vld [vmem:[%s8672_s11 + $0xd88] sm:$0xff] }
  0xbc   : > { %3930 = vmatprep.subr.bf16.mxu0 %v7455_v55  ;;  %4135 = vmatprep.subr.bf16.mxu1 %v7457_v56  ;;  %v7511_v55 = vcombine.high %v684_v47, %v688_v48  ;;  %v7513_v56 = vcombine.high %v685_v50, %v689_v51  ;;  %v736_v40 = vld [vmem:[%s8672_s11 + $0xda0] sm:$0xff] }
  0xbf   : > { %3931 = vmatpush1.bf16.msra.mxu0 %v7454_v62  ;;  %4136 = vmatpush1.bf16.msra.mxu1 %v7456_v63  ;;  %v697_v62 = vld [vmem:[%s8672_s11 + $0xc68] sm:$0xff]  ;;  %v7510_v63 = vcombine.low %v684_v47, %v688_v48  ;;  %v740_v48 = vld [vmem:[%s8672_s11 + $0xdc0] sm:$0xff] }
  0xc0   : > { %3932 = vmatprep.subr.bf16.mxu0 %v7463_v1  ;;  %4137 = vmatprep.subr.bf16.mxu1 %v7465_v2  ;;  %v7512_v1 = vcombine.low %v685_v50, %v689_v51  ;;  %v7519_v2 = vcombine.high %v692_v57, %v696_v58  ;;  %v7521_v3 = vcombine.high %v693_v61, %v697_v62  ;;  %v744_v50 = vld [vmem:[%s8672_s11 + $0xde0] sm:$0xff]  ;;  %v741_v51 = vld [vmem:[%s8672_s11 + $0xdc8] sm:$0xff] }
  0xc3   : > { %3933 = vmatpush1.bf16.msra.mxu0 %v7462_v7  ;;  %4138 = vmatpush1.bf16.msra.mxu1 %v7464_v8  ;;  %v705_v7 = vld [vmem:[%s8672_s11 + $0xca8] sm:$0xff]  ;;  %v7518_v8 = vcombine.low %v692_v57, %v696_v58  ;;  %v748_v58 = vld [vmem:[%s8672_s11 + $0xe00] sm:$0xff] }
  0xc4   : > { %3934 = vmatprep.subr.bf16.mxu0 %v7471_v9  ;;  %4139 = vmatprep.subr.bf16.mxu1 %v7473_v11  ;;  %v7520_v9 = vcombine.low %v693_v61, %v697_v62  ;;  %v7527_v11 = vcombine.high %v700_v4, %v704_v5  ;;  %v7529_v12 = vcombine.high %v701_v30, %v705_v7  ;;  %v752_v61 = vld [vmem:[%s8672_s11 + $0xe20] sm:$0xff]  ;;  %v749_v62 = vld [vmem:[%s8672_s11 + $0xe08] sm:$0xff] }
  0xc7   : > { %3935 = vmatpush1.bf16.msra.mxu0 %v7470_v16  ;;  %4140 = vmatpush1.bf16.msra.mxu1 %v7472_v17  ;;  %v713_v16 = vld [vmem:[%s8672_s11 + $0xce8] sm:$0xff]  ;;  %v7526_v17 = vcombine.low %v700_v4, %v704_v5  ;;  %v756_v5 = vld [vmem:[%s8672_s11 + $0xe40] sm:$0xff] }
  0xc8   : > { %3936 = vmatprep.subr.bf16.mxu0 %v7479_v18  ;;  %4141 = vmatprep.subr.bf16.mxu1 %v7481_v19  ;;  %v7528_v18 = vcombine.low %v701_v30, %v705_v7  ;;  %v7535_v19 = vcombine.high %v708_v13, %v712_v14  ;;  %v7537_v20 = vcombine.high %v709_v15, %v713_v16  ;;  %v760_v30 = vld [vmem:[%s8672_s11 + $0xe60] sm:$0xff]  ;;  %v757_v7 = vld [vmem:[%s8672_s11 + $0xe48] sm:$0xff] }
  0xcb   : > { %3937 = vmatpush1.bf16.msra.mxu0 %v7478_v25  ;;  %4142 = vmatpush1.bf16.msra.mxu1 %v7480_v26  ;;  %v721_v25 = vld [vmem:[%s8672_s11 + $0xd28] sm:$0xff]  ;;  %v7534_v26 = vcombine.low %v708_v13, %v712_v14  ;;  %v764_v14 = vld [vmem:[%s8672_s11 + $0xe80] sm:$0xff] }
  0xcc   : > { %3938 = vmatprep.subr.bf16.mxu0 %v7487_v27  ;;  %4143 = vmatprep.subr.bf16.mxu1 %v7489_v28  ;;  %v7536_v27 = vcombine.low %v709_v15, %v713_v16  ;;  %v7543_v28 = vcombine.high %v716_v21, %v720_v22  ;;  %v7545_v29 = vcombine.high %v717_v23, %v721_v25  ;;  %v768_v15 = vld [vmem:[%s8672_s11 + $0xea0] sm:$0xff]  ;;  %v765_v16 = vld [vmem:[%s8672_s11 + $0xe88] sm:$0xff] }
  0xcf   : > { %3939 = vmatpush1.bf16.msra.mxu0 %v7486_v0  ;;  %4144 = vmatpush1.bf16.msra.mxu1 %v7488_v34  ;;  %v729_v0 = vld [vmem:[%s8672_s11 + $0xd68] sm:$0xff]  ;;  %v7542_v34 = vcombine.low %v716_v21, %v720_v22  ;;  %v772_v22 = vld [vmem:[%s8672_s11 + $0xec0] sm:$0xff] }
  0xd0   : > { %3940 = vmatprep.subr.bf16.mxu0 %v7495_v35  ;;  %4145 = vmatprep.subr.bf16.mxu1 %v7497_v36  ;;  %v7544_v35 = vcombine.low %v717_v23, %v721_v25  ;;  %v7551_v36 = vcombine.high %v724_v60, %v728_v31  ;;  %v7553_v37 = vcombine.high %v725_v32, %v729_v0  ;;  %v776_v23 = vld [vmem:[%s8672_s11 + $0xee0] sm:$0xff]  ;;  %v773_v25 = vld [vmem:[%s8672_s11 + $0xec8] sm:$0xff] }
  0xd3   : > { %3941 = vmatpush1.bf16.msra.mxu0 %v7494_v42  ;;  %4146 = vmatpush1.bf16.msra.mxu1 %v7496_v43  ;;  %v737_v42 = vld [vmem:[%s8672_s11 + $0xda8] sm:$0xff]  ;;  %v7550_v43 = vcombine.low %v724_v60, %v728_v31  ;;  %v780_v31 = vld [vmem:[%s8672_s11 + $0xf00] sm:$0xff] }
  0xd4   : > { %3942 = vmatprep.subr.bf16.mxu0 %v7503_v44  ;;  %4147 = vmatprep.subr.bf16.mxu1 %v7505_v46  ;;  %v7552_v44 = vcombine.low %v725_v32, %v729_v0  ;;  %v7559_v46 = vcombine.high %v732_v38, %v736_v40  ;;  %v7561_v47 = vcombine.high %v733_v41, %v737_v42  ;;  %v784_v32 = vld [vmem:[%s8672_s11 + $0xf20] sm:$0xff]  ;;  %v781_v0 = vld [vmem:[%s8672_s11 + $0xf08] sm:$0xff] }
  0xd7   : > { %3943 = vmatpush1.bf16.msra.mxu0 %v7502_v52  ;;  %4148 = vmatpush1.bf16.msra.mxu1 %v7504_v53  ;;  %v745_v52 = vld [vmem:[%s8672_s11 + $0xde8] sm:$0xff]  ;;  %v7558_v53 = vcombine.low %v732_v38, %v736_v40  ;;  %v788_v40 = vld [vmem:[%s8672_s11 + $0xf40] sm:$0xff] }
  0xd8   : > { %3953 = vmatprep.subr.bf16.mxu0 %v7511_v55  ;;  %4158 = vmatprep.subr.bf16.mxu1 %v7513_v56  ;;  %v7560_v55 = vcombine.low %v733_v41, %v737_v42  ;;  %v7567_v56 = vcombine.high %v740_v48, %v744_v50  ;;  %v7569_v57 = vcombine.high %v741_v51, %v745_v52  ;;  %v792_v41 = vld [vmem:[%s8672_s11 + $0xf60] sm:$0xff]  ;;  %v789_v42 = vld [vmem:[%s8672_s11 + $0xf48] sm:$0xff] }
  0xda   : > { %3945 = vmatmul.mubr.bf16.vlgmr.msra.gmra.mrb[0].mxu0 %v8924_v59  ;;  %4150 = vmatmul.mubr.bf16.vlgmr.msra.gmra.mrb[0].mxu1 %v8924_v59 }
  0xdb   : > { %3954 = vmatpush1.bf16.msra.mxu0 %v7510_v63  ;;  %4159 = vmatpush1.bf16.msra.mxu1 %v7512_v1  ;;  %v753_v63 = vld [vmem:[%s8672_s11 + $0xe28] sm:$0xff]  ;;  %v7566_v1 = vcombine.low %v740_v48, %v744_v50  ;;  %v796_v50 = vld [vmem:[%s8672_s11 + $0xf80] sm:$0xff] }
  0xdc   : > { %3955 = vmatprep.subr.bf16.mxu0 %v7519_v2  ;;  %4160 = vmatprep.subr.bf16.mxu1 %v7521_v3  ;;  %v7568_v2 = vcombine.low %v741_v51, %v745_v52  ;;  %v7575_v3 = vcombine.high %v748_v58, %v752_v61  ;;  %v7577_v4 = vcombine.high %v749_v62, %v753_v63  ;;  %v800_v51 = vld [vmem:[%s8672_s11 + $0xfa0] sm:$0xff]  ;;  %v797_v52 = vld [vmem:[%s8672_s11 + $0xf88] sm:$0xff] }
  0xdd   : > { %3985 = vmatprep.mubr.bf16.mxu0 %v8932_v6  ;;  %4190 = vmatprep.mubr.bf16.mxu1 %v8932_v6 }
  0xdf   : > { %3956 = vmatpush1.bf16.msra.mxu0 %v7518_v8  ;;  %4161 = vmatpush1.bf16.msra.mxu1 %v7520_v9  ;;  %v761_v8 = vld [vmem:[%s8672_s11 + $0xe68] sm:$0xff]  ;;  %v7574_v9 = vcombine.low %v748_v58, %v752_v61  ;;  %v804_v61 = vld [vmem:[%s8672_s11 + $0xfc0] sm:$0xff] }
  0xe0   : > { %3957 = vmatprep.subr.bf16.mxu0 %v7527_v11  ;;  %4162 = vmatprep.subr.bf16.mxu1 %v7529_v12  ;;  %v7576_v11 = vcombine.low %v749_v62, %v753_v63  ;;  %v7583_v12 = vcombine.high %v756_v5, %v760_v30  ;;  %v7585_v13 = vcombine.high %v757_v7, %v761_v8  ;;  %v808_v62 = vld [vmem:[%s8672_s11 + $0xfe0] sm:$0xff]  ;;  %v805_v63 = vld [vmem:[%s8672_s11 + $0xfc8] sm:$0xff] }
  0xe3   : > { %3958 = vmatpush1.bf16.msra.mxu0 %v7526_v17  ;;  %4163 = vmatpush1.bf16.msra.mxu1 %v7528_v18  ;;  %v769_v17 = vld [vmem:[%s8672_s11 + $0xea8] sm:$0xff]  ;;  %v7582_v18 = vcombine.low %v756_v5, %v760_v30  ;;  %v812_v30 = vld [vmem:[%s8672_s11 + $0x1000] sm:$0xff] }
  0xe4   : > { %3959 = vmatprep.subr.bf16.mxu0 %v7535_v19  ;;  %4164 = vmatprep.subr.bf16.mxu1 %v7537_v20  ;;  %v7584_v19 = vcombine.low %v757_v7, %v761_v8  ;;  %v7591_v20 = vcombine.high %v764_v14, %v768_v15  ;;  %v7593_v21 = vcombine.high %v765_v16, %v769_v17  ;;  %v816_v7 = vld [vmem:[%s8672_s11 + $0x1020] sm:$0xff]  ;;  %v813_v8 = vld [vmem:[%s8672_s11 + $0x1008] sm:$0xff] }
  0xe7   : > { %3960 = vmatpush1.bf16.msra.mxu0 %v7534_v26  ;;  %4165 = vmatpush1.bf16.msra.mxu1 %v7536_v27  ;;  %v777_v26 = vld [vmem:[%s8672_s11 + $0xee8] sm:$0xff]  ;;  %v7590_v27 = vcombine.low %v764_v14, %v768_v15  ;;  %v820_v15 = vld [vmem:[%s8672_s11 + $0x1040] sm:$0xff] }
  0xe8   : > { %3961 = vmatprep.subr.bf16.mxu0 %v7543_v28  ;;  %4166 = vmatprep.subr.bf16.mxu1 %v7545_v29  ;;  %v7592_v28 = vcombine.low %v765_v16, %v769_v17  ;;  %v7599_v29 = vcombine.high %v772_v22, %v776_v23  ;;  %v7601_v60 = vcombine.high %v773_v25, %v777_v26  ;;  %v824_v16 = vld [vmem:[%s8672_s11 + $0x1060] sm:$0xff] }
  0xe9   : > { %v9000_v17 = vcombine.high %v8924_v59, %v8924_v59 }
  0xeb   : > { %3962 = vmatpush1.bf16.msra.mxu0 %v7542_v34  ;;  %4167 = vmatpush1.bf16.msra.mxu1 %v7544_v35  ;;  %v785_v34 = vld [vmem:[%s8672_s11 + $0xf28] sm:$0xff]  ;;  %v7598_v35 = vcombine.low %v772_v22, %v776_v23  ;;  %v7647_v22 = vcombine.high %v820_v15, %v824_v16 }
  0xec   : > { %3963 = vmatprep.subr.bf16.mxu0 %v7551_v36  ;;  %4168 = vmatprep.subr.bf16.mxu1 %v7553_v37  ;;  %v7600_v36 = vcombine.low %v773_v25, %v777_v26  ;;  %v7607_v37 = vcombine.high %v780_v31, %v784_v32  ;;  %v7609_v38 = vcombine.high %v781_v0, %v785_v34  ;;  %v828_v25 = vld [vmem:[%s8672_s11 + $0x1080] sm:$0xff] }
  0xed   : > { %v832_v26 = vld [vmem:[%s8672_s11 + $0x10a0] sm:$0xff] }
  0xef   : > { %3964 = vmatpush1.bf16.msra.mxu0 %v7550_v43  ;;  %4169 = vmatpush1.bf16.msra.mxu1 %v7552_v44  ;;  %v793_v43 = vld [vmem:[%s8672_s11 + $0xf68] sm:$0xff]  ;;  %v7606_v44 = vcombine.low %v780_v31, %v784_v32  ;;  %v7655_v31 = vcombine.high %v828_v25, %v832_v26 }
  0xf0   : > { %3965 = vmatprep.subr.bf16.mxu0 %v7559_v46  ;;  %4170 = vmatprep.subr.bf16.mxu1 %v7561_v47  ;;  %v7608_v46 = vcombine.low %v781_v0, %v785_v34  ;;  %v7615_v47 = vcombine.high %v788_v40, %v792_v41  ;;  %v7617_v48 = vcombine.high %v789_v42, %v793_v43  ;;  %v836_v0 = vld [vmem:[%s8672_s11 + $0x10c0] sm:$0xff] }
  0xf1   : > { %v840_v34 = vld [vmem:[%s8672_s11 + $0x10e0] sm:$0xff] }
  0xf3   : > { %3966 = vmatpush1.bf16.msra.mxu0 %v7558_v53  ;;  %4171 = vmatpush1.bf16.msra.mxu1 %v7560_v55  ;;  %v801_v53 = vld [vmem:[%s8672_s11 + $0xfa8] sm:$0xff]  ;;  %v7614_v55 = vcombine.low %v788_v40, %v792_v41  ;;  %v7663_v41 = vcombine.high %v836_v0, %v840_v34 }
  0xf4   : > { %3967 = vmatprep.subr.bf16.mxu0 %v7567_v56  ;;  %4172 = vmatprep.subr.bf16.mxu1 %v7569_v57  ;;  %v7616_v56 = vcombine.low %v789_v42, %v793_v43  ;;  %v7623_v57 = vcombine.high %v796_v50, %v800_v51  ;;  %v7625_v58 = vcombine.high %v797_v52, %v801_v53  ;;  %v844_v43 = vld [vmem:[%s8672_s11 + $0x1100] sm:$0xff] }
  0xf7   : > { %3968 = vmatpush1.bf16.msra.mxu0 %v7566_v1  ;;  %4173 = vmatpush1.bf16.msra.mxu1 %v7568_v2  ;;  %v809_v1 = vld [vmem:[%s8672_s11 + $0xfe8] sm:$0xff]  ;;  %v7622_v2 = vcombine.low %v796_v50, %v800_v51 }
  0xf8   : > { %3969 = vmatprep.subr.bf16.mxu0 %v7575_v3  ;;  %4174 = vmatprep.subr.bf16.mxu1 %v7577_v4  ;;  %v7624_v3 = vcombine.low %v797_v52, %v801_v53  ;;  %v7631_v4 = vcombine.high %v804_v61, %v808_v62  ;;  %v7633_v5 = vcombine.high %v805_v63, %v809_v1  ;;  %v852_v53 = vld [vmem:[%s8672_s11 + $0x1140] sm:$0xff] }
  0xfb   : > { %3970 = vmatpush1.bf16.msra.mxu0 %v7574_v9  ;;  %4175 = vmatpush1.bf16.msra.mxu1 %v7576_v11  ;;  %v817_v9 = vld [vmem:[%s8672_s11 + $0x1028] sm:$0xff]  ;;  %v7630_v11 = vcombine.low %v804_v61, %v808_v62 }
  0xfc   : > { %3971 = vmatprep.subr.bf16.mxu0 %v7583_v12  ;;  %4176 = vmatprep.subr.bf16.mxu1 %v7585_v13  ;;  %v7632_v12 = vcombine.low %v805_v63, %v809_v1  ;;  %v7639_v13 = vcombine.high %v812_v30, %v816_v7  ;;  %v7641_v14 = vcombine.high %v813_v8, %v817_v9  ;;  %v860_v1 = vld [vmem:[%s8672_s11 + $0x1180] sm:$0xff] }
  0xff   : > { %3972 = vmatpush1.bf16.msra.mxu0 %v7582_v18  ;;  %4177 = vmatpush1.bf16.msra.mxu1 %v7584_v19  ;;  %v821_v18 = vld [vmem:[%s8672_s11 + $0x1048] sm:$0xff] }
 0x100   : > { %3973 = vmatprep.subr.bf16.mxu0 %v7591_v20  ;;  %4178 = vmatprep.subr.bf16.mxu1 %v7593_v21  ;;  %v825_v19 = vld [vmem:[%s8672_s11 + $0x1068] sm:$0xff]  ;;  %v7638_v20 = vcombine.low %v812_v30, %v816_v7  ;;  %v7640_v21 = vcombine.low %v813_v8, %v817_v9  ;;  %v868_v9 = vld [vmem:[%s8672_s11 + $0x11c0] sm:$0xff] }
 0x101   : > { %v7649_v23 = vcombine.high %v821_v18, %v825_v19 }
 0x103   : > { %3974 = vmatpush1.bf16.msra.mxu0 %v7590_v27  ;;  %4179 = vmatpush1.bf16.msra.mxu1 %v7592_v28  ;;  %v829_v27 = vld [vmem:[%s8672_s11 + $0x1088] sm:$0xff] }
 0x104   : > { %3975 = vmatprep.subr.bf16.mxu0 %v7599_v29  ;;  %4180 = vmatprep.subr.bf16.mxu1 %v7601_v60  ;;  %v833_v28 = vld [vmem:[%s8672_s11 + $0x10a8] sm:$0xff]  ;;  %v7646_v29 = vcombine.low %v820_v15, %v824_v16  ;;  %v7648_v60 = vcombine.low %v821_v18, %v825_v19  ;;  %v302_v19 = vld [vmem:[%s8672_s11 + $0x10] sm:$0xff] }
 0x105   : > { %v7657_v32 = vcombine.high %v829_v27, %v833_v28  ;;  %v7656_v40 = vcombine.low %v829_v27, %v833_v28 }
 0x107   : > { %3976 = vmatpush1.bf16.msra.mxu0 %v7598_v35  ;;  %4181 = vmatpush1.bf16.msra.mxu1 %v7600_v36  ;;  %v8609_v35 = vmov 0   ;;  %v837_v36 = vld [vmem:[%s8672_s11 + $0x10c8] sm:$0xff] }
 0x108   : > { %3977 = vmatprep.subr.bf16.mxu0 %v7607_v37  ;;  %4182 = vmatprep.subr.bf16.mxu1 %v7609_v38  ;;  %v841_v37 = vld [vmem:[%s8672_s11 + $0x10e8] sm:$0xff]  ;;  %v7654_v38 = vcombine.low %v828_v25, %v832_v26 }
 0x109   : > { %v7665_v42 = vcombine.high %v837_v36, %v841_v37  ;;  %v7664_v50 = vcombine.low %v837_v36, %v841_v37  ;;  %v7125_v25 = vld.sshfl [vmem:[%s8667_s30 + $0x8] sm:$0x1 pattern:$0x75316420] }
 0x10b   : > { %3978 = vmatpush1.bf16.msra.mxu0 %v7606_v44  ;;  %4183 = vmatpush1.bf16.msra.mxu1 %v7608_v46  ;;  %v848_v44 = vld [vmem:[%s8672_s11 + $0x1120] sm:$0xff]  ;;  %v845_v46 = vld [vmem:[%s8672_s11 + $0x1108] sm:$0xff] }
 0x10c   : > { %3979 = vmatprep.subr.bf16.mxu0 %v7615_v47  ;;  %4184 = vmatprep.subr.bf16.mxu1 %v7617_v48  ;;  %v849_v47 = vld [vmem:[%s8672_s11 + $0x1128] sm:$0xff]  ;;  %v7662_v48 = vcombine.low %v836_v0, %v840_v34  ;;  %v7671_v51 = vcombine.high %v844_v43, %v848_v44  ;;  %v315_v0 = vld [vmem:[%s8672_s11 + $0x78] sm:$0xff] }
 0x10d   : > { %v7673_v52 = vcombine.high %v845_v46, %v849_v47  ;;  %v7672_v61 = vcombine.low %v845_v46, %v849_v47 }
 0x10f   : > { %3980 = vmatpush1.bf16.msra.mxu0 %v7614_v55  ;;  %4185 = vmatpush1.bf16.msra.mxu1 %v7616_v56  ;;  %v856_v55 = vld [vmem:[%s8672_s11 + $0x1160] sm:$0xff]  ;;  %v853_v56 = vld [vmem:[%s8672_s11 + $0x1148] sm:$0xff] }
 0x110   : > { %3981 = vmatprep.subr.bf16.mxu0 %v7623_v57  ;;  %4186 = vmatprep.subr.bf16.mxu1 %v7625_v58  ;;  %v857_v57 = vld [vmem:[%s8672_s11 + $0x1168] sm:$0xff]  ;;  %v7670_v58 = vcombine.low %v844_v43, %v848_v44  ;;  %v7679_v62 = vcombine.high %v852_v53, %v856_v55 }
 0x111   : > { %v7681_v63 = vcombine.high %v853_v56, %v857_v57  ;;  %v7680_v30 = vcombine.low %v853_v56, %v857_v57 }
 0x113   : > { %3982 = vmatpush1.bf16.msra.mxu0 %v7622_v2  ;;  %4187 = vmatpush1.bf16.msra.mxu1 %v7624_v3  ;;  %v864_v2 = vld [vmem:[%s8672_s11 + $0x11a0] sm:$0xff]  ;;  %v861_v3 = vld [vmem:[%s8672_s11 + $0x1188] sm:$0xff] }
 0x114   : > { %3983 = vmatprep.subr.bf16.mxu0 %v7631_v4  ;;  %4188 = vmatprep.subr.bf16.mxu1 %v7633_v5  ;;  %v865_v4 = vld [vmem:[%s8672_s11 + $0x11a8] sm:$0xff]  ;;  %v7678_v5 = vcombine.low %v852_v53, %v856_v55  ;;  %v7687_v7 = vcombine.high %v860_v1, %v864_v2 }
 0x115   : > { %v7689_v8 = vcombine.high %v861_v3, %v865_v4  ;;  %v7688_v15 = vcombine.low %v861_v3, %v865_v4  ;;  %v342_v4 = vld [vmem:[%s8672_s11 + $0x150] sm:$0xff] }
 0x117   : > { %3984 = vmatpush1.bf16.msra.mxu0 %v7630_v11  ;;  %4189 = vmatpush1.bf16.msra.mxu1 %v7632_v12  ;;  %v872_v11 = vld [vmem:[%s8672_s11 + $0x11e0] sm:$0xff]  ;;  %v869_v12 = vld [vmem:[%s8672_s11 + $0x11c8] sm:$0xff] }
 0x118   : > { %3994 = vmatprep.subr.bf16.mxu0 %v7639_v13  ;;  %4199 = vmatprep.subr.bf16.mxu1 %v7641_v14  ;;  %v873_v13 = vld [vmem:[%s8672_s11 + $0x11e8] sm:$0xff]  ;;  %v7686_v14 = vcombine.low %v860_v1, %v864_v2  ;;  %v7695_v16 = vcombine.high %v868_v9, %v872_v11 }
 0x119   : > { %v7697_v18 = vcombine.high %v869_v12, %v873_v13  ;;  %v7696_v26 = vcombine.low %v869_v12, %v873_v13  ;;  %v350_v13 = vld [vmem:[%s8672_s11 + $0x190] sm:$0xff] }
 0x11a   : > { %3986 = vmatmul.mubr.bf16.vlgmr.msra.gmra.mrb[0].mxu0 %v9000_v17  ;;  %4191 = vmatmul.mubr.bf16.vlgmr.msra.gmra.mrb[0].mxu1 %v9000_v17 }
 0x11b   : > { %3995 = vmatpush1.bf16.msra.mxu0 %v7638_v20  ;;  %4200 = vmatpush1.bf16.msra.mxu1 %v7640_v21  ;;  %v306_v20 = vld [vmem:[%s8672_s11 + $0x30] sm:$0xff]  ;;  %v303_v21 = vld [vmem:[%s8672_s11 + $0x18] sm:$0xff] }
 0x11c   : > { %3996 = vmatprep.subr.bf16.mxu0 %v7647_v22  ;;  %4201 = vmatprep.subr.bf16.mxu1 %v7649_v23  ;;  %v307_v22 = vld [vmem:[%s8672_s11 + $0x38] sm:$0xff]  ;;  %v7694_v23 = vcombine.low %v868_v9, %v872_v11  ;;  %v7131_v27 = vcombine.high %v302_v19, %v306_v20  ;;  %v7130_v34 = vcombine.low %v302_v19, %v306_v20 }
 0x11d   : > { %4026 = vmatprep.mubr.bf16.mxu0 %v8609_v35  ;;  %4231 = vmatprep.mubr.bf16.mxu1 %v8609_v35  ;;  %v7133_v28 = vcombine.high %v303_v21, %v307_v22  ;;  %v7132_v36 = vcombine.low %v303_v21, %v307_v22  ;;  %v358_v22 = vld [vmem:[%s8672_s11 + $0x1d0] sm:$0xff] }
 0x11f   : > { %3997 = vmatpush1.bf16.msra.mxu0 %v7646_v29  ;;  %4202 = vmatpush1.bf16.msra.mxu1 %v7648_v60  ;;  %v310_v29 = vld [vmem:[%s8672_s11 + $0x50] sm:$0xff] }
 0x120   : > { %3998 = vmatprep.subr.bf16.mxu0 %v7655_v31  ;;  %4203 = vmatprep.subr.bf16.mxu1 %v7657_v32  ;;  %v314_v60 = vld [vmem:[%s8672_s11 + $0x70] sm:$0xff]  ;;  %v9040_v31 = vrot.slane %v7125_v25, %v8704_v54  ;;  %v311_v32 = vld [vmem:[%s8672_s11 + $0x58] sm:$0xff] }
 0x121   : > { %v7139_v37 = vcombine.high %v310_v29, %v314_v60  ;;  %v319_v54 = vld [vmem:[%s8672_s11 + $0x98] sm:$0xff]  ;;  %v7138_v43 = vcombine.low %v310_v29, %v314_v60  ;;  %v7140_v44 = vcombine.low %v311_v32, %v315_v0 }
 0x122   : > { %v359_v25 = vld [vmem:[%s8672_s11 + $0x1d8] sm:$0xff] }
 0x123   : > { %3999 = vmatpush1.bf16.msra.mxu0 %v7654_v38  ;;  %4204 = vmatpush1.bf16.msra.mxu1 %v7656_v40  ;;  %v7141_v38 = vcombine.high %v311_v32, %v315_v0  ;;  %v318_v40 = vld [vmem:[%s8672_s11 + $0x90] sm:$0xff] }
 0x124   : > { %4000 = vmatprep.subr.bf16.mxu0 %v7663_v41  ;;  %4205 = vmatprep.subr.bf16.mxu1 %v7665_v42  ;;  %v322_v41 = vld [vmem:[%s8672_s11 + $0xb0] sm:$0xff]  ;;  %v323_v42 = vld [vmem:[%s8672_s11 + $0xb8] sm:$0xff] }
 0x125   : > { %v7147_v46 = vcombine.high %v318_v40, %v322_v41  ;;  %v7149_v47 = vcombine.high %v319_v54, %v323_v42  ;;  %v7146_v53 = vcombine.low %v318_v40, %v322_v41  ;;  %v7148_v55 = vcombine.low %v319_v54, %v323_v42  ;;  %v366_v32 = vld [vmem:[%s8672_s11 + $0x210] sm:$0xff] }
 0x126   : > { %v370_v0 = vld [vmem:[%s8672_s11 + $0x230] sm:$0xff] }
 0x127   : > { %4001 = vmatpush1.bf16.msra.mxu0 %v7662_v48  ;;  %4206 = vmatpush1.bf16.msra.mxu1 %v7664_v50  ;;  %v326_v48 = vld [vmem:[%s8672_s11 + $0xd0] sm:$0xff]  ;;  %v7195_v40 = vcombine.high %v366_v32, %v370_v0 }
 0x128   : > { %4002 = vmatprep.subr.bf16.mxu0 %v7671_v51  ;;  %4207 = vmatprep.subr.bf16.mxu1 %v7673_v52  ;;  %v330_v50 = vld [vmem:[%s8672_s11 + $0xf0] sm:$0xff]  ;;  %v327_v51 = vld [vmem:[%s8672_s11 + $0xd8] sm:$0xff] }
 0x129   : > { %v331_v52 = vld [vmem:[%s8672_s11 + $0xf8] sm:$0xff]  ;;  %v7155_v56 = vcombine.high %v326_v48, %v330_v50  ;;  %v7154_v1 = vcombine.low %v326_v48, %v330_v50  ;;  %v374_v54 = vld [vmem:[%s8672_s11 + $0x250] sm:$0xff] }
 0x12a   : > { %v7157_v57 = vcombine.high %v327_v51, %v331_v52  ;;  %v378_v42 = vld [vmem:[%s8672_s11 + $0x270] sm:$0xff] }
 0x12b   : > { %4003 = vmatpush1.bf16.msra.mxu0 %v7670_v58  ;;  %4208 = vmatpush1.bf16.msra.mxu1 %v7672_v61  ;;  %v334_v58 = vld [vmem:[%s8672_s11 + $0x110] sm:$0xff]  ;;  %v7203_v48 = vcombine.high %v374_v54, %v378_v42 }
 0x12c   : > { %4004 = vmatprep.subr.bf16.mxu0 %v7679_v62  ;;  %4209 = vmatprep.subr.bf16.mxu1 %v7681_v63  ;;  %v338_v61 = vld [vmem:[%s8672_s11 + $0x130] sm:$0xff]  ;;  %v335_v62 = vld [vmem:[%s8672_s11 + $0x118] sm:$0xff] }
 0x12d   : > { %v339_v63 = vld [vmem:[%s8672_s11 + $0x138] sm:$0xff]  ;;  %v7163_v2 = vcombine.high %v334_v58, %v338_v61 }
 0x12e   : > { %v7165_v3 = vcombine.high %v335_v62, %v339_v63  ;;  %v7164_v9 = vcombine.low %v335_v62, %v339_v63  ;;  %v390_v62 = vld [vmem:[%s8672_s11 + $0x2d0] sm:$0xff] }
 0x12f   : > { %4005 = vmatpush1.bf16.msra.mxu0 %v7678_v5  ;;  %4210 = vmatpush1.bf16.msra.mxu1 %v7680_v30  ;;  %v346_v5 = vld [vmem:[%s8672_s11 + $0x170] sm:$0xff]  ;;  %v343_v30 = vld [vmem:[%s8672_s11 + $0x158] sm:$0xff] }
 0x130   : > { %4006 = vmatprep.subr.bf16.mxu0 %v7687_v7  ;;  %4211 = vmatprep.subr.bf16.mxu1 %v7689_v8  ;;  %v347_v7 = vld [vmem:[%s8672_s11 + $0x178] sm:$0xff]  ;;  %v7162_v8 = vcombine.low %v334_v58, %v338_v61  ;;  %v7171_v11 = vcombine.high %v342_v4, %v346_v5  ;;  %v394_v63 = vld [vmem:[%s8672_s11 + $0x2f0] sm:$0xff] }
 0x131   : > { %v7173_v12 = vcombine.high %v343_v30, %v347_v7  ;;  %v7172_v19 = vcombine.low %v343_v30, %v347_v7  ;;  %v398_v30 = vld [vmem:[%s8672_s11 + $0x310] sm:$0xff] }
 0x132   : > { %v402_v7 = vld [vmem:[%s8672_s11 + $0x330] sm:$0xff] }
 0x133   : > { %4007 = vmatpush1.bf16.msra.mxu0 %v7686_v14  ;;  %4212 = vmatpush1.bf16.msra.mxu1 %v7688_v15  ;;  %v354_v14 = vld [vmem:[%s8672_s11 + $0x1b0] sm:$0xff]  ;;  %v351_v15 = vld [vmem:[%s8672_s11 + $0x198] sm:$0xff] }
 0x134   : > { %4008 = vmatprep.subr.bf16.mxu0 %v7695_v16  ;;  %4213 = vmatprep.subr.bf16.mxu1 %v7697_v18  ;;  %v355_v16 = vld [vmem:[%s8672_s11 + $0x1b8] sm:$0xff]  ;;  %v7170_v18 = vcombine.low %v342_v4, %v346_v5  ;;  %v7179_v20 = vcombine.high %v350_v13, %v354_v14  ;;  %v7219_v4 = vcombine.high %v390_v62, %v394_v63 }
 0x135   : > { %v7181_v21 = vcombine.high %v351_v15, %v355_v16 }
 0x137   : > { %4009 = vmatpush1.bf16.msra.mxu0 %v7694_v23  ;;  %4214 = vmatpush1.bf16.msra.mxu1 %v7696_v26  ;;  %v362_v23 = vld [vmem:[%s8672_s11 + $0x1f0] sm:$0xff]  ;;  %v363_v26 = vld [vmem:[%s8672_s11 + $0x1f8] sm:$0xff] }
 0x138   : > { %4240 = vmatprep.subr.bf16.mxu0 %v7131_v27  ;;  %4445 = vmatprep.subr.bf16.mxu1 %v7133_v28  ;;  %v7178_v27 = vcombine.low %v350_v13, %v354_v14  ;;  %v7180_v28 = vcombine.low %v351_v15, %v355_v16  ;;  %v7187_v29 = vcombine.high %v358_v22, %v362_v23  ;;  %v406_v15 = vld [vmem:[%s8672_s11 + $0x350] sm:$0xff] }
 0x139   : > { %v7189_v60 = vcombine.high %v359_v25, %v363_v26  ;;  %v7227_v13 = vcombine.high %v398_v30, %v402_v7  ;;  %v410_v16 = vld [vmem:[%s8672_s11 + $0x370] sm:$0xff] }
 0x13a   : > { %4027 = vmatmul.mubr.bf16.vlgmr.msra.gmra.mrb[0].mxu0 %v9040_v31  ;;  %4232 = vmatmul.mubr.bf16.vlgmr.msra.gmra.mrb[0].mxu1 %v9040_v31 }
 0x13b   : > { %4241 = vmatpush1.bf16.msra.mxu0 %v7130_v34  ;;  %4446 = vmatpush1.bf16.msra.mxu1 %v7132_v36  ;;  %v367_v34 = vld [vmem:[%s8672_s11 + $0x218] sm:$0xff] }
 0x13c   : > { %4242 = vmatprep.subr.bf16.mxu0 %v7139_v37  ;;  %4447 = vmatprep.subr.bf16.mxu1 %v7141_v38  ;;  %v371_v36 = vld [vmem:[%s8672_s11 + $0x238] sm:$0xff]  ;;  %v7186_v37 = vcombine.low %v358_v22, %v362_v23  ;;  %v7188_v38 = vcombine.low %v359_v25, %v363_v26  ;;  %v7235_v22 = vcombine.high %v406_v15, %v410_v16  ;;  %v414_v25 = vld [vmem:[%s8672_s11 + $0x390] sm:$0xff] }
 0x13d   : > { %4272 = vmatprep.mubr.bf16.mxu0 %v8724_v10  ;;  %4477 = vmatprep.mubr.bf16.mxu1 %v8724_v10  ;;  %v7156_v10 = vcombine.low %v327_v51, %v331_v52  ;;  %v7197_v41 = vcombine.high %v367_v34, %v371_v36  ;;  %v382_v51 = vld [vmem:[%s8672_s11 + $0x290] sm:$0xff] }
 0x13e   : > { %v386_v52 = vld [vmem:[%s8672_s11 + $0x2b0] sm:$0xff] }
 0x13f   : > { %4243 = vmatpush1.bf16.msra.mxu0 %v7138_v43  ;;  %4448 = vmatpush1.bf16.msra.mxu1 %v7140_v44  ;;  %v375_v43 = vld [vmem:[%s8672_s11 + $0x258] sm:$0xff]  ;;  %v7211_v58 = vcombine.high %v382_v51, %v386_v52  ;;  %v418_v26 = vld [vmem:[%s8672_s11 + $0x3b0] sm:$0xff] }
 0x140   : > { %4244 = vmatprep.subr.bf16.mxu0 %v7147_v46  ;;  %4449 = vmatprep.subr.bf16.mxu1 %v7149_v47  ;;  %v379_v44 = vld [vmem:[%s8672_s11 + $0x278] sm:$0xff]  ;;  %v7194_v46 = vcombine.low %v366_v32, %v370_v0  ;;  %v7196_v47 = vcombine.low %v367_v34, %v371_v36  ;;  %v7243_v32 = vcombine.high %v414_v25, %v418_v26  ;;  %v422_v34 = vld [vmem:[%s8672_s11 + $0x3d0] sm:$0xff] }
 0x141   : > { %v7205_v50 = vcombine.high %v375_v43, %v379_v44  ;;  %v426_v36 = vld [vmem:[%s8672_s11 + $0x3f0] sm:$0xff] }
 0x143   : > { %4245 = vmatpush1.bf16.msra.mxu0 %v7146_v53  ;;  %4450 = vmatpush1.bf16.msra.mxu1 %v7148_v55  ;;  %v383_v53 = vld [vmem:[%s8672_s11 + $0x298] sm:$0xff] }
 0x144   : > { %4246 = vmatprep.subr.bf16.mxu0 %v7155_v56  ;;  %4451 = vmatprep.subr.bf16.mxu1 %v7157_v57  ;;  %v387_v55 = vld [vmem:[%s8672_s11 + $0x2b8] sm:$0xff]  ;;  %v7202_v56 = vcombine.low %v374_v54, %v378_v42  ;;  %v7204_v57 = vcombine.low %v375_v43, %v379_v44  ;;  %v7251_v54 = vcombine.high %v422_v34, %v426_v36  ;;  %v430_v43 = vld [vmem:[%s8672_s11 + $0x410] sm:$0xff] }
 0x145   : > { %v7213_v61 = vcombine.high %v383_v53, %v387_v55  ;;  %v434_v44 = vld [vmem:[%s8672_s11 + $0x430] sm:$0xff] }
 0x147   : > { %4247 = vmatpush1.bf16.msra.mxu0 %v7154_v1  ;;  %4452 = vmatpush1.bf16.msra.mxu1 %v7156_v10  ;;  %v391_v1 = vld [vmem:[%s8672_s11 + $0x2d8] sm:$0xff] }
 0x148   : > { %4248 = vmatprep.subr.bf16.mxu0 %v7163_v2  ;;  %4453 = vmatprep.subr.bf16.mxu1 %v7165_v3  ;;  %v395_v10 = vld [vmem:[%s8672_s11 + $0x2f8] sm:$0xff]  ;;  %v7210_v2 = vcombine.low %v382_v51, %v386_v52  ;;  %v7212_v3 = vcombine.low %v383_v53, %v387_v55  ;;  %v7259_v51 = vcombine.high %v430_v43, %v434_v44  ;;  %v438_v53 = vld [vmem:[%s8672_s11 + $0x450] sm:$0xff] }
 0x149   : > { %v7221_v5 = vcombine.high %v391_v1, %v395_v10  ;;  %v442_v55 = vld [vmem:[%s8672_s11 + $0x470] sm:$0xff] }
 0x14b   : > { %4249 = vmatpush1.bf16.msra.mxu0 %v7162_v8  ;;  %4454 = vmatpush1.bf16.msra.mxu1 %v7164_v9  ;;  %v399_v8 = vld [vmem:[%s8672_s11 + $0x318] sm:$0xff] }
 0x14c   : > { %4250 = vmatprep.subr.bf16.mxu0 %v7171_v11  ;;  %4455 = vmatprep.subr.bf16.mxu1 %v7173_v12  ;;  %v403_v9 = vld [vmem:[%s8672_s11 + $0x338] sm:$0xff]  ;;  %v7218_v11 = vcombine.low %v390_v62, %v394_v63  ;;  %v7220_v12 = vcombine.low %v391_v1, %v395_v10  ;;  %v7267_v62 = vcombine.high %v438_v53, %v442_v55  ;;  %v446_v1 = vld [vmem:[%s8672_s11 + $0x490] sm:$0xff] }
 0x14d   : > { %v7229_v14 = vcombine.high %v399_v8, %v403_v9  ;;  %v450_v10 = vld [vmem:[%s8672_s11 + $0x4b0] sm:$0xff] }
 0x14f   : > { %4251 = vmatpush1.bf16.msra.mxu0 %v7170_v18  ;;  %4456 = vmatpush1.bf16.msra.mxu1 %v7172_v19  ;;  %v407_v18 = vld [vmem:[%s8672_s11 + $0x358] sm:$0xff] }
 0x150   : > { %4252 = vmatprep.subr.bf16.mxu0 %v7179_v20  ;;  %4457 = vmatprep.subr.bf16.mxu1 %v7181_v21  ;;  %v411_v19 = vld [vmem:[%s8672_s11 + $0x378] sm:$0xff]  ;;  %v7226_v20 = vcombine.low %v398_v30, %v402_v7  ;;  %v7228_v21 = vcombine.low %v399_v8, %v403_v9  ;;  %v7275_v30 = vcombine.high %v446_v1, %v450_v10  ;;  %v454_v8 = vld [vmem:[%s8672_s11 + $0x4d0] sm:$0xff] }
 0x151   : > { %v7237_v23 = vcombine.high %v407_v18, %v411_v19  ;;  %v458_v9 = vld [vmem:[%s8672_s11 + $0x4f0] sm:$0xff] }
 0x153   : > { %4253 = vmatpush1.bf16.msra.mxu0 %v7178_v27  ;;  %4458 = vmatpush1.bf16.msra.mxu1 %v7180_v28  ;;  %v415_v27 = vld [vmem:[%s8672_s11 + $0x398] sm:$0xff] }
 0x154   : > { %4254 = vmatprep.subr.bf16.mxu0 %v7187_v29  ;;  %4459 = vmatprep.subr.bf16.mxu1 %v7189_v60  ;;  %v419_v28 = vld [vmem:[%s8672_s11 + $0x3b8] sm:$0xff]  ;;  %v7234_v29 = vcombine.low %v406_v15, %v410_v16  ;;  %v7236_v60 = vcombine.low %v407_v18, %v411_v19  ;;  %v462_v16 = vld [vmem:[%s8672_s11 + $0x510] sm:$0xff] }
 0x155   : > { %v7245_v0 = vcombine.high %v415_v27, %v419_v28  ;;  %v466_v18 = vld [vmem:[%s8672_s11 + $0x530] sm:$0xff]  ;;  %v463_v19 = vld [vmem:[%s8672_s11 + $0x518] sm:$0xff] }
 0x157   : > { %4255 = vmatpush1.bf16.msra.mxu0 %v7186_v37  ;;  %4460 = vmatpush1.bf16.msra.mxu1 %v7188_v38  ;;  %v423_v37 = vld [vmem:[%s8672_s11 + $0x3d8] sm:$0xff] }
 0x158   : > { %4256 = vmatprep.subr.bf16.mxu0 %v7195_v40  ;;  %4461 = vmatprep.subr.bf16.mxu1 %v7197_v41  ;;  %v427_v38 = vld [vmem:[%s8672_s11 + $0x3f8] sm:$0xff]  ;;  %v7242_v40 = vcombine.low %v414_v25, %v418_v26  ;;  %v7244_v41 = vcombine.low %v415_v27, %v419_v28  ;;  %v470_v25 = vld [vmem:[%s8672_s11 + $0x550] sm:$0xff] }
 0x159   : > { %v7253_v42 = vcombine.high %v423_v37, %v427_v38  ;;  %v474_v26 = vld [vmem:[%s8672_s11 + $0x570] sm:$0xff]  ;;  %v471_v27 = vld [vmem:[%s8672_s11 + $0x558] sm:$0xff] }
 0x15a   : > { %v475_v28 = vld [vmem:[%s8672_s11 + $0x578] sm:$0xff] }
 0x15b   : > { %4257 = vmatpush1.bf16.msra.mxu0 %v7194_v46  ;;  %4462 = vmatpush1.bf16.msra.mxu1 %v7196_v47  ;;  %v431_v46 = vld [vmem:[%s8672_s11 + $0x418] sm:$0xff] }
 0x15c   : > { %4258 = vmatprep.subr.bf16.mxu0 %v7203_v48  ;;  %4463 = vmatprep.subr.bf16.mxu1 %v7205_v50  ;;  %v435_v47 = vld [vmem:[%s8672_s11 + $0x438] sm:$0xff]  ;;  %v7250_v48 = vcombine.low %v422_v34, %v426_v36  ;;  %v7252_v50 = vcombine.low %v423_v37, %v427_v38  ;;  %v478_v34 = vld [vmem:[%s8672_s11 + $0x590] sm:$0xff] }
 0x15d   : > { %v7261_v52 = vcombine.high %v431_v46, %v435_v47  ;;  %v482_v36 = vld [vmem:[%s8672_s11 + $0x5b0] sm:$0xff]  ;;  %v479_v37 = vld [vmem:[%s8672_s11 + $0x598] sm:$0xff] }
 0x15e   : > { %v483_v38 = vld [vmem:[%s8672_s11 + $0x5b8] sm:$0xff] }
 0x15f   : > { %4259 = vmatpush1.bf16.msra.mxu0 %v7202_v56  ;;  %4464 = vmatpush1.bf16.msra.mxu1 %v7204_v57  ;;  %v439_v56 = vld [vmem:[%s8672_s11 + $0x458] sm:$0xff] }
 0x160   : > { %4260 = vmatprep.subr.bf16.mxu0 %v7211_v58  ;;  %4465 = vmatprep.subr.bf16.mxu1 %v7213_v61  ;;  %v443_v57 = vld [vmem:[%s8672_s11 + $0x478] sm:$0xff]  ;;  %v7258_v58 = vcombine.low %v430_v43, %v434_v44  ;;  %v7260_v61 = vcombine.low %v431_v46, %v435_v47  ;;  %v486_v43 = vld [vmem:[%s8672_s11 + $0x5d0] sm:$0xff] }
 0x161   : > { %v7269_v63 = vcombine.high %v439_v56, %v443_v57  ;;  %v490_v44 = vld [vmem:[%s8672_s11 + $0x5f0] sm:$0xff]  ;;  %v487_v46 = vld [vmem:[%s8672_s11 + $0x5d8] sm:$0xff] }
 0x162   : > { %v491_v47 = vld [vmem:[%s8672_s11 + $0x5f8] sm:$0xff] }
 0x163   : > { %4261 = vmatpush1.bf16.msra.mxu0 %v7210_v2  ;;  %4466 = vmatpush1.bf16.msra.mxu1 %v7212_v3  ;;  %v447_v2 = vld [vmem:[%s8672_s11 + $0x498] sm:$0xff] }
 0x164   : > { %4262 = vmatprep.subr.bf16.mxu0 %v7219_v4  ;;  %4467 = vmatprep.subr.bf16.mxu1 %v7221_v5  ;;  %v451_v3 = vld [vmem:[%s8672_s11 + $0x4b8] sm:$0xff]  ;;  %v7266_v4 = vcombine.low %v438_v53, %v442_v55  ;;  %v7268_v5 = vcombine.low %v439_v56, %v443_v57  ;;  %v494_v53 = vld [vmem:[%s8672_s11 + $0x610] sm:$0xff] }
 0x165   : > { %v7277_v7 = vcombine.high %v447_v2, %v451_v3  ;;  %v498_v55 = vld [vmem:[%s8672_s11 + $0x630] sm:$0xff]  ;;  %v495_v56 = vld [vmem:[%s8672_s11 + $0x618] sm:$0xff] }
 0x166   : > { %v499_v57 = vld [vmem:[%s8672_s11 + $0x638] sm:$0xff] }
 0x167   : > { %4263 = vmatpush1.bf16.msra.mxu0 %v7218_v11  ;;  %4468 = vmatpush1.bf16.msra.mxu1 %v7220_v12  ;;  %v455_v11 = vld [vmem:[%s8672_s11 + $0x4d8] sm:$0xff] }
 0x168   : > { %4264 = vmatprep.subr.bf16.mxu0 %v7227_v13  ;;  %4469 = vmatprep.subr.bf16.mxu1 %v7229_v14  ;;  %v459_v12 = vld [vmem:[%s8672_s11 + $0x4f8] sm:$0xff]  ;;  %v7276_v13 = vcombine.low %v447_v2, %v451_v3  ;;  %v7283_v14 = vcombine.high %v454_v8, %v458_v9 }
 0x169   : > { %v7285_v15 = vcombine.high %v455_v11, %v459_v12  ;;  %v503_v2 = vld [vmem:[%s8672_s11 + $0x658] sm:$0xff] }
 0x16a   : > { %v507_v3 = vld [vmem:[%s8672_s11 + $0x678] sm:$0xff] }
 0x16b   : > { %4265 = vmatpush1.bf16.msra.mxu0 %v7226_v20  ;;  %4470 = vmatpush1.bf16.msra.mxu1 %v7228_v21  ;;  %v467_v20 = vld [vmem:[%s8672_s11 + $0x538] sm:$0xff]  ;;  %v7282_v21 = vcombine.low %v454_v8, %v458_v9  ;;  %v510_v8 = vld [vmem:[%s8672_s11 + $0x690] sm:$0xff] }
 0x16c   : > { %4266 = vmatprep.subr.bf16.mxu0 %v7235_v22  ;;  %4471 = vmatprep.subr.bf16.mxu1 %v7237_v23  ;;  %v7291_v22 = vcombine.high %v462_v16, %v466_v18  ;;  %v7293_v23 = vcombine.high %v463_v19, %v467_v20  ;;  %v514_v9 = vld [vmem:[%s8672_s11 + $0x6b0] sm:$0xff] }
 0x16f   : > { %4267 = vmatpush1.bf16.msra.mxu0 %v7234_v29  ;;  %4472 = vmatpush1.bf16.msra.mxu1 %v7236_v60  ;;  %v7290_v29 = vcombine.low %v462_v16, %v466_v18  ;;  %v7292_v60 = vcombine.low %v463_v19, %v467_v20  ;;  %v518_v16 = vld [vmem:[%s8672_s11 + $0x6d0] sm:$0xff]  ;;  %v519_v19 = vld [vmem:[%s8672_s11 + $0x6d8] sm:$0xff] }
 0x170   : > { %4268 = vmatprep.subr.bf16.mxu0 %v7243_v32  ;;  %4473 = vmatprep.subr.bf16.mxu1 %v7245_v0  ;;  %v7299_v32 = vcombine.high %v470_v25, %v474_v26  ;;  %v7301_v0 = vcombine.high %v471_v27, %v475_v28  ;;  %v522_v18 = vld [vmem:[%s8672_s11 + $0x6f0] sm:$0xff]  ;;  %v523_v20 = vld [vmem:[%s8672_s11 + $0x6f8] sm:$0xff] }
 0x173   : > { %4269 = vmatpush1.bf16.msra.mxu0 %v7242_v40  ;;  %4474 = vmatpush1.bf16.msra.mxu1 %v7244_v41  ;;  %v7298_v40 = vcombine.low %v470_v25, %v474_v26  ;;  %v7300_v41 = vcombine.low %v471_v27, %v475_v28  ;;  %v526_v25 = vld [vmem:[%s8672_s11 + $0x710] sm:$0xff]  ;;  %v527_v27 = vld [vmem:[%s8672_s11 + $0x718] sm:$0xff] }
 0x174   : > { %4270 = vmatprep.subr.bf16.mxu0 %v7251_v54  ;;  %4475 = vmatprep.subr.bf16.mxu1 %v7253_v42  ;;  %v7307_v54 = vcombine.high %v478_v34, %v482_v36  ;;  %v7309_v42 = vcombine.high %v479_v37, %v483_v38  ;;  %v530_v26 = vld [vmem:[%s8672_s11 + $0x730] sm:$0xff]  ;;  %v531_v28 = vld [vmem:[%s8672_s11 + $0x738] sm:$0xff] }
 0x177   : > { %4271 = vmatpush1.bf16.msra.mxu0 %v7250_v48  ;;  %4476 = vmatpush1.bf16.msra.mxu1 %v7252_v50  ;;  %v7306_v48 = vcombine.low %v478_v34, %v482_v36  ;;  %v7308_v50 = vcombine.low %v479_v37, %v483_v38  ;;  %v534_v34 = vld [vmem:[%s8672_s11 + $0x750] sm:$0xff]  ;;  %v535_v37 = vld [vmem:[%s8672_s11 + $0x758] sm:$0xff] }
 0x178   : > { %4281 = vmatprep.subr.bf16.mxu0 %v7259_v51  ;;  %4486 = vmatprep.subr.bf16.mxu1 %v7261_v52  ;;  %v7315_v51 = vcombine.high %v486_v43, %v490_v44  ;;  %v7317_v52 = vcombine.high %v487_v46, %v491_v47  ;;  %v538_v36 = vld [vmem:[%s8672_s11 + $0x770] sm:$0xff]  ;;  %v539_v38 = vld [vmem:[%s8672_s11 + $0x778] sm:$0xff] }
 0x17a   : > { %4273 = vmatmul.mubr.bf16.vlgmr.msra.gmra.mrb[4].mxu0 %v8766_v24  ;;  %4478 = vmatmul.mubr.bf16.vlgmr.msra.gmra.mrb[4].mxu1 %v8766_v24  ;;  %v7274_v24 = vcombine.low %v446_v1, %v450_v10  ;;  %v502_v1 = vld [vmem:[%s8672_s11 + $0x650] sm:$0xff] }
 0x17b   : > { %4282 = vmatpush1.bf16.msra.mxu0 %v7258_v58  ;;  %4487 = vmatpush1.bf16.msra.mxu1 %v7260_v61  ;;  %v7314_v58 = vcombine.low %v486_v43, %v490_v44  ;;  %v7316_v61 = vcombine.low %v487_v46, %v491_v47  ;;  %v506_v10 = vld [vmem:[%s8672_s11 + $0x670] sm:$0xff]  ;;  %v543_v46 = vld [vmem:[%s8672_s11 + $0x798] sm:$0xff] }
 0x17c   : > { %4283 = vmatprep.subr.bf16.mxu0 %v7267_v62  ;;  %4488 = vmatprep.subr.bf16.mxu1 %v7269_v63  ;;  %v7323_v62 = vcombine.high %v494_v53, %v498_v55  ;;  %v7325_v63 = vcombine.high %v495_v56, %v499_v57  ;;  %v542_v43 = vld [vmem:[%s8672_s11 + $0x790] sm:$0xff]  ;;  %v547_v47 = vld [vmem:[%s8672_s11 + $0x7b8] sm:$0xff] }
 0x17d   : > { %4313 = vmatprep.mubr.bf16.mxu0 %v8774_v33  ;;  %4518 = vmatprep.mubr.bf16.mxu1 %v8774_v33  ;;  %v7284_v33 = vcombine.low %v455_v11, %v459_v12  ;;  %v511_v11 = vld [vmem:[%s8672_s11 + $0x698] sm:$0xff]  ;;  %v546_v44 = vld [vmem:[%s8672_s11 + $0x7b0] sm:$0xff] }
 0x17e   : > { %v515_v12 = vld [vmem:[%s8672_s11 + $0x6b8] sm:$0xff] }
 0x17f   : > { %4284 = vmatpush1.bf16.msra.mxu0 %v7266_v4  ;;  %4489 = vmatpush1.bf16.msra.mxu1 %v7268_v5  ;;  %v7322_v4 = vcombine.low %v494_v53, %v498_v55  ;;  %v7324_v5 = vcombine.low %v495_v56, %v499_v57  ;;  %v550_v53 = vld [vmem:[%s8672_s11 + $0x7d0] sm:$0xff]  ;;  %v551_v56 = vld [vmem:[%s8672_s11 + $0x7d8] sm:$0xff] }
 0x180   : > { %4285 = vmatprep.subr.bf16.mxu0 %v7275_v30  ;;  %4490 = vmatprep.subr.bf16.mxu1 %v7277_v7  ;;  %v7331_v30 = vcombine.high %v502_v1, %v506_v10  ;;  %v7333_v7 = vcombine.high %v503_v2, %v507_v3  ;;  %v554_v55 = vld [vmem:[%s8672_s11 + $0x7f0] sm:$0xff]  ;;  %v555_v57 = vld [vmem:[%s8672_s11 + $0x7f8] sm:$0xff] }
 0x183   : > { %4286 = vmatpush1.bf16.msra.mxu0 %v7274_v24  ;;  %4491 = vmatpush1.bf16.msra.mxu1 %v7276_v13  ;;  %v7330_v24 = vcombine.low %v502_v1, %v506_v10  ;;  %v7332_v13 = vcombine.low %v503_v2, %v507_v3  ;;  %v558_v1 = vld [vmem:[%s8672_s11 + $0x810] sm:$0xff]  ;;  %v559_v2 = vld [vmem:[%s8672_s11 + $0x818] sm:$0xff] }
 0x184   : > { %4287 = vmatprep.subr.bf16.mxu0 %v7283_v14  ;;  %4492 = vmatprep.subr.bf16.mxu1 %v7285_v15  ;;  %v7339_v14 = vcombine.high %v510_v8, %v514_v9  ;;  %v7341_v15 = vcombine.high %v511_v11, %v515_v12  ;;  %v562_v10 = vld [vmem:[%s8672_s11 + $0x830] sm:$0xff]  ;;  %v563_v3 = vld [vmem:[%s8672_s11 + $0x838] sm:$0xff] }
 0x187   : > { %4288 = vmatpush1.bf16.msra.mxu0 %v7282_v21  ;;  %4493 = vmatpush1.bf16.msra.mxu1 %v7284_v33  ;;  %v7338_v21 = vcombine.low %v510_v8, %v514_v9  ;;  %v7340_v33 = vcombine.low %v511_v11, %v515_v12  ;;  %v566_v8 = vld [vmem:[%s8672_s11 + $0x850] sm:$0xff]  ;;  %v567_v11 = vld [vmem:[%s8672_s11 + $0x858] sm:$0xff] }
 0x188   : > { %4289 = vmatprep.subr.bf16.mxu0 %v7291_v22  ;;  %4494 = vmatprep.subr.bf16.mxu1 %v7293_v23  ;;  %v7347_v22 = vcombine.high %v518_v16, %v522_v18  ;;  %v7349_v23 = vcombine.high %v519_v19, %v523_v20  ;;  %v570_v9 = vld [vmem:[%s8672_s11 + $0x870] sm:$0xff]  ;;  %v571_v12 = vld [vmem:[%s8672_s11 + $0x878] sm:$0xff] }
 0x18b   : > { %4290 = vmatpush1.bf16.msra.mxu0 %v7290_v29  ;;  %4495 = vmatpush1.bf16.msra.mxu1 %v7292_v60  ;;  %v7346_v29 = vcombine.low %v518_v16, %v522_v18  ;;  %v7348_v60 = vcombine.low %v519_v19, %v523_v20  ;;  %v574_v16 = vld [vmem:[%s8672_s11 + $0x890] sm:$0xff]  ;;  %v575_v19 = vld [vmem:[%s8672_s11 + $0x898] sm:$0xff] }
 0x18c   : > { %4291 = vmatprep.subr.bf16.mxu0 %v7299_v32  ;;  %4496 = vmatprep.subr.bf16.mxu1 %v7301_v0  ;;  %v7355_v32 = vcombine.high %v526_v25, %v530_v26  ;;  %v7357_v0 = vcombine.high %v527_v27, %v531_v28  ;;  %v578_v18 = vld [vmem:[%s8672_s11 + $0x8b0] sm:$0xff]  ;;  %v579_v20 = vld [vmem:[%s8672_s11 + $0x8b8] sm:$0xff] }
 0x18f   : > { %4292 = vmatpush1.bf16.msra.mxu0 %v7298_v40  ;;  %4497 = vmatpush1.bf16.msra.mxu1 %v7300_v41  ;;  %v7354_v40 = vcombine.low %v526_v25, %v530_v26  ;;  %v7356_v41 = vcombine.low %v527_v27, %v531_v28  ;;  %v582_v25 = vld [vmem:[%s8672_s11 + $0x8d0] sm:$0xff]  ;;  %v583_v27 = vld [vmem:[%s8672_s11 + $0x8d8] sm:$0xff] }
 0x190   : > { %4293 = vmatprep.subr.bf16.mxu0 %v7307_v54  ;;  %4498 = vmatprep.subr.bf16.mxu1 %v7309_v42  ;;  %v7363_v54 = vcombine.high %v534_v34, %v538_v36  ;;  %v7365_v42 = vcombine.high %v535_v37, %v539_v38  ;;  %v586_v26 = vld [vmem:[%s8672_s11 + $0x8f0] sm:$0xff]  ;;  %v587_v28 = vld [vmem:[%s8672_s11 + $0x8f8] sm:$0xff] }
 0x193   : > { %4294 = vmatpush1.bf16.msra.mxu0 %v7306_v48  ;;  %4499 = vmatpush1.bf16.msra.mxu1 %v7308_v50  ;;  %v7362_v48 = vcombine.low %v534_v34, %v538_v36  ;;  %v7364_v50 = vcombine.low %v535_v37, %v539_v38  ;;  %v594_v34 = vld [vmem:[%s8672_s11 + $0x930] sm:$0xff]  ;;  %v591_v36 = vld [vmem:[%s8672_s11 + $0x918] sm:$0xff]  ;;  %v7410_v38 = vcombine.low %v582_v25, %v586_v26 }
 0x194   : > { %4295 = vmatprep.subr.bf16.mxu0 %v7315_v51  ;;  %4500 = vmatprep.subr.bf16.mxu1 %v7317_v52  ;;  %v7371_v51 = vcombine.high %v542_v43, %v546_v44  ;;  %v7373_v52 = vcombine.high %v543_v46, %v547_v47  ;;  %v595_v37 = vld [vmem:[%s8672_s11 + $0x938] sm:$0xff] }
 0x197   : > { %4296 = vmatpush1.bf16.msra.mxu0 %v7314_v58  ;;  %4501 = vmatpush1.bf16.msra.mxu1 %v7316_v61  ;;  %v7370_v58 = vcombine.low %v542_v43, %v546_v44  ;;  %v7372_v61 = vcombine.low %v543_v46, %v547_v47  ;;  %v599_v43 = vld [vmem:[%s8672_s11 + $0x958] sm:$0xff]  ;;  %v7420_v47 = vcombine.low %v591_v36, %v595_v37 }
 0x198   : > { %4297 = vmatprep.subr.bf16.mxu0 %v7323_v62  ;;  %4502 = vmatprep.subr.bf16.mxu1 %v7325_v63  ;;  %v7379_v62 = vcombine.high %v550_v53, %v554_v55  ;;  %v7381_v63 = vcombine.high %v551_v56, %v555_v57  ;;  %v603_v44 = vld [vmem:[%s8672_s11 + $0x978] sm:$0xff] }
 0x19b   : > { %4298 = vmatpush1.bf16.msra.mxu0 %v7322_v4  ;;  %4503 = vmatpush1.bf16.msra.mxu1 %v7324_v5  ;;  %v7378_v4 = vcombine.low %v550_v53, %v554_v55  ;;  %v7380_v5 = vcombine.low %v551_v56, %v555_v57  ;;  %v607_v53 = vld [vmem:[%s8672_s11 + $0x998] sm:$0xff]  ;;  %v7428_v57 = vcombine.low %v599_v43, %v603_v44 }
 0x19c   : > { %4299 = vmatprep.subr.bf16.mxu0 %v7331_v30  ;;  %4504 = vmatprep.subr.bf16.mxu1 %v7333_v7  ;;  %v7387_v30 = vcombine.high %v558_v1, %v562_v10  ;;  %v7389_v7 = vcombine.high %v559_v2, %v563_v3  ;;  %v611_v55 = vld [vmem:[%s8672_s11 + $0x9b8] sm:$0xff] }
 0x19f   : > { %4300 = vmatpush1.bf16.msra.mxu0 %v7330_v24  ;;  %4505 = vmatpush1.bf16.msra.mxu1 %v7332_v13  ;;  %v7386_v24 = vcombine.low %v558_v1, %v562_v10  ;;  %v7388_v13 = vcombine.low %v559_v2, %v563_v3  ;;  %v615_v1 = vld [vmem:[%s8672_s11 + $0x9d8] sm:$0xff]  ;;  %v7436_v3 = vcombine.low %v607_v53, %v611_v55 }
 0x1a0   : > { %4301 = vmatprep.subr.bf16.mxu0 %v7339_v14  ;;  %4506 = vmatprep.subr.bf16.mxu1 %v7341_v15  ;;  %v7395_v14 = vcombine.high %v566_v8, %v570_v9  ;;  %v7397_v15 = vcombine.high %v567_v11, %v571_v12  ;;  %v619_v10 = vld [vmem:[%s8672_s11 + $0x9f8] sm:$0xff] }
 0x1a3   : > { %4302 = vmatpush1.bf16.msra.mxu0 %v7338_v21  ;;  %4507 = vmatpush1.bf16.msra.mxu1 %v7340_v33  ;;  %v7394_v21 = vcombine.low %v566_v8, %v570_v9  ;;  %v7396_v33 = vcombine.low %v567_v11, %v571_v12  ;;  %v623_v8 = vld [vmem:[%s8672_s11 + $0xa18] sm:$0xff]  ;;  %v7444_v12 = vcombine.low %v615_v1, %v619_v10 }
 0x1a4   : > { %4303 = vmatprep.subr.bf16.mxu0 %v7347_v22  ;;  %4508 = vmatprep.subr.bf16.mxu1 %v7349_v23  ;;  %v7403_v22 = vcombine.high %v574_v16, %v578_v18  ;;  %v7405_v23 = vcombine.high %v575_v19, %v579_v20  ;;  %v627_v9 = vld [vmem:[%s8672_s11 + $0xa38] sm:$0xff] }
 0x1a7   : > { %4304 = vmatpush1.bf16.msra.mxu0 %v7346_v29  ;;  %4509 = vmatpush1.bf16.msra.mxu1 %v7348_v60  ;;  %v7404_v29 = vcombine.low %v575_v19, %v579_v20  ;;  %v7411_v60 = vcombine.high %v582_v25, %v586_v26  ;;  %v7452_v20 = vcombine.low %v623_v8, %v627_v9  ;;  %v639_v25 = vld [vmem:[%s8672_s11 + $0xa98] sm:$0xff] }
 0x1a8   : > { %4305 = vmatprep.subr.bf16.mxu0 %v7355_v32  ;;  %4510 = vmatprep.subr.bf16.mxu1 %v7357_v0  ;;  %v7413_v32 = vcombine.high %v583_v27, %v587_v28  ;;  %v590_v0 = vld [vmem:[%s8672_s11 + $0x910] sm:$0xff]  ;;  %v643_v26 = vld [vmem:[%s8672_s11 + $0xab8] sm:$0xff] }
 0x1a9   : > { %v7418_v46 = vcombine.low %v590_v0, %v594_v34 }
 0x1ab   : > { %4306 = vmatpush1.bf16.msra.mxu0 %v7354_v40  ;;  %4511 = vmatpush1.bf16.msra.mxu1 %v7356_v41  ;;  %v7419_v40 = vcombine.high %v590_v0, %v594_v34  ;;  %v7421_v41 = vcombine.high %v591_v36, %v595_v37  ;;  %v647_v0 = vld [vmem:[%s8672_s11 + $0xad8] sm:$0xff]  ;;  %v7468_v37 = vcombine.low %v639_v25, %v643_v26 }
 0x1ac   : > { %4307 = vmatprep.subr.bf16.mxu0 %v7363_v54  ;;  %4512 = vmatprep.subr.bf16.mxu1 %v7365_v42  ;;  %v598_v54 = vld [vmem:[%s8672_s11 + $0x950] sm:$0xff]  ;;  %v651_v34 = vld [vmem:[%s8672_s11 + $0xaf8] sm:$0xff] }
 0x1ad   : > { %v602_v42 = vld [vmem:[%s8672_s11 + $0x970] sm:$0xff] }
 0x1ae   : > { %v7426_v56 = vcombine.low %v598_v54, %v602_v42 }
 0x1af   : > { %4308 = vmatpush1.bf16.msra.mxu0 %v7362_v48  ;;  %4513 = vmatpush1.bf16.msra.mxu1 %v7364_v50  ;;  %v7427_v48 = vcombine.high %v598_v54, %v602_v42  ;;  %v7429_v50 = vcombine.high %v599_v43, %v603_v44  ;;  %v655_v54 = vld [vmem:[%s8672_s11 + $0xb18] sm:$0xff]  ;;  %v7476_v44 = vcombine.low %v647_v0, %v651_v34 }
 0x1b0   : > { %4309 = vmatprep.subr.bf16.mxu0 %v7371_v51  ;;  %4514 = vmatprep.subr.bf16.mxu1 %v7373_v52  ;;  %v606_v51 = vld [vmem:[%s8672_s11 + $0x990] sm:$0xff]  ;;  %v659_v42 = vld [vmem:[%s8672_s11 + $0xb38] sm:$0xff] }
 0x1b1   : > { %v610_v52 = vld [vmem:[%s8672_s11 + $0x9b0] sm:$0xff] }
 0x1b2   : > { %v7434_v2 = vcombine.low %v606_v51, %v610_v52 }
 0x1b3   : > { %4310 = vmatpush1.bf16.msra.mxu0 %v7370_v58  ;;  %4515 = vmatpush1.bf16.msra.mxu1 %v7372_v61  ;;  %v7435_v58 = vcombine.high %v606_v51, %v610_v52  ;;  %v7437_v61 = vcombine.high %v607_v53, %v611_v55  ;;  %v663_v51 = vld [vmem:[%s8672_s11 + $0xb58] sm:$0xff]  ;;  %v7484_v55 = vcombine.low %v655_v54, %v659_v42 }
 0x1b4   : > { %4311 = vmatprep.subr.bf16.mxu0 %v7379_v62  ;;  %4516 = vmatprep.subr.bf16.mxu1 %v7381_v63  ;;  %v614_v62 = vld [vmem:[%s8672_s11 + $0x9d0] sm:$0xff]  ;;  %v667_v52 = vld [vmem:[%s8672_s11 + $0xb78] sm:$0xff] }
 0x1b5   : > { %v618_v63 = vld [vmem:[%s8672_s11 + $0x9f0] sm:$0xff] }
 0x1b6   : > { %v7442_v11 = vcombine.low %v614_v62, %v618_v63 }
 0x1b7   : > { %4312 = vmatpush1.bf16.msra.mxu0 %v7378_v4  ;;  %4517 = vmatpush1.bf16.msra.mxu1 %v7380_v5  ;;  %v7443_v4 = vcombine.high %v614_v62, %v618_v63  ;;  %v7445_v5 = vcombine.high %v615_v1, %v619_v10  ;;  %v671_v62 = vld [vmem:[%s8672_s11 + $0xb98] sm:$0xff]  ;;  %v7492_v10 = vcombine.low %v663_v51, %v667_v52 }
 0x1b8   : > { %4322 = vmatprep.subr.bf16.mxu0 %v7387_v30  ;;  %4527 = vmatprep.subr.bf16.mxu1 %v7389_v7  ;;  %v622_v30 = vld [vmem:[%s8672_s11 + $0xa10] sm:$0xff]  ;;  %v675_v63 = vld [vmem:[%s8672_s11 + $0xbb8] sm:$0xff] }
 0x1b9   : > { %v626_v7 = vld [vmem:[%s8672_s11 + $0xa30] sm:$0xff] }
 0x1ba   : > { %4314 = vmatmul.mubr.bf16.vlgmr.msra.gmra.mrb[4].mxu0 %v8849_v39  ;;  %4519 = vmatmul.mubr.bf16.vlgmr.msra.gmra.mrb[4].mxu1 %v8849_v39  ;;  %v7402_v39 = vcombine.low %v574_v16, %v578_v18  ;;  %v631_v16 = vld [vmem:[%s8672_s11 + $0xa58] sm:$0xff]  ;;  %v7450_v19 = vcombine.low %v622_v30, %v626_v7 }
 0x1bb   : > { %4323 = vmatpush1.bf16.msra.mxu0 %v7386_v24  ;;  %4528 = vmatpush1.bf16.msra.mxu1 %v7388_v13  ;;  %v7451_v24 = vcombine.high %v622_v30, %v626_v7  ;;  %v7453_v13 = vcombine.high %v623_v8, %v627_v9  ;;  %v635_v18 = vld [vmem:[%s8672_s11 + $0xa78] sm:$0xff]  ;;  %v7500_v9 = vcombine.low %v671_v62, %v675_v63 }
 0x1bc   : > { %4324 = vmatprep.subr.bf16.mxu0 %v7395_v14  ;;  %4529 = vmatprep.subr.bf16.mxu1 %v7397_v15  ;;  %v630_v14 = vld [vmem:[%s8672_s11 + $0xa50] sm:$0xff]  ;;  %v679_v30 = vld [vmem:[%s8672_s11 + $0xbd8] sm:$0xff] }
 0x1bd   : > { %4354 = vmatprep.mubr.bf16.mxu0 %v8856_v49  ;;  %4559 = vmatprep.mubr.bf16.mxu1 %v8856_v49  ;;  %v7412_v49 = vcombine.low %v583_v27, %v587_v28  ;;  %v634_v15 = vld [vmem:[%s8672_s11 + $0xa70] sm:$0xff]  ;;  %v7460_v28 = vcombine.low %v631_v16, %v635_v18  ;;  %v683_v7 = vld [vmem:[%s8672_s11 + $0xbf8] sm:$0xff] }
 0x1be   : > { %v7458_v27 = vcombine.low %v630_v14, %v634_v15 }
 0x1bf   : > { %4325 = vmatpush1.bf16.msra.mxu0 %v7394_v21  ;;  %4530 = vmatpush1.bf16.msra.mxu1 %v7396_v33  ;;  %v7459_v21 = vcombine.high %v630_v14, %v634_v15  ;;  %v7461_v33 = vcombine.high %v631_v16, %v635_v18  ;;  %v687_v14 = vld [vmem:[%s8672_s11 + $0xc18] sm:$0xff]  ;;  %v7508_v18 = vcombine.low %v679_v30, %v683_v7 }
 0x1c0   : > { %4326 = vmatprep.subr.bf16.mxu0 %v7403_v22  ;;  %4531 = vmatprep.subr.bf16.mxu1 %v7405_v23  ;;  %v638_v22 = vld [vmem:[%s8672_s11 + $0xa90] sm:$0xff]  ;;  %v691_v15 = vld [vmem:[%s8672_s11 + $0xc38] sm:$0xff] }
 0x1c1   : > { %v642_v23 = vld [vmem:[%s8672_s11 + $0xab0] sm:$0xff] }
 0x1c2   : > { %v7466_v36 = vcombine.low %v638_v22, %v642_v23 }
 0x1c3   : > { %4327 = vmatpush1.bf16.msra.mxu0 %v7402_v39  ;;  %4532 = vmatpush1.bf16.msra.mxu1 %v7404_v29  ;;  %v7467_v39 = vcombine.high %v638_v22, %v642_v23  ;;  %v7469_v29 = vcombine.high %v639_v25, %v643_v26  ;;  %v695_v22 = vld [vmem:[%s8672_s11 + $0xc58] sm:$0xff]  ;;  %v7516_v26 = vcombine.low %v687_v14, %v691_v15 }
 0x1c4   : > { %4328 = vmatprep.subr.bf16.mxu0 %v7411_v60  ;;  %4533 = vmatprep.subr.bf16.mxu1 %v7413_v32  ;;  %v646_v60 = vld [vmem:[%s8672_s11 + $0xad0] sm:$0xff]  ;;  %v699_v23 = vld [vmem:[%s8672_s11 + $0xc78] sm:$0xff] }
 0x1c5   : > { %v650_v32 = vld [vmem:[%s8672_s11 + $0xaf0] sm:$0xff] }
 0x1c6   : > { %v7474_v43 = vcombine.low %v646_v60, %v650_v32 }
 0x1c7   : > { %4329 = vmatpush1.bf16.msra.mxu0 %v7410_v38  ;;  %4534 = vmatpush1.bf16.msra.mxu1 %v7412_v49  ;;  %v7475_v38 = vcombine.high %v646_v60, %v650_v32  ;;  %v7477_v49 = vcombine.high %v647_v0, %v651_v34  ;;  %v703_v60 = vld [vmem:[%s8672_s11 + $0xc98] sm:$0xff]  ;;  %v7524_v34 = vcombine.low %v695_v22, %v699_v23 }
 0x1c8   : > { %4330 = vmatprep.subr.bf16.mxu0 %v7419_v40  ;;  %4535 = vmatprep.subr.bf16.mxu1 %v7421_v41  ;;  %v654_v40 = vld [vmem:[%s8672_s11 + $0xb10] sm:$0xff]  ;;  %v707_v32 = vld [vmem:[%s8672_s11 + $0xcb8] sm:$0xff] }
 0x1c9   : > { %v658_v41 = vld [vmem:[%s8672_s11 + $0xb30] sm:$0xff] }
 0x1ca   : > { %v7482_v53 = vcombine.low %v654_v40, %v658_v41 }
 0x1cb   : > { %4331 = vmatpush1.bf16.msra.mxu0 %v7418_v46  ;;  %4536 = vmatpush1.bf16.msra.mxu1 %v7420_v47  ;;  %v7483_v46 = vcombine.high %v654_v40, %v658_v41  ;;  %v7485_v47 = vcombine.high %v655_v54, %v659_v42  ;;  %v711_v40 = vld [vmem:[%s8672_s11 + $0xcd8] sm:$0xff]  ;;  %v7532_v54 = vcombine.low %v703_v60, %v707_v32 }
 0x1cc   : > { %4332 = vmatprep.subr.bf16.mxu0 %v7427_v48  ;;  %4537 = vmatprep.subr.bf16.mxu1 %v7429_v50  ;;  %v662_v48 = vld [vmem:[%s8672_s11 + $0xb50] sm:$0xff]  ;;  %v715_v41 = vld [vmem:[%s8672_s11 + $0xcf8] sm:$0xff] }
 0x1cd   : > { %v666_v50 = vld [vmem:[%s8672_s11 + $0xb70] sm:$0xff] }
 0x1ce   : > { %v7490_v1 = vcombine.low %v662_v48, %v666_v50 }
 0x1cf   : > { %4333 = vmatpush1.bf16.msra.mxu0 %v7426_v56  ;;  %4538 = vmatpush1.bf16.msra.mxu1 %v7428_v57  ;;  %v7491_v56 = vcombine.high %v662_v48, %v666_v50  ;;  %v7493_v57 = vcombine.high %v663_v51, %v667_v52  ;;  %v723_v48 = vld [vmem:[%s8672_s11 + $0xd38] sm:$0xff] }
 0x1d0   : > { %4334 = vmatprep.subr.bf16.mxu0 %v7435_v58  ;;  %4539 = vmatprep.subr.bf16.mxu1 %v7437_v61  ;;  %v670_v58 = vld [vmem:[%s8672_s11 + $0xb90] sm:$0xff] }
 0x1d1   : > { %v674_v61 = vld [vmem:[%s8672_s11 + $0xbb0] sm:$0xff] }
 0x1d2   : > { %v7498_v8 = vcombine.low %v670_v58, %v674_v61 }
 0x1d3   : > { %4335 = vmatpush1.bf16.msra.mxu0 %v7434_v2  ;;  %4540 = vmatpush1.bf16.msra.mxu1 %v7436_v3  ;;  %v7499_v2 = vcombine.high %v670_v58, %v674_v61  ;;  %v7501_v3 = vcombine.high %v671_v62, %v675_v63  ;;  %v727_v58 = vld [vmem:[%s8672_s11 + $0xd58] sm:$0xff] }
 0x1d4   : > { %4336 = vmatprep.subr.bf16.mxu0 %v7443_v4  ;;  %4541 = vmatprep.subr.bf16.mxu1 %v7445_v5  ;;  %v678_v4 = vld [vmem:[%s8672_s11 + $0xbd0] sm:$0xff]  ;;  %v731_v61 = vld [vmem:[%s8672_s11 + $0xd78] sm:$0xff] }
 0x1d5   : > { %v682_v5 = vld [vmem:[%s8672_s11 + $0xbf0] sm:$0xff] }
 0x1d6   : > { %v7506_v16 = vcombine.low %v678_v4, %v682_v5 }
 0x1d7   : > { %4337 = vmatpush1.bf16.msra.mxu0 %v7442_v11  ;;  %4542 = vmatpush1.bf16.msra.mxu1 %v7444_v12  ;;  %v7507_v11 = vcombine.high %v678_v4, %v682_v5  ;;  %v7509_v12 = vcombine.high %v679_v30, %v683_v7  ;;  %v738_v4 = vld [vmem:[%s8672_s11 + $0xdb0] sm:$0xff]  ;;  %v735_v5 = vld [vmem:[%s8672_s11 + $0xd98] sm:$0xff] }
 0x1d8   : > { %4338 = vmatprep.subr.bf16.mxu0 %v7451_v24  ;;  %4543 = vmatprep.subr.bf16.mxu1 %v7453_v13  ;;  %v686_v24 = vld [vmem:[%s8672_s11 + $0xc10] sm:$0xff]  ;;  %v739_v30 = vld [vmem:[%s8672_s11 + $0xdb8] sm:$0xff] }
 0x1d9   : > { %v690_v13 = vld [vmem:[%s8672_s11 + $0xc30] sm:$0xff] }
 0x1da   : > { %v7514_v25 = vcombine.low %v686_v24, %v690_v13 }
 0x1db   : > { %4339 = vmatpush1.bf16.msra.mxu0 %v7450_v19  ;;  %4544 = vmatpush1.bf16.msra.mxu1 %v7452_v20  ;;  %v7515_v19 = vcombine.high %v686_v24, %v690_v13  ;;  %v7517_v20 = vcombine.high %v687_v14, %v691_v15  ;;  %v7565_v24 = vcombine.high %v735_v5, %v739_v30  ;;  %v742_v13 = vld [vmem:[%s8672_s11 + $0xdd0] sm:$0xff] }
 0x1dc   : > { %4340 = vmatprep.subr.bf16.mxu0 %v7459_v21  ;;  %4545 = vmatprep.subr.bf16.mxu1 %v7461_v33  ;;  %v694_v21 = vld [vmem:[%s8672_s11 + $0xc50] sm:$0xff] }
 0x1dd   : > { %v698_v33 = vld [vmem:[%s8672_s11 + $0xc70] sm:$0xff] }
 0x1de   : > { %v7522_v0 = vcombine.low %v694_v21, %v698_v33  ;;  %v746_v14 = vld [vmem:[%s8672_s11 + $0xdf0] sm:$0xff] }
 0x1df   : > { %4341 = vmatpush1.bf16.msra.mxu0 %v7458_v27  ;;  %4546 = vmatpush1.bf16.msra.mxu1 %v7460_v28  ;;  %v7523_v27 = vcombine.high %v694_v21, %v698_v33  ;;  %v7525_v28 = vcombine.high %v695_v22, %v699_v23 }
 0x1e0   : > { %4342 = vmatprep.subr.bf16.mxu0 %v7467_v39  ;;  %4547 = vmatprep.subr.bf16.mxu1 %v7469_v29  ;;  %v702_v39 = vld [vmem:[%s8672_s11 + $0xc90] sm:$0xff] }
 0x1e1   : > { %v706_v29 = vld [vmem:[%s8672_s11 + $0xcb0] sm:$0xff] }
 0x1e3   : > { %4343 = vmatpush1.bf16.msra.mxu0 %v7466_v36  ;;  %4548 = vmatpush1.bf16.msra.mxu1 %v7468_v37  ;;  %v7531_v36 = vcombine.high %v702_v39, %v706_v29  ;;  %v7533_v37 = vcombine.high %v703_v60, %v707_v32  ;;  %v750_v32 = vld [vmem:[%s8672_s11 + $0xe10] sm:$0xff] }
 0x1e4   : > { %4344 = vmatprep.subr.bf16.mxu0 %v7475_v38  ;;  %4549 = vmatprep.subr.bf16.mxu1 %v7477_v49  ;;  %v710_v38 = vld [vmem:[%s8672_s11 + $0xcd0] sm:$0xff] }
 0x1e5   : > { %v714_v49 = vld [vmem:[%s8672_s11 + $0xcf0] sm:$0xff] }
 0x1e6   : > { %v7539_v42 = vcombine.high %v710_v38, %v714_v49  ;;  %v7538_v50 = vcombine.low %v710_v38, %v714_v49  ;;  %v296_v38 = vld [vmem:[#allocation2] sm:$0xff]  ;;  %v7570_v49 = vcombine.low %v742_v13, %v746_v14 }
 0x1e7   : > { %4345 = vmatpush1.bf16.msra.mxu0 %v7474_v43  ;;  %4550 = vmatpush1.bf16.msra.mxu1 %v7476_v44  ;;  %v7541_v43 = vcombine.high %v711_v40, %v715_v41  ;;  %v718_v44 = vld [vmem:[%s8672_s11 + $0xd10] sm:$0xff] }
 0x1e8   : > { %4346 = vmatprep.subr.bf16.mxu0 %v7483_v46  ;;  %4551 = vmatprep.subr.bf16.mxu1 %v7485_v47  ;;  %v722_v46 = vld [vmem:[%s8672_s11 + $0xd30] sm:$0xff]  ;;  %v719_v47 = vld [vmem:[%s8672_s11 + $0xd18] sm:$0xff] }
 0x1e9   : > { %v7547_v51 = vcombine.high %v718_v44, %v722_v46  ;;  %v7549_v52 = vcombine.high %v719_v47, %v723_v48  ;;  %v7546_v62 = vcombine.low %v718_v44, %v722_v46  ;;  %v7548_v63 = vcombine.low %v719_v47, %v723_v48  ;;  %v759_v46 = vld [vmem:[%s8672_s11 + $0xe58] sm:$0xff] }
 0x1ea   : > { %v763_v47 = vld [vmem:[%s8672_s11 + $0xe78] sm:$0xff] }
 0x1eb   : > { %4347 = vmatpush1.bf16.msra.mxu0 %v7482_v53  ;;  %4552 = vmatpush1.bf16.msra.mxu1 %v7484_v55  ;;  %v8610_v53 = vmov 1983009808  }
 0x1ec   : > { %4348 = vmatprep.subr.bf16.mxu0 %v7491_v56  ;;  %4553 = vmatprep.subr.bf16.mxu1 %v7493_v57  ;;  %v4661_v55 = vunpack.c.l.s4 %v8610_v53  ;;  %v726_v56 = vld [vmem:[%s8672_s11 + $0xd50] sm:$0xff] }
 0x1ed   : > { %v730_v57 = vld [vmem:[%s8672_s11 + $0xd70] sm:$0xff] }
 0x1ee   : > { %v7554_v7 = vcombine.low %v726_v56, %v730_v57  ;;  %v770_v53 = vld [vmem:[%s8672_s11 + $0xeb0] sm:$0xff] }
 0x1ef   : > { %4349 = vmatpush1.bf16.msra.mxu0 %v7490_v1  ;;  %4554 = vmatpush1.bf16.msra.mxu1 %v7492_v10  ;;  %v7555_v1 = vcombine.high %v726_v56, %v730_v57  ;;  %v4662_v10 = vunpack.c.0.s8 %v4661_v55  ;;  %v767_v55 = vld [vmem:[%s8672_s11 + $0xe98] sm:$0xff] }
 0x1f0   : > { %4350 = vmatprep.subr.bf16.mxu0 %v7499_v2  ;;  %4555 = vmatprep.subr.bf16.mxu1 %v7501_v3  ;;  %v7557_v2 = vcombine.high %v727_v58, %v731_v61  ;;  %v734_v3 = vld [vmem:[%s8672_s11 + $0xd90] sm:$0xff]  ;;  %v771_v56 = vld [vmem:[%s8672_s11 + $0xeb8] sm:$0xff] }
 0x1f1   : > { %v7562_v22 = vcombine.low %v734_v3, %v738_v4 }
 0x1f3   : > { %4351 = vmatpush1.bf16.msra.mxu0 %v7498_v8  ;;  %4556 = vmatpush1.bf16.msra.mxu1 %v7500_v9  ;;  %v7556_v8 = vcombine.low %v727_v58, %v731_v61  ;;  %v7563_v9 = vcombine.high %v734_v3, %v738_v4  ;;  %v7588_v58 = vcombine.low %v759_v46, %v763_v47 }
 0x1f4   : > { %4352 = vmatprep.subr.bf16.mxu0 %v7507_v11  ;;  %4557 = vmatprep.subr.bf16.mxu1 %v7509_v12  ;;  %v9273_v12 = vsub.s32 %v4662_v10, %v8697_v45  ;;  %v775_v10 = vld [vmem:[%s8672_s11 + $0xed8] sm:$0xff]  ;;  %v7596_v4 = vcombine.low %v767_v55, %v771_v56 }
 0x1f7   : > { %4353 = vmatpush1.bf16.msra.mxu0 %v7506_v16  ;;  %4558 = vmatpush1.bf16.msra.mxu1 %v7508_v18  ;;  %v743_v18 = vld [vmem:[%s8672_s11 + $0xdd8] sm:$0xff] }
 0x1f8   : > { %4363 = vmatprep.subr.bf16.mxu0 %v7515_v19  ;;  %4568 = vmatprep.subr.bf16.mxu1 %v7517_v20  ;;  %v747_v19 = vld [vmem:[%s8672_s11 + $0xdf8] sm:$0xff] }
 0x1f9   : > { %v7573_v60 = vcombine.high %v743_v18, %v747_v19 }
 0x1fa   : > { %4355 = vmatmul.mubr.bf16.vlgmr.msra.gmra.mrb[4].mxu0 %v8924_v59  ;;  %4560 = vmatmul.mubr.bf16.vlgmr.msra.gmra.mrb[4].mxu1 %v8924_v59  ;;  %v7530_v59 = vcombine.low %v702_v39, %v706_v29 }
 0x1fb   : > { %4364 = vmatpush1.bf16.msra.mxu0 %v7514_v25  ;;  %4569 = vmatpush1.bf16.msra.mxu1 %v7516_v26 }
 0x1fc   : > { %4365 = vmatprep.subr.bf16.mxu0 %v7523_v27  ;;  %4570 = vmatprep.subr.bf16.mxu1 %v7525_v28  ;;  %v7564_v27 = vcombine.low %v735_v5, %v739_v30  ;;  %v7571_v28 = vcombine.high %v742_v13, %v746_v14 }
 0x1fd   : > { %4395 = vmatprep.mubr.bf16.mxu0 %v8932_v6  ;;  %4600 = vmatprep.mubr.bf16.mxu1 %v8932_v6  ;;  %v7540_v6 = vcombine.low %v711_v40, %v715_v41  ;;  %v7572_v41 = vcombine.low %v743_v18, %v747_v19  ;;  %v794_v18 = vld [vmem:[%s8672_s11 + $0xf70] sm:$0xff]  ;;  %v791_v19 = vld [vmem:[%s8672_s11 + $0xf58] sm:$0xff] }
 0x1ff   : > { %4366 = vmatpush1.bf16.msra.mxu0 %v7522_v0  ;;  %4571 = vmatpush1.bf16.msra.mxu1 %v7524_v34  ;;  %v754_v0 = vld [vmem:[%s8672_s11 + $0xe30] sm:$0xff] }
 0x200   : > { %4367 = vmatprep.subr.bf16.mxu0 %v7531_v36  ;;  %4572 = vmatprep.subr.bf16.mxu1 %v7533_v37  ;;  %v751_v36 = vld [vmem:[%s8672_s11 + $0xe18] sm:$0xff]  ;;  %v7578_v48 = vcombine.low %v750_v32, %v754_v0 }
 0x201   : > { %v755_v37 = vld [vmem:[%s8672_s11 + $0xe38] sm:$0xff] }
 0x203   : > { %4368 = vmatpush1.bf16.msra.mxu0 %v7530_v59  ;;  %4573 = vmatpush1.bf16.msra.mxu1 %v7532_v54  ;;  %v7579_v59 = vcombine.high %v750_v32, %v754_v0  ;;  %v7581_v54 = vcombine.high %v751_v36, %v755_v37  ;;  %v806_v0 = vld [vmem:[%s8672_s11 + $0xfd0] sm:$0xff] }
 0x204   : > { %4369 = vmatprep.subr.bf16.mxu0 %v7539_v42  ;;  %4574 = vmatprep.subr.bf16.mxu1 %v7541_v43  ;;  %v758_v42 = vld [vmem:[%s8672_s11 + $0xe50] sm:$0xff] }
 0x205   : > { %v762_v43 = vld [vmem:[%s8672_s11 + $0xe70] sm:$0xff] }
 0x206   : > { %v7586_v57 = vcombine.low %v758_v42, %v762_v43 }
 0x207   : > { %4370 = vmatpush1.bf16.msra.mxu0 %v7538_v50  ;;  %4575 = vmatpush1.bf16.msra.mxu1 %v7540_v6  ;;  %v7580_v50 = vcombine.low %v751_v36, %v755_v37  ;;  %v7587_v6 = vcombine.high %v758_v42, %v762_v43  ;;  %v807_v36 = vld [vmem:[%s8672_s11 + $0xfd8] sm:$0xff] }
 0x208   : > { %4371 = vmatprep.subr.bf16.mxu0 %v7547_v51  ;;  %4576 = vmatprep.subr.bf16.mxu1 %v7549_v52  ;;  %v7589_v51 = vcombine.high %v759_v46, %v763_v47  ;;  %v766_v52 = vld [vmem:[%s8672_s11 + $0xe90] sm:$0xff]  ;;  %v811_v37 = vld [vmem:[%s8672_s11 + $0xff8] sm:$0xff] }
 0x209   : > { %v7595_v61 = vcombine.high %v766_v52, %v770_v53  ;;  %v7594_v3 = vcombine.low %v766_v52, %v770_v53  ;;  %v815_v42 = vld [vmem:[%s8672_s11 + $0x1018] sm:$0xff]  ;;  %v7636_v46 = vcombine.low %v807_v36, %v811_v37 }
 0x20a   : > { %v819_v43 = vld [vmem:[%s8672_s11 + $0x1038] sm:$0xff] }
 0x20b   : > { %4372 = vmatpush1.bf16.msra.mxu0 %v7546_v62  ;;  %4577 = vmatpush1.bf16.msra.mxu1 %v7548_v63  ;;  %v7597_v62 = vcombine.high %v767_v55, %v771_v56  ;;  %v774_v63 = vld [vmem:[%s8672_s11 + $0xed0] sm:$0xff]  ;;  %v827_v52 = vld [vmem:[%s8672_s11 + $0x1078] sm:$0xff]  ;;  %v7644_v55 = vcombine.low %v815_v42, %v819_v43 }
 0x20c   : > { %4373 = vmatprep.subr.bf16.mxu0 %v7555_v1  ;;  %4578 = vmatprep.subr.bf16.mxu1 %v7557_v2  ;;  %v778_v1 = vld [vmem:[%s8672_s11 + $0xef0] sm:$0xff]  ;;  %v779_v2 = vld [vmem:[%s8672_s11 + $0xef8] sm:$0xff] }
 0x20d   : > { %v4028_v11 = vpop.f32.mrb[0].mxu0  ;;  %v4233_v15 = vpop.f32.mrb[0].mxu1  ;;  %v7603_v5 = vcombine.high %v774_v63, %v778_v1  ;;  %v7605_v30 = vcombine.high %v775_v10, %v779_v2  ;;  %v7604_v13 = vcombine.low %v775_v10, %v779_v2 }
 0x20e   : > { %v4030_v16 = vpop.f32.mrb[1].mxu0  ;;  %v4235_v21 = vpop.f32.mrb[1].mxu1 }
 0x20f   : > { %v4658_v20 = vcombine.low %v4028_v11, %v4030_v16  ;;  %v4032_v33 = vpop.f32.mrb[2].mxu0  ;;  %4374 = vmatpush1.bf16.msra.mxu0 %v7554_v7  ;;  %v4659_v23 = vcombine.low %v4233_v15, %v4235_v21  ;;  %v4237_v25 = vpop.f32.mrb[2].mxu1  ;;  %4579 = vmatpush1.bf16.msra.mxu1 %v7556_v8  ;;  %v782_v7 = vld [vmem:[%s8672_s11 + $0xf10] sm:$0xff]  ;;  %v787_v11 = vld [vmem:[%s8672_s11 + $0xf38] sm:$0xff] }
 0x210   : > { %v4033_v26 = vpop.f32.mrb[3].mxu0  ;;  %4375 = vmatprep.subr.bf16.mxu0 %v7563_v9  ;;  %v4238_v29 = vpop.f32.mrb[3].mxu1  ;;  %4580 = vmatprep.subr.bf16.mxu1 %v7565_v24  ;;  %v786_v8 = vld [vmem:[%s8672_s11 + $0xf30] sm:$0xff]  ;;  %v783_v9 = vld [vmem:[%s8672_s11 + $0xf18] sm:$0xff]  ;;  %v7602_v24 = vcombine.low %v774_v63, %v778_v1 }
 0x211   : > { %v4666_v39 = vrot.slane %v4658_v20, %v9273_v12  ;;  %v4673_v34 = vrot.slane %v4659_v23, %v9273_v12  ;;  %v7611_v14 = vcombine.high %v782_v7, %v786_v8  ;;  %v7613_v15 = vcombine.high %v783_v9, %v787_v11  ;;  %v790_v16 = vld [vmem:[%s8672_s11 + $0xf50] sm:$0xff]  ;;  %v795_v20 = vld [vmem:[%s8672_s11 + $0xf78] sm:$0xff] }
 0x212   : > { %v7610_v21 = vcombine.low %v782_v7, %v786_v8  ;;  %v7612_v33 = vcombine.low %v783_v9, %v787_v11  ;;  %v7621_v23 = vcombine.high %v791_v19, %v795_v20  ;;  %v798_v25 = vld [vmem:[%s8672_s11 + $0xf90] sm:$0xff]  ;;  %v7620_v29 = vcombine.low %v791_v19, %v795_v20  ;;  %v835_v63 = vld [vmem:[%s8672_s11 + $0x10b8] sm:$0xff] }
 0x213   : > { %4376 = vmatpush1.bf16.msra.mxu0 %v7562_v22  ;;  %v4674_v40 = vcombine.low %v4666_v39, %v4673_v34  ;;  %4581 = vmatpush1.bf16.msra.mxu1 %v7564_v27  ;;  %v7619_v22 = vcombine.high %v790_v16, %v794_v18  ;;  %v802_v26 = vld [vmem:[%s8672_s11 + $0xfb0] sm:$0xff]  ;;  %v799_v27 = vld [vmem:[%s8672_s11 + $0xf98] sm:$0xff]  ;;  %v7618_v39 = vcombine.low %v790_v16, %v794_v18 }
 0x214   : > { %4377 = vmatprep.subr.bf16.mxu0 %v7571_v28  ;;  %4582 = vmatprep.subr.bf16.mxu1 %v7573_v60  ;;  %v803_v28 = vld [vmem:[%s8672_s11 + $0xfb8] sm:$0xff]  ;;  %v7627_v60 = vcombine.high %v798_v25, %v802_v26  ;;  %v810_v34 = vld [vmem:[%s8672_s11 + $0xff0] sm:$0xff] }
 0x215   : > { %v4694_v44 = vadd.f32 %v4674_v40, %v296_v38  ;;  %v7629_v32 = vcombine.high %v799_v27, %v803_v28  ;;  %v7626_v38 = vcombine.low %v798_v25, %v802_v26  ;;  %v7635_v40 = vcombine.high %v806_v0, %v810_v34  ;;  %v843_v7 = vld [vmem:[%s8672_s11 + $0x10f8] sm:$0xff]  ;;  %v854_v20 = vld [vmem:[%s8672_s11 + $0x1150] sm:$0xff] }
 0x217   : > { %4378 = vmatpush1.bf16.msra.mxu0 %v7570_v49  ;;  %4696 = vst [vmem:[#allocation2] sm:$0xff] %v4694_v44  ;;  %4583 = vmatpush1.bf16.msra.mxu1 %v7572_v41  ;;  %v7628_v49 = vcombine.low %v799_v27, %v803_v28  ;;  %v7637_v41 = vcombine.high %v807_v36, %v811_v37  ;;  %v862_v28 = vld [vmem:[%s8672_s11 + $0x1190] sm:$0xff] }
 0x218   : > { %4379 = vmatprep.subr.bf16.mxu0 %v7579_v59  ;;  %4584 = vmatprep.subr.bf16.mxu1 %v7581_v54  ;;  %v814_v59 = vld [vmem:[%s8672_s11 + $0x1010] sm:$0xff]  ;;  %v7634_v44 = vcombine.low %v806_v0, %v810_v34 }
 0x219   : > { %v818_v54 = vld [vmem:[%s8672_s11 + $0x1030] sm:$0xff] }
 0x21a   : > { %v7643_v47 = vcombine.high %v814_v59, %v818_v54  ;;  %v7642_v53 = vcombine.low %v814_v59, %v818_v54  ;;  %v870_v37 = vld [vmem:[%s8672_s11 + $0x11d0] sm:$0xff] }
 0x21b   : > { %4380 = vmatpush1.bf16.msra.mxu0 %v7578_v48  ;;  %4585 = vmatpush1.bf16.msra.mxu1 %v7580_v50  ;;  %v7645_v48 = vcombine.high %v815_v42, %v819_v43  ;;  %v822_v50 = vld [vmem:[%s8672_s11 + $0x1050] sm:$0xff] }
 0x21c   : > { %4381 = vmatprep.subr.bf16.mxu0 %v7587_v6  ;;  %4586 = vmatprep.subr.bf16.mxu1 %v7589_v51  ;;  %v826_v6 = vld [vmem:[%s8672_s11 + $0x1070] sm:$0xff]  ;;  %v823_v51 = vld [vmem:[%s8672_s11 + $0x1058] sm:$0xff] }
 0x21d   : > { %v7651_v56 = vcombine.high %v822_v50, %v826_v6  ;;  %v7650_v1 = vcombine.low %v822_v50, %v826_v6  ;;  %v7652_v10 = vcombine.low %v823_v51, %v827_v52 }
 0x21f   : > { %4382 = vmatpush1.bf16.msra.mxu0 %v7586_v57  ;;  %4587 = vmatpush1.bf16.msra.mxu1 %v7588_v58  ;;  %v7653_v57 = vcombine.high %v823_v51, %v827_v52  ;;  %v830_v58 = vld [vmem:[%s8672_s11 + $0x1090] sm:$0xff] }
 0x220   : > { %4383 = vmatprep.subr.bf16.mxu0 %v7595_v61  ;;  %4588 = vmatprep.subr.bf16.mxu1 %v7597_v62  ;;  %v834_v61 = vld [vmem:[%s8672_s11 + $0x10b0] sm:$0xff]  ;;  %v831_v62 = vld [vmem:[%s8672_s11 + $0x1098] sm:$0xff] }
 0x221   : > { %v7659_v2 = vcombine.high %v830_v58, %v834_v61  ;;  %v7660_v8 = vcombine.low %v831_v62, %v835_v63 }
 0x223   : > { %4384 = vmatpush1.bf16.msra.mxu0 %v7594_v3  ;;  %4589 = vmatpush1.bf16.msra.mxu1 %v7596_v4  ;;  %v7661_v3 = vcombine.high %v831_v62, %v835_v63  ;;  %v838_v4 = vld [vmem:[%s8672_s11 + $0x10d0] sm:$0xff] }
 0x224   : > { %4385 = vmatprep.subr.bf16.mxu0 %v7603_v5  ;;  %4590 = vmatprep.subr.bf16.mxu1 %v7605_v30  ;;  %v842_v5 = vld [vmem:[%s8672_s11 + $0x10f0] sm:$0xff]  ;;  %v839_v30 = vld [vmem:[%s8672_s11 + $0x10d8] sm:$0xff] }
 0x225   : > { %v7667_v9 = vcombine.high %v838_v4, %v842_v5  ;;  %v7669_v11 = vcombine.high %v839_v30, %v843_v7  ;;  %v7666_v16 = vcombine.low %v838_v4, %v842_v5  ;;  %v8161_v4 = vld [vmem:[%s10321_s3 + $0x2c] ss:$16 sps:$4 sm:$0xff] (!%p7702_p6)   ;;  %v8163_v5 = vld [vmem:[%s10321_s3 + $0x20] ss:$16 sps:$4 sm:$0xff] (!%p7702_p6)  }
 0x227   : > { %4386 = vmatpush1.bf16.msra.mxu0 %v7602_v24  ;;  %4591 = vmatpush1.bf16.msra.mxu1 %v7604_v13  ;;  %v846_v24 = vld [vmem:[%s8672_s11 + $0x1110] sm:$0xff] }
 0x228   : > { %4387 = vmatprep.subr.bf16.mxu0 %v7611_v14  ;;  %4592 = vmatprep.subr.bf16.mxu1 %v7613_v15  ;;  %v850_v13 = vld [vmem:[%s8672_s11 + $0x1130] sm:$0xff]  ;;  %v847_v14 = vld [vmem:[%s8672_s11 + $0x1118] sm:$0xff] }
 0x229   : > { %v851_v15 = vld [vmem:[%s8672_s11 + $0x1138] sm:$0xff]  ;;  %v7675_v18 = vcombine.high %v846_v24, %v850_v13 }
 0x22a   : > { %v7677_v19 = vcombine.high %v847_v14, %v851_v15  ;;  %v7676_v25 = vcombine.low %v847_v14, %v851_v15  ;;  %v8176_v14 = vld [vmem:[%s10321_s3 + $0x68] ss:$16 sps:$4 sm:$0xff] (!%p7702_p6)   ;;  %v8177_v15 = vld [vmem:[%s10321_s3 + $0x84] ss:$16 sps:$4 sm:$0xff] (!%p7702_p6)  }
 0x22b   : > { %4388 = vmatpush1.bf16.msra.mxu0 %v7610_v21  ;;  %4593 = vmatpush1.bf16.msra.mxu1 %v7612_v33  ;;  %v858_v21 = vld [vmem:[%s8672_s11 + $0x1170] sm:$0xff]  ;;  %v855_v33 = vld [vmem:[%s8672_s11 + $0x1158] sm:$0xff] }
 0x22c   : > { %4389 = vmatprep.subr.bf16.mxu0 %v7619_v22  ;;  %4594 = vmatprep.subr.bf16.mxu1 %v7621_v23  ;;  %v859_v22 = vld [vmem:[%s8672_s11 + $0x1178] sm:$0xff]  ;;  %v7674_v23 = vcombine.low %v846_v24, %v850_v13  ;;  %v7683_v26 = vcombine.high %v854_v20, %v858_v21  ;;  %v8175_v13 = vld [vmem:[%s10321_s3 + $0x60] ss:$16 sps:$4 sm:$0xff] (!%p7702_p6)  }
 0x22d   : > { %v7685_v27 = vcombine.high %v855_v33, %v859_v22  ;;  %v7684_v0 = vcombine.low %v855_v33, %v859_v22  ;;  %v8173_v24 = vld [vmem:[%s10321_s3 + $0x6c] ss:$16 sps:$4 sm:$0xff] (!%p7702_p6)   ;;  %v8188_v33 = vld [vmem:[%s10321_s3 + $0xa8] ss:$16 sps:$4 sm:$0xff] (!%p7702_p6)   ;;  %v8189_v22 = vld [vmem:[%s10321_s3 + $0xc4] ss:$16 sps:$4 sm:$0xff] (!%p7702_p6)  }
 0x22f   : > { %4390 = vmatpush1.bf16.msra.mxu0 %v7618_v39  ;;  %4595 = vmatpush1.bf16.msra.mxu1 %v7620_v29  ;;  %v866_v39 = vld [vmem:[%s8672_s11 + $0x11b0] sm:$0xff]  ;;  %v863_v29 = vld [vmem:[%s8672_s11 + $0x1198] sm:$0xff] }
 0x230   : > { %4391 = vmatprep.subr.bf16.mxu0 %v7627_v60  ;;  %4596 = vmatprep.subr.bf16.mxu1 %v7629_v32  ;;  %v867_v60 = vld [vmem:[%s8672_s11 + $0x11b8] sm:$0xff]  ;;  %v7682_v32 = vcombine.low %v854_v20, %v858_v21  ;;  %v7691_v34 = vcombine.high %v862_v28, %v866_v39  ;;  %v8187_v21 = vld [vmem:[%s10321_s3 + $0xa0] ss:$16 sps:$4 sm:$0xff] (!%p7702_p6)  }
 0x231   : > { %v7693_v36 = vcombine.high %v863_v29, %v867_v60  ;;  %v7692_v59 = vcombine.low %v863_v29, %v867_v60  ;;  %v8185_v20 = vld [vmem:[%s10321_s3 + $0xac] ss:$16 sps:$4 sm:$0xff] (!%p7702_p6)   ;;  %v8200_v29 = vld [vmem:[%s10321_s3 + $0xe8] ss:$16 sps:$4 sm:$0xff] (!%p7702_p6)   ;;  %v8201_v60 = vld [vmem:[%s10321_s3 + $0x104] ss:$16 sps:$4 sm:$0xff] (!%p7702_p6)  }
 0x233   : > { %4392 = vmatpush1.bf16.msra.mxu0 %v7626_v38  ;;  %4597 = vmatpush1.bf16.msra.mxu1 %v7628_v49  ;;  %v874_v38 = vld [vmem:[%s8672_s11 + $0x11f0] sm:$0xff]  ;;  %v871_v49 = vld [vmem:[%s8672_s11 + $0x11d8] sm:$0xff] }
 0x234   : > { %4393 = vmatprep.subr.bf16.mxu0 %v7635_v40  ;;  %4598 = vmatprep.subr.bf16.mxu1 %v7637_v41  ;;  %v875_v40 = vld [vmem:[%s8672_s11 + $0x11f8] sm:$0xff]  ;;  %v7690_v41 = vcombine.low %v862_v28, %v866_v39  ;;  %v7699_v54 = vcombine.high %v870_v37, %v874_v38  ;;  %v7698_v43 = vcombine.low %v870_v37, %v874_v38  ;;  %v8199_v39 = vld [vmem:[%s10321_s3 + $0xe0] ss:$16 sps:$4 sm:$0xff] (!%p7702_p6)  }
 0x235   : > { %v7701_v42 = vcombine.high %v871_v49, %v875_v40  ;;  %v8197_v28 = vld [vmem:[%s10321_s3 + $0xec] ss:$16 sps:$4 sm:$0xff] (!%p7702_p6)   ;;  %v8211_v38 = vld [vmem:[%s10321_s3 + $0x120] ss:$16 sps:$4 sm:$0xff] (!%p7702_p6)  }
 0x236   : > { %v8209_v37 = vld [vmem:[%s10321_s3 + $0x12c] ss:$16 sps:$4 sm:$0xff] (!%p7702_p6)  }
 0x237   : > { %4394 = vmatpush1.bf16.msra.mxu0 %v7634_v44  ;;  %4599 = vmatpush1.bf16.msra.mxu1 %v7636_v46  ;;  %v7700_v44 = vcombine.low %v871_v49, %v875_v40  ;;  %v8212_v49 = vld [vmem:[%s10321_s3 + $0x128] ss:$16 sps:$4 sm:$0xff] (!%p7702_p6)   ;;  %v8213_v40 = vld [vmem:[%s10321_s3 + $0x144] ss:$16 sps:$4 sm:$0xff] (!%p7702_p6)  }
 0x238   : > { %4404 = vmatprep.subr.bf16.mxu0 %v7643_v47  ;;  %4609 = vmatprep.subr.bf16.mxu1 %v7645_v48 }
 0x23a   : > { %4396 = vmatmul.mubr.bf16.vlgmr.msra.gmra.mrb[4].mxu0 %v9000_v17  ;;  %4601 = vmatmul.mubr.bf16.vlgmr.msra.gmra.mrb[4].mxu1 %v9000_v17  ;;  %v7658_v17 = vcombine.low %v830_v58, %v834_v61  ;;  %v297_v61 = vld [vmem:[#allocation2 + $0x8] sm:$0xff] }
 0x23b   : > { %4405 = vmatpush1.bf16.msra.mxu0 %v7642_v53  ;;  %4610 = vmatpush1.bf16.msra.mxu1 %v7644_v55 }
 0x23c   : > { %4406 = vmatprep.subr.bf16.mxu0 %v7651_v56  ;;  %4611 = vmatprep.subr.bf16.mxu1 %v7653_v57 }
 0x23d   : > { %4436 = vmatprep.mubr.bf16.mxu0 %v8609_v35  ;;  %4641 = vmatprep.mubr.bf16.mxu1 %v8609_v35  ;;  %v7668_v35 = vcombine.low %v839_v30, %v843_v7  ;;  %v8164_v30 = vld [vmem:[%s10321_s3 + $0x28] ss:$16 sps:$4 sm:$0xff] (!%p7702_p6)   ;;  %v8165_v7 = vld [vmem:[%s10321_s3 + $0x44] ss:$16 sps:$4 sm:$0xff] (!%p7702_p6)  }
 0x23f   : > { %4407 = vmatpush1.bf16.msra.mxu0 %v7650_v1  ;;  %4612 = vmatpush1.bf16.msra.mxu1 %v7652_v10  ;;  %v8155_v1 = vld [vmem:[%s10321_s3 + $0xc] ss:$16 sps:$4 sm:$0xff] (!%p7702_p6)   ;;  %v8157_v10 = vld [vmem:[%s10321_s3] ss:$16 sps:$4 sm:$0xff] (!%p7702_p6)  }
 0x240   : > { %4408 = vmatprep.subr.bf16.mxu0 %v7659_v2  ;;  %4613 = vmatprep.subr.bf16.mxu1 %v7661_v3  ;;  %v8158_v2 = vld [vmem:[%s10321_s3 + $0x8] ss:$16 sps:$4 sm:$0xff] (!%p7702_p6)   ;;  %v8159_v3 = vld [vmem:[%s10321_s3 + $0x24] ss:$16 sps:$4 sm:$0xff] (!%p7702_p6)  }
 0x243   : > { %4409 = vmatpush1.bf16.msra.mxu0 %v7658_v17  ;;  %4614 = vmatpush1.bf16.msra.mxu1 %v7660_v8  ;;  %v8167_v17 = vld [vmem:[%s10321_s3 + $0x4c] ss:$16 sps:$4 sm:$0xff] (!%p7702_p6)   ;;  %v8169_v8 = vld [vmem:[%s10321_s3 + $0x40] ss:$16 sps:$4 sm:$0xff] (!%p7702_p6)  }
 0x244   : > { %4410 = vmatprep.subr.bf16.mxu0 %v7667_v9  ;;  %4615 = vmatprep.subr.bf16.mxu1 %v7669_v11  ;;  %v8170_v9 = vld [vmem:[%s10321_s3 + $0x48] ss:$16 sps:$4 sm:$0xff] (!%p7702_p6)   ;;  %v8171_v11 = vld [vmem:[%s10321_s3 + $0x64] ss:$16 sps:$4 sm:$0xff] (!%p7702_p6)  }
 0x247   : > { %4411 = vmatpush1.bf16.msra.mxu0 %v7666_v16  ;;  %4616 = vmatpush1.bf16.msra.mxu1 %v7668_v35  ;;  %v8179_v16 = vld [vmem:[%s10321_s3 + $0x8c] ss:$16 sps:$4 sm:$0xff] (!%p7702_p6)   ;;  %v8181_v35 = vld [vmem:[%s10321_s3 + $0x80] ss:$16 sps:$4 sm:$0xff] (!%p7702_p6)  }
 0x248   : > { %4412 = vmatprep.subr.bf16.mxu0 %v7675_v18  ;;  %4617 = vmatprep.subr.bf16.mxu1 %v7677_v19  ;;  %v8182_v18 = vld [vmem:[%s10321_s3 + $0x88] ss:$16 sps:$4 sm:$0xff] (!%p7702_p6)   ;;  %v8183_v19 = vld [vmem:[%s10321_s3 + $0xa4] ss:$16 sps:$4 sm:$0xff] (!%p7702_p6)  }
 0x24b   : > { %4413 = vmatpush1.bf16.msra.mxu0 %v7674_v23  ;;  %4618 = vmatpush1.bf16.msra.mxu1 %v7676_v25  ;;  %v8191_v23 = vld [vmem:[%s10321_s3 + $0xcc] ss:$16 sps:$4 sm:$0xff] (!%p7702_p6)   ;;  %v8193_v25 = vld [vmem:[%s10321_s3 + $0xc0] ss:$16 sps:$4 sm:$0xff] (!%p7702_p6)  }
 0x24c   : > { %4414 = vmatprep.subr.bf16.mxu0 %v7683_v26  ;;  %4619 = vmatprep.subr.bf16.mxu1 %v7685_v27  ;;  %v8194_v26 = vld [vmem:[%s10321_s3 + $0xc8] ss:$16 sps:$4 sm:$0xff] (!%p7702_p6)   ;;  %v8195_v27 = vld [vmem:[%s10321_s3 + $0xe4] ss:$16 sps:$4 sm:$0xff] (!%p7702_p6)  }
 0x24f   : > { %4415 = vmatpush1.bf16.msra.mxu0 %v7682_v32  ;;  %4620 = vmatpush1.bf16.msra.mxu1 %v7684_v0  ;;  %v8203_v32 = vld [vmem:[%s10321_s3 + $0x10c] ss:$16 sps:$4 sm:$0xff] (!%p7702_p6)   ;;  %v8205_v0 = vld [vmem:[%s10321_s3 + $0x100] ss:$16 sps:$4 sm:$0xff] (!%p7702_p6)  }
 0x250   : > { %4416 = vmatprep.subr.bf16.mxu0 %v7691_v34  ;;  %4621 = vmatprep.subr.bf16.mxu1 %v7693_v36  ;;  %v8206_v34 = vld [vmem:[%s10321_s3 + $0x108] ss:$16 sps:$4 sm:$0xff] (!%p7702_p6)   ;;  %v8207_v36 = vld [vmem:[%s10321_s3 + $0x124] ss:$16 sps:$4 sm:$0xff] (!%p7702_p6)  }
 0x253   : > { %4417 = vmatpush1.bf16.msra.mxu0 %v7690_v41  ;;  %4622 = vmatpush1.bf16.msra.mxu1 %v7692_v59  ;;  %v8215_v41 = vld [vmem:[%s10321_s3 + $0x14c] ss:$16 sps:$4 sm:$0xff] (!%p7702_p6)   ;;  %v8217_v59 = vld [vmem:[%s10321_s3 + $0x140] ss:$16 sps:$4 sm:$0xff] (!%p7702_p6)  }
 0x254   : > { %4418 = vmatprep.subr.bf16.mxu0 %v7699_v54  ;;  %4623 = vmatprep.subr.bf16.mxu1 %v7701_v42  ;;  %v8218_v54 = vld [vmem:[%s10321_s3 + $0x148] ss:$16 sps:$4 sm:$0xff] (!%p7702_p6)   ;;  %v4708_v42 = vsub.s32 (!%p7702_p6), 0, %v8697_v45 }
 0x257   : > { %4419 = vmatpush1.bf16.msra.mxu0 %v7698_v43  ;;  %4624 = vmatpush1.bf16.msra.mxu1 %v7700_v44  ;;  %v8219_v43 = vld [vmem:[%s10321_s3 + $0x164] ss:$16 sps:$4 sm:$0xff] (!%p7702_p6)   ;;  %v4712_v44 = vsub.s32 (!%p7702_p6), 1, %v8697_v45 }
 0x258   : > { %6550 = vmatprep.subr.bf16.mxu1 (!%p7702_p6), %v8155_v1 }
 0x25a   : > { %4437 = vmatmul.mubr.bf16.vlgmr.msra.gmra.mrb[4].mxu0 %v9040_v31  ;;  %4642 = vmatmul.mubr.bf16.vlgmr.msra.gmra.mrb[4].mxu1 %v9040_v31  ;;  %v8153_v31 = vld [vmem:[%s10321_s3 + $0x4] ss:$16 sps:$4 sm:$0xff] (!%p7702_p6)  }
 0x25b   : > { %6386 = vmatprep.subr.bf16.mxu0 (!%p7702_p6), %v8153_v31  ;;  %6551 = vmatpush1.bf16.msra.mxu1 (!%p7702_p6), %v8158_v2  ;;  %v8230_v31 = vld [vmem:[%s10321_s3 + $0x188] ss:$16 sps:$4 sm:$0xff] (!%p7702_p6)   ;;  %v8233_v2 = vld [vmem:[%s10321_s3 + $0x1ac] ss:$16 sps:$4 sm:$0xff] (!%p7702_p6)  }
 0x25c   : > { %6387 = vmatpush1.bf16.msra.mxu0 (!%p7702_p6), %v8157_v10  ;;  %6552 = vmatprep.subr.bf16.mxu1 (!%p7702_p6), %v8161_v4  ;;  %v8231_v10 = vld [vmem:[%s10321_s3 + $0x1a4] ss:$16 sps:$4 sm:$0xff] (!%p7702_p6)  }
 0x25d   : > { %6388 = vmatprep.subr.bf16.mxu0 (!%p7702_p6), %v8159_v3  ;;  %v4702_v4 = vld [vmem:[#allocation2] sm:$0xff] (!%p7702_p6) }
 0x25f   : > { %6553 = vmatpush1.bf16.msra.mxu1 (!%p7702_p6), %v8164_v30  ;;  %v8235_v30 = vld [vmem:[%s10321_s3 + $0x1a0] ss:$16 sps:$4 sm:$0xff] (!%p7702_p6)  }
 0x260   : > { %6389 = vmatpush1.bf16.msra.mxu0 (!%p7702_p6), %v8163_v5  ;;  %6554 = vmatprep.subr.bf16.mxu1 (!%p7702_p6), %v8167_v17  ;;  %v8237_v17 = vld [vmem:[%s10321_s3 + $0x1c4] ss:$16 sps:$4 sm:$0xff] (!%p7702_p6)  }
 0x261   : > { %6390 = vmatprep.subr.bf16.mxu0 (!%p7702_p6), %v8165_v7  ;;  %v8236_v7 = vld [vmem:[%s10321_s3 + $0x1a8] ss:$16 sps:$4 sm:$0xff] (!%p7702_p6)  }
 0x263   : > { %6555 = vmatpush1.bf16.msra.mxu1 (!%p7702_p6), %v8170_v9 }
 0x264   : > { %6391 = vmatpush1.bf16.msra.mxu0 (!%p7702_p6), %v8169_v8  ;;  %6556 = vmatprep.subr.bf16.mxu1 (!%p7702_p6), %v8173_v24  ;;  %v8239_v8 = vld [vmem:[%s10321_s3 + $0x1cc] ss:$16 sps:$4 sm:$0xff] (!%p7702_p6)  }
 0x265   : > { %6392 = vmatprep.subr.bf16.mxu0 (!%p7702_p6), %v8171_v11 }
 0x267   : > { %6557 = vmatpush1.bf16.msra.mxu1 (!%p7702_p6), %v8176_v14  ;;  %v8242_v14 = vld [vmem:[%s10321_s3 + $0x1c8] ss:$16 sps:$4 sm:$0xff] (!%p7702_p6)  }
 0x268   : > { %6393 = vmatpush1.bf16.msra.mxu0 (!%p7702_p6), %v8175_v13  ;;  %6558 = vmatprep.subr.bf16.mxu1 (!%p7702_p6), %v8179_v16  ;;  %v8241_v13 = vld [vmem:[%s10321_s3 + $0x1c0] ss:$16 sps:$4 sm:$0xff] (!%p7702_p6)   ;;  %v8245_v16 = vld [vmem:[%s10321_s3 + $0x1ec] ss:$16 sps:$4 sm:$0xff] (!%p7702_p6)  }
 0x269   : > { %6394 = vmatprep.subr.bf16.mxu0 (!%p7702_p6), %v8177_v15  ;;  %v8243_v15 = vld [vmem:[%s10321_s3 + $0x1e4] ss:$16 sps:$4 sm:$0xff] (!%p7702_p6)  }
 0x26b   : > { %6559 = vmatpush1.bf16.msra.mxu1 (!%p7702_p6), %v8182_v18 }
 0x26c   : > { %6395 = vmatpush1.bf16.msra.mxu0 (!%p7702_p6), %v8181_v35  ;;  %6560 = vmatprep.subr.bf16.mxu1 (!%p7702_p6), %v8185_v20  ;;  %v8247_v20 = vld [vmem:[%s10321_s3 + $0x1e0] ss:$16 sps:$4 sm:$0xff] (!%p7702_p6)  }
 0x26d   : > { %6396 = vmatprep.subr.bf16.mxu0 (!%p7702_p6), %v8183_v19 }
 0x26f   : > { %6561 = vmatpush1.bf16.msra.mxu1 (!%p7702_p6), %v8188_v33  ;;  %v8251_v33 = vld [vmem:[%s10321_s3 + $0x204] ss:$16 sps:$4 sm:$0xff] (!%p7702_p6)  }
 0x270   : > { %6397 = vmatpush1.bf16.msra.mxu0 (!%p7702_p6), %v8187_v21  ;;  %6562 = vmatprep.subr.bf16.mxu1 (!%p7702_p6), %v8191_v23  ;;  %v8248_v21 = vld [vmem:[%s10321_s3 + $0x1e8] ss:$16 sps:$4 sm:$0xff] (!%p7702_p6)  }
 0x271   : > { %6398 = vmatprep.subr.bf16.mxu0 (!%p7702_p6), %v8189_v22  ;;  %v8254_v22 = vld [vmem:[%s10321_s3 + $0x20c] ss:$16 sps:$4 sm:$0xff] (!%p7702_p6)  }
 0x273   : > { %6563 = vmatpush1.bf16.msra.mxu1 (!%p7702_p6), %v8194_v26  ;;  %v8249_v26 = vld [vmem:[%s10321_s3 + $0x200] ss:$16 sps:$4 sm:$0xff] (!%p7702_p6)  }
 0x274   : > { %6399 = vmatpush1.bf16.msra.mxu0 (!%p7702_p6), %v8193_v25  ;;  %6564 = vmatprep.subr.bf16.mxu1 (!%p7702_p6), %v8197_v28  ;;  %v8257_v28 = vld [vmem:[%s10321_s3 + $0x224] ss:$16 sps:$4 sm:$0xff] (!%p7702_p6)  }
 0x275   : > { %6400 = vmatprep.subr.bf16.mxu0 (!%p7702_p6), %v8195_v27  ;;  %v8252_v27 = vld [vmem:[%s10321_s3 + $0x208] ss:$16 sps:$4 sm:$0xff] (!%p7702_p6)  }
 0x277   : > { %6565 = vmatpush1.bf16.msra.mxu1 (!%p7702_p6), %v8200_v29 }
 0x278   : > { %6401 = vmatpush1.bf16.msra.mxu0 (!%p7702_p6), %v8199_v39  ;;  %6566 = vmatprep.subr.bf16.mxu1 (!%p7702_p6), %v8203_v32  ;;  %v8260_v39 = vld [vmem:[%s10321_s3 + $0x22c] ss:$16 sps:$4 sm:$0xff] (!%p7702_p6)   ;;  %v8258_v32 = vld [vmem:[%s10321_s3 + $0x228] ss:$16 sps:$4 sm:$0xff] (!%p7702_p6)  }
 0x279   : > { %6402 = vmatprep.subr.bf16.mxu0 (!%p7702_p6), %v8201_v60  ;;  %v8255_v60 = vld [vmem:[%s10321_s3 + $0x220] ss:$16 sps:$4 sm:$0xff] (!%p7702_p6)  }
 0x27b   : > { %6567 = vmatpush1.bf16.msra.mxu1 (!%p7702_p6), %v8206_v34  ;;  %v8266_v34 = vld [vmem:[%s10321_s3 + $0x24c] ss:$16 sps:$4 sm:$0xff] (!%p7702_p6)  }
 0x27c   : > { %6403 = vmatpush1.bf16.msra.mxu0 (!%p7702_p6), %v8205_v0  ;;  %6568 = vmatprep.subr.bf16.mxu1 (!%p7702_p6), %v8209_v37  ;;  %v8263_v0 = vld [vmem:[%s10321_s3 + $0x244] ss:$16 sps:$4 sm:$0xff] (!%p7702_p6)   ;;  %v8264_v37 = vld [vmem:[%s10321_s3 + $0x248] ss:$16 sps:$4 sm:$0xff] (!%p7702_p6)  }
 0x27d   : > { %6404 = vmatprep.subr.bf16.mxu0 (!%p7702_p6), %v8207_v36  ;;  %v8261_v36 = vld [vmem:[%s10321_s3 + $0x240] ss:$16 sps:$4 sm:$0xff] (!%p7702_p6)  }
 0x27f   : > { %6569 = vmatpush1.bf16.msra.mxu1 (!%p7702_p6), %v8212_v49  ;;  %v8272_v49 = vld [vmem:[%s10321_s3 + $0x26c] ss:$16 sps:$4 sm:$0xff] (!%p7702_p6)  }
 0x280   : > { %6405 = vmatpush1.bf16.msra.mxu0 (!%p7702_p6), %v8211_v38  ;;  %6570 = vmatprep.subr.bf16.mxu1 (!%p7702_p6), %v8215_v41  ;;  %v8269_v38 = vld [vmem:[%s10321_s3 + $0x264] ss:$16 sps:$4 sm:$0xff] (!%p7702_p6)   ;;  %v8270_v41 = vld [vmem:[%s10321_s3 + $0x268] ss:$16 sps:$4 sm:$0xff] (!%p7702_p6)  }
 0x281   : > { %6406 = vmatprep.subr.bf16.mxu0 (!%p7702_p6), %v8213_v40  ;;  %v8267_v40 = vld [vmem:[%s10321_s3 + $0x260] ss:$16 sps:$4 sm:$0xff] (!%p7702_p6)  }
 0x283   : > { %6571 = vmatpush1.bf16.msra.mxu1 (!%p7702_p6), %v8218_v54  ;;  %v8278_v54 = vld [vmem:[%s10321_s3 + $0x28c] ss:$16 sps:$4 sm:$0xff] (!%p7702_p6)  }
 0x284   : > { %6407 = vmatpush1.bf16.msra.mxu0 (!%p7702_p6), %v8217_v59  ;;  %v8275_v59 = vld [vmem:[%s10321_s3 + $0x284] ss:$16 sps:$4 sm:$0xff] (!%p7702_p6)  }
 0x285   : > { %6408 = vmatprep.subr.bf16.mxu0 (!%p7702_p6), %v8219_v43  ;;  %v8273_v43 = vld [vmem:[%s10321_s3 + $0x280] ss:$16 sps:$4 sm:$0xff] (!%p7702_p6)  }
 0x32d   : > { %v4438_v46 = vpop.f32.mrb[4].mxu0  ;;  %v4643_v47 = vpop.f32.mrb[4].mxu1 }
 0x32e   : > { %v4440_v48 = vpop.f32.mrb[5].mxu0  ;;  %v4645_v6 = vpop.f32.mrb[5].mxu1 }
 0x32f   : > { %v4675_v50 = vcombine.low %v4438_v46, %v4440_v48  ;;  %v4442_v51 = vpop.f32.mrb[6].mxu0  ;;  %v4676_v52 = vcombine.low %v4643_v47, %v4645_v6  ;;  %v4647_v53 = vpop.f32.mrb[6].mxu1  ;;  %v4716_v46 = vsub.s32 (!%p7702_p6), 2, %v8697_v45  ;;  %v8221_v47 = vld [vmem:[%s10321_s3 + $0x16c] ss:$16 sps:$4 sm:$0xff] (!%p7702_p6)   ;;  %v4720_v48 = vsub.s32 (!%p7702_p6), 3, %v8697_v45 }
 0x330   : > { %v4443_v55 = vpop.f32.mrb[7].mxu0  ;;  %v4648_v57 = vpop.f32.mrb[7].mxu1  ;;  %v8223_v6 = vld [vmem:[%s10321_s3 + $0x160] ss:$16 sps:$4 sm:$0xff] (!%p7702_p6)   ;;  %v8224_v51 = vld [vmem:[%s10321_s3 + $0x168] ss:$16 sps:$4 sm:$0xff] (!%p7702_p6)   ;;  %6572 = vmatprep.subr.bf16.mxu1 (!%p7702_p6), %v8221_v47 }
 0x331   : > { %v4683_v56 = vrot.slane %v4675_v50, %v9273_v12  ;;  %v4690_v58 = vrot.slane %v4676_v52, %v9273_v12  ;;  %4701 = sbr.rel (%p7702_p6) target bundleno = 1469 (0x5bd), region = 56  ;;  %v9499_v50 = vld [vmem:[%s10320_s2] sm:$0xff] (!%p7702_p6)  ;;  %v8227_v57 = vld [vmem:[%s10321_s3 + $0x18c] ss:$16 sps:$4 sm:$0xff] (!%p7702_p6)   ;;  %6409 = vmatpush1.bf16.msra.mxu0 (!%p7702_p6), %v8223_v6  ;;  %6573 = vmatpush1.bf16.msra.mxu1 (!%p7702_p6), %v8224_v51  ;;  %v8276_v47 = vld [vmem:[%s10321_s3 + $0x288] ss:$16 sps:$4 sm:$0xff] (!%p7702_p6)  }
 0x332   : > { %v4709_v52 = vrot.slane (!%p7702_p6), %v9499_v50, %v4708_v42  ;;  %v4713_v53 = vrot.slane (!%p7702_p6), %v9499_v50, %v4712_v44  ;;  %v4717_v55 = vrot.slane (!%p7702_p6), %v9499_v50, %v4716_v46  ;;  %6574 = vmatprep.subr.bf16.mxu1 (!%p7702_p6), %v8227_v57  ;;  %v8281_v6 = vld [vmem:[%s10321_s3 + $0x2a4] ss:$16 sps:$4 sm:$0xff] (!%p7702_p6)   ;;  %v8284_v51 = vld [vmem:[%s10321_s3 + $0x2ac] ss:$16 sps:$4 sm:$0xff] (!%p7702_p6)   ;;  %v8285_v57 = vld [vmem:[%s10321_s3 + $0x2c0] ss:$16 sps:$4 sm:$0xff] (!%p7702_p6)  }
 0x333   : > { %v4691_v62 = vcombine.low %v4683_v56, %v4690_v58  ;;  %v8225_v56 = vld [vmem:[%s10321_s3 + $0x184] ss:$16 sps:$4 sm:$0xff] (!%p7702_p6)   ;;  %v4721_v58 = vrot.slane (!%p7702_p6), %v9499_v50, %v4720_v48 }
 0x334   : > { %6410 = vmatprep.subr.bf16.mxu0 (!%p7702_p6), %v8225_v56  ;;  %v8290_v56 = vld [vmem:[%s10321_s3 + $0x2cc] ss:$16 sps:$4 sm:$0xff] (!%p7702_p6)  }
 0x335   : > { %v4695_v63 = vadd.f32 %v4691_v62, %v297_v61  ;;  %v4738_v61 = vcombine.low (!%p7702_p6), %v4709_v52, %v4713_v53  ;;  %v4739_v62 = vcombine.low (!%p7702_p6), %v4717_v55, %v4721_v58  ;;  %6575 = vmatpush1.bf16.msra.mxu1 (!%p7702_p6), %v8230_v31  ;;  %v8279_v52 = vld [vmem:[%s10321_s3 + $0x2a0] ss:$16 sps:$4 sm:$0xff] (!%p7702_p6)   ;;  %v8282_v53 = vld [vmem:[%s10321_s3 + $0x2a8] ss:$16 sps:$4 sm:$0xff] (!%p7702_p6)   ;;  %v8287_v55 = vld [vmem:[%s10321_s3 + $0x2c4] ss:$16 sps:$4 sm:$0xff] (!%p7702_p6)  }
 0x336   : > { %6576 = vmatprep.subr.bf16.mxu1 (!%p7702_p6), %v8233_v2  ;;  %v8288_v58 = vld [vmem:[%s10321_s3 + $0x2c8] ss:$16 sps:$4 sm:$0xff] (!%p7702_p6)   ;;  %v8297_v2 = vld [vmem:[%s10321_s3 + $0x300] ss:$16 sps:$4 sm:$0xff] (!%p7702_p6)  }
 0x337   : > { %4697 = vst [vmem:[#allocation2 + $0x8] sm:$0xff] %v4695_v63  ;;  %v8229_v63 = vld [vmem:[%s10321_s3 + $0x180] ss:$16 sps:$4 sm:$0xff] (!%p7702_p6)   ;;  %v4746_v1 = vrot.slane (!%p7702_p6), %v4738_v61, %v9273_v12  ;;  %v4753_v3 = vrot.slane (!%p7702_p6), %v4739_v62, %v9273_v12  ;;  %v8293_v61 = vld [vmem:[%s10321_s3 + $0x2e4] ss:$16 sps:$4 sm:$0xff] (!%p7702_p6)  }
 0x338   : > { %6411 = vmatpush1.bf16.msra.mxu0 %v8229_v63  ;;  %v8296_v62 = vld [vmem:[%s10321_s3 + $0x2ec] ss:$16 sps:$4 sm:$0xff]   ;;  %v8291_v63 = vld [vmem:[%s10321_s3 + $0x2e0] ss:$16 sps:$4 sm:$0xff]   ;;  %v8294_v31 = vld [vmem:[%s10321_s3 + $0x2e8] ss:$16 sps:$4 sm:$0xff]  }
 0x339   : > { %v4754_v5 = vcombine.low %v4746_v1, %v4753_v3  ;;  %6412 = vmatprep.subr.bf16.mxu0 %v8231_v10  ;;  %6577 = vmatpush1.bf16.msra.mxu1 %v8236_v7  ;;  %v8299_v1 = vld [vmem:[%s10321_s3 + $0x304] ss:$16 sps:$4 sm:$0xff]   ;;  %v8302_v10 = vld [vmem:[%s10321_s3 + $0x30c] ss:$16 sps:$4 sm:$0xff]   ;;  %v8300_v3 = vld [vmem:[%s10321_s3 + $0x308] ss:$16 sps:$4 sm:$0xff]  }
 0x33a   : > { %6578 = vmatprep.subr.bf16.mxu1 %v8239_v8  ;;  %v8306_v7 = vld [vmem:[%s10321_s3 + $0x328] ss:$16 sps:$4 sm:$0xff]   ;;  %v8314_v8 = vld [vmem:[%s10321_s3 + $0x34c] ss:$16 sps:$4 sm:$0xff]  }
 0x33b   : > { %v4774_v9 = vadd.f32 %v4754_v5, %v4702_v4  ;;  %v8305_v4 = vld [vmem:[%s10321_s3 + $0x324] ss:$16 sps:$4 sm:$0xff]   ;;  %v8308_v5 = vld [vmem:[%s10321_s3 + $0x32c] ss:$16 sps:$4 sm:$0xff]  }
 0x33c   : > { %6413 = vmatpush1.bf16.msra.mxu0 %v8235_v30  ;;  %v8303_v30 = vld [vmem:[%s10321_s3 + $0x320] ss:$16 sps:$4 sm:$0xff]  }
 0x33d   : > { %v4785_v11 = vrot.slane %v4774_v9, %v9273_v12  ;;  %v4778_v24 = vcombine.high %v4774_v9, %v4774_v9  ;;  %6414 = vmatprep.subr.bf16.mxu0 %v8237_v17  ;;  %6579 = vmatpush1.bf16.msra.mxu1 %v8242_v14  ;;  %v8311_v17 = vld [vmem:[%s10321_s3 + $0x344] ss:$16 sps:$4 sm:$0xff]   ;;  %v8309_v9 = vld [vmem:[%s10321_s3 + $0x340] ss:$16 sps:$4 sm:$0xff]   ;;  %v4724_v14 = vsub.s32 4, %v8697_v45 }
 0x33e   : > { %6580 = vmatprep.subr.bf16.mxu1 %v8245_v16  ;;  %v8315_v16 = vld [vmem:[%s10321_s3 + $0x360] ss:$16 sps:$4 sm:$0xff]  }
 0x33f   : > { %v4793_v35 = vcombine.high %v4785_v11, %v4785_v11  ;;  %v9565_v18 = vrot.slane %v4778_v24, %v9273_v12  ;;  %v4820_v25 = vpack.c.bf16 %v4785_v11, %v4785_v11  ;;  %v8312_v11 = vld [vmem:[%s10321_s3 + $0x348] ss:$16 sps:$4 sm:$0xff]   ;;  %v8317_v24 = vld [vmem:[%s10321_s3 + $0x364] ss:$16 sps:$4 sm:$0xff]  }
 0x340   : > { %6415 = vmatpush1.bf16.msra.mxu0 %v8241_v13  ;;  %v8320_v13 = vld [vmem:[%s10321_s3 + $0x36c] ss:$16 sps:$4 sm:$0xff]  }
 0x341   : > { %v4821_v19 = vpack.c.bf16 %v4793_v35, %v4793_v35  ;;  %6416 = vmatprep.subr.bf16.mxu0 %v8243_v15  ;;  %v4794_v23 = vcombine.high %v9565_v18, %v9565_v18  ;;  %6581 = vmatpush1.bf16.msra.mxu1 %v8248_v21  ;;  %v4728_v15 = vsub.s32 5, %v8697_v45  ;;  %v8318_v35 = vld [vmem:[%s10321_s3 + $0x368] ss:$16 sps:$4 sm:$0xff]   ;;  %v8326_v21 = vld [vmem:[%s10321_s3 + $0x38c] ss:$16 sps:$4 sm:$0xff]  }
 0x342   : > { %6591 = vmatprep.subr.bf16.mxu1 %v8254_v22  ;;  %v8321_v22 = vld [vmem:[%s10321_s3 + $0x380] ss:$16 sps:$4 sm:$0xff]  }
 0x343   : > { %6418 = vmatprep.mubr.bf16.mxu0 %v4821_v19  ;;  %6582 = vmatprep.mubr.bf16.mxu1 %v4821_v19  ;;  %v4823_v29 = vpack.c.bf16 %v4794_v23, %v4794_v23  ;;  %v4732_v19 = vsub.s32 6, %v8697_v45  ;;  %v8324_v23 = vld [vmem:[%s10321_s3 + $0x388] ss:$16 sps:$4 sm:$0xff]  }
 0x344   : > { %6417 = vmatpush1.bf16.msra.mxu0 %v8247_v20  ;;  %6583 = vmatmul.mubr.bf16.vlgmr.msra.gmra.mrb[0].mxu1 %v4820_v25  ;;  %v8323_v20 = vld [vmem:[%s10321_s3 + $0x384] ss:$16 sps:$4 sm:$0xff]  }
 0x345   : > { %6427 = vmatprep.subr.bf16.mxu0 %v8251_v33  ;;  %6592 = vmatpush1.bf16.msra.mxu1 %v8252_v27  ;;  %v4736_v33 = vsub.s32 7, %v8697_v45  ;;  %v8332_v27 = vld [vmem:[%s10321_s3 + $0x3ac] ss:$16 sps:$4 sm:$0xff]  }
 0x346   : > { %6593 = vmatprep.subr.bf16.mxu1 %v8260_v39  ;;  %6623 = vmatprep.mubr.bf16.mxu1 %v4823_v29  ;;  %v4733_v39 = vrot.slane %v9499_v50, %v4732_v19  ;;  %v8386_v19 = vld [vmem:[%s10321_s3 + $0x4cc] ss:$16 sps:$4 sm:$0xff]  }
 0x347   : > { %6419 = vmatmul.mubr.bf16.vlgmr.msra.gmra.mrb[0].mxu0 %v4820_v25  ;;  %v4725_v25 = vrot.slane %v9499_v50, %v4724_v14  ;;  %v8380_v14 = vld [vmem:[%s10321_s3 + $0x4ac] ss:$16 sps:$4 sm:$0xff]  }
 0x348   : > { %6428 = vmatpush1.bf16.msra.mxu0 %v8249_v26  ;;  %6459 = vmatprep.mubr.bf16.mxu0 %v4823_v29  ;;  %v8329_v26 = vld [vmem:[%s10321_s3 + $0x3a4] ss:$16 sps:$4 sm:$0xff]   ;;  %v4737_v29 = vrot.slane %v9499_v50, %v4736_v33 }
 0x349   : > { %6429 = vmatprep.subr.bf16.mxu0 %v8257_v28  ;;  %6594 = vmatpush1.bf16.msra.mxu1 %v8258_v32  ;;  %v4729_v28 = vrot.slane %v9499_v50, %v4728_v15  ;;  %v8330_v32 = vld [vmem:[%s10321_s3 + $0x3a8] ss:$16 sps:$4 sm:$0xff]   ;;  %v8338_v50 = vld [vmem:[%s10321_s3 + $0x3cc] ss:$16 sps:$4 sm:$0xff]   ;;  %v8375_v15 = vld [vmem:[%s10321_s3 + $0x4a0] ss:$16 sps:$4 sm:$0xff]  }
 0x34a   : > { %6595 = vmatprep.subr.bf16.mxu1 %v8266_v34  ;;  %v8389_v33 = vld [vmem:[%s10321_s3 + $0x4e4] ss:$16 sps:$4 sm:$0xff]  }
 0x34b   : > { %v4755_v34 = vcombine.low %v4725_v25, %v4729_v28  ;;  %v8390_v25 = vld [vmem:[%s10321_s3 + $0x4e8] ss:$16 sps:$4 sm:$0xff]   ;;  %v8393_v28 = vld [vmem:[%s10321_s3 + $0x500] ss:$16 sps:$4 sm:$0xff]  }
 0x34c   : > { %6430 = vmatpush1.bf16.msra.mxu0 %v8255_v60  ;;  %v8327_v60 = vld [vmem:[%s10321_s3 + $0x3a0] ss:$16 sps:$4 sm:$0xff]  }
 0x34d   : > { %6431 = vmatprep.subr.bf16.mxu0 %v8263_v0  ;;  %6596 = vmatpush1.bf16.msra.mxu1 %v8264_v37  ;;  %v8335_v0 = vld [vmem:[%s10321_s3 + $0x3c4] ss:$16 sps:$4 sm:$0xff]   ;;  %v8333_v37 = vld [vmem:[%s10321_s3 + $0x3c0] ss:$16 sps:$4 sm:$0xff]  }
 0x34e   : > { %6597 = vmatprep.subr.bf16.mxu1 %v8272_v49  ;;  %v8341_v49 = vld [vmem:[%s10321_s3 + $0x3e4] ss:$16 sps:$4 sm:$0xff]  }
 0x350   : > { %6432 = vmatpush1.bf16.msra.mxu0 %v8261_v36  ;;  %v4756_v36 = vcombine.low %v4733_v39, %v4737_v29  ;;  %v8396_v39 = vld [vmem:[%s10321_s3 + $0x508] ss:$16 sps:$4 sm:$0xff]   ;;  %v8401_v29 = vld [vmem:[%s10321_s3 + $0x524] ss:$16 sps:$4 sm:$0xff]  }
 0x351   : > { %6433 = vmatprep.subr.bf16.mxu0 %v8269_v38  ;;  %6598 = vmatpush1.bf16.msra.mxu1 %v8270_v41  ;;  %v8336_v38 = vld [vmem:[%s10321_s3 + $0x3c8] ss:$16 sps:$4 sm:$0xff]   ;;  %v4763_v41 = vrot.slane %v4755_v34, %v9273_v12  ;;  %v8410_v34 = vld [vmem:[%s10321_s3 + $0x54c] ss:$16 sps:$4 sm:$0xff]  }
 0x352   : > { %6599 = vmatprep.subr.bf16.mxu1 %v8278_v54  ;;  %v8339_v54 = vld [vmem:[%s10321_s3 + $0x3e0] ss:$16 sps:$4 sm:$0xff]  }
 0x354   : > { %6434 = vmatpush1.bf16.msra.mxu0 %v8267_v40  ;;  %v8344_v40 = vld [vmem:[%s10321_s3 + $0x3ec] ss:$16 sps:$4 sm:$0xff]  }
 0x355   : > { %6435 = vmatprep.subr.bf16.mxu0 %v8275_v59  ;;  %6600 = vmatpush1.bf16.msra.mxu1 %v8276_v47  ;;  %v4770_v59 = vrot.slane %v4756_v36, %v9273_v12  ;;  %v8347_v47 = vld [vmem:[%s10321_s3 + $0x404] ss:$16 sps:$4 sm:$0xff]   ;;  %v8405_v36 = vld [vmem:[%s10321_s3 + $0x540] ss:$16 sps:$4 sm:$0xff]  }
 0x356   : > { %6601 = vmatprep.subr.bf16.mxu1 %v8284_v51 }
 0x357   : > { %v4771_v51 = vcombine.low %v4763_v41, %v4770_v59  ;;  %v8414_v41 = vld [vmem:[%s10321_s3 + $0x568] ss:$16 sps:$4 sm:$0xff]   ;;  %v8419_v59 = vld [vmem:[%s10321_s3 + $0x584] ss:$16 sps:$4 sm:$0xff]  }
 0x358   : > { %6436 = vmatpush1.bf16.msra.mxu0 %v8273_v43  ;;  %v8342_v43 = vld [vmem:[%s10321_s3 + $0x3e8] ss:$16 sps:$4 sm:$0xff]  }
 0x359   : > { %6437 = vmatprep.subr.bf16.mxu0 %v8281_v6  ;;  %6602 = vmatpush1.bf16.msra.mxu1 %v8282_v53  ;;  %v8350_v6 = vld [vmem:[%s10321_s3 + $0x40c] ss:$16 sps:$4 sm:$0xff]   ;;  %v4822_v53 = vpack.c.bf16 %v9565_v18, %v9565_v18  ;;  %v8351_v18 = vld [vmem:[%s10321_s3 + $0x420] ss:$16 sps:$4 sm:$0xff]  }
 0x35a   : > { %6603 = vmatprep.subr.bf16.mxu1 %v8290_v56  ;;  %v8353_v56 = vld [vmem:[%s10321_s3 + $0x424] ss:$16 sps:$4 sm:$0xff]  }
 0x35c   : > { %6438 = vmatpush1.bf16.msra.mxu0 %v8279_v52  ;;  %v8345_v52 = vld [vmem:[%s10321_s3 + $0x400] ss:$16 sps:$4 sm:$0xff]  }
 0x35d   : > { %6439 = vmatprep.subr.bf16.mxu0 %v8287_v55  ;;  %6604 = vmatpush1.bf16.msra.mxu1 %v8288_v58  ;;  %v8348_v55 = vld [vmem:[%s10321_s3 + $0x408] ss:$16 sps:$4 sm:$0xff]   ;;  %v8356_v58 = vld [vmem:[%s10321_s3 + $0x42c] ss:$16 sps:$4 sm:$0xff]  }
 0x35e   : > { %6605 = vmatprep.subr.bf16.mxu1 %v8296_v62 }
 0x360   : > { %6440 = vmatpush1.bf16.msra.mxu0 %v8285_v57  ;;  %v4703_v57 = vld [vmem:[#allocation2 + $0x8] sm:$0xff] }
 0x361   : > { %6441 = vmatprep.subr.bf16.mxu0 %v8293_v61  ;;  %6606 = vmatpush1.bf16.msra.mxu1 %v8294_v31  ;;  %v9797_v61 = vadd.f32 %v4771_v51, %v4703_v57  ;;  %v8359_v31 = vld [vmem:[%s10321_s3 + $0x444] ss:$16 sps:$4 sm:$0xff]   ;;  %v8428_v51 = vld [vmem:[%s10321_s3 + $0x5ac] ss:$16 sps:$4 sm:$0xff]   ;;  %v8429_v57 = vld [vmem:[%s10321_s3 + $0x5c0] ss:$16 sps:$4 sm:$0xff]  }
 0x362   : > { %6607 = vmatprep.subr.bf16.mxu1 %v8302_v10 }
 0x363   : > { %v9804_v62 = vrot.slane %v9797_v61, %v9273_v12 }
 0x364   : > { %6442 = vmatpush1.bf16.msra.mxu0 %v8291_v63  ;;  %v8354_v63 = vld [vmem:[%s10321_s3 + $0x428] ss:$16 sps:$4 sm:$0xff]  }
 0x365   : > { %6443 = vmatprep.subr.bf16.mxu0 %v8299_v1  ;;  %6608 = vmatpush1.bf16.msra.mxu1 %v8300_v3  ;;  %v8362_v1 = vld [vmem:[%s10321_s3 + $0x44c] ss:$16 sps:$4 sm:$0xff]   ;;  %v4810_v10 = vcombine.high %v9804_v62, %v9804_v62 }
 0x366   : > { %6609 = vmatprep.subr.bf16.mxu1 %v8308_v5  ;;  %v8365_v5 = vld [vmem:[%s10321_s3 + $0x464] ss:$16 sps:$4 sm:$0xff]  }
 0x367   : > { %v4825_v3 = vpack.c.bf16 %v4810_v10, %v4810_v10  ;;  %v8438_v10 = vld [vmem:[%s10321_s3 + $0x5e8] ss:$16 sps:$4 sm:$0xff]  }
 0x368   : > { %6444 = vmatpush1.bf16.msra.mxu0 %v8297_v2  ;;  %v8357_v2 = vld [vmem:[%s10321_s3 + $0x440] ss:$16 sps:$4 sm:$0xff]  }
 0x369   : > { %6445 = vmatprep.subr.bf16.mxu0 %v8305_v4  ;;  %6610 = vmatpush1.bf16.msra.mxu1 %v8306_v7  ;;  %v8360_v4 = vld [vmem:[%s10321_s3 + $0x448] ss:$16 sps:$4 sm:$0xff]   ;;  %v8363_v7 = vld [vmem:[%s10321_s3 + $0x460] ss:$16 sps:$4 sm:$0xff]  }
 0x36a   : > { %6611 = vmatprep.subr.bf16.mxu1 %v8314_v8  ;;  %v8371_v8 = vld [vmem:[%s10321_s3 + $0x484] ss:$16 sps:$4 sm:$0xff]  }
 0x36c   : > { %6446 = vmatpush1.bf16.msra.mxu0 %v8303_v30  ;;  %v8368_v30 = vld [vmem:[%s10321_s3 + $0x46c] ss:$16 sps:$4 sm:$0xff]  }
 0x36d   : > { %6447 = vmatprep.subr.bf16.mxu0 %v8311_v17  ;;  %6612 = vmatpush1.bf16.msra.mxu1 %v8312_v11  ;;  %v8366_v17 = vld [vmem:[%s10321_s3 + $0x468] ss:$16 sps:$4 sm:$0xff]   ;;  %v8369_v11 = vld [vmem:[%s10321_s3 + $0x480] ss:$16 sps:$4 sm:$0xff]  }
 0x36e   : > { %6613 = vmatprep.subr.bf16.mxu1 %v8320_v13  ;;  %v8377_v13 = vld [vmem:[%s10321_s3 + $0x4a4] ss:$16 sps:$4 sm:$0xff]  }
 0x370   : > { %6448 = vmatpush1.bf16.msra.mxu0 %v8309_v9  ;;  %v8374_v9 = vld [vmem:[%s10321_s3 + $0x48c] ss:$16 sps:$4 sm:$0xff]  }
 0x371   : > { %6449 = vmatprep.subr.bf16.mxu0 %v8317_v24  ;;  %6614 = vmatpush1.bf16.msra.mxu1 %v8318_v35  ;;  %v8372_v24 = vld [vmem:[%s10321_s3 + $0x488] ss:$16 sps:$4 sm:$0xff]   ;;  %v8383_v35 = vld [vmem:[%s10321_s3 + $0x4c4] ss:$16 sps:$4 sm:$0xff]  }
 0x372   : > { %6615 = vmatprep.subr.bf16.mxu1 %v8326_v21  ;;  %v8384_v21 = vld [vmem:[%s10321_s3 + $0x4c8] ss:$16 sps:$4 sm:$0xff]  }
 0x374   : > { %6450 = vmatpush1.bf16.msra.mxu0 %v8315_v16  ;;  %v8378_v16 = vld [vmem:[%s10321_s3 + $0x4a8] ss:$16 sps:$4 sm:$0xff]  }
 0x375   : > { %6451 = vmatprep.subr.bf16.mxu0 %v8323_v20  ;;  %6616 = vmatpush1.bf16.msra.mxu1 %v8324_v23  ;;  %v8381_v20 = vld [vmem:[%s10321_s3 + $0x4c0] ss:$16 sps:$4 sm:$0xff]  }
 0x376   : > { %6617 = vmatprep.subr.bf16.mxu1 %v8332_v27  ;;  %v8387_v23 = vld [vmem:[%s10321_s3 + $0x4e0] ss:$16 sps:$4 sm:$0xff]   ;;  %v8398_v27 = vld [vmem:[%s10321_s3 + $0x50c] ss:$16 sps:$4 sm:$0xff]  }
 0x378   : > { %6452 = vmatpush1.bf16.msra.mxu0 %v8321_v22  ;;  %v8392_v22 = vld [vmem:[%s10321_s3 + $0x4ec] ss:$16 sps:$4 sm:$0xff]  }
 0x379   : > { %6453 = vmatprep.subr.bf16.mxu0 %v8329_v26  ;;  %6618 = vmatpush1.bf16.msra.mxu1 %v8330_v32  ;;  %v8395_v26 = vld [vmem:[%s10321_s3 + $0x504] ss:$16 sps:$4 sm:$0xff]   ;;  %v8399_v32 = vld [vmem:[%s10321_s3 + $0x520] ss:$16 sps:$4 sm:$0xff]  }
 0x37a   : > { %6619 = vmatprep.subr.bf16.mxu1 %v8338_v50  ;;  %v8407_v50 = vld [vmem:[%s10321_s3 + $0x544] ss:$16 sps:$4 sm:$0xff]  }
 0x37c   : > { %6454 = vmatpush1.bf16.msra.mxu0 %v8327_v60  ;;  %v8404_v60 = vld [vmem:[%s10321_s3 + $0x52c] ss:$16 sps:$4 sm:$0xff]  }
 0x37d   : > { %6455 = vmatprep.subr.bf16.mxu0 %v8335_v0  ;;  %6620 = vmatpush1.bf16.msra.mxu1 %v8336_v38  ;;  %v8402_v0 = vld [vmem:[%s10321_s3 + $0x528] ss:$16 sps:$4 sm:$0xff]   ;;  %v8413_v38 = vld [vmem:[%s10321_s3 + $0x564] ss:$16 sps:$4 sm:$0xff]  }
 0x37e   : > { %6621 = vmatprep.subr.bf16.mxu1 %v8344_v40  ;;  %v8411_v40 = vld [vmem:[%s10321_s3 + $0x560] ss:$16 sps:$4 sm:$0xff]  }
 0x380   : > { %6456 = vmatpush1.bf16.msra.mxu0 %v8333_v37  ;;  %v8408_v37 = vld [vmem:[%s10321_s3 + $0x548] ss:$16 sps:$4 sm:$0xff]  }
 0x381   : > { %6457 = vmatprep.subr.bf16.mxu0 %v8341_v49  ;;  %6622 = vmatpush1.bf16.msra.mxu1 %v8342_v43  ;;  %v8416_v49 = vld [vmem:[%s10321_s3 + $0x56c] ss:$16 sps:$4 sm:$0xff]   ;;  %v8417_v43 = vld [vmem:[%s10321_s3 + $0x580] ss:$16 sps:$4 sm:$0xff]  }
 0x382   : > { %6632 = vmatprep.subr.bf16.mxu1 %v8350_v6  ;;  %v8425_v6 = vld [vmem:[%s10321_s3 + $0x5a4] ss:$16 sps:$4 sm:$0xff]  }
 0x384   : > { %6458 = vmatpush1.bf16.msra.mxu0 %v8339_v54  ;;  %6624 = vmatmul.mubr.bf16.vlgmr.msra.gmra.mrb[0].mxu1 %v4822_v53  ;;  %v8422_v54 = vld [vmem:[%s10321_s3 + $0x58c] ss:$16 sps:$4 sm:$0xff]  }
 0x385   : > { %6468 = vmatprep.subr.bf16.mxu0 %v8347_v47  ;;  %6633 = vmatpush1.bf16.msra.mxu1 %v8348_v55  ;;  %v8420_v47 = vld [vmem:[%s10321_s3 + $0x588] ss:$16 sps:$4 sm:$0xff]   ;;  %v8431_v55 = vld [vmem:[%s10321_s3 + $0x5c4] ss:$16 sps:$4 sm:$0xff]  }
 0x386   : > { %6634 = vmatprep.subr.bf16.mxu1 %v8356_v58  ;;  %6664 = vmatprep.mubr.bf16.mxu1 %v4825_v3  ;;  %v4795_v58 = vcombine.high %v9797_v61, %v9797_v61  ;;  %v8435_v61 = vld [vmem:[%s10321_s3 + $0x5e0] ss:$16 sps:$4 sm:$0xff]  }
 0x387   : > { %6460 = vmatmul.mubr.bf16.vlgmr.msra.gmra.mrb[0].mxu0 %v4822_v53  ;;  %v8426_v53 = vld [vmem:[%s10321_s3 + $0x5a8] ss:$16 sps:$4 sm:$0xff]  }
 0x388   : > { %6469 = vmatpush1.bf16.msra.mxu0 %v8345_v52  ;;  %6500 = vmatprep.mubr.bf16.mxu0 %v4825_v3  ;;  %v8423_v52 = vld [vmem:[%s10321_s3 + $0x5a0] ss:$16 sps:$4 sm:$0xff]   ;;  %v8446_v3 = vld [vmem:[%s10321_s3 + $0x60c] ss:$16 sps:$4 sm:$0xff]  }
 0x389   : > { %6470 = vmatprep.subr.bf16.mxu0 %v8353_v56  ;;  %6635 = vmatpush1.bf16.msra.mxu1 %v8354_v63  ;;  %v8434_v56 = vld [vmem:[%s10321_s3 + $0x5cc] ss:$16 sps:$4 sm:$0xff]   ;;  %v8437_v63 = vld [vmem:[%s10321_s3 + $0x5e4] ss:$16 sps:$4 sm:$0xff]  }
 0x38a   : > { %6636 = vmatprep.subr.bf16.mxu1 %v8362_v1  ;;  %v9979_v1 = vrot.slane %v4795_v58, %v9273_v12  ;;  %v8441_v12 = vld [vmem:[%s10321_s3 + $0x600] ss:$16 sps:$4 sm:$0xff]   ;;  %v8518_v58 = vld [vmem:[%s10321_s3 + $0x78c] ss:$16 sps:$4 sm:$0xff]  }
 0x38c   : > { %6471 = vmatpush1.bf16.msra.mxu0 %v8351_v18  ;;  %v8432_v18 = vld [vmem:[%s10321_s3 + $0x5c8] ss:$16 sps:$4 sm:$0xff]  }
 0x38d   : > { %6472 = vmatprep.subr.bf16.mxu0 %v8359_v31  ;;  %6637 = vmatpush1.bf16.msra.mxu1 %v8360_v4  ;;  %v8440_v31 = vld [vmem:[%s10321_s3 + $0x5ec] ss:$16 sps:$4 sm:$0xff]   ;;  %v4811_v4 = vcombine.high %v9979_v1, %v9979_v1 }
 0x38e   : > { %6638 = vmatprep.subr.bf16.mxu1 %v8368_v30  ;;  %v4824_v30 = vpack.c.bf16 %v9804_v62, %v9804_v62  ;;  %v8450_v62 = vld [vmem:[%s10321_s3 + $0x628] ss:$16 sps:$4 sm:$0xff]  }
 0x390   : > { %6473 = vmatpush1.bf16.msra.mxu0 %v8357_v2  ;;  %v8443_v2 = vld [vmem:[%s10321_s3 + $0x604] ss:$16 sps:$4 sm:$0xff]  }
 0x391   : > { %6474 = vmatprep.subr.bf16.mxu0 %v8365_v5  ;;  %6639 = vmatpush1.bf16.msra.mxu1 %v8366_v17  ;;  %v8444_v5 = vld [vmem:[%s10321_s3 + $0x608] ss:$16 sps:$4 sm:$0xff]   ;;  %v8452_v17 = vld [vmem:[%s10321_s3 + $0x62c] ss:$16 sps:$4 sm:$0xff]  }
 0x392   : > { %6640 = vmatprep.subr.bf16.mxu1 %v8374_v9  ;;  %v8447_v9 = vld [vmem:[%s10321_s3 + $0x620] ss:$16 sps:$4 sm:$0xff]  }
 0x394   : > { %6475 = vmatpush1.bf16.msra.mxu0 %v8363_v7  ;;  %v8449_v7 = vld [vmem:[%s10321_s3 + $0x624] ss:$16 sps:$4 sm:$0xff]  }
 0x395   : > { %6476 = vmatprep.subr.bf16.mxu0 %v8371_v8  ;;  %6641 = vmatpush1.bf16.msra.mxu1 %v8372_v24  ;;  %v4827_v8 = vpack.c.bf16 %v4811_v4, %v4811_v4  ;;  %v8458_v24 = vld [vmem:[%s10321_s3 + $0x64c] ss:$16 sps:$4 sm:$0xff]   ;;  %v8525_v4 = vld [vmem:[%s10321_s3 + $0x7c0] ss:$16 sps:$4 sm:$0xff]  }
 0x396   : > { %6642 = vmatprep.subr.bf16.mxu1 %v8380_v14  ;;  %v8456_v14 = vld [vmem:[%s10321_s3 + $0x648] ss:$16 sps:$4 sm:$0xff]  }
 0x398   : > { %6477 = vmatpush1.bf16.msra.mxu0 %v8369_v11  ;;  %v8455_v11 = vld [vmem:[%s10321_s3 + $0x644] ss:$16 sps:$4 sm:$0xff]  }
 0x399   : > { %6478 = vmatprep.subr.bf16.mxu0 %v8377_v13  ;;  %6643 = vmatpush1.bf16.msra.mxu1 %v8378_v16  ;;  %v8453_v13 = vld [vmem:[%s10321_s3 + $0x640] ss:$16 sps:$4 sm:$0xff]   ;;  %v8464_v16 = vld [vmem:[%s10321_s3 + $0x66c] ss:$16 sps:$4 sm:$0xff]  }
 0x39a   : > { %6644 = vmatprep.subr.bf16.mxu1 %v8386_v19  ;;  %v8462_v19 = vld [vmem:[%s10321_s3 + $0x668] ss:$16 sps:$4 sm:$0xff]  }
 0x39c   : > { %6479 = vmatpush1.bf16.msra.mxu0 %v8375_v15  ;;  %v8461_v15 = vld [vmem:[%s10321_s3 + $0x664] ss:$16 sps:$4 sm:$0xff]  }
 0x39d   : > { %6480 = vmatprep.subr.bf16.mxu0 %v8383_v35  ;;  %6645 = vmatpush1.bf16.msra.mxu1 %v8384_v21  ;;  %v8459_v35 = vld [vmem:[%s10321_s3 + $0x660] ss:$16 sps:$4 sm:$0xff]   ;;  %v8470_v21 = vld [vmem:[%s10321_s3 + $0x68c] ss:$16 sps:$4 sm:$0xff]  }
 0x39e   : > { %6646 = vmatprep.subr.bf16.mxu1 %v8392_v22  ;;  %v8468_v22 = vld [vmem:[%s10321_s3 + $0x688] ss:$16 sps:$4 sm:$0xff]  }
 0x3a0   : > { %6481 = vmatpush1.bf16.msra.mxu0 %v8381_v20  ;;  %v8467_v20 = vld [vmem:[%s10321_s3 + $0x684] ss:$16 sps:$4 sm:$0xff]  }
 0x3a1   : > { %6482 = vmatprep.subr.bf16.mxu0 %v8389_v33  ;;  %6647 = vmatpush1.bf16.msra.mxu1 %v8390_v25  ;;  %v8465_v33 = vld [vmem:[%s10321_s3 + $0x680] ss:$16 sps:$4 sm:$0xff]   ;;  %v8476_v25 = vld [vmem:[%s10321_s3 + $0x6ac] ss:$16 sps:$4 sm:$0xff]  }
 0x3a2   : > { %6648 = vmatprep.subr.bf16.mxu1 %v8398_v27  ;;  %v8474_v27 = vld [vmem:[%s10321_s3 + $0x6a8] ss:$16 sps:$4 sm:$0xff]  }
 0x3a4   : > { %6483 = vmatpush1.bf16.msra.mxu0 %v8387_v23  ;;  %v8473_v23 = vld [vmem:[%s10321_s3 + $0x6a4] ss:$16 sps:$4 sm:$0xff]  }
 0x3a5   : > { %6484 = vmatprep.subr.bf16.mxu0 %v8395_v26  ;;  %6649 = vmatpush1.bf16.msra.mxu1 %v8396_v39  ;;  %v8471_v26 = vld [vmem:[%s10321_s3 + $0x6a0] ss:$16 sps:$4 sm:$0xff]   ;;  %v8482_v39 = vld [vmem:[%s10321_s3 + $0x6cc] ss:$16 sps:$4 sm:$0xff]  }
 0x3a6   : > { %6650 = vmatprep.subr.bf16.mxu1 %v8404_v60  ;;  %v8480_v60 = vld [vmem:[%s10321_s3 + $0x6c8] ss:$16 sps:$4 sm:$0xff]  }
 0x3a8   : > { %6485 = vmatpush1.bf16.msra.mxu0 %v8393_v28  ;;  %v8479_v28 = vld [vmem:[%s10321_s3 + $0x6c4] ss:$16 sps:$4 sm:$0xff]  }
 0x3a9   : > { %6486 = vmatprep.subr.bf16.mxu0 %v8401_v29  ;;  %6651 = vmatpush1.bf16.msra.mxu1 %v8402_v0  ;;  %v8477_v29 = vld [vmem:[%s10321_s3 + $0x6c0] ss:$16 sps:$4 sm:$0xff]   ;;  %v8488_v0 = vld [vmem:[%s10321_s3 + $0x6ec] ss:$16 sps:$4 sm:$0xff]  }
 0x3aa   : > { %6652 = vmatprep.subr.bf16.mxu1 %v8410_v34  ;;  %v8486_v34 = vld [vmem:[%s10321_s3 + $0x6e8] ss:$16 sps:$4 sm:$0xff]  }
 0x3ac   : > { %6487 = vmatpush1.bf16.msra.mxu0 %v8399_v32  ;;  %v8485_v32 = vld [vmem:[%s10321_s3 + $0x6e4] ss:$16 sps:$4 sm:$0xff]  }
 0x3ad   : > { %6488 = vmatprep.subr.bf16.mxu0 %v8407_v50  ;;  %6653 = vmatpush1.bf16.msra.mxu1 %v8408_v37  ;;  %v8483_v50 = vld [vmem:[%s10321_s3 + $0x6e0] ss:$16 sps:$4 sm:$0xff]   ;;  %v8494_v37 = vld [vmem:[%s10321_s3 + $0x70c] ss:$16 sps:$4 sm:$0xff]  }
 0x3ae   : > { %6654 = vmatprep.subr.bf16.mxu1 %v8416_v49  ;;  %v8492_v49 = vld [vmem:[%s10321_s3 + $0x708] ss:$16 sps:$4 sm:$0xff]  }
 0x3b0   : > { %6489 = vmatpush1.bf16.msra.mxu0 %v8405_v36  ;;  %v8491_v36 = vld [vmem:[%s10321_s3 + $0x704] ss:$16 sps:$4 sm:$0xff]  }
 0x3b1   : > { %6490 = vmatprep.subr.bf16.mxu0 %v8413_v38  ;;  %6655 = vmatpush1.bf16.msra.mxu1 %v8414_v41  ;;  %v8489_v38 = vld [vmem:[%s10321_s3 + $0x700] ss:$16 sps:$4 sm:$0xff]   ;;  %v8500_v41 = vld [vmem:[%s10321_s3 + $0x72c] ss:$16 sps:$4 sm:$0xff]  }
 0x3b2   : > { %6656 = vmatprep.subr.bf16.mxu1 %v8422_v54  ;;  %v8498_v54 = vld [vmem:[%s10321_s3 + $0x728] ss:$16 sps:$4 sm:$0xff]  }
 0x3b4   : > { %6491 = vmatpush1.bf16.msra.mxu0 %v8411_v40  ;;  %v8497_v40 = vld [vmem:[%s10321_s3 + $0x724] ss:$16 sps:$4 sm:$0xff]  }
 0x3b5   : > { %6492 = vmatprep.subr.bf16.mxu0 %v8419_v59  ;;  %6657 = vmatpush1.bf16.msra.mxu1 %v8420_v47  ;;  %v8495_v59 = vld [vmem:[%s10321_s3 + $0x720] ss:$16 sps:$4 sm:$0xff]   ;;  %v8506_v47 = vld [vmem:[%s10321_s3 + $0x74c] ss:$16 sps:$4 sm:$0xff]  }
 0x3b6   : > { %6658 = vmatprep.subr.bf16.mxu1 %v8428_v51  ;;  %v8504_v51 = vld [vmem:[%s10321_s3 + $0x748] ss:$16 sps:$4 sm:$0xff]  }
 0x3b8   : > { %6493 = vmatpush1.bf16.msra.mxu0 %v8417_v43  ;;  %v8503_v43 = vld [vmem:[%s10321_s3 + $0x744] ss:$16 sps:$4 sm:$0xff]  }
 0x3b9   : > { %6494 = vmatprep.subr.bf16.mxu0 %v8425_v6  ;;  %6659 = vmatpush1.bf16.msra.mxu1 %v8426_v53  ;;  %v8501_v6 = vld [vmem:[%s10321_s3 + $0x740] ss:$16 sps:$4 sm:$0xff]   ;;  %v8512_v53 = vld [vmem:[%s10321_s3 + $0x76c] ss:$16 sps:$4 sm:$0xff]  }
 0x3ba   : > { %6660 = vmatprep.subr.bf16.mxu1 %v8434_v56  ;;  %v8510_v56 = vld [vmem:[%s10321_s3 + $0x768] ss:$16 sps:$4 sm:$0xff]  }
 0x3bc   : > { %6495 = vmatpush1.bf16.msra.mxu0 %v8423_v52  ;;  %v8509_v52 = vld [vmem:[%s10321_s3 + $0x764] ss:$16 sps:$4 sm:$0xff]  }
 0x3bd   : > { %6496 = vmatprep.subr.bf16.mxu0 %v8431_v55  ;;  %6661 = vmatpush1.bf16.msra.mxu1 %v8432_v18  ;;  %v8507_v55 = vld [vmem:[%s10321_s3 + $0x760] ss:$16 sps:$4 sm:$0xff]  }
 0x3be   : > { %6662 = vmatprep.subr.bf16.mxu1 %v8440_v31  ;;  %v8513_v18 = vld [vmem:[%s10321_s3 + $0x780] ss:$16 sps:$4 sm:$0xff]   ;;  %v8521_v31 = vld [vmem:[%s10321_s3 + $0x7a4] ss:$16 sps:$4 sm:$0xff]  }
 0x3c0   : > { %6497 = vmatpush1.bf16.msra.mxu0 %v8429_v57  ;;  %v8515_v57 = vld [vmem:[%s10321_s3 + $0x784] ss:$16 sps:$4 sm:$0xff]  }
 0x3c1   : > { %6498 = vmatprep.subr.bf16.mxu0 %v8437_v63  ;;  %6663 = vmatpush1.bf16.msra.mxu1 %v8438_v10  ;;  %v8516_v63 = vld [vmem:[%s10321_s3 + $0x788] ss:$16 sps:$4 sm:$0xff]   ;;  %v8519_v10 = vld [vmem:[%s10321_s3 + $0x7a0] ss:$16 sps:$4 sm:$0xff]  }
 0x3c2   : > { %6673 = vmatprep.subr.bf16.mxu1 %v8446_v3  ;;  %v8527_v3 = vld [vmem:[%s10321_s3 + $0x7c4] ss:$16 sps:$4 sm:$0xff]  }
 0x3c4   : > { %6499 = vmatpush1.bf16.msra.mxu0 %v8435_v61  ;;  %6665 = vmatmul.mubr.bf16.vlgmr.msra.gmra.mrb[0].mxu1 %v4824_v30  ;;  %v8524_v61 = vld [vmem:[%s10321_s3 + $0x7ac] ss:$16 sps:$4 sm:$0xff]  }
 0x3c5   : > { %6509 = vmatprep.subr.bf16.mxu0 %v8443_v2  ;;  %6674 = vmatpush1.bf16.msra.mxu1 %v8444_v5  ;;  %v8522_v2 = vld [vmem:[%s10321_s3 + $0x7a8] ss:$16 sps:$4 sm:$0xff]  }
 0x3c6   : > { %6675 = vmatprep.subr.bf16.mxu1 %v8452_v17  ;;  %6705 = vmatprep.mubr.bf16.mxu1 %v4827_v8  ;;  %v8528_v5 = vld [vmem:[%s10321_s3 + $0x7c8] ss:$16 sps:$4 sm:$0xff]   ;;  %v8531_v17 = vld [vmem:[%s10321_s3 + $0x7e0] ss:$16 sps:$4 sm:$0xff]  }
 0x3c7   : > { %6501 = vmatmul.mubr.bf16.vlgmr.msra.gmra.mrb[0].mxu0 %v4824_v30  ;;  %v8533_v30 = vld [vmem:[%s10321_s3 + $0x7e4] ss:$16 sps:$4 sm:$0xff]  }
 0x3c8   : > { %6510 = vmatpush1.bf16.msra.mxu0 %v8441_v12  ;;  %6541 = vmatprep.mubr.bf16.mxu0 %v4827_v8  ;;  %v8530_v12 = vld [vmem:[%s10321_s3 + $0x7cc] ss:$16 sps:$4 sm:$0xff]   ;;  %v8534_v8 = vld [vmem:[%s10321_s3 + $0x7e8] ss:$16 sps:$4 sm:$0xff]  }
 0x3c9   : > { %6511 = vmatprep.subr.bf16.mxu0 %v8449_v7  ;;  %6676 = vmatpush1.bf16.msra.mxu1 %v8450_v62  ;;  %v8536_v7 = vld [vmem:[%s10321_s3 + $0x7ec] ss:$16 sps:$4 sm:$0xff]   ;;  %v8538_v62 = vld [vmem:[%s10323_s5 + $0xc0] sm:$0xff]  }
 0x3ca   : > { %6677 = vmatprep.subr.bf16.mxu1 %v8458_v24  ;;  %v8539_v24 = vld [vmem:[%s10323_s5] sm:$0xff]  }
 0x3cc   : > { %6512 = vmatpush1.bf16.msra.mxu0 %v8447_v9  ;;  %v8537_v9 = vld [vmem:[%s10323_s5 + $0x40] sm:$0xff]  }
 0x3cd   : > { %6513 = vmatprep.subr.bf16.mxu0 %v8455_v11  ;;  %6678 = vmatpush1.bf16.msra.mxu1 %v8456_v14  ;;  %v4826_v11 = vpack.c.bf16 %v9979_v1, %v9979_v1  ;;  %v8541_v14 = vld [vmem:[%s10323_s5 + $0x48] sm:$0xff]  }
 0x3ce   : > { %6679 = vmatprep.subr.bf16.mxu1 %v8464_v16  ;;  %v8542_v1 = vld [vmem:[%s10323_s5 + $0xc8] sm:$0xff]  }
 0x3cf   : > { %v8544_v16 = vld [vmem:[%s10323_s5 + $0x88] sm:$0xff]  }
 0x3d0   : > { %6514 = vmatpush1.bf16.msra.mxu0 %v8453_v13  ;;  %v8540_v13 = vld [vmem:[%s10323_s5 + $0x80] sm:$0xff]  }
 0x3d1   : > { %6515 = vmatprep.subr.bf16.mxu0 %v8461_v15  ;;  %6680 = vmatpush1.bf16.msra.mxu1 %v8462_v19  ;;  %v8543_v15 = vld [vmem:[%s10323_s5 + $0x8] sm:$0xff]   ;;  %v8546_v19 = vld [vmem:[%s10323_s5 + $0xd0] sm:$0xff]  }
 0x3d2   : > { %6681 = vmatprep.subr.bf16.mxu1 %v8470_v21  ;;  %v8548_v21 = vld [vmem:[%s10323_s5 + $0x90] sm:$0xff]  }
 0x3d4   : > { %6516 = vmatpush1.bf16.msra.mxu0 %v8459_v35  ;;  %v8545_v35 = vld [vmem:[%s10323_s5 + $0x50] sm:$0xff]  }
 0x3d5   : > { %6517 = vmatprep.subr.bf16.mxu0 %v8467_v20  ;;  %6682 = vmatpush1.bf16.msra.mxu1 %v8468_v22  ;;  %v8547_v20 = vld [vmem:[%s10323_s5 + $0x10] sm:$0xff]   ;;  %v8550_v22 = vld [vmem:[%s10323_s5 + $0xd8] sm:$0xff]  }
 0x3d6   : > { %6683 = vmatprep.subr.bf16.mxu1 %v8476_v25  ;;  %v8552_v25 = vld [vmem:[%s10323_s5 + $0x98] sm:$0xff]  }
 0x3d8   : > { %6518 = vmatpush1.bf16.msra.mxu0 %v8465_v33  ;;  %v8549_v33 = vld [vmem:[%s10323_s5 + $0x58] sm:$0xff]  }
 0x3d9   : > { %6519 = vmatprep.subr.bf16.mxu0 %v8473_v23  ;;  %6684 = vmatpush1.bf16.msra.mxu1 %v8474_v27  ;;  %v8551_v23 = vld [vmem:[%s10323_s5 + $0x18] sm:$0xff]   ;;  %v8554_v27 = vld [vmem:[%s10323_s5 + $0xe0] sm:$0xff]  }
 0x3da   : > { %6685 = vmatprep.subr.bf16.mxu1 %v8482_v39  ;;  %v8556_v39 = vld [vmem:[%s10323_s5 + $0xa0] sm:$0xff]  }
 0x3dc   : > { %6520 = vmatpush1.bf16.msra.mxu0 %v8471_v26  ;;  %v8553_v26 = vld [vmem:[%s10323_s5 + $0x60] sm:$0xff]  }
 0x3dd   : > { %6521 = vmatprep.subr.bf16.mxu0 %v8479_v28  ;;  %6686 = vmatpush1.bf16.msra.mxu1 %v8480_v60  ;;  %v8555_v28 = vld [vmem:[%s10323_s5 + $0x20] sm:$0xff]   ;;  %v8558_v60 = vld [vmem:[%s10323_s5 + $0xe8] sm:$0xff]  }
 0x3de   : > { %6687 = vmatprep.subr.bf16.mxu1 %v8488_v0  ;;  %v8560_v0 = vld [vmem:[%s10323_s5 + $0xa8] sm:$0xff]  }
 0x3e0   : > { %6522 = vmatpush1.bf16.msra.mxu0 %v8477_v29  ;;  %v8557_v29 = vld [vmem:[%s10323_s5 + $0x68] sm:$0xff]  }
 0x3e1   : > { %6523 = vmatprep.subr.bf16.mxu0 %v8485_v32  ;;  %6688 = vmatpush1.bf16.msra.mxu1 %v8486_v34  ;;  %v8559_v32 = vld [vmem:[%s10323_s5 + $0x28] sm:$0xff]   ;;  %v8562_v34 = vld [vmem:[%s10323_s5 + $0xf0] sm:$0xff]  }
 0x3e2   : > { %6689 = vmatprep.subr.bf16.mxu1 %v8494_v37  ;;  %v8564_v37 = vld [vmem:[%s10323_s5 + $0xb0] sm:$0xff]  }
 0x3e4   : > { %6524 = vmatpush1.bf16.msra.mxu0 %v8483_v50  ;;  %v8561_v50 = vld [vmem:[%s10323_s5 + $0x70] sm:$0xff]  }
 0x3e5   : > { %6525 = vmatprep.subr.bf16.mxu0 %v8491_v36  ;;  %6690 = vmatpush1.bf16.msra.mxu1 %v8492_v49  ;;  %v8563_v36 = vld [vmem:[%s10323_s5 + $0x30] sm:$0xff]   ;;  %v8566_v49 = vld [vmem:[%s10323_s5 + $0xf8] sm:$0xff]  }
 0x3e6   : > { %6691 = vmatprep.subr.bf16.mxu1 %v8500_v41  ;;  %v8568_v41 = vld [vmem:[%s10323_s5 + $0xb8] sm:$0xff]  }
 0x3e8   : > { %6526 = vmatpush1.bf16.msra.mxu0 %v8489_v38  ;;  %v8565_v38 = vld [vmem:[%s10323_s5 + $0x78] sm:$0xff]  }
 0x3e9   : > { %6527 = vmatprep.subr.bf16.mxu0 %v8497_v40  ;;  %6692 = vmatpush1.bf16.msra.mxu1 %v8498_v54  ;;  %v8567_v40 = vld [vmem:[%s10323_s5 + $0x38] sm:$0xff]  }
 0x3ea   : > { %6693 = vmatprep.subr.bf16.mxu1 %v8506_v47 }
 0x3ec   : > { %6528 = vmatpush1.bf16.msra.mxu0 %v8495_v59  ;;  %v5084_v59 = vld [vmem:[%s10322_s4] sm:$0xf] }
 0x3ed   : > { %6529 = vmatprep.subr.bf16.mxu0 %v8503_v43  ;;  %6694 = vmatpush1.bf16.msra.mxu1 %v8504_v51  ;;  %v5089_v54 = vrot.slane %v5084_v59, %v4708_v42  ;;  %v5097_v43 = vrot.slane %v5084_v59, %v4716_v46  ;;  %v5093_v47 = vrot.slane %v5084_v59, %v4712_v44 }
 0x3ee   : > { %6695 = vmatprep.subr.bf16.mxu1 %v8512_v53 }
 0x3f0   : > { %6530 = vmatpush1.bf16.msra.mxu0 %v8501_v6  ;;  %v5101_v6 = vrot.slane %v5084_v59, %v4720_v48  ;;  %v7959_v48 = vld [vmem:[%s10324_s6] ss:$0 sm:$0xff] }
 0x3f1   : > { %6531 = vmatprep.subr.bf16.mxu0 %v8509_v52  ;;  %6696 = vmatpush1.bf16.msra.mxu1 %v8510_v56 }
 0x3f2   : > { %6697 = vmatprep.subr.bf16.mxu1 %v8518_v58 }
 0x3f4   : > { %6532 = vmatpush1.bf16.msra.mxu0 %v8507_v55 }
 0x3f5   : > { %6533 = vmatprep.subr.bf16.mxu0 %v8515_v57  ;;  %6698 = vmatpush1.bf16.msra.mxu1 %v8516_v63 }
 0x3f6   : > { %6699 = vmatprep.subr.bf16.mxu1 %v8524_v61 }
 0x3f8   : > { %6534 = vmatpush1.bf16.msra.mxu0 %v8513_v18 }
 0x3f9   : > { %6535 = vmatprep.subr.bf16.mxu0 %v8521_v31  ;;  %6700 = vmatpush1.bf16.msra.mxu1 %v8522_v2 }
 0x3fa   : > { %6701 = vmatprep.subr.bf16.mxu1 %v8530_v12 }
 0x3fc   : > { %6536 = vmatpush1.bf16.msra.mxu0 %v8519_v10 }
 0x3fd   : > { %6537 = vmatprep.subr.bf16.mxu0 %v8527_v3  ;;  %6702 = vmatpush1.bf16.msra.mxu1 %v8528_v5 }
 0x3fe   : > { %6703 = vmatprep.subr.bf16.mxu1 %v8536_v7 }
 0x400   : > { %6538 = vmatpush1.bf16.msra.mxu0 %v8525_v4 }
 0x401   : > { %6539 = vmatprep.subr.bf16.mxu0 %v8533_v30  ;;  %6704 = vmatpush1.bf16.msra.mxu1 %v8534_v8 }
 0x402   : > { %8019 = vmatprep.subr.bf16.mxu1 %v8538_v62 }
 0x404   : > { %6540 = vmatpush1.bf16.msra.mxu0 %v8531_v17  ;;  %6706 = vmatmul.mubr.bf16.vlgmr.msra.gmra.mrb[0].mxu1 %v4826_v11 }
 0x405   : > { %7997 = vmatprep.subr.bf16.mxu0 %v8537_v9  ;;  %8020 = vmatpush3.bf16.msra.mxu1 %v8540_v13 }
 0x406   : > { %8021 = vmatprep.subr.bf16.mxu1 %v8542_v1 }
 0x407   : > { %6542 = vmatmul.mubr.bf16.vlgmr.msra.gmra.mrb[0].mxu0 %v4826_v11 }
 0x408   : > { %7998 = vmatpush3.bf16.msra.mxu0 %v8539_v24 }
 0x409   : > { %7999 = vmatprep.subr.bf16.mxu0 %v8541_v14  ;;  %8022 = vmatpush3.bf16.msra.mxu1 %v8544_v16 }
 0x40a   : > { %8023 = vmatprep.subr.bf16.mxu1 %v8546_v19 }
 0x40c   : > { %8000 = vmatpush3.bf16.msra.mxu0 %v8543_v15 }
 0x40d   : > { %8001 = vmatprep.subr.bf16.mxu0 %v8545_v35  ;;  %8024 = vmatpush3.bf16.msra.mxu1 %v8548_v21 }
 0x40e   : > { %8025 = vmatprep.subr.bf16.mxu1 %v8550_v22 }
 0x410   : > { %8002 = vmatpush3.bf16.msra.mxu0 %v8547_v20 }
 0x411   : > { %8003 = vmatprep.subr.bf16.mxu0 %v8549_v33  ;;  %8026 = vmatpush3.bf16.msra.mxu1 %v8552_v25 }
 0x412   : > { %8027 = vmatprep.subr.bf16.mxu1 %v8554_v27 }
 0x414   : > { %8004 = vmatpush3.bf16.msra.mxu0 %v8551_v23 }
 0x415   : > { %8005 = vmatprep.subr.bf16.mxu0 %v8553_v26  ;;  %8028 = vmatpush3.bf16.msra.mxu1 %v8556_v39 }
 0x416   : > { %8029 = vmatprep.subr.bf16.mxu1 %v8558_v60 }
 0x418   : > { %8006 = vmatpush3.bf16.msra.mxu0 %v8555_v28 }
 0x419   : > { %8007 = vmatprep.subr.bf16.mxu0 %v8557_v29  ;;  %8030 = vmatpush3.bf16.msra.mxu1 %v8560_v0 }
 0x41a   : > { %8031 = vmatprep.subr.bf16.mxu1 %v8562_v34 }
 0x41c   : > { %8008 = vmatpush3.bf16.msra.mxu0 %v8559_v32 }
 0x41d   : > { %8009 = vmatprep.subr.bf16.mxu0 %v8561_v50  ;;  %8032 = vmatpush3.bf16.msra.mxu1 %v8564_v37 }
 0x41e   : > { %8033 = vmatprep.subr.bf16.mxu1 %v8566_v49 }
 0x420   : > { %8010 = vmatpush3.bf16.msra.mxu0 %v8563_v36 }
 0x421   : > { %8011 = vmatprep.subr.bf16.mxu0 %v8565_v38  ;;  %8034 = vmatpush3.bf16.msra.mxu1 %v8568_v41 }
 0x424   : > { %8012 = vmatpush3.bf16.msra.mxu0 %v8567_v40 }
 0x4d7   : > { %v6707_v52 = vpop.f32.mrb[0].mxu1 }
 0x4d8   : > { %v8107_v55 = vadd.f32 %v6707_v52, %v5097_v43  ;;  %v6709_v57 = vpop.f32.mrb[1].mxu1 }
 0x4d9   : > { %v8108_v18 = vadd.f32 %v6709_v57, %v5101_v6  ;;  %v6711_v31 = vpop.f32.mrb[2].mxu1 }
 0x4da   : > { %v6543_v51 = vpop.f32.mrb[0].mxu0  ;;  %v6712_v61 = vpop.f32.mrb[3].mxu1  ;;  %v6716_v3 = vpack.c.bf16 %v8107_v55, %v8107_v55 }
 0x4db   : > { %v8105_v53 = vadd.f32 %v6543_v51, %v5089_v54  ;;  %v6545_v56 = vpop.f32.mrb[1].mxu0  ;;  %v6717_v46 = vpack.c.bf16 %v8108_v18, %v8108_v18 }
 0x4dc   : > { %v8106_v58 = vadd.f32 %v6545_v56, %v5093_v47  ;;  %v6547_v63 = vpop.f32.mrb[2].mxu0 }
 0x4dd   : > { %v6548_v42 = vpop.f32.mrb[3].mxu0  ;;  %v6714_v2 = vpack.c.bf16 %v8105_v53, %v8105_v53  ;;  %7053 = vmatprep.mubr.bf16.mxu1 %v6717_v46 }
 0x4de   : > { %v6715_v10 = vpack.c.bf16 %v8106_v58, %v8106_v58  ;;  %7054 = vmatmul.mubr.bf16.vlgmr.msra.gmra.mrb[4].mxu1 %v6716_v3 }
 0x4e0   : > { %7013 = vmatprep.mubr.bf16.mxu0 %v6715_v10 }
 0x4e1   : > { %7014 = vmatmul.mubr.bf16.vlgmr.msra.gmra.mrb[4].mxu0 %v6714_v2 }
 0x5b1   : > { %v8035_v44 = vpop.f32.mrb[4].mxu1 }
 0x5b2   : > { %v8036_v4 = vpop.f32.mrb[5].mxu1 }
 0x5b3   : > { %v8037_v30 = vadd.f32 %v8036_v4, %v8035_v44  ;;  %v8038_v17 = vpop.f32.mrb[6].mxu1 }
 0x5b4   : > { %v8013_v45 = vpop.f32.mrb[4].mxu0  ;;  %v8039_v9 = vpop.f32.mrb[7].mxu1 }
 0x5b5   : > { %v8014_v12 = vpop.f32.mrb[5].mxu0 }
 0x5b6   : > { %v8015_v5 = vadd.f32 %v8014_v12, %v8013_v45  ;;  %v8016_v7 = vpop.f32.mrb[6].mxu0 }
 0x5b7   : > { %v8017_v8 = vpop.f32.mrb[7].mxu0 }
 0x5b8   : > { %v7016_v62 = vadd.f32 %v8015_v5, %v7959_v48 }
 0x5ba   : > { %v7056_v11 = vadd.f32 %v8037_v30, %v7016_v62 }
 0x5bc   : > { %7062 = vst.msk [vmem:[#allocation3] sm:$0x3] %vm7061_vm0, %v7056_v11 }
 0x5bd PF: > { %p8137_p7 = scmp.eq.s32.totalorder %s8658_s25, 3  ;;  %s8611_s29 = smov [#allocation3]  }
 0x5be   : > { %s7070_s30 = sshll.u32 %s8611_s29, 4  ;;  %s7071_s30 = int_to_ptr.vmem [resolvable:$true] %s7070_s30 }
 0x5bf   : > { %s8569_s8 = scalar_lea.vmem %s7071_s30, 32  ;;  %p8576_p11 = scmp.lt.s32.totalorder %s7071_s30, %s7071_s30 }
 0x5c0   : > { %p8570_p8 = scmp.ne.s32.totalorder %s7071_s30, %s8569_s8  ;;  %p8577_p12 = scmp.lt.s32.totalorder %s8569_s8, %s8569_s8 }
 0x5c2   : > { %p8571_p9 = pnand %p8570_p8, %p8137_p7  ;;  %p8578_p13 = por %p8577_p12, %p8576_p11 }
 0x5c4   : > { %p8572_p10 = pneg %p8571_p9 }
 0x5c6   : > { %p8579_p0 = pnand %p8578_p13, %p8572_p10 }
 0x5c8   : > { %8582 = shalt.err (!%p8579_p0)
}
 0x5c9   : > { %s8583_s11 = scalar_lea.hbm %s10325_s7, 32 }
 0x5ca   : > { %p8584_p1 = scmp.ne.s32.totalorder %s10325_s7, %s8583_s11  ;;  %p8589_p4 = scmp.lt.u32.totalorder %s8583_s11, %s10325_s7 }
 0x5cc   : > { %p8585_p2 = pnand %p8584_p1, %p8137_p7 }
 0x5ce   : > { %p8586_p3 = pneg %p8585_p2 }
 0x5d0   : > { %p8591_p5 = pnand %p8589_p4, %p8586_p3 }
 0x5d2   : > { %8594 = shalt.err (!%p8591_p5)
}
 0x5d3   : > { %8134 = dma.vmem_to_hbm [thread:$0]  (%p8137_p7), %s7071_s30, 32, %s10325_s7, [#allocation4]  }
 0x5d4   : > { %8600 = dma.done.wait (%p8137_p7), [#allocation4], 32  }
 0x5d5   : > { %8602 = vsyncadd (%p8137_p7), [#allocation4], 4294967264 }
 0x5d6 PF: > { %s18_s24 = sadd.s32 1, %s8605_s24  }
 0x5d7   : > { %p15_p6 = scmp.ge.s32.totalorder %s18_s24, 6  }
 0x5d9   :  { %17 = sbr.rel (!%p15_p6) target bundleno = 1 (0x1), region = 86 }
 0x5e0   :  { %7083 = vsyncpa [#allocation4], 1 }
 0x5e1   :  { %7085 = vsyncpa [#allocation4 + $0x1], 1 }

</bundles_post_ra>
